<compile_context>
chip_gen: v7x
topology: tpu7x:2x2x1
jax: 0.10.0
libtpu: 0.0.40
codegen_flags: <defaults>
</compile_context>

<pallas_src>
import functools

import jax
import jax.numpy as jnp
from jax.experimental import pallas as pl
from jax.experimental.pallas import tpu as pltpu

PRIM_VEC = 16      # prim_vec_size of PrimaryPointCapsLayer
CAPS_DIM = 1024    # per-capsule Conv1d output channels
LATENT_CH = 16     # encoder_fc1 / encoder_fc2 output channels
OUT_PAD = 128      # final output padded to a lane-dense width
NEG_SLOPE = 0.3    # LeakyReLU slope
EPS_TF = 1e-3      # bn1 / bn2 / mean_bn / logvar_bn eps
EPS_DEF = 1e-5     # torch default eps (ppc bn3, encoder_bn1/2)


# ---------------- shared helpers -------------------------------------------------

def _lrelu(x):
    return jnp.where(x >= 0, x, NEG_SLOPE * x)


def _bn_rows_k(x, gamma, beta, eps):
    # training-mode BatchNorm1d, single pass: var = E[x^2] - E[x]^2.
    inv_n = 1.0 / x.shape[0]
    mean = jnp.sum(x, axis=0, keepdims=True) * inv_n
    var = jnp.sum(x * x, axis=0, keepdims=True) * inv_n - mean * mean
    var = jnp.maximum(var, 0.0)
    return gamma * (x - mean) * jax.lax.rsqrt(var + eps) + beta


def _conv_bn_lrelu_k(x, w, p, eps):
    # p is (3, C): row 0 = conv bias, row 1 = BN gamma, row 2 = BN beta
    y = jnp.dot(x, w, preferred_element_type=jnp.float32) + p[0:1, :]
    return _lrelu(_bn_rows_k(y, p[1:2, :], p[2:3, :], eps))


# ---------------- call 1: capsule-channel streaming kernel ------------------------

def _make_caps_kernel(batch, n_pts, tile_c):
    rows = batch * n_pts

    def kernel(x_ref, w1_ref, p1_ref, w2_ref, p2_ref, w3_ref, p3_ref, u_ref, h_sc):
        # ---- prologue (block 0 only): fc1+bn1+lrelu, fc2+bn2+lrelu into VMEM scratch
        @pl.when(pl.program_id(0) == 0)
        def _():
            h = _conv_bn_lrelu_k(x_ref[...], w1_ref[...], p1_ref[...], EPS_TF)  # (rows,64)
            h = _conv_bn_lrelu_k(h, w2_ref[...], p2_ref[...], EPS_TF)           # (rows,128)
            h_sc[...] = h

        # ---- raw capsule matmul for this channel block (bf16 in, f32 acc) ----------
        p3 = p3_ref[...]                                   # (3, tile_c)
        y = jnp.dot(h_sc[...].astype(jnp.bfloat16), w3_ref[...],
                    preferred_element_type=jnp.float32) + p3[0:1, :]   # (rows, tile_c)

        # ---- streaming BN stats on the RAW output (never materialize normalized y) -
        inv_n = 1.0 / rows
        mean = jnp.sum(y, axis=0, keepdims=True) * inv_n                # (1, tile_c)
        var = jnp.sum(y * y, axis=0, keepdims=True) * inv_n - mean * mean
        var = jnp.maximum(var, 0.0)

        # ---- per-batch raw max/min over n_pts (MaxPool1d), BN applied to pooled only
        y3 = y.reshape(batch, n_pts, tile_c)
        ymax = jnp.max(y3, axis=1)                                      # (B, tile_c)
        ymin = jnp.min(y3, axis=1)
        gamma, beta = p3[1:2, :], p3[2:3, :]
        pooled_raw = jnp.where(gamma >= 0.0, ymax, ymin)   # sign guard (gamma=1 here)
        u_ref[...] = gamma * (pooled_raw - mean) * jax.lax.rsqrt(var + EPS_DEF) + beta

    return kernel


# ---------------- call 2: squash + heads + encoder (tiny, gridless) ---------------

def _make_head_kernel(batch):
    L, C = PRIM_VEC, CAPS_DIM

    def kernel(u_ref, wh_ref, ph_ref, we_ref, pe_ref, out_ref):
        u = u_ref[...]                                     # (B, L*C) post-bn3 pooled

        # squared norm over the capsule axis, computed caps-major via static lane
        # slices (pure VPU adds); single relayout happens below when forming v.
        sn = None
        for cap in range(L):
            s = u[:, cap * C:(cap + 1) * C]                # (B, C)
            sn = s * s if sn is None else sn + s * s
        scale = jnp.sqrt(sn) * pl.reciprocal(1.0 + sn, approx=True)     # (B, C)
        v = (u.reshape(batch, L, C) * scale.reshape(batch, 1, C)).reshape(batch * L, C)

        # fused mean/logvar heads: one (B*L,1024)@(1024,256) bf16 matmul
        ph = ph_ref[...]
        zh = jnp.dot(v.astype(jnp.bfloat16), wh_ref[...],
                     preferred_element_type=jnp.float32) + ph[0:1, :]
        zh = _lrelu(_bn_rows_k(zh, ph[1:2, :], ph[2:3, :], EPS_TF))     # (B*L, 256)

        # block-diagonal encoder_fc1/fc2 + encoder_bn1/bn2 (output padded to 128 lanes)
        pe = pe_ref[...]
        ze = jnp.dot(zh, we_ref[...], preferred_element_type=jnp.float32) + pe[0:1, :]
        out_ref[...] = _bn_rows_k(ze, pe[1:2, :], pe[2:3, :], EPS_DEF)  # (B*L, 128)

    return kernel


# ---------------- wrapper ----------------------------------------------------------

def vae_encoder_forward(x, params, caps_per_block=4):
    """x: (B, 3, n_pts) float32 (PyTorch NCL). Returns (z_mean, z_log_var): (B, 16*16)."""
    B, cin, N = x.shape
    assert cin == 3
    L, C = PRIM_VEC, CAPS_DIM
    rows = B * N

    # Keep the transient (rows, tile_c) f32 block modest and tile_c a divisor of L*C.
    cpb = caps_per_block
    while cpb > 1 and (rows * cpb * C * 4 > 4 * 1024 * 1024 or L % cpb != 0):
        cpb //= 2
    tile_c = cpb * C
    n_blocks = (L * C) // tile_c

    # NCL -> (rows, cin) with rows = B*N, batch-major; pad cin 3 -> 8.
    x2d = jnp.transpose(x, (0, 2, 1)).reshape(rows, cin)
    x2d = jnp.pad(x2d, ((0, 0), (0, 8 - cin)))
    w1 = jnp.pad(params['w1'], ((0, 8 - cin), (0, 0)))

    # Fuse the 16 capsule convs into one wide weight (channel index = caps*1024 + c).
    w3 = jnp.transpose(params['w3'], (1, 0, 2)).reshape(128, L * C).astype(jnp.bfloat16)
    p3 = jnp.transpose(params['p3'], (1, 0, 2)).reshape(3, L * C)

    # ---- call 1: stream the capsule weight over channel blocks --------------------
    pooled = pl.pallas_call(
        _make_caps_kernel(B, N, tile_c),
        out_shape=jax.ShapeDtypeStruct((B, L * C), jnp.float32),
        grid_spec=pltpu.PrefetchScalarGridSpec(
            num_scalar_prefetch=0,
            grid=(n_blocks,),
            in_specs=[
                pl.BlockSpec(x2d.shape, lambda j: (0, 0)),
                pl.BlockSpec(w1.shape, lambda j: (0, 0)),
                pl.BlockSpec(params['p1'].shape, lambda j: (0, 0)),
                pl.BlockSpec(params['w2'].shape, lambda j: (0, 0)),
                pl.BlockSpec(params['p2'].shape, lambda j: (0, 0)),
                pl.BlockSpec((128, tile_c), lambda j: (0, j)),   # streamed w3 block
                pl.BlockSpec((3, tile_c), lambda j: (0, j)),     # streamed bias/gamma/beta
            ],
            out_specs=pl.BlockSpec((B, tile_c), lambda j: (0, j)),
            scratch_shapes=[pltpu.VMEM((rows, 128), jnp.float32)],   # persistent h
        ),
        compiler_params=pltpu.CompilerParams(
            # "arbitrary": fc1/fc2 prologue runs only at block 0 (see TODO for v7x).
            dimension_semantics=("arbitrary",),
            # live footprint ~5 MiB at this config; 24 MiB is safe on v5e/v6e/v7x.
            vmem_limit_bytes=24 * 1024 * 1024,
        ),
    )(x2d, w1, params['p1'], params['w2'], params['p2'], w3, p3)

    # ---- call 2: squash + fused heads + block-diagonal encoder --------------------
    wh = jnp.concatenate([params['wm'], params['wlv']], axis=1).astype(jnp.bfloat16)
    ph = jnp.concatenate([params['pm'], params['plv']], axis=1)

    we = jnp.zeros((256, OUT_PAD), jnp.float32)
    we = we.at[:128, :LATENT_CH].set(params['we1'])
    we = we.at[128:, LATENT_CH:2 * LATENT_CH].set(params['we2'])
    pe = jnp.zeros((3, OUT_PAD), jnp.float32)
    pe = pe.at[:, :LATENT_CH].set(params['pe1'])
    pe = pe.at[:, LATENT_CH:2 * LATENT_CH].set(params['pe2'])
    pe = pe.at[1, 2 * LATENT_CH:].set(1.0)    # gamma=1 on padding columns (output 0)

    ze2d = pl.pallas_call(
        _make_head_kernel(B),
        out_shape=jax.ShapeDtypeStruct((B * L, OUT_PAD), jnp.float32),
        in_specs=[pl.BlockSpec(memory_space=pltpu.MemorySpace.VMEM)] * 5,
        out_specs=pl.BlockSpec(memory_space=pltpu.MemorySpace.VMEM),
        compiler_params=pltpu.CompilerParams(vmem_limit_bytes=16 * 1024 * 1024),
    )(pooled, wh, ph, we, pe)

    zm2d = ze2d[:, :LATENT_CH]
    zlv2d = ze2d[:, LATENT_CH:2 * LATENT_CH]

    def to_torch_flat(z2d):
        # kernel output rows are (b, l) row-major; PyTorch does (B, C, L).view(B, -1)
        # i.e. channel-major flattening.
        return jnp.transpose(z2d.reshape(B, L, LATENT_CH), (0, 2, 1)).reshape(B, -1)

    return to_torch_flat(zm2d), to_torch_flat(zlv2d)


# ---------------- pure-JAX reference (exact two-pass BN, all f32) -----------------

def _bn_rows_ref(x, gamma, beta, eps):
    mean = jnp.mean(x, axis=0, keepdims=True)
    var = jnp.mean(jnp.square(x - mean), axis=0, keepdims=True)
    return gamma * (x - mean) * jax.lax.rsqrt(var + eps) + beta


def _conv_bn_lrelu_ref(x, w, p, eps):
    y = jnp.dot(x, w, preferred_element_type=jnp.float32) + p[0:1, :]
    return _lrelu(_bn_rows_ref(y, p[1:2, :], p[2:3, :], eps))


def reference_forward(x, params):
    B, cin, N = x.shape
    L = PRIM_VEC
    h = jnp.transpose(x, (0, 2, 1)).reshape(B * N, cin)
    h = _conv_bn_lrelu_ref(h, params['w1'], params['p1'], EPS_TF)
    h = _conv_bn_lrelu_ref(h, params['w2'], params['p2'], EPS_TF)
    caps = []
    for i in range(L):
        pc = params['p3'][i]
        y = h @ params['w3'][i] + pc[0:1, :]
        y = _bn_rows_ref(y, pc[1:2, :], pc[2:3, :], EPS_DEF)
        caps.append(jnp.max(y.reshape(B, N, CAPS_DIM), axis=1))            # (B, 1024)
    u = jnp.stack(caps, axis=1)                                            # (B, L, 1024)
    sn = jnp.sum(u * u, axis=1, keepdims=True)
    v = (u * sn / ((1.0 + sn) * jnp.sqrt(sn))).reshape(B * L, CAPS_DIM)
    zm = _conv_bn_lrelu_ref(v, params['wm'], params['pm'], EPS_TF)
    zlv = _conv_bn_lrelu_ref(v, params['wlv'], params['plv'], EPS_TF)
    pe1, pe2 = params['pe1'], params['pe2']
    zm = _bn_rows_ref(zm @ params['we1'] + pe1[0:1, :], pe1[1:2, :], pe1[2:3, :], EPS_DEF)
    zlv = _bn_rows_ref(zlv @ params['we2'] + pe2[0:1, :], pe2[1:2, :], pe2[2:3, :], EPS_DEF)

    def flat(z):
        return jnp.transpose(z.reshape(B, L, LATENT_CH), (0, 2, 1)).reshape(B, -1)

    return flat(zm), flat(zlv)


# ---------------- deterministic parameter init ------------------------------------

def init_params(key):
    ks = jax.random.split(key, 16)

    def conv_w(k, cin, cout):
        return jax.random.normal(k, (cin, cout), jnp.float32) / jnp.sqrt(float(cin))

    def bn_pack(k, cout):
        bias = 0.1 * jax.random.normal(k, (1, cout), jnp.float32)
        gamma = jnp.ones((1, cout), jnp.float32)     # torch BN default weight = 1
        beta = jnp.zeros((1, cout), jnp.float32)     # torch BN default bias = 0
        return jnp.concatenate([bias, gamma, beta], axis=0)                # (3, cout)

    cap_w = jax.random.normal(ks[4], (PRIM_VEC, 128, CAPS_DIM), jnp.float32) / jnp.sqrt(128.0)
    cap_bias = 0.1 * jax.random.normal(ks[5], (PRIM_VEC, 1, CAPS_DIM), jnp.float32)
    cap_p = jnp.concatenate(
        [cap_bias,
         jnp.ones((PRIM_VEC, 1, CAPS_DIM), jnp.float32),
         jnp.zeros((PRIM_VEC, 1, CAPS_DIM), jnp.float32)], axis=1)         # (16, 3, 1024)

    return {
        'w1': conv_w(ks[0], 3, 64),       'p1': bn_pack(ks[1], 64),
        'w2': conv_w(ks[2], 64, 128),     'p2': bn_pack(ks[3], 128),
        'w3': cap_w,                      'p3': cap_p,
        'wm': conv_w(ks[6], CAPS_DIM, 128),  'pm': bn_pack(ks[7], 128),
        'wlv': conv_w(ks[8], CAPS_DIM, 128), 'plv': bn_pack(ks[9], 128),
        'we1': conv_w(ks[10], 128, LATENT_CH), 'pe1': bn_pack(ks[11], LATENT_CH),
        'we2': conv_w(ks[12], 128, LATENT_CH), 'pe2': bn_pack(ks[13], LATENT_CH),
    }


if __name__ == "__main__":
    cfg = {'measure_cnt': 16, 'latent_num': 256, 'batch_size': 2}
    key = jax.random.PRNGKey(0)
    pkey, xkey = jax.random.split(key)
    params = init_params(pkey)
    x = jax.random.normal(xkey, (cfg['batch_size'], 3, cfg['measure_cnt']), jnp.float32)

    fwd = jax.jit(functools.partial(vae_encoder_forward, params=params))
    z_mean, z_log_var = fwd(x)
    jax.block_until_ready((z_mean, z_log_var))

    assert z_mean.shape == (cfg['batch_size'], cfg['latent_num'])
    assert z_log_var.shape == (cfg['batch_size'], cfg['latent_num'])
    assert bool(jnp.all(jnp.isfinite(z_mean))) and bool(jnp.all(jnp.isfinite(z_log_var)))

    zm_ref, zlv_ref = reference_forward(x, params)
    max_diff = max(float(jnp.max(jnp.abs(z_mean - zm_ref))),
                   float(jnp.max(jnp.abs(z_log_var - zlv_ref))))
    assert max_diff < 1e-1, f"kernel vs reference max abs diff {max_diff}"

    print("KERNEL_OK")
</pallas_src>

<mosaic_0001>
module attributes {stable_mosaic.version = 11 : i64} {
  func.func @kernel(%arg0: i32, %arg1: memref<32x8xf32, #tpu.memory_space<vmem>>, %arg2: memref<8x64xf32, #tpu.memory_space<vmem>>, %arg3: memref<3x64xf32, #tpu.memory_space<vmem>>, %arg4: memref<64x128xf32, #tpu.memory_space<vmem>>, %arg5: memref<3x128xf32, #tpu.memory_space<vmem>>, %arg6: memref<128x4096xbf16, #tpu.memory_space<vmem>>, %arg7: memref<3x4096xf32, #tpu.memory_space<vmem>>, %arg8: memref<2x4096xf32, #tpu.memory_space<vmem>>, %arg9: memref<32x128xf32, #tpu.memory_space<vmem>>) attributes {dimension_semantics = [#tpu.dimension_semantics<arbitrary>], iteration_bounds = array<i64: 4>, scalar_prefetch = 0 : i64, scratch_operands = 1 : i64, tpu.core_type = #tpu.core_type<tc>, window_params = [{pipeline_mode = #tpu.pipeline_mode<synchronous>, transform_indices = @transform_0, window_bounds = array<i64: 32, 8>}, {pipeline_mode = #tpu.pipeline_mode<synchronous>, transform_indices = @transform_1, window_bounds = array<i64: 8, 64>}, {pipeline_mode = #tpu.pipeline_mode<synchronous>, transform_indices = @transform_2, window_bounds = array<i64: 3, 64>}, {pipeline_mode = #tpu.pipeline_mode<synchronous>, transform_indices = @transform_3, window_bounds = array<i64: 64, 128>}, {pipeline_mode = #tpu.pipeline_mode<synchronous>, transform_indices = @transform_4, window_bounds = array<i64: 3, 128>}, {transform_indices = @transform_5, window_bounds = array<i64: 128, 4096>}, {transform_indices = @transform_6, window_bounds = array<i64: 3, 4096>}, {transform_indices = @transform_7, window_bounds = array<i64: 2, 4096>}]} {
    %c0_i32 = arith.constant 0 : i32
    %0 = arith.cmpi eq, %arg0, %c0_i32 : i32
    %1 = arith.extui %0 : i1 to i32
    %c0_i32_0 = arith.constant 0 : i32
    %2 = arith.cmpi ne, %1, %c0_i32_0 : i32
    scf.if %2 {
      %c0_17 = arith.constant 0 : index
      %c0_18 = arith.constant 0 : index
      %46 = vector.load %arg1[%c0_17, %c0_18] : memref<32x8xf32, #tpu.memory_space<vmem>>, vector<32x8xf32>
      %c0_19 = arith.constant 0 : index
      %c0_20 = arith.constant 0 : index
      %47 = vector.load %arg2[%c0_19, %c0_20] : memref<8x64xf32, #tpu.memory_space<vmem>>, vector<8x64xf32>
      %c0_21 = arith.constant 0 : index
      %c0_22 = arith.constant 0 : index
      %48 = vector.load %arg3[%c0_21, %c0_22] : memref<3x64xf32, #tpu.memory_space<vmem>>, vector<3x64xf32>
      %cst_23 = arith.constant dense<0.000000e+00> : vector<32x64xf32>
      %49 = tpu.matmul %46, %47, %cst_23 {dimension_numbers = #tpu.dot_dimension_numbers<[1], [0], [0], [1], [0, 0, 1, 1], [], []>} : vector<32x8xf32>, vector<8x64xf32>, vector<32x64xf32> -> vector<32x64xf32>
      %50 = vector.extract_strided_slice %48 {offsets = [0, 0], sizes = [1, 64], strides = [1, 1]} : vector<3x64xf32> to vector<1x64xf32>
      %51 = vector.broadcast %50 : vector<1x64xf32> to vector<32x64xf32>
      %52 = arith.addf %49, %51 : vector<32x64xf32>
      %53 = vector.extract_strided_slice %48 {offsets = [1, 0], sizes = [1, 64], strides = [1, 1]} : vector<3x64xf32> to vector<1x64xf32>
      %54 = vector.extract_strided_slice %48 {offsets = [2, 0], sizes = [1, 64], strides = [1, 1]} : vector<3x64xf32> to vector<1x64xf32>
      %cst_24 = arith.constant dense<0.000000e+00> : vector<64xf32>
      %55 = vector.multi_reduction <add>, %52, %cst_24 [0] : vector<32x64xf32> to vector<64xf32>
      %56 = vector.shape_cast %55 : vector<64xf32> to vector<1x64xf32>
      %cst_25 = arith.constant 3.125000e-02 : f32
      %57 = vector.broadcast %cst_25 : f32 to vector<1x64xf32>
      %58 = arith.mulf %56, %57 : vector<1x64xf32>
      %59 = arith.mulf %52, %52 : vector<32x64xf32>
      %cst_26 = arith.constant dense<0.000000e+00> : vector<64xf32>
      %60 = vector.multi_reduction <add>, %59, %cst_26 [0] : vector<32x64xf32> to vector<64xf32>
      %61 = vector.shape_cast %60 : vector<64xf32> to vector<1x64xf32>
      %cst_27 = arith.constant 3.125000e-02 : f32
      %62 = vector.broadcast %cst_27 : f32 to vector<1x64xf32>
      %63 = arith.mulf %61, %62 : vector<1x64xf32>
      %64 = arith.mulf %58, %58 : vector<1x64xf32>
      %65 = arith.subf %63, %64 : vector<1x64xf32>
      %cst_28 = arith.constant 0.000000e+00 : f32
      %66 = vector.broadcast %cst_28 : f32 to vector<1x64xf32>
      %67 = arith.maximumf %65, %66 : vector<1x64xf32>
      %68 = vector.broadcast %58 : vector<1x64xf32> to vector<32x64xf32>
      %69 = arith.subf %52, %68 : vector<32x64xf32>
      %70 = vector.broadcast %53 : vector<1x64xf32> to vector<32x64xf32>
      %71 = arith.mulf %70, %69 : vector<32x64xf32>
      %cst_29 = arith.constant 1.000000e-03 : f32
      %72 = vector.broadcast %cst_29 : f32 to vector<1x64xf32>
      %73 = arith.addf %67, %72 : vector<1x64xf32>
      %74 = math.rsqrt %73 : vector<1x64xf32>
      %75 = vector.broadcast %74 : vector<1x64xf32> to vector<32x64xf32>
      %76 = arith.mulf %71, %75 : vector<32x64xf32>
      %77 = vector.broadcast %54 : vector<1x64xf32> to vector<32x64xf32>
      %78 = arith.addf %76, %77 : vector<32x64xf32>
      %cst_30 = arith.constant 0.000000e+00 : f32
      %79 = vector.broadcast %cst_30 : f32 to vector<32x64xf32>
      %80 = arith.cmpf oge, %78, %79 : vector<32x64xf32>
      %cst_31 = arith.constant 3.000000e-01 : f32
      %81 = vector.broadcast %cst_31 : f32 to vector<32x64xf32>
      %82 = arith.mulf %81, %78 : vector<32x64xf32>
      %83 = arith.select %80, %78, %82 : vector<32x64xi1>, vector<32x64xf32>
      %c0_32 = arith.constant 0 : index
      %c0_33 = arith.constant 0 : index
      %84 = vector.load %arg4[%c0_32, %c0_33] : memref<64x128xf32, #tpu.memory_space<vmem>>, vector<64x128xf32>
      %c0_34 = arith.constant 0 : index
      %c0_35 = arith.constant 0 : index
      %85 = vector.load %arg5[%c0_34, %c0_35] : memref<3x128xf32, #tpu.memory_space<vmem>>, vector<3x128xf32>
      %cst_36 = arith.constant dense<0.000000e+00> : vector<32x128xf32>
      %86 = tpu.matmul %83, %84, %cst_36 {dimension_numbers = #tpu.dot_dimension_numbers<[1], [0], [0], [1], [0, 0, 1, 1], [], []>} : vector<32x64xf32>, vector<64x128xf32>, vector<32x128xf32> -> vector<32x128xf32>
      %87 = vector.extract_strided_slice %85 {offsets = [0, 0], sizes = [1, 128], strides = [1, 1]} : vector<3x128xf32> to vector<1x128xf32>
      %88 = vector.broadcast %87 : vector<1x128xf32> to vector<32x128xf32>
      %89 = arith.addf %86, %88 : vector<32x128xf32>
      %90 = vector.extract_strided_slice %85 {offsets = [1, 0], sizes = [1, 128], strides = [1, 1]} : vector<3x128xf32> to vector<1x128xf32>
      %91 = vector.extract_strided_slice %85 {offsets = [2, 0], sizes = [1, 128], strides = [1, 1]} : vector<3x128xf32> to vector<1x128xf32>
      %cst_37 = arith.constant dense<0.000000e+00> : vector<128xf32>
      %92 = vector.multi_reduction <add>, %89, %cst_37 [0] : vector<32x128xf32> to vector<128xf32>
      %93 = vector.shape_cast %92 : vector<128xf32> to vector<1x128xf32>
      %cst_38 = arith.constant 3.125000e-02 : f32
      %94 = vector.broadcast %cst_38 : f32 to vector<1x128xf32>
      %95 = arith.mulf %93, %94 : vector<1x128xf32>
      %96 = arith.mulf %89, %89 : vector<32x128xf32>
      %cst_39 = arith.constant dense<0.000000e+00> : vector<128xf32>
      %97 = vector.multi_reduction <add>, %96, %cst_39 [0] : vector<32x128xf32> to vector<128xf32>
      %98 = vector.shape_cast %97 : vector<128xf32> to vector<1x128xf32>
      %cst_40 = arith.constant 3.125000e-02 : f32
      %99 = vector.broadcast %cst_40 : f32 to vector<1x128xf32>
      %100 = arith.mulf %98, %99 : vector<1x128xf32>
      %101 = arith.mulf %95, %95 : vector<1x128xf32>
      %102 = arith.subf %100, %101 : vector<1x128xf32>
      %cst_41 = arith.constant 0.000000e+00 : f32
      %103 = vector.broadcast %cst_41 : f32 to vector<1x128xf32>
      %104 = arith.maximumf %102, %103 : vector<1x128xf32>
      %105 = vector.broadcast %95 : vector<1x128xf32> to vector<32x128xf32>
      %106 = arith.subf %89, %105 : vector<32x128xf32>
      %107 = vector.broadcast %90 : vector<1x128xf32> to vector<32x128xf32>
      %108 = arith.mulf %107, %106 : vector<32x128xf32>
      %cst_42 = arith.constant 1.000000e-03 : f32
      %109 = vector.broadcast %cst_42 : f32 to vector<1x128xf32>
      %110 = arith.addf %104, %109 : vector<1x128xf32>
      %111 = math.rsqrt %110 : vector<1x128xf32>
      %112 = vector.broadcast %111 : vector<1x128xf32> to vector<32x128xf32>
      %113 = arith.mulf %108, %112 : vector<32x128xf32>
      %114 = vector.broadcast %91 : vector<1x128xf32> to vector<32x128xf32>
      %115 = arith.addf %113, %114 : vector<32x128xf32>
      %cst_43 = arith.constant 0.000000e+00 : f32
      %116 = vector.broadcast %cst_43 : f32 to vector<32x128xf32>
      %117 = arith.cmpf oge, %115, %116 : vector<32x128xf32>
      %cst_44 = arith.constant 3.000000e-01 : f32
      %118 = vector.broadcast %cst_44 : f32 to vector<32x128xf32>
      %119 = arith.mulf %118, %115 : vector<32x128xf32>
      %120 = arith.select %117, %115, %119 : vector<32x128xi1>, vector<32x128xf32>
      %c0_45 = arith.constant 0 : index
      %c0_46 = arith.constant 0 : index
      %121 = vector.load %arg9[%c0_45, %c0_46] : memref<32x128xf32, #tpu.memory_space<vmem>>, vector<32x128xf32>
      tpu.vector_store %arg9[%c0_45, %c0_46], %120 {strides = array<i32>} : memref<32x128xf32, #tpu.memory_space<vmem>>, vector<32x128xf32>,
    } else {
    }
    %c0 = arith.constant 0 : index
    %c0_1 = arith.constant 0 : index
    %3 = vector.load %arg7[%c0, %c0_1] : memref<3x4096xf32, #tpu.memory_space<vmem>>, vector<3x4096xf32>
    %c0_2 = arith.constant 0 : index
    %c0_3 = arith.constant 0 : index
    %4 = vector.load %arg9[%c0_2, %c0_3] : memref<32x128xf32, #tpu.memory_space<vmem>>, vector<32x128xf32>
    %5 = arith.truncf %4 : vector<32x128xf32> to vector<32x128xbf16>
    %c0_4 = arith.constant 0 : index
    %c0_5 = arith.constant 0 : index
    %6 = vector.load %arg6[%c0_4, %c0_5] : memref<128x4096xbf16, #tpu.memory_space<vmem>>, vector<128x4096xbf16>
    %cst = arith.constant dense<0.000000e+00> : vector<32x4096xf32>
    %7 = tpu.matmul %5, %6, %cst {dimension_numbers = #tpu.dot_dimension_numbers<[1], [0], [0], [1], [0, 0, 1, 1], [], []>} : vector<32x128xbf16>, vector<128x4096xbf16>, vector<32x4096xf32> -> vector<32x4096xf32>
    %8 = vector.extract_strided_slice %3 {offsets = [0, 0], sizes = [1, 4096], strides = [1, 1]} : vector<3x4096xf32> to vector<1x4096xf32>
    %9 = vector.broadcast %8 : vector<1x4096xf32> to vector<32x4096xf32>
    %10 = arith.addf %7, %9 : vector<32x4096xf32>
    %cst_6 = arith.constant dense<0.000000e+00> : vector<4096xf32>
    %11 = vector.multi_reduction <add>, %10, %cst_6 [0] : vector<32x4096xf32> to vector<4096xf32>
    %12 = vector.shape_cast %11 : vector<4096xf32> to vector<1x4096xf32>
    %cst_7 = arith.constant 3.125000e-02 : f32
    %13 = vector.broadcast %cst_7 : f32 to vector<1x4096xf32>
    %14 = arith.mulf %12, %13 : vector<1x4096xf32>
    %15 = arith.mulf %10, %10 : vector<32x4096xf32>
    %cst_8 = arith.constant dense<0.000000e+00> : vector<4096xf32>
    %16 = vector.multi_reduction <add>, %15, %cst_8 [0] : vector<32x4096xf32> to vector<4096xf32>
    %17 = vector.shape_cast %16 : vector<4096xf32> to vector<1x4096xf32>
    %cst_9 = arith.constant 3.125000e-02 : f32
    %18 = vector.broadcast %cst_9 : f32 to vector<1x4096xf32>
    %19 = arith.mulf %17, %18 : vector<1x4096xf32>
    %20 = arith.mulf %14, %14 : vector<1x4096xf32>
    %21 = arith.subf %19, %20 : vector<1x4096xf32>
    %cst_10 = arith.constant 0.000000e+00 : f32
    %22 = vector.broadcast %cst_10 : f32 to vector<1x4096xf32>
    %23 = arith.maximumf %21, %22 : vector<1x4096xf32>
    %24 = vector.shape_cast %10 : vector<32x4096xf32> to vector<2x16x4096xf32>
    %cst_11 = arith.constant dense<0xFF800000> : vector<2x4096xf32>
    %25 = vector.multi_reduction <maximumf>, %24, %cst_11 [1] : vector<2x16x4096xf32> to vector<2x4096xf32>
    %cst_12 = arith.constant dense<0x7F800000> : vector<2x4096xf32>
    %26 = vector.multi_reduction <minimumf>, %24, %cst_12 [1] : vector<2x16x4096xf32> to vector<2x4096xf32>
    %27 = vector.extract_strided_slice %3 {offsets = [1, 0], sizes = [1, 4096], strides = [1, 1]} : vector<3x4096xf32> to vector<1x4096xf32>
    %28 = vector.extract_strided_slice %3 {offsets = [2, 0], sizes = [1, 4096], strides = [1, 1]} : vector<3x4096xf32> to vector<1x4096xf32>
    %cst_13 = arith.constant 0.000000e+00 : f32
    %29 = vector.broadcast %cst_13 : f32 to vector<1x4096xf32>
    %30 = arith.cmpf oge, %27, %29 : vector<1x4096xf32>
    %31 = vector.shape_cast %30 : vector<1x4096xi1> to vector<1x4096xi1>
    %32 = vector.broadcast %31 : vector<1x4096xi1> to vector<2x4096xi1>
    %33 = arith.select %32, %25, %26 : vector<2x4096xi1>, vector<2x4096xf32>
    %34 = vector.broadcast %14 : vector<1x4096xf32> to vector<2x4096xf32>
    %35 = arith.subf %33, %34 : vector<2x4096xf32>
    %36 = vector.broadcast %27 : vector<1x4096xf32> to vector<2x4096xf32>
    %37 = arith.mulf %36, %35 : vector<2x4096xf32>
    %cst_14 = arith.constant 9.99999974E-6 : f32
    %38 = vector.broadcast %cst_14 : f32 to vector<1x4096xf32>
    %39 = arith.addf %23, %38 : vector<1x4096xf32>
    %40 = math.rsqrt %39 : vector<1x4096xf32>
    %41 = vector.broadcast %40 : vector<1x4096xf32> to vector<2x4096xf32>
    %42 = arith.mulf %37, %41 : vector<2x4096xf32>
    %43 = vector.broadcast %28 : vector<1x4096xf32> to vector<2x4096xf32>
    %44 = arith.addf %42, %43 : vector<2x4096xf32>
    %c0_15 = arith.constant 0 : index
    %c0_16 = arith.constant 0 : index
    %45 = vector.load %arg8[%c0_15, %c0_16] : memref<2x4096xf32, #tpu.memory_space<vmem>>, vector<2x4096xf32>
    tpu.vector_store %arg8[%c0_15, %c0_16], %44 {strides = array<i32>} : memref<2x4096xf32, #tpu.memory_space<vmem>>, vector<2x4096xf32>,
    return
  }
  func.func @transform_0(%arg0: i32) -> (i32, i32) {
    %c0_i32 = arith.constant 0 : i32
    %c0_i32_0 = arith.constant 0 : i32
    %c0_i32_1 = arith.constant 0 : i32
    return %c0_i32, %c0_i32_0 : i32, i32
  }
  func.func @transform_1(%arg0: i32) -> (i32, i32) {
    %c0_i32 = arith.constant 0 : i32
    %c0_i32_0 = arith.constant 0 : i32
    %c0_i32_1 = arith.constant 0 : i32
    return %c0_i32, %c0_i32_0 : i32, i32
  }
  func.func @transform_2(%arg0: i32) -> (i32, i32) {
    %c0_i32 = arith.constant 0 : i32
    %c0_i32_0 = arith.constant 0 : i32
    %c0_i32_1 = arith.constant 0 : i32
    return %c0_i32, %c0_i32_0 : i32, i32
  }
  func.func @transform_3(%arg0: i32) -> (i32, i32) {
    %c0_i32 = arith.constant 0 : i32
    %c0_i32_0 = arith.constant 0 : i32
    %c0_i32_1 = arith.constant 0 : i32
    return %c0_i32, %c0_i32_0 : i32, i32
  }
  func.func @transform_4(%arg0: i32) -> (i32, i32) {
    %c0_i32 = arith.constant 0 : i32
    %c0_i32_0 = arith.constant 0 : i32
    %c0_i32_1 = arith.constant 0 : i32
    return %c0_i32, %c0_i32_0 : i32, i32
  }
  func.func @transform_5(%arg0: i32) -> (i32, i32) {
    %c0_i32 = arith.constant 0 : i32
    %c0_i32_0 = arith.constant 0 : i32
    return %c0_i32, %arg0 : i32, i32
  }
  func.func @transform_6(%arg0: i32) -> (i32, i32) {
    %c0_i32 = arith.constant 0 : i32
    %c0_i32_0 = arith.constant 0 : i32
    return %c0_i32, %arg0 : i32, i32
  }
  func.func @transform_7(%arg0: i32) -> (i32, i32) {
    %c0_i32 = arith.constant 0 : i32
    %c0_i32_0 = arith.constant 0 : i32
    return %c0_i32, %arg0 : i32, i32
  }
}

module attributes {stable_mosaic.version = 11 : i64} {
  func.func @kernel(%arg0: memref<2x16384xf32, #tpu.memory_space<vmem>>, %arg1: memref<1024x256xbf16, #tpu.memory_space<vmem>>, %arg2: memref<3x256xf32, #tpu.memory_space<vmem>>, %arg3: memref<256x128xf32, #tpu.memory_space<vmem>>, %arg4: memref<3x128xf32, #tpu.memory_space<vmem>>, %arg5: memref<32x128xf32, #tpu.memory_space<vmem>>) attributes {dimension_semantics = [], scalar_prefetch = 0 : i64, scratch_operands = 0 : i64, tpu.core_type = #tpu.core_type<tc>} {
    %c0 = arith.constant 0 : index
    %c0_0 = arith.constant 0 : index
    %0 = vector.load %arg0[%c0, %c0_0] : memref<2x16384xf32, #tpu.memory_space<vmem>>, vector<2x16384xf32>
    %1 = vector.extract_strided_slice %0 {offsets = [0, 0], sizes = [2, 1024], strides = [1, 1]} : vector<2x16384xf32> to vector<2x1024xf32>
    %2 = arith.mulf %1, %1 : vector<2x1024xf32>
    %3 = vector.extract_strided_slice %0 {offsets = [0, 1024], sizes = [2, 1024], strides = [1, 1]} : vector<2x16384xf32> to vector<2x1024xf32>
    %4 = arith.mulf %3, %3 : vector<2x1024xf32>
    %5 = arith.addf %2, %4 : vector<2x1024xf32>
    %6 = vector.extract_strided_slice %0 {offsets = [0, 2048], sizes = [2, 1024], strides = [1, 1]} : vector<2x16384xf32> to vector<2x1024xf32>
    %7 = arith.mulf %6, %6 : vector<2x1024xf32>
    %8 = arith.addf %5, %7 : vector<2x1024xf32>
    %9 = vector.extract_strided_slice %0 {offsets = [0, 3072], sizes = [2, 1024], strides = [1, 1]} : vector<2x16384xf32> to vector<2x1024xf32>
    %10 = arith.mulf %9, %9 : vector<2x1024xf32>
    %11 = arith.addf %8, %10 : vector<2x1024xf32>
    %12 = vector.extract_strided_slice %0 {offsets = [0, 4096], sizes = [2, 1024], strides = [1, 1]} : vector<2x16384xf32> to vector<2x1024xf32>
    %13 = arith.mulf %12, %12 : vector<2x1024xf32>
    %14 = arith.addf %11, %13 : vector<2x1024xf32>
    %15 = vector.extract_strided_slice %0 {offsets = [0, 5120], sizes = [2, 1024], strides = [1, 1]} : vector<2x16384xf32> to vector<2x1024xf32>
    %16 = arith.mulf %15, %15 : vector<2x1024xf32>
    %17 = arith.addf %14, %16 : vector<2x1024xf32>
    %18 = vector.extract_strided_slice %0 {offsets = [0, 6144], sizes = [2, 1024], strides = [1, 1]} : vector<2x16384xf32> to vector<2x1024xf32>
    %19 = arith.mulf %18, %18 : vector<2x1024xf32>
    %20 = arith.addf %17, %19 : vector<2x1024xf32>
    %21 = vector.extract_strided_slice %0 {offsets = [0, 7168], sizes = [2, 1024], strides = [1, 1]} : vector<2x16384xf32> to vector<2x1024xf32>
    %22 = arith.mulf %21, %21 : vector<2x1024xf32>
    %23 = arith.addf %20, %22 : vector<2x1024xf32>
    %24 = vector.extract_strided_slice %0 {offsets = [0, 8192], sizes = [2, 1024], strides = [1, 1]} : vector<2x16384xf32> to vector<2x1024xf32>
    %25 = arith.mulf %24, %24 : vector<2x1024xf32>
    %26 = arith.addf %23, %25 : vector<2x1024xf32>
    %27 = vector.extract_strided_slice %0 {offsets = [0, 9216], sizes = [2, 1024], strides = [1, 1]} : vector<2x16384xf32> to vector<2x1024xf32>
    %28 = arith.mulf %27, %27 : vector<2x1024xf32>
    %29 = arith.addf %26, %28 : vector<2x1024xf32>
    %30 = vector.extract_strided_slice %0 {offsets = [0, 10240], sizes = [2, 1024], strides = [1, 1]} : vector<2x16384xf32> to vector<2x1024xf32>
    %31 = arith.mulf %30, %30 : vector<2x1024xf32>
    %32 = arith.addf %29, %31 : vector<2x1024xf32>
    %33 = vector.extract_strided_slice %0 {offsets = [0, 11264], sizes = [2, 1024], strides = [1, 1]} : vector<2x16384xf32> to vector<2x1024xf32>
    %34 = arith.mulf %33, %33 : vector<2x1024xf32>
    %35 = arith.addf %32, %34 : vector<2x1024xf32>
    %36 = vector.extract_strided_slice %0 {offsets = [0, 12288], sizes = [2, 1024], strides = [1, 1]} : vector<2x16384xf32> to vector<2x1024xf32>
    %37 = arith.mulf %36, %36 : vector<2x1024xf32>
    %38 = arith.addf %35, %37 : vector<2x1024xf32>
    %39 = vector.extract_strided_slice %0 {offsets = [0, 13312], sizes = [2, 1024], strides = [1, 1]} : vector<2x16384xf32> to vector<2x1024xf32>
    %40 = arith.mulf %39, %39 : vector<2x1024xf32>
    %41 = arith.addf %38, %40 : vector<2x1024xf32>
    %42 = vector.extract_strided_slice %0 {offsets = [0, 14336], sizes = [2, 1024], strides = [1, 1]} : vector<2x16384xf32> to vector<2x1024xf32>
    %43 = arith.mulf %42, %42 : vector<2x1024xf32>
    %44 = arith.addf %41, %43 : vector<2x1024xf32>
    %45 = vector.extract_strided_slice %0 {offsets = [0, 15360], sizes = [2, 1024], strides = [1, 1]} : vector<2x16384xf32> to vector<2x1024xf32>
    %46 = arith.mulf %45, %45 : vector<2x1024xf32>
    %47 = arith.addf %44, %46 : vector<2x1024xf32>
    %48 = math.sqrt %47 : vector<2x1024xf32>
    %cst = arith.constant 1.000000e+00 : f32
    %49 = vector.broadcast %cst : f32 to vector<2x1024xf32>
    %50 = arith.addf %49, %47 : vector<2x1024xf32>
    %51 = tpu.reciprocal %50 {approx = true} : vector<2x1024xf32> -> vector<2x1024xf32>
    %52 = arith.mulf %48, %51 : vector<2x1024xf32>
    %53 = vector.shape_cast %0 : vector<2x16384xf32> to vector<2x16x1024xf32>
    %54 = vector.shape_cast %52 : vector<2x1024xf32> to vector<2x1x1024xf32>
    %55 = vector.broadcast %54 : vector<2x1x1024xf32> to vector<2x16x1024xf32>
    %56 = arith.mulf %53, %55 : vector<2x16x1024xf32>
    %57 = vector.shape_cast %56 : vector<2x16x1024xf32> to vector<32x1024xf32>
    %c0_1 = arith.constant 0 : index
    %c0_2 = arith.constant 0 : index
    %58 = vector.load %arg2[%c0_1, %c0_2] : memref<3x256xf32, #tpu.memory_space<vmem>>, vector<3x256xf32>
    %59 = arith.truncf %57 : vector<32x1024xf32> to vector<32x1024xbf16>
    %c0_3 = arith.constant 0 : index
    %c0_4 = arith.constant 0 : index
    %60 = vector.load %arg1[%c0_3, %c0_4] : memref<1024x256xbf16, #tpu.memory_space<vmem>>, vector<1024x256xbf16>
    %cst_5 = arith.constant dense<0.000000e+00> : vector<32x256xf32>
    %61 = tpu.matmul %59, %60, %cst_5 {dimension_numbers = #tpu.dot_dimension_numbers<[1], [0], [0], [1], [0, 0, 1, 1], [], []>} : vector<32x1024xbf16>, vector<1024x256xbf16>, vector<32x256xf32> -> vector<32x256xf32>
    %62 = vector.extract_strided_slice %58 {offsets = [0, 0], sizes = [1, 256], strides = [1, 1]} : vector<3x256xf32> to vector<1x256xf32>
    %63 = vector.broadcast %62 : vector<1x256xf32> to vector<32x256xf32>
    %64 = arith.addf %61, %63 : vector<32x256xf32>
    %65 = vector.extract_strided_slice %58 {offsets = [1, 0], sizes = [1, 256], strides = [1, 1]} : vector<3x256xf32> to vector<1x256xf32>
    %66 = vector.extract_strided_slice %58 {offsets = [2, 0], sizes = [1, 256], strides = [1, 1]} : vector<3x256xf32> to vector<1x256xf32>
    %cst_6 = arith.constant dense<0.000000e+00> : vector<256xf32>
    %67 = vector.multi_reduction <add>, %64, %cst_6 [0] : vector<32x256xf32> to vector<256xf32>
    %68 = vector.shape_cast %67 : vector<256xf32> to vector<1x256xf32>
    %cst_7 = arith.constant 3.125000e-02 : f32
    %69 = vector.broadcast %cst_7 : f32 to vector<1x256xf32>
    %70 = arith.mulf %68, %69 : vector<1x256xf32>
    %71 = arith.mulf %64, %64 : vector<32x256xf32>
    %cst_8 = arith.constant dense<0.000000e+00> : vector<256xf32>
    %72 = vector.multi_reduction <add>, %71, %cst_8 [0] : vector<32x256xf32> to vector<256xf32>
    %73 = vector.shape_cast %72 : vector<256xf32> to vector<1x256xf32>
    %cst_9 = arith.constant 3.125000e-02 : f32
    %74 = vector.broadcast %cst_9 : f32 to vector<1x256xf32>
    %75 = arith.mulf %73, %74 : vector<1x256xf32>
    %76 = arith.mulf %70, %70 : vector<1x256xf32>
    %77 = arith.subf %75, %76 : vector<1x256xf32>
    %cst_10 = arith.constant 0.000000e+00 : f32
    %78 = vector.broadcast %cst_10 : f32 to vector<1x256xf32>
    %79 = arith.maximumf %77, %78 : vector<1x256xf32>
    %80 = vector.broadcast %70 : vector<1x256xf32> to vector<32x256xf32>
    %81 = arith.subf %64, %80 : vector<32x256xf32>
    %82 = vector.broadcast %65 : vector<1x256xf32> to vector<32x256xf32>
    %83 = arith.mulf %82, %81 : vector<32x256xf32>
    %cst_11 = arith.constant 1.000000e-03 : f32
    %84 = vector.broadcast %cst_11 : f32 to vector<1x256xf32>
    %85 = arith.addf %79, %84 : vector<1x256xf32>
    %86 = math.rsqrt %85 : vector<1x256xf32>
    %87 = vector.broadcast %86 : vector<1x256xf32> to vector<32x256xf32>
    %88 = arith.mulf %83, %87 : vector<32x256xf32>
    %89 = vector.broadcast %66 : vector<1x256xf32> to vector<32x256xf32>
    %90 = arith.addf %88, %89 : vector<32x256xf32>
    %cst_12 = arith.constant 0.000000e+00 : f32
    %91 = vector.broadcast %cst_12 : f32 to vector<32x256xf32>
    %92 = arith.cmpf oge, %90, %91 : vector<32x256xf32>
    %cst_13 = arith.constant 3.000000e-01 : f32
    %93 = vector.broadcast %cst_13 : f32 to vector<32x256xf32>
    %94 = arith.mulf %93, %90 : vector<32x256xf32>
    %95 = arith.select %92, %90, %94 : vector<32x256xi1>, vector<32x256xf32>
    %c0_14 = arith.constant 0 : index
    %c0_15 = arith.constant 0 : index
    %96 = vector.load %arg4[%c0_14, %c0_15] : memref<3x128xf32, #tpu.memory_space<vmem>>, vector<3x128xf32>
    %c0_16 = arith.constant 0 : index
    %c0_17 = arith.constant 0 : index
    %97 = vector.load %arg3[%c0_16, %c0_17] : memref<256x128xf32, #tpu.memory_space<vmem>>, vector<256x128xf32>
    %cst_18 = arith.constant dense<0.000000e+00> : vector<32x128xf32>
    %98 = tpu.matmul %95, %97, %cst_18 {dimension_numbers = #tpu.dot_dimension_numbers<[1], [0], [0], [1], [0, 0, 1, 1], [], []>} : vector<32x256xf32>, vector<256x128xf32>, vector<32x128xf32> -> vector<32x128xf32>
    %99 = vector.extract_strided_slice %96 {offsets = [0, 0], sizes = [1, 128], strides = [1, 1]} : vector<3x128xf32> to vector<1x128xf32>
    %100 = vector.broadcast %99 : vector<1x128xf32> to vector<32x128xf32>
    %101 = arith.addf %98, %100 : vector<32x128xf32>
    %102 = vector.extract_strided_slice %96 {offsets = [1, 0], sizes = [1, 128], strides = [1, 1]} : vector<3x128xf32> to vector<1x128xf32>
    %103 = vector.extract_strided_slice %96 {offsets = [2, 0], sizes = [1, 128], strides = [1, 1]} : vector<3x128xf32> to vector<1x128xf32>
    %cst_19 = arith.constant dense<0.000000e+00> : vector<128xf32>
    %104 = vector.multi_reduction <add>, %101, %cst_19 [0] : vector<32x128xf32> to vector<128xf32>
    %105 = vector.shape_cast %104 : vector<128xf32> to vector<1x128xf32>
    %cst_20 = arith.constant 3.125000e-02 : f32
    %106 = vector.broadcast %cst_20 : f32 to vector<1x128xf32>
    %107 = arith.mulf %105, %106 : vector<1x128xf32>
    %108 = arith.mulf %101, %101 : vector<32x128xf32>
    %cst_21 = arith.constant dense<0.000000e+00> : vector<128xf32>
    %109 = vector.multi_reduction <add>, %108, %cst_21 [0] : vector<32x128xf32> to vector<128xf32>
    %110 = vector.shape_cast %109 : vector<128xf32> to vector<1x128xf32>
    %cst_22 = arith.constant 3.125000e-02 : f32
    %111 = vector.broadcast %cst_22 : f32 to vector<1x128xf32>
    %112 = arith.mulf %110, %111 : vector<1x128xf32>
    %113 = arith.mulf %107, %107 : vector<1x128xf32>
    %114 = arith.subf %112, %113 : vector<1x128xf32>
    %cst_23 = arith.constant 0.000000e+00 : f32
    %115 = vector.broadcast %cst_23 : f32 to vector<1x128xf32>
    %116 = arith.maximumf %114, %115 : vector<1x128xf32>
    %117 = vector.broadcast %107 : vector<1x128xf32> to vector<32x128xf32>
    %118 = arith.subf %101, %117 : vector<32x128xf32>
    %119 = vector.broadcast %102 : vector<1x128xf32> to vector<32x128xf32>
    %120 = arith.mulf %119, %118 : vector<32x128xf32>
    %cst_24 = arith.constant 9.99999974E-6 : f32
    %121 = vector.broadcast %cst_24 : f32 to vector<1x128xf32>
    %122 = arith.addf %116, %121 : vector<1x128xf32>
    %123 = math.rsqrt %122 : vector<1x128xf32>
    %124 = vector.broadcast %123 : vector<1x128xf32> to vector<32x128xf32>
    %125 = arith.mulf %120, %124 : vector<32x128xf32>
    %126 = vector.broadcast %103 : vector<1x128xf32> to vector<32x128xf32>
    %127 = arith.addf %125, %126 : vector<32x128xf32>
    %c0_25 = arith.constant 0 : index
    %c0_26 = arith.constant 0 : index
    %128 = vector.load %arg5[%c0_25, %c0_26] : memref<32x128xf32, #tpu.memory_space<vmem>>, vector<32x128xf32>
    tpu.vector_store %arg5[%c0_25, %c0_26], %127 {strides = array<i32>} : memref<32x128xf32, #tpu.memory_space<vmem>>, vector<32x128xf32>,
    return
  }
}

</mosaic_0001>

<bundles_post_ra>
// kernel: vae_encoder_forward.3
= control target key start
LH: loop header
LB: loop body
LE: loop exit
PB: predicated region body
PF: predicated region fallthrough
CT: control target
= control target key end

     0   :  { %s4334_s1 = inlined_call_operand.vmem [shape: bf16[1024,256], index: 1, kind: input, shape index: {}]   ;;  %s4335_s0 = inlined_call_operand.vmem [shape: f32[2,16384], index: 0, kind: input, shape index: {}]   ;;  %s4336_s3 = inlined_call_operand.vmem [shape: f32[256,128], index: 3, kind: input, shape index: {}]   ;;  %s4337_s2 = inlined_call_operand.vmem [shape: f32[3,256], index: 2, kind: input, shape index: {}]   ;;  %s4338_s4 = inlined_call_operand.vmem [shape: f32[3,128], index: 4, kind: input, shape index: {}]   ;;  %s4339_s5 = inlined_call_operand.vmem [shape: f32[32,128], index: 5, kind: output, shape index: {}]  }
   0x1   :  { %v2652_v0 = vld [vmem:[%s4334_s1 + $0x4] ss:$8 sps:$4 sm:$0xff]   ;;  %v2656_v2 = vld [vmem:[%s4334_s1] ss:$8 sps:$4 sm:$0xff]   ;;  %v2658_v4 = vld [vmem:[%s4334_s1 + $0x14] ss:$8 sps:$4 sm:$0xff]  }
   0x2   :  { %v2654_v1 = vld [vmem:[%s4334_s1 + $0x204] ss:$8 sps:$4 sm:$0xff]   ;;  %1852 = vmatprep.subr.bf16.mxu1 %v2652_v0  ;;  %v2657_v3 = vld [vmem:[%s4334_s1 + $0x200] ss:$8 sps:$4 sm:$0xff]   ;;  %v2660_v5 = vld [vmem:[%s4334_s1 + $0x214] ss:$8 sps:$4 sm:$0xff]  }
   0x3   :  { %1958 = vmatprep.subr.bf16.mxu0 %v2654_v1  ;;  %1853 = vmatpush1.bf16.msra.mxu1 %v2656_v2  ;;  %v2662_v6 = vld [vmem:[%s4334_s1 + $0x10] ss:$8 sps:$4 sm:$0xff]   ;;  %v2664_v8 = vld [vmem:[%s4334_s1 + $0x24] ss:$8 sps:$4 sm:$0xff]   ;;  %v2668_v10 = vld [vmem:[%s4334_s1 + $0x20] ss:$8 sps:$4 sm:$0xff]  }
   0x4   :  { %1959 = vmatpush1.bf16.msra.mxu0 %v2657_v3  ;;  %1854 = vmatprep.subr.bf16.mxu1 %v2658_v4  ;;  %v2663_v7 = vld [vmem:[%s4334_s1 + $0x210] ss:$8 sps:$4 sm:$0xff]   ;;  %v2666_v9 = vld [vmem:[%s4334_s1 + $0x224] ss:$8 sps:$4 sm:$0xff]   ;;  %v2669_v11 = vld [vmem:[%s4334_s1 + $0x220] ss:$8 sps:$4 sm:$0xff]  }
   0x5   :  { %1960 = vmatprep.subr.bf16.mxu0 %v2660_v5  ;;  %v2670_v12 = vld [vmem:[%s4334_s1 + $0x34] ss:$8 sps:$4 sm:$0xff]   ;;  %v2674_v14 = vld [vmem:[%s4334_s1 + $0x30] ss:$8 sps:$4 sm:$0xff]   ;;  %v2676_v16 = vld [vmem:[%s4334_s1 + $0x44] ss:$8 sps:$4 sm:$0xff]  }
   0x6   :  { %v2672_v13 = vld [vmem:[%s4334_s1 + $0x234] ss:$8 sps:$4 sm:$0xff]   ;;  %v2675_v15 = vld [vmem:[%s4334_s1 + $0x230] ss:$8 sps:$4 sm:$0xff]   ;;  %v2678_v17 = vld [vmem:[%s4334_s1 + $0x244] ss:$8 sps:$4 sm:$0xff]  }
   0x7   :  { %1855 = vmatpush1.bf16.msra.mxu1 %v2662_v6  ;;  %v2680_v18 = vld [vmem:[%s4334_s1 + $0x40] ss:$8 sps:$4 sm:$0xff]   ;;  %v2682_v20 = vld [vmem:[%s4334_s1 + $0x54] ss:$8 sps:$4 sm:$0xff]   ;;  %v2686_v22 = vld [vmem:[%s4334_s1 + $0x50] ss:$8 sps:$4 sm:$0xff]  }
   0x8   :  { %1961 = vmatpush1.bf16.msra.mxu0 %v2663_v7  ;;  %1856 = vmatprep.subr.bf16.mxu1 %v2664_v8  ;;  %v2681_v19 = vld [vmem:[%s4334_s1 + $0x240] ss:$8 sps:$4 sm:$0xff]   ;;  %v2684_v21 = vld [vmem:[%s4334_s1 + $0x254] ss:$8 sps:$4 sm:$0xff]   ;;  %v2687_v23 = vld [vmem:[%s4334_s1 + $0x250] ss:$8 sps:$4 sm:$0xff]  }
   0x9   :  { %1962 = vmatprep.subr.bf16.mxu0 %v2666_v9  ;;  %v2688_v24 = vld [vmem:[%s4334_s1 + $0x64] ss:$8 sps:$4 sm:$0xff]   ;;  %v2692_v26 = vld [vmem:[%s4334_s1 + $0x60] ss:$8 sps:$4 sm:$0xff]   ;;  %v2694_v28 = vld [vmem:[%s4334_s1 + $0x74] ss:$8 sps:$4 sm:$0xff]  }
   0xa   :  { %v2690_v25 = vld [vmem:[%s4334_s1 + $0x264] ss:$8 sps:$4 sm:$0xff]   ;;  %v2693_v27 = vld [vmem:[%s4334_s1 + $0x260] ss:$8 sps:$4 sm:$0xff]   ;;  %v2696_v29 = vld [vmem:[%s4334_s1 + $0x274] ss:$8 sps:$4 sm:$0xff]  }
   0xb   :  { %1857 = vmatpush1.bf16.msra.mxu1 %v2668_v10  ;;  %v2698_v30 = vld [vmem:[%s4334_s1 + $0x70] ss:$8 sps:$4 sm:$0xff]   ;;  %v2700_v32 = vld [vmem:[%s4334_s1 + $0x84] ss:$8 sps:$4 sm:$0xff]   ;;  %v2704_v34 = vld [vmem:[%s4334_s1 + $0x80] ss:$8 sps:$4 sm:$0xff]  }
   0xc   :  { %1963 = vmatpush1.bf16.msra.mxu0 %v2669_v11  ;;  %1858 = vmatprep.subr.bf16.mxu1 %v2670_v12  ;;  %v2699_v31 = vld [vmem:[%s4334_s1 + $0x270] ss:$8 sps:$4 sm:$0xff]   ;;  %v2702_v33 = vld [vmem:[%s4334_s1 + $0x284] ss:$8 sps:$4 sm:$0xff]   ;;  %v2705_v35 = vld [vmem:[%s4334_s1 + $0x280] ss:$8 sps:$4 sm:$0xff]  }
   0xd   :  { %1964 = vmatprep.subr.bf16.mxu0 %v2672_v13  ;;  %v2706_v36 = vld [vmem:[%s4334_s1 + $0x94] ss:$8 sps:$4 sm:$0xff]   ;;  %v2710_v38 = vld [vmem:[%s4334_s1 + $0x90] ss:$8 sps:$4 sm:$0xff]   ;;  %v2712_v40 = vld [vmem:[%s4334_s1 + $0xa4] ss:$8 sps:$4 sm:$0xff]  }
   0xe   :  { %v2708_v37 = vld [vmem:[%s4334_s1 + $0x294] ss:$8 sps:$4 sm:$0xff]   ;;  %v2711_v39 = vld [vmem:[%s4334_s1 + $0x290] ss:$8 sps:$4 sm:$0xff]   ;;  %v2714_v41 = vld [vmem:[%s4334_s1 + $0x2a4] ss:$8 sps:$4 sm:$0xff]  }
   0xf   :  { %1859 = vmatpush1.bf16.msra.mxu1 %v2674_v14  ;;  %v2716_v42 = vld [vmem:[%s4334_s1 + $0xa0] ss:$8 sps:$4 sm:$0xff]   ;;  %v2718_v44 = vld [vmem:[%s4334_s1 + $0xb4] ss:$8 sps:$4 sm:$0xff]   ;;  %v2722_v46 = vld [vmem:[%s4334_s1 + $0xb0] ss:$8 sps:$4 sm:$0xff]  }
  0x10   :  { %1965 = vmatpush1.bf16.msra.mxu0 %v2675_v15  ;;  %1860 = vmatprep.subr.bf16.mxu1 %v2676_v16  ;;  %v2717_v43 = vld [vmem:[%s4334_s1 + $0x2a0] ss:$8 sps:$4 sm:$0xff]   ;;  %v2720_v45 = vld [vmem:[%s4334_s1 + $0x2b4] ss:$8 sps:$4 sm:$0xff]   ;;  %v2723_v47 = vld [vmem:[%s4334_s1 + $0x2b0] ss:$8 sps:$4 sm:$0xff]  }
  0x11   :  { %1966 = vmatprep.subr.bf16.mxu0 %v2678_v17  ;;  %v3070_v48 = vld [vmem:[%s4335_s0] sm:$0xff]  ;;  %v3081_v51 = vld [vmem:[%s4335_s0 + $0x8] sm:$0xff]  ;;  %v3086_v52 = vld [vmem:[%s4335_s0 + $0x10] sm:$0xff] }
  0x12   :  { %v2724_v49 = vld [vmem:[%s4334_s1 + $0xc4] ss:$8 sps:$4 sm:$0xff]   ;;  %v3091_v53 = vld [vmem:[%s4335_s0 + $0x18] sm:$0xff]  ;;  %v52_v54 = vmul.f32 %v3070_v48, %v3070_v48  ;;  %v3108_v57 = vld [vmem:[%s4335_s0 + $0x30] sm:$0xff]  ;;  %v53_v58 = vmul.f32 %v3081_v51, %v3081_v51  ;;  %v54_v59 = vmul.f32 %v3086_v52, %v3086_v52 }
  0x13   :  { %1861 = vmatpush1.bf16.msra.mxu1 %v2680_v18  ;;  %v2726_v50 = vld [vmem:[%s4334_s1 + $0x2c4] ss:$8 sps:$4 sm:$0xff]   ;;  %v55_v60 = vmul.f32 %v3091_v53, %v3091_v53  ;;  %v3119_v61 = vld [vmem:[%s4335_s0 + $0x38] sm:$0xff]  ;;  %v62_v4 = vmul.f32 %v3108_v57, %v3108_v57  ;;  %v3142_v6 = vld [vmem:[%s4335_s0 + $0x50] sm:$0xff]  ;;  %v2890_v18 = vmov 1934713408  }
  0x14   :  { %1967 = vmatpush1.bf16.msra.mxu0 %v2681_v19  ;;  %1862 = vmatprep.subr.bf16.mxu1 %v2682_v20  ;;  %v3098_v55 = vld [vmem:[%s4335_s0 + $0x20] sm:$0xff]  ;;  %v3103_v56 = vld [vmem:[%s4335_s0 + $0x28] sm:$0xff]  ;;  %v56_v2 = vadd.f32 %v54_v59, %v52_v54  ;;  %v63_v5 = vmul.f32 %v3119_v61, %v3119_v61  ;;  %v3147_v7 = vld [vmem:[%s4335_s0 + $0x58] sm:$0xff]  ;;  %v137_v19 = vunpack.c.l.s4 %v2890_v18 }
  0x15   :  { %1968 = vmatprep.subr.bf16.mxu0 %v2684_v21  ;;  %v3124_v62 = vld [vmem:[%s4335_s0 + $0x40] sm:$0xff]  ;;  %v3129_v63 = vld [vmem:[%s4335_s0 + $0x48] sm:$0xff]  ;;  %v58_v0 = vmul.f32 %v3098_v55, %v3098_v55  ;;  %v59_v1 = vmul.f32 %v3103_v56, %v3103_v56  ;;  %v57_v3 = vadd.f32 %v55_v60, %v53_v58  ;;  %v2730_v15 = vld [vmem:[%s4334_s1 + $0xd4] ss:$8 sps:$4 sm:$0xff]  }
  0x16   :  { %v66_v8 = vmul.f32 %v3124_v62, %v3124_v62  ;;  %v2728_v9 = vld [vmem:[%s4334_s1 + $0xc0] ss:$8 sps:$4 sm:$0xff]   ;;  %v67_v14 = vmul.f32 %v3129_v63, %v3129_v63  ;;  %v2732_v16 = vld [vmem:[%s4334_s1 + $0x2d4] ss:$8 sps:$4 sm:$0xff]   ;;  %v2734_v20 = vld [vmem:[%s4334_s1 + $0xd0] ss:$8 sps:$4 sm:$0xff]  }
  0x17   :  { %1863 = vmatpush1.bf16.msra.mxu1 %v2686_v22  ;;  %v2729_v10 = vld [vmem:[%s4334_s1 + $0x2c0] ss:$8 sps:$4 sm:$0xff]   ;;  %v60_v12 = vadd.f32 %v58_v0, %v56_v2  ;;  %v61_v13 = vadd.f32 %v59_v1, %v57_v3  ;;  %v3236_v54 = vld [vmem:[%s4335_s0 + $0x98] sm:$0xff] }
  0x18   :  { %1969 = vmatpush1.bf16.msra.mxu0 %v2687_v23  ;;  %1864 = vmatprep.subr.bf16.mxu1 %v2688_v24  ;;  %v3160_v11 = vld [vmem:[%s4335_s0 + $0x60] sm:$0xff]  ;;  %v3173_v17 = vld [vmem:[%s4335_s0 + $0x68] sm:$0xff]  ;;  %v70_v23 = vmul.f32 %v3142_v6, %v3142_v6  ;;  %v71_v24 = vmul.f32 %v3147_v7, %v3147_v7 }
  0x19   :  { %1970 = vmatprep.subr.bf16.mxu0 %v2690_v25  ;;  %v64_v21 = vadd.f32 %v62_v4, %v60_v12  ;;  %v65_v22 = vadd.f32 %v63_v5, %v61_v13  ;;  %v2735_v25 = vld [vmem:[%s4334_s1 + $0x2d0] ss:$8 sps:$4 sm:$0xff]   ;;  %v3241_v58 = vld [vmem:[%s4335_s0 + $0xa0] sm:$0xff]  ;;  %v3250_v2 = vld [vmem:[%s4335_s0 + $0xa8] sm:$0xff] }
  0x1a   :  { %v2746_v13 = vld [vmem:[%s4334_s1 + $0xf0] ss:$8 sps:$4 sm:$0xff]  }
  0x1b   :  { %1865 = vmatpush1.bf16.msra.mxu1 %v2692_v26  ;;  %v3188_v26 = vld [vmem:[%s4335_s0 + $0x70] sm:$0xff] }
  0x1c   :  { %1971 = vmatpush1.bf16.msra.mxu0 %v2693_v27  ;;  %1866 = vmatprep.subr.bf16.mxu1 %v2694_v28  ;;  %v3193_v27 = vld [vmem:[%s4335_s0 + $0x78] sm:$0xff]  ;;  %v74_v28 = vmul.f32 %v3160_v11, %v3160_v11 }
  0x1d   :  { %1972 = vmatprep.subr.bf16.mxu0 %v2696_v29  ;;  %v139_v29 = vlaneseq }
  0x1f   :  { %1867 = vmatpush1.bf16.msra.mxu1 %v2698_v30  ;;  %v2891_v30 = vmov 1966171168   ;;  %v3245_v60 = vshrl.u32 %v139_v29, 7  ;;  %v3304_v29 = vld [vmem:[%s4335_s0 + $0xc8] sm:$0xff] }
  0x20   :  { %1973 = vmatpush1.bf16.msra.mxu0 %v2699_v31  ;;  %1868 = vmatprep.subr.bf16.mxu1 %v2700_v32  ;;  %v425_v31 = vunpack.c.l.s4 %v2891_v30  ;;  %v2892_v32 = vmov 1983009808  }
  0x21   :  { %1974 = vmatprep.subr.bf16.mxu0 %v2702_v33  ;;  %v509_v33 = vunpack.c.l.s4 %v2892_v32  ;;  %v3264_v12 = vsub.s32 1, %v3245_v60  ;;  %v134_v32 = vcombine.low %v3070_v48, %v3086_v52 }
  0x22   :  { %v426_v0 = vunpack.c.0.s8 %v425_v31 }
  0x23   :  { %1869 = vmatpush1.bf16.msra.mxu1 %v2704_v34  ;;  %v2736_v34 = vld [vmem:[%s4334_s1 + $0xe4] ss:$8 sps:$4 sm:$0xff]   ;;  %v510_v1 = vunpack.c.0.s8 %v509_v33  ;;  %4362 = vst [vmem:[#allocation3_spill] sm:$0xff] %v3264_v12  ;;  %v3309_v33 = vsub.s32 2, %v3245_v60 }
  0x24   :  { %1975 = vmatpush1.bf16.msra.mxu0 %v2705_v35  ;;  %1870 = vmatprep.subr.bf16.mxu1 %v2706_v36  ;;  %v2738_v35 = vld [vmem:[%s4334_s1 + $0x2e4] ss:$8 sps:$4 sm:$0xff]  }
  0x25   :  { %1976 = vmatprep.subr.bf16.mxu0 %v2708_v37  ;;  %v3206_v36 = vld [vmem:[%s4335_s0 + $0x80] sm:$0xff]  ;;  %v68_v37 = vadd.f32 %v66_v8, %v64_v21  ;;  %v2744_v8 = vld [vmem:[%s4334_s1 + $0x2f4] ss:$8 sps:$4 sm:$0xff]   ;;  %4363 = vst [vmem:[#allocation4_spill] sm:$0xff] %v3309_v33 }
  0x26   :  { %v82_v59 = vmul.f32 %v3206_v36, %v3206_v36  ;;  %v3284_v21 = vld [vmem:[%s4335_s0 + $0xb8] sm:$0xff] }
  0x27   :  { %1871 = vmatpush1.bf16.msra.mxu1 %v2710_v38  ;;  %v69_v38 = vadd.f32 %v67_v14, %v65_v22  ;;  %v2747_v14 = vld [vmem:[%s4334_s1 + $0x2f0] ss:$8 sps:$4 sm:$0xff]   ;;  %v3289_v22 = vld [vmem:[%s4335_s0 + $0xc0] sm:$0xff] }
  0x28   :  { %1977 = vmatpush1.bf16.msra.mxu0 %v2711_v39  ;;  %1872 = vmatprep.subr.bf16.mxu1 %v2712_v40  ;;  %v75_v39 = vmul.f32 %v3173_v17, %v3173_v17  ;;  %v3213_v40 = vld [vmem:[%s4335_s0 + $0x88] sm:$0xff] }
  0x29   :  { %1978 = vmatprep.subr.bf16.mxu0 %v2714_v41  ;;  %v138_v41 = vunpack.c.0.s8 %v137_v19  ;;  %v83_v5 = vmul.f32 %v3213_v40, %v3213_v40 }
  0x2b   :  { %1873 = vmatpush1.bf16.msra.mxu1 %v2716_v42  ;;  %v2740_v42 = vld [vmem:[%s4334_s1 + $0xe0] ss:$8 sps:$4 sm:$0xff]  }
  0x2c   :  { %1979 = vmatpush1.bf16.msra.mxu0 %v2717_v43  ;;  %1874 = vmatprep.subr.bf16.mxu1 %v2718_v44  ;;  %v2741_v43 = vld [vmem:[%s4334_s1 + $0x2e0] ss:$8 sps:$4 sm:$0xff]   ;;  %v3224_v44 = vld [vmem:[%s4335_s0 + $0x90] sm:$0xff] }
  0x2d   :  { %1980 = vmatprep.subr.bf16.mxu0 %v2720_v45  ;;  %v72_v45 = vadd.f32 %v70_v23, %v68_v37  ;;  %v86_v19 = vmul.f32 %v3224_v44, %v3224_v44  ;;  %v90_v23 = vmul.f32 %v3241_v58, %v3241_v58  ;;  %v135_v37 = vcombine.high %v3070_v48, %v3086_v52 }
  0x2e   :  { %v95_v52 = vmul.f32 %v3284_v21, %v3284_v21 }
  0x2f   :  { %1875 = vmatpush1.bf16.msra.mxu1 %v2722_v46  ;;  %v73_v46 = vadd.f32 %v71_v24, %v69_v38  ;;  %v76_v3 = vadd.f32 %v74_v28, %v72_v45  ;;  %v91_v24 = vmul.f32 %v3250_v2, %v3250_v2  ;;  %v3299_v28 = vsub.s32 %v510_v1, %v3245_v60  ;;  %v3365_v1 = vld [vmem:[%s4335_s0 + $0xf8] sm:$0xff] }
  0x30   :  { %1981 = vmatpush1.bf16.msra.mxu0 %v2723_v47  ;;  %1876 = vmatprep.subr.bf16.mxu1 %v2724_v49  ;;  %v78_v47 = vmul.f32 %v3188_v26, %v3188_v26  ;;  %v79_v49 = vmul.f32 %v3193_v27, %v3193_v27  ;;  %v152_v38 = vcombine.low %v3098_v55, %v3108_v57 }
  0x31   :  { %1982 = vmatprep.subr.bf16.mxu0 %v2726_v50  ;;  %v2742_v50 = vld [vmem:[%s4334_s1 + $0xf4] ss:$8 sps:$4 sm:$0xff]   ;;  %v77_v4 = vadd.f32 %v75_v39, %v73_v46  ;;  %v153_v39 = vcombine.high %v3098_v55, %v3108_v57  ;;  %v2785_v55 = vld [vmem:[%s4334_s1 + $0x304] ss:$8 sps:$4 sm:$0xff]  }
  0x32   :  { %v3346_v57 = vld [vmem:[%s4335_s0 + $0xe8] sm:$0xff] }
  0x33   :  { %1877 = vmatpush1.bf16.msra.mxu1 %v2728_v9  ;;  %v3258_v9 = vsub.s32 %v138_v41, %v3245_v60  ;;  %v81_v18 = vadd.f32 %v79_v49, %v77_v4  ;;  %v4340_v41 = vsub.s32 3, %v3245_v60  ;;  %v98_v49 = vmul.f32 %v3289_v22, %v3289_v22 }
  0x34   :  { %1983 = vmatpush1.bf16.msra.mxu0 %v2729_v10  ;;  %1878 = vmatprep.subr.bf16.mxu1 %v2730_v15  ;;  %v3261_v10 = vsub.s32 0, %v3245_v60  ;;  %v3275_v15 = vld [vmem:[%s4335_s0 + $0xb0] sm:$0xff] }
  0x35   :  { %1984 = vmatprep.subr.bf16.mxu0 %v2732_v16  ;;  %v80_v16 = vadd.f32 %v78_v47, %v76_v3  ;;  %v85_v31 = vadd.f32 %v83_v5, %v81_v18  ;;  %v94_v48 = vmul.f32 %v3275_v15, %v3275_v15  ;;  %v50_v47 = vld [vmem:[%s4335_s0 + $0xf0] sm:$0xff]  ;;  %v99_v5 = vmul.f32 %v3304_v29, %v3304_v29 }
  0x36   :  { %4361 = vst [vmem:[#allocation2_spill] sm:$0xff] %v3261_v10  ;;  %v3374_v18 = vrot.slane %v135_v37, %v3258_v9  ;;  %v111_v37 = vmul.f32 %v3365_v1, %v3365_v1 }
  0x37   :  { %1879 = vmatpush1.bf16.msra.mxu1 %v2734_v20  ;;  %v87_v20 = vmul.f32 %v3236_v54, %v3236_v54  ;;  %v84_v30 = vadd.f32 %v82_v59, %v80_v16  ;;  %v3357_v59 = vsub.s32 5, %v3245_v60  ;;  %v3371_v16 = vrot.slane %v134_v32, %v3258_v9 }
  0x38   :  { %1985 = vmatpush1.bf16.msra.mxu0 %v2735_v25  ;;  %1880 = vmatprep.subr.bf16.mxu1 %v2736_v34  ;;  %v3296_v25 = vsub.s32 %v426_v0, %v3245_v60  ;;  %v3314_v34 = vld [vmem:[%s4335_s0 + $0xd0] sm:$0xff]  ;;  %v3360_v0 = vsub.s32 6, %v3245_v60  ;;  %v110_v32 = vmul.f32 %v50_v47, %v50_v47 }
  0x39   :  { %1986 = vmatprep.subr.bf16.mxu0 %v2738_v35  ;;  %v3319_v35 = vld [vmem:[%s4335_s0 + $0xd8] sm:$0xff]  ;;  %v88_v45 = vadd.f32 %v86_v19, %v84_v30  ;;  %v89_v46 = vadd.f32 %v87_v20, %v85_v31  ;;  %v107_v31 = vmul.f32 %v3346_v57, %v3346_v57 }
  0x3b   :  { %1881 = vmatpush1.bf16.msra.mxu1 %v2740_v42  ;;  %v2766_v42 = vld [vmem:[%s4334_s1 + $0x104] ss:$8 sps:$4 sm:$0xff]   ;;  %v92_v3 = vadd.f32 %v90_v23, %v88_v45  ;;  %v93_v4 = vadd.f32 %v91_v24, %v89_v46  ;;  %v102_v23 = vmul.f32 %v3314_v34, %v3314_v34  ;;  %v103_v24 = vmul.f32 %v3319_v35, %v3319_v35 }
  0x3c   :  { %1987 = vmatpush1.bf16.msra.mxu0 %v2741_v43  ;;  %1882 = vmatprep.subr.bf16.mxu1 %v2742_v50  ;;  %v3334_v43 = vld [vmem:[%s4335_s0 + $0xe0] sm:$0xff]  ;;  %v3354_v50 = vsub.s32 4, %v3245_v60  ;;  %v171_v45 = vcombine.high %v3124_v62, %v3142_v6 }
  0x3d   :  { %1988 = vmatprep.subr.bf16.mxu0 %v2744_v8  ;;  %v4341_v8 = vsub.s32 7, %v3245_v60  ;;  %v96_v19 = vadd.f32 %v94_v48, %v92_v3  ;;  %v97_v20 = vadd.f32 %v95_v52, %v93_v4  ;;  %v106_v30 = vmul.f32 %v3334_v43, %v3334_v43 }
  0x3e   :  { %v188_v52 = vcombine.low %v3160_v11, %v3188_v26  ;;  %v206_v4 = vcombine.low %v3206_v36, %v3224_v44 }
  0x3f   :  { %1883 = vmatpush1.bf16.msra.mxu1 %v2746_v13  ;;  %v3377_v13 = vrot.slane %v152_v38, %v3258_v9  ;;  %v100_v38 = vadd.f32 %v98_v49, %v96_v19  ;;  %v242_v19 = vcombine.low %v3289_v22, %v3314_v34 }
  0x40   :  { %1989 = vmatpush1.bf16.msra.mxu0 %v2747_v14  ;;  %v3380_v14 = vrot.slane %v153_v39, %v3258_v9  ;;  %1905 = vmatprep.subr.bf16.mxu1 %v2766_v42  ;;  %v101_v39 = vadd.f32 %v99_v5, %v97_v20  ;;  %v170_v42 = vcombine.low %v3124_v62, %v3142_v6 }
  0x41   :  { %2011 = vmatprep.subr.bf16.mxu0 %v2785_v55  ;;  %v189_v55 = vcombine.high %v3160_v11, %v3188_v26  ;;  %v104_v49 = vadd.f32 %v102_v23, %v100_v38  ;;  %v207_v62 = vcombine.high %v3206_v36, %v3224_v44  ;;  %v224_v6 = vcombine.low %v3241_v58, %v3275_v15 }
  0x42   :  { %v105_v3 = vadd.f32 %v103_v24, %v101_v39  ;;  %v225_v5 = vcombine.high %v3241_v58, %v3275_v15  ;;  %v243_v11 = vcombine.high %v3289_v22, %v3314_v34  ;;  %v260_v23 = vcombine.low %v3334_v43, %v50_v47 }
  0x43   :  { %v108_v26 = vadd.f32 %v106_v30, %v104_v49  ;;  %v261_v24 = vcombine.high %v3334_v43, %v50_v47  ;;  %v3419_v36 = vrot.slane %v170_v42, %v3258_v9  ;;  %v3422_v44 = vrot.slane %v171_v45, %v3258_v9 }
  0x44   :  { %v109_v20 = vadd.f32 %v107_v31, %v105_v3  ;;  %v3425_v58 = vrot.slane %v188_v52, %v3258_v9  ;;  %v3428_v15 = vrot.slane %v189_v55, %v3258_v9  ;;  %v3435_v34 = vrot.slane %v206_v4, %v3258_v9 }
  0x45   :  { %v3430_v38 = vadd.f32 %v110_v32, %v108_v26  ;;  %v3438_v43 = vrot.slane %v207_v62, %v3258_v9  ;;  %v3441_v47 = vrot.slane %v224_v6, %v3258_v9  ;;  %v3444_v30 = vrot.slane %v225_v5, %v3258_v9 }
  0x46   :  { %v3432_v22 = vadd.f32 %v111_v37, %v109_v20  ;;  %v3447_v31 = vrot.slane %v242_v19, %v3258_v9  ;;  %v3450_v32 = vrot.slane %v243_v11, %v3258_v9  ;;  %v3454_v37 = vrot.slane %v260_v23, %v3258_v9 }
  0x47   :  { %2876 = vrsqrt.f32 %v3430_v38  ;;  %v3457_v39 = vrot.slane %v261_v24, %v3258_v9  ;;  %v278_v42 = vcombine.low %v3081_v51, %v3091_v53  ;;  %v279_v45 = vcombine.high %v3081_v51, %v3091_v53 }
  0x48   :  { %2878 = vrsqrt.f32 %v3432_v22  ;;  %v296_v52 = vcombine.low %v3103_v56, %v3119_v61  ;;  %v297_v55 = vcombine.high %v3103_v56, %v3119_v61  ;;  %v128_v49 = vadd.f32 1.0, %v3430_v38 }
  0x49   :  { %v129_v3 = vadd.f32 1.0, %v3432_v22  ;;  %v314_v53 = vcombine.low %v3129_v63, %v3147_v7  ;;  %v315_v56 = vcombine.high %v3129_v63, %v3147_v7  ;;  %v3487_v19 = vrot.slane %v278_v42, %v3258_v9 }
  0x4a   :  { %2880 = vrcp.f32 %v128_v49  ;;  %v3490_v11 = vrot.slane %v279_v45, %v3258_v9  ;;  %v3493_v26 = vrot.slane %v296_v52, %v3258_v9  ;;  %v3496_v20 = vrot.slane %v297_v55, %v3258_v9 }
  0x4b   :  { %2882 = vrcp.f32 %v129_v3  ;;  %v332_v63 = vcombine.low %v3173_v17, %v3193_v27  ;;  %v333_v7 = vcombine.high %v3173_v17, %v3193_v27  ;;  %v350_v23 = vcombine.low %v3213_v40, %v3236_v54 }
  0x4c   :  { %4364 = vst [vmem:[#allocation5_spill] sm:$0xff] %v3496_v20  ;;  %v351_v24 = vcombine.high %v3213_v40, %v3236_v54  ;;  %vm116_vm0 = vcmp.eq.f32.partialorder %v3430_v38, inf  ;;  %v3508_v42 = vrot.slane %v314_v53, %v3258_v9  ;;  %v3511_v45 = vrot.slane %v315_v56, %v3258_v9 }
  0x4d   :  { %v368_v52 = vcombine.low %v3250_v2, %v3284_v21  ;;  %vm118_vm1 = vcmp.eq.f32.partialorder %v3430_v38, 0.0  ;;  %v369_v17 = vcombine.high %v3250_v2, %v3284_v21  ;;  %v386_v27 = vcombine.low %v3304_v29, %v3319_v35 }
  0x4e   :  { %v387_v40 = vcombine.high %v3304_v29, %v3319_v35  ;;  %v119_v54 = vand.u32 2147483648, %v3430_v38  ;;  %vm123_vm2 = vcmp.eq.f32.partialorder %v3432_v22, inf  ;;  %vm125_vm3 = vcmp.eq.f32.partialorder %v3432_v22, 0.0 }
  0x4f   :  { %v126_v55 = vand.u32 2147483648, %v3432_v22  ;;  %v3527_v3 = vrot.slane %v332_v63, %v3258_v9  ;;  %v3530_v2 = vrot.slane %v333_v7, %v3258_v9  ;;  %v3533_v21 = vrot.slane %v350_v23, %v3258_v9 }
  0x50   :  { %v3536_v29 = vrot.slane %v351_v24, %v3258_v9  ;;  %v3540_v56 = vrot.slane %v368_v52, %v3258_v9  ;;  %v404_v5 = vcombine.low %v3346_v57, %v3365_v1  ;;  %v405_v63 = vcombine.high %v3346_v57, %v3365_v1 }
  0x51   :  { %v2877_v49 = vpop.eup %2876  ;;  %4365 = vst [vmem:[#allocation6_spill] sm:$0xff] %v3527_v3  ;;  %4366 = vst [vmem:[#allocation7_spill] sm:$0xff] %v3530_v2  ;;  %v3548_v23 = vrot.slane %v369_v17, %v3258_v9  ;;  %v3551_v24 = vrot.slane %v386_v27, %v3258_v9  ;;  %v3554_v61 = vrot.slane %v387_v40, %v3258_v9 }
  0x52   :  { %v2879_v35 = vpop.eup %2878  ;;  %v115_v53 = vmul.f32 %v2877_v49, %v3430_v38  ;;  %v3577_v1 = vrot.slane %v404_v5, %v3258_v9 }
  0x53   :  { %v122_v7 = vmul.f32 %v2879_v35, %v3432_v22 }
  0x54   :  { %v117_v52 = vsel %vm116_vm0, %v3430_v38, %v115_v53  ;;  %v2881_v17 = vpop.eup %2880  ;;  %v3580_v38 = vrot.slane %v405_v63, %v3258_v9 }
  0x55   :  { %v120_v27 = vsel %vm118_vm1, %v119_v54, %v117_v52  ;;  %v124_v40 = vsel %vm123_vm2, %v3432_v22, %v122_v7  ;;  %v2883_v49 = vpop.eup %2882 }
  0x56   :  { %v127_v57 = vsel %vm125_vm3, %v126_v55, %v124_v40  ;;  %v132_v51 = vmul.f32 %v2881_v17, %v120_v27  ;;  %4367 = vst [vmem:[#allocation8_spill] sm:$0xff] %v3580_v38 }
  0x57   :  { %v133_v54 = vmul.f32 %v2883_v49, %v127_v57 }
  0x58   :  { %v430_v22 = vrot.slane %v132_v51, %v3296_v25 }
  0x59   :  { %v437_v63 = vrot.slane %v133_v54, %v3296_v25 }
  0x5b   :  { %v438_v54 = vcombine.low %v430_v22, %v437_v63  ;;  %v3616_v9 = vcombine.high %v430_v22, %v437_v63 }
  0x5d   :  { %v443_v5 = vrot.slane %v438_v54, %v3261_v10  ;;  %v447_v49 = vrot.slane %v438_v54, %v3264_v12  ;;  %v451_v57 = vrot.slane %v438_v54, %v3309_v33  ;;  %v455_v51 = vrot.slane %v438_v54, %v4340_v41 }
  0x5e   :  { %v459_v22 = vrot.slane %v438_v54, %v3354_v50  ;;  %v463_v63 = vrot.slane %v438_v54, %v3357_v59  ;;  %v467_v27 = vrot.slane %v438_v54, %v3360_v0  ;;  %v471_v40 = vrot.slane %v438_v54, %v4341_v8 }
  0x5f   :  { %v504_v55 = vcombine.low %v443_v5, %v447_v49  ;;  %v505_v25 = vcombine.high %v443_v5, %v447_v49  ;;  %v506_v53 = vcombine.low %v451_v57, %v455_v51  ;;  %v507_v17 = vcombine.high %v451_v57, %v455_v51 }
  0x60   :  { %v540_v52 = vcombine.low %v459_v22, %v463_v63  ;;  %v541_v7 = vcombine.high %v459_v22, %v463_v63  ;;  %v542_v35 = vcombine.low %v467_v27, %v471_v40  ;;  %v543_v6 = vcombine.high %v467_v27, %v471_v40 }
  0x61   :  { %v514_v62 = vrot.slane %v504_v55, %v3299_v28  ;;  %v521_v41 = vrot.slane %v505_v25, %v3299_v28  ;;  %v528_v4 = vrot.slane %v506_v53, %v3299_v28  ;;  %v535_v48 = vrot.slane %v507_v17, %v3299_v28 }
  0x62   :  { %v550_v46 = vrot.slane %v540_v52, %v3299_v28  ;;  %v557_v54 = vrot.slane %v541_v7, %v3299_v28  ;;  %v564_v5 = vrot.slane %v542_v35, %v3299_v28  ;;  %v571_v49 = vrot.slane %v543_v6, %v3299_v28 }
  0x63   :  { %v536_v57 = vcombine.low %v514_v62, %v528_v4  ;;  %v537_v51 = vcombine.high %v514_v62, %v528_v4  ;;  %v538_v22 = vcombine.low %v521_v41, %v535_v48  ;;  %v539_v27 = vcombine.high %v521_v41, %v535_v48 }
  0x64   :  { %v572_v40 = vcombine.low %v550_v46, %v564_v5  ;;  %v573_v55 = vcombine.high %v550_v46, %v564_v5  ;;  %v574_v63 = vcombine.low %v557_v54, %v571_v49  ;;  %v575_v25 = vcombine.high %v557_v54, %v571_v49 }
  0x65   :  { %v4368_v53 = vcombine.low %v3371_v16, %v3374_v18  ;;  %v4369_v7 = vcombine.low %v3377_v13, %v3380_v14  ;;  %v4370_v6 = vcombine.low %v3419_v36, %v3422_v44  ;;  %v4371_v41 = vcombine.low %v3425_v58, %v3428_v15 }
  0x66   :  { %v4372_v48 = vcombine.low %v3435_v34, %v3438_v43  ;;  %v4374_v35 = vcombine.low %v3441_v47, %v3444_v30  ;;  %v4376_v5 = vcombine.low %v3447_v31, %v3450_v32 }
  0x67   :  { %v3645_v17 = vmul.f32 %v536_v57, %v4368_v53  ;;  %v3650_v52 = vmul.f32 %v537_v51, %v4369_v7  ;;  %v3655_v4 = vmul.f32 %v538_v22, %v4370_v6  ;;  %v3660_v46 = vmul.f32 %v539_v27, %v4371_v41 }
  0x68   :  { %v3665_v62 = vmul.f32 %v536_v57, %v4372_v48  ;;  %v3670_v54 = vmul.f32 %v537_v51, %v4374_v35  ;;  %v3675_v49 = vmul.f32 %v538_v22, %v4376_v5  ;;  %v4378_v53 = vcombine.low %v3454_v37, %v3457_v39 }
  0x69   :  { %v729_v6 = vcombine.low %v3645_v17, %v3650_v52  ;;  %v731_v57 = vcombine.low %v3655_v4, %v3660_v46  ;;  %v4380_v51 = vcombine.low %v3487_v19, %v3490_v11  ;;  %v4382_v22 = vcombine.low %v3493_v26, %v3496_v20 }
  0x6a   :  { %4373 = vst [vmem:[#allocation9_spill] sm:$0xff] %v3665_v62  ;;  %4375 = vst [vmem:[#allocation10_spill] sm:$0xff] %v3670_v54  ;;  %v3680_v7 = vmul.f32 %v539_v27, %v4378_v53  ;;  %v801_v27 = vcombine.low %v3665_v62, %v3670_v54  ;;  %v4384_v5 = vcombine.low %v3508_v42, %v3511_v45 }
  0x6b   :  { %4377 = vst [vmem:[#allocation11_spill] sm:$0xff] %v3675_v49  ;;  %v3689_v41 = vmul.f32 %v572_v40, %v4380_v51  ;;  %v3694_v48 = vmul.f32 %v573_v55, %v4382_v22  ;;  %v4386_v51 = vcombine.low %v3527_v3, %v3530_v2  ;;  %v739_v20 = vrot.slane %v729_v6, %v3299_v28 }
  0x6c   :  { %4379 = vst [vmem:[#allocation12_spill] sm:$0xff] %v3680_v7  ;;  %v803_v35 = vcombine.low %v3675_v49, %v3680_v7  ;;  %v3703_v53 = vmul.f32 %v574_v63, %v4384_v5  ;;  %v753_v22 = vrot.slane %v731_v57, %v3299_v28  ;;  %v4387_v62 = vcombine.low %v3533_v21, %v3536_v29 }
  0x6d   :  { %4381 = vst [vmem:[#allocation13_spill] sm:$0xff] %v3689_v41  ;;  %4383 = vst [vmem:[#allocation14_spill] sm:$0xff] %v3694_v48  ;;  %v3708_v8 = vmul.f32 %v575_v25, %v4386_v51  ;;  %v4389_v49 = vcombine.low %v3540_v56, %v3548_v23  ;;  %v811_v5 = vrot.slane %v801_v27, %v3299_v28 }
  0x6e   :  { %4385 = vst [vmem:[#allocation15_spill] sm:$0xff] %v3703_v53  ;;  %v3715_v54 = vmul.f32 %v572_v40, %v4387_v62  ;;  %v825_v2 = vrot.slane %v803_v35, %v3299_v28  ;;  %v4391_v51 = vcombine.low %v3551_v24, %v3554_v61  ;;  %v4392_v57 = vcombine.low %v3577_v1, %v3580_v38 }
  0x6f   :  { %v3720_v7 = vmul.f32 %v573_v55, %v4389_v49  ;;  %v762_v40 = vcombine.high %v739_v20, %v753_v22  ;;  %v765_v62 = vcombine.low %v3689_v41, %v3694_v48  ;;  %v767_v55 = vcombine.low %v3703_v53, %v3708_v8 }
  0x70   :  { %4388 = vst [vmem:[#allocation16_spill] sm:$0xff] %v3715_v54  ;;  %v3727_v6 = vmul.f32 %v574_v63, %v4391_v51  ;;  %v3732_v3 = vmul.f32 %v575_v25, %v4392_v57  ;;  %v834_v27 = vcombine.high %v811_v5, %v825_v2  ;;  %v761_v35 = vcombine.low %v739_v20, %v753_v22 }
  0x71   :  { %4390 = vst [vmem:[#allocation17_spill] sm:$0xff] %v3720_v7  ;;  %v837_v49 = vcombine.low %v3715_v54, %v3720_v7  ;;  %v833_v51 = vcombine.low %v811_v5, %v825_v2  ;;  %v775_v38 = vrot.slane %v765_v62, %v3299_v28  ;;  %v789_v25 = vrot.slane %v767_v55, %v3299_v28  ;;  %v2764_v54 = vld [vmem:[%s4334_s1 + $0x100] ss:$8 sps:$4 sm:$0xff]   ;;  %v2788_v5 = vld [vmem:[%s4334_s1 + $0x114] ss:$8 sps:$4 sm:$0xff]  }
  0x72   :  { %v839_v63 = vcombine.low %v3727_v6, %v3732_v3  ;;  %v475_v41 = vrot.slane %v3616_v9, %v3261_v10  ;;  %v1050_v48 = vpack.c.bf16 %v834_v27, %v762_v40  ;;  %v479_v20 = vrot.slane %v3616_v9, %v3264_v12 }
  0x73   :  { %v847_v57 = vrot.slane %v837_v49, %v3299_v28  ;;  %v1049_v53 = vpack.c.bf16 %v833_v51, %v761_v35  ;;  %v798_v2 = vcombine.high %v775_v38, %v789_v25  ;;  %v797_v22 = vcombine.low %v775_v38, %v789_v25 }
  0x74   :  { %v861_v7 = vrot.slane %v839_v63, %v3299_v28  ;;  %v483_v62 = vrot.slane %v3616_v9, %v3309_v33  ;;  %v4393_v40 = vsub.s32 3, %v3245_v60  ;;  %1884 = vmatprep.mubr.bf16.mxu1 %v1050_v48  ;;  %v576_v63 = vcombine.low %v475_v41, %v479_v20  ;;  %v2783_v33 = vld [vmem:[%s4334_s1 + $0x300] ss:$8 sps:$4 sm:$0xff]  }
  0x75   :  { %v577_v35 = vcombine.high %v475_v41, %v479_v20  ;;  %1885 = vmatmul.mubr.bf16.vlgmr.msra.gmra.mrb[0].mxu1 %v1049_v53  ;;  %v491_v38 = vrot.slane %v3616_v9, %v3354_v50  ;;  %v495_v25 = vrot.slane %v3616_v9, %v3357_v59  ;;  %v2794_v20 = vld [vmem:[%s4334_s1 + $0x124] ss:$8 sps:$4 sm:$0xff]  }
  0x76   :  { %v487_v55 = vrot.slane %v3616_v9, %v4393_v40  ;;  %v870_v49 = vcombine.high %v847_v57, %v861_v7  ;;  %v869_v27 = vcombine.low %v847_v57, %v861_v7  ;;  %1906 = vmatpush1.bf16.msra.mxu1 %v2764_v54  ;;  %v2786_v7 = vld [vmem:[%s4334_s1 + $0x110] ss:$8 sps:$4 sm:$0xff]   ;;  %v586_v41 = vrot.slane %v576_v63, %v3299_v28  ;;  %v2791_v57 = vld [vmem:[%s4334_s1 + $0x314] ss:$8 sps:$4 sm:$0xff]  }
  0x77   :  { %v593_v53 = vrot.slane %v577_v35, %v3299_v28  ;;  %1907 = vmatprep.subr.bf16.mxu1 %v2788_v5  ;;  %v612_v5 = vcombine.low %v491_v38, %v495_v25 }
  0x78   :  { %v578_v51 = vcombine.low %v483_v62, %v487_v55  ;;  %v579_v12 = vcombine.high %v483_v62, %v487_v55  ;;  %v1054_v10 = vpack.c.bf16 %v870_v49, %v798_v2  ;;  %v1053_v48 = vpack.c.bf16 %v869_v27, %v797_v22 }
  0x79   :  { %v499_v22 = vrot.slane %v3616_v9, %v3360_v0  ;;  %v4394_v62 = vsub.s32 7, %v3245_v60  ;;  %v613_v55 = vcombine.high %v491_v38, %v495_v25  ;;  %v730_v49 = vcombine.high %v3645_v17, %v3650_v52  ;;  %v2789_v60 = vld [vmem:[%s4334_s1 + $0x310] ss:$8 sps:$4 sm:$0xff]  }
  0x7a   :  { %v600_v54 = vrot.slane %v578_v51, %v3299_v28  ;;  %v607_v2 = vrot.slane %v579_v12, %v3299_v28  ;;  %1990 = vmatprep.mubr.bf16.mxu0 %v1054_v10  ;;  %v732_v27 = vcombine.high %v3655_v4, %v3660_v46  ;;  %1908 = vmatpush1.bf16.msra.mxu1 %v2786_v7  ;;  %v2792_v10 = vld [vmem:[%s4334_s1 + $0x120] ss:$8 sps:$4 sm:$0xff]   ;;  %v2813_v4 = vld [vmem:[%s4334_s1 + $0x350] ss:$8 sps:$4 sm:$0xff]  }
  0x7b   :  { %v503_v40 = vrot.slane %v3616_v9, %v4394_v62  ;;  %1991 = vmatmul.mubr.bf16.vlgmr.msra.gmra.mrb[0].mxu0 %v1053_v48  ;;  %v622_v25 = vrot.slane %v612_v5, %v3299_v28  ;;  %1909 = vmatprep.subr.bf16.mxu1 %v2794_v20  ;;  %v2797_v48 = vld [vmem:[%s4334_s1 + $0x324] ss:$8 sps:$4 sm:$0xff]   ;;  %v4395_v7 = vcombine.high %v3371_v16, %v3374_v18  ;;  %v2816_v46 = vld [vmem:[%s4334_s1 + $0x160] ss:$8 sps:$4 sm:$0xff]  }
  0x7c   :  { %v608_v63 = vcombine.low %v586_v41, %v600_v54  ;;  %v609_v35 = vcombine.high %v586_v41, %v600_v54  ;;  %v610_v12 = vcombine.low %v593_v53, %v607_v2  ;;  %v611_v51 = vcombine.high %v593_v53, %v607_v2  ;;  %2012 = vmatpush1.bf16.msra.mxu0 %v2783_v33  ;;  %v2800_v33 = vld [vmem:[%s4334_s1 + $0x134] ss:$8 sps:$4 sm:$0xff]  }
  0x7d   :  { %v614_v9 = vcombine.low %v499_v22, %v503_v40  ;;  %v615_v38 = vcombine.high %v499_v22, %v503_v40  ;;  %2013 = vmatprep.subr.bf16.mxu0 %v2791_v57  ;;  %v4396_v53 = vcombine.high %v3377_v13, %v3380_v14  ;;  %v4397_v57 = vcombine.high %v3419_v36, %v3422_v44  ;;  %v2806_v40 = vld [vmem:[%s4334_s1 + $0x144] ss:$8 sps:$4 sm:$0xff]  }
  0x7e   :  { %v3806_v41 = vmul.f32 %v608_v63, %v4395_v7  ;;  %v4398_v2 = vcombine.high %v3425_v58, %v3428_v15  ;;  %v4399_v16 = vcombine.high %v3435_v34, %v3438_v43  ;;  %v4400_v13 = vcombine.high %v3441_v47, %v3444_v30  ;;  %v2795_v47 = vld [vmem:[%s4334_s1 + $0x320] ss:$8 sps:$4 sm:$0xff]   ;;  %1910 = vmatpush1.bf16.msra.mxu1 %v2792_v10  ;;  %v2798_v30 = vld [vmem:[%s4334_s1 + $0x130] ss:$8 sps:$4 sm:$0xff]  }
  0x7f   :  { %v3811_v54 = vmul.f32 %v609_v35, %v4396_v53  ;;  %v3816_v20 = vmul.f32 %v610_v12, %v4397_v57  ;;  %v4401_v36 = vcombine.high %v3447_v31, %v3450_v32  ;;  %v4402_v58 = vcombine.high %v3454_v37, %v3457_v39  ;;  %1911 = vmatprep.subr.bf16.mxu1 %v2800_v33  ;;  %v2803_v39 = vld [vmem:[%s4334_s1 + $0x334] ss:$8 sps:$4 sm:$0xff]   ;;  %v2801_v53 = vld [vmem:[%s4334_s1 + $0x330] ss:$8 sps:$4 sm:$0xff]  }
  0x80   :  { %v3821_v22 = vmul.f32 %v611_v51, %v4398_v2  ;;  %v3826_v18 = vmul.f32 %v608_v63, %v4399_v16  ;;  %v3831_v14 = vmul.f32 %v609_v35, %v4400_v13  ;;  %v629_v43 = vrot.slane %v613_v55, %v3299_v28  ;;  %2014 = vmatpush1.bf16.msra.mxu0 %v2789_v60  ;;  %v2809_v16 = vld [vmem:[%s4334_s1 + $0x344] ss:$8 sps:$4 sm:$0xff]   ;;  %v2812_v13 = vld [vmem:[%s4334_s1 + $0x154] ss:$8 sps:$4 sm:$0xff]  }
  0x81   :  { %v3836_v44 = vmul.f32 %v610_v12, %v4401_v36  ;;  %v3841_v15 = vmul.f32 %v611_v51, %v4402_v58  ;;  %v873_v34 = vcombine.low %v3806_v41, %v3811_v54  ;;  %v636_v62 = vrot.slane %v614_v9, %v3299_v28  ;;  %2015 = vmatprep.subr.bf16.mxu0 %v2797_v48  ;;  %v4408_v58 = vld [vmem:[#allocation6_spill] sm:$0xff] }
  0x82   :  { %v875_v31 = vcombine.low %v3816_v20, %v3821_v22  ;;  %v945_v32 = vcombine.low %v3826_v18, %v3831_v14  ;;  %v643_v37 = vrot.slane %v615_v38, %v3299_v28  ;;  %v4403_v38 = vcombine.high %v3487_v19, %v3490_v11  ;;  %1912 = vmatpush1.bf16.msra.mxu1 %v2798_v30  ;;  %v4405_v19 = vld [vmem:[#allocation5_spill] sm:$0xff]  ;;  %v4413_v30 = vld [vmem:[#allocation8_spill] sm:$0xff] }
  0x83   :  { %v883_v5 = vrot.slane %v873_v34, %v3299_v28  ;;  %v947_v55 = vcombine.low %v3836_v44, %v3841_v15  ;;  %v644_v63 = vcombine.low %v622_v25, %v636_v62  ;;  %v645_v51 = vcombine.high %v622_v25, %v636_v62  ;;  %v2804_v25 = vld [vmem:[%s4334_s1 + $0x140] ss:$8 sps:$4 sm:$0xff]   ;;  %1913 = vmatprep.subr.bf16.mxu1 %v2806_v40 }
  0x84   :  { %v897_v35 = vrot.slane %v875_v31, %v3299_v28  ;;  %v955_v12 = vrot.slane %v945_v32, %v3299_v28  ;;  %v646_v60 = vcombine.low %v629_v43, %v643_v37  ;;  %v647_v9 = vcombine.high %v629_v43, %v643_v37  ;;  %2016 = vmatpush1.bf16.msra.mxu0 %v2795_v47 }
  0x85   :  { %v969_v10 = vrot.slane %v947_v55, %v3299_v28  ;;  %v3873_v48 = vmul.f32 %v644_v63, %v4403_v38  ;;  %v4404_v33 = vcombine.high %v3533_v21, %v3536_v29  ;;  %v4406_v11 = vcombine.high %v3493_v26, %v4405_v19  ;;  %2017 = vmatprep.subr.bf16.mxu0 %v2803_v39  ;;  %v4409_v26 = vld [vmem:[#allocation7_spill] sm:$0xff] }
  0x86   :  { %v906_v57 = vcombine.high %v883_v5, %v897_v35  ;;  %v4407_v21 = vcombine.high %v3508_v42, %v3511_v45  ;;  %v4410_v34 = vcombine.high %v4408_v58, %v4409_v26  ;;  %v4411_v42 = vcombine.high %v3540_v56, %v3548_v23  ;;  %1914 = vmatpush1.bf16.msra.mxu1 %v2804_v25  ;;  %v2821_v26 = vld [vmem:[%s4334_s1 + $0x364] ss:$8 sps:$4 sm:$0xff]  }
  0x87   :  { %v3878_v7 = vmul.f32 %v644_v63, %v4404_v33  ;;  %v3889_v2 = vmul.f32 %v645_v51, %v4406_v11  ;;  %v978_v36 = vcombine.high %v955_v12, %v969_v10  ;;  %v4412_v62 = vcombine.high %v3551_v24, %v3554_v61  ;;  %v2807_v61 = vld [vmem:[%s4334_s1 + $0x340] ss:$8 sps:$4 sm:$0xff]   ;;  %v2810_v24 = vld [vmem:[%s4334_s1 + $0x150] ss:$8 sps:$4 sm:$0xff]   ;;  %1915 = vmatprep.subr.bf16.mxu1 %v2812_v13 }
  0x88   :  { %v3894_v29 = vmul.f32 %v646_v60, %v4407_v21  ;;  %v3905_v43 = vmul.f32 %v647_v9, %v4410_v34  ;;  %v3910_v45 = vmul.f32 %v645_v51, %v4411_v42  ;;  %v4414_v31 = vcombine.high %v3577_v1, %v4413_v30  ;;  %2018 = vmatpush1.bf16.msra.mxu0 %v2801_v53  ;;  %v4417_v33 = vld [vmem:[#allocation12_spill] sm:$0xff]  ;;  %v4418_v53 = vld [vmem:[#allocation11_spill] sm:$0xff]  ;;  %v4419_v11 = vld [vmem:[#allocation14_spill] sm:$0xff] }
  0x89   :  { %v3915_v47 = vmul.f32 %v646_v60, %v4412_v62  ;;  %v909_v37 = vcombine.low %v3873_v48, %v3889_v2  ;;  %v905_v39 = vcombine.low %v883_v5, %v897_v35  ;;  %v1058_v40 = vpack.c.bf16 %v978_v36, %v906_v57  ;;  %2019 = vmatprep.subr.bf16.mxu0 %v2809_v16  ;;  %v2815_v35 = vld [vmem:[%s4334_s1 + $0x354] ss:$8 sps:$4 sm:$0xff]   ;;  %v4421_v13 = vld [vmem:[#allocation15_spill] sm:$0xff] }
  0x8a   :  { %v3920_v32 = vmul.f32 %v647_v9, %v4414_v31  ;;  %v911_v56 = vcombine.low %v3894_v29, %v3905_v43  ;;  %v981_v23 = vcombine.low %v3878_v7, %v3910_v45  ;;  %v977_v55 = vcombine.low %v955_v12, %v969_v10  ;;  %v2818_v12 = vld [vmem:[%s4334_s1 + $0x164] ss:$8 sps:$4 sm:$0xff]   ;;  %v4416_v9 = vld [vmem:[#allocation9_spill] sm:$0xff]  ;;  %1916 = vmatpush1.bf16.msra.mxu1 %v2810_v24  ;;  %v2819_v24 = vld [vmem:[%s4334_s1 + $0x360] ss:$8 sps:$4 sm:$0xff]  }
  0x8b   :  { %v919_v1 = vrot.slane %v909_v37, %v3299_v28  ;;  %v3941_v63 = vrot.slane %v730_v49, %v3299_v28  ;;  %1894 = vmatprep.mubr.bf16.mxu1 %v1058_v40  ;;  %v3956_v52 = vrot.slane %v732_v27, %v3299_v28  ;;  %v4415_v49 = vld [vmem:[#allocation10_spill] sm:$0xff]  ;;  %v804_v25 = vcombine.high %v4418_v53, %v4417_v33  ;;  %v4420_v21 = vld [vmem:[#allocation13_spill] sm:$0xff] }
  0x8c   :  { %v983_v5 = vcombine.low %v3915_v47, %v3920_v32  ;;  %v933_v51 = vrot.slane %v911_v56, %v3299_v28  ;;  %v991_v60 = vrot.slane %v981_v23, %v3299_v28  ;;  %v1057_v10 = vpack.c.bf16 %v977_v55, %v905_v39  ;;  %2020 = vmatpush1.bf16.msra.mxu0 %v2807_v61  ;;  %v4422_v56 = vld [vmem:[#allocation17_spill] sm:$0xff]  ;;  %v4423_v23 = vld [vmem:[#allocation16_spill] sm:$0xff]  ;;  %v2831_v33 = vld [vmem:[%s4334_s1 + $0x380] ss:$8 sps:$4 sm:$0xff]  }
  0x8d   :  { %v802_v38 = vcombine.high %v4416_v9, %v4415_v49  ;;  %v766_v16 = vcombine.high %v4420_v21, %v4419_v11  ;;  %v768_v36 = vcombine.high %v4421_v13, %v3708_v8  ;;  %2021 = vmatprep.subr.bf16.mxu0 %v2815_v35  ;;  %1917 = vmatprep.subr.bf16.mxu1 %v2818_v12  ;;  %v2824_v8 = vld [vmem:[%s4334_s1 + $0x174] ss:$8 sps:$4 sm:$0xff]   ;;  %v2833_v49 = vld [vmem:[%s4334_s1 + $0x384] ss:$8 sps:$4 sm:$0xff]   ;;  %v2834_v53 = vld [vmem:[%s4334_s1 + $0x190] ss:$8 sps:$4 sm:$0xff]  }
  0x8e   :  { %v1005_v17 = vrot.slane %v983_v5, %v3299_v28  ;;  %v942_v57 = vcombine.high %v919_v1, %v933_v51  ;;  %1895 = vmatmul.mubr.bf16.gmra.mrb[4].mxu1 %v1057_v10  ;;  %v941_v19 = vcombine.low %v919_v1, %v933_v51  ;;  %v764_v34 = vcombine.high %v3941_v63, %v3956_v52  ;;  %v2822_v1 = vld [vmem:[%s4334_s1 + $0x170] ss:$8 sps:$4 sm:$0xff]   ;;  %v2827_v35 = vld [vmem:[%s4334_s1 + $0x374] ss:$8 sps:$4 sm:$0xff]   ;;  %v2840_v11 = vld [vmem:[%s4334_s1 + $0x1a0] ss:$8 sps:$4 sm:$0xff]  }
  0x8f   :  { %v3981_v42 = vrot.slane %v802_v38, %v3299_v28  ;;  %v3984_v62 = vrot.slane %v804_v25, %v3299_v28  ;;  %v3987_v31 = vrot.slane %v766_v16, %v3299_v28  ;;  %v3990_v37 = vrot.slane %v768_v36, %v3299_v28  ;;  %1918 = vmatpush1.bf16.msra.mxu1 %v2816_v46  ;;  %v2825_v10 = vld [vmem:[%s4334_s1 + $0x370] ss:$8 sps:$4 sm:$0xff]   ;;  %v2836_v9 = vld [vmem:[%s4334_s1 + $0x194] ss:$8 sps:$4 sm:$0xff]   ;;  %v2845_v21 = vld [vmem:[%s4334_s1 + $0x3a4] ss:$8 sps:$4 sm:$0xff]  }
  0x90   :  { %v1014_v27 = vcombine.high %v991_v60, %v1005_v17  ;;  %v1013_v58 = vcombine.low %v991_v60, %v1005_v17  ;;  %v838_v55 = vcombine.high %v4423_v23, %v4422_v56  ;;  %v840_v61 = vcombine.high %v3727_v6, %v3732_v3  ;;  %2022 = vmatpush1.bf16.msra.mxu0 %v2813_v4  ;;  %v2830_v3 = vld [vmem:[%s4334_s1 + $0x184] ss:$8 sps:$4 sm:$0xff]   ;;  %v2828_v17 = vld [vmem:[%s4334_s1 + $0x180] ss:$8 sps:$4 sm:$0xff]   ;;  %v2839_v25 = vld [vmem:[%s4334_s1 + $0x394] ss:$8 sps:$4 sm:$0xff]  }
  0x91   :  { %v836_v40 = vcombine.high %v3981_v42, %v3984_v62  ;;  %v800_v5 = vcombine.high %v3987_v31, %v3990_v37  ;;  %2023 = vmatprep.subr.bf16.mxu0 %v2821_v26  ;;  %1919 = vmatprep.subr.bf16.mxu1 %v2824_v8  ;;  %v2848_v16 = vld [vmem:[%s4334_s1 + $0x1b4] ss:$8 sps:$4 sm:$0xff]   ;;  %v2843_v13 = vld [vmem:[%s4334_s1 + $0x3a0] ss:$8 sps:$4 sm:$0xff]   ;;  %v2846_v36 = vld [vmem:[%s4334_s1 + $0x1b0] ss:$8 sps:$4 sm:$0xff]  }
  0x92   :  { %v1062_v30 = vpack.c.bf16 %v1014_v27, %v942_v57  ;;  %v1061_v39 = vpack.c.bf16 %v1013_v58, %v941_v19  ;;  %v4013_v12 = vrot.slane %v838_v55, %v3299_v28  ;;  %v4016_v51 = vrot.slane %v840_v61, %v3299_v28  ;;  %v2842_v57 = vld [vmem:[%s4334_s1 + $0x1a4] ss:$8 sps:$4 sm:$0xff]   ;;  %v2837_v19 = vld [vmem:[%s4334_s1 + $0x390] ss:$8 sps:$4 sm:$0xff]   ;;  %v2851_v4 = vld [vmem:[%s4334_s1 + $0x3b4] ss:$8 sps:$4 sm:$0xff]  }
  0x93   :  { %v1052_v6 = vpack.c.bf16 %v836_v40, %v764_v34  ;;  %1920 = vmatpush1.bf16.msra.mxu1 %v2822_v1  ;;  %v2854_v46 = vld [vmem:[%s4334_s1 + $0x1c4] ss:$8 sps:$4 sm:$0xff]   ;;  %v2849_v27 = vld [vmem:[%s4334_s1 + $0x3b0] ss:$8 sps:$4 sm:$0xff]   ;;  %v2852_v58 = vld [vmem:[%s4334_s1 + $0x1c0] ss:$8 sps:$4 sm:$0xff]   ;;  %v874_v34 = vcombine.high %v3806_v41, %v3811_v54  ;;  %v948_v40 = vcombine.high %v3836_v44, %v3841_v15  ;;  %v910_v44 = vcombine.high %v3873_v48, %v3889_v2 }
  0x94   :  { %2000 = vmatprep.mubr.bf16.mxu0 %v1062_v30  ;;  %v872_v60 = vcombine.high %v4013_v12, %v4016_v51  ;;  %2024 = vmatpush1.bf16.msra.mxu0 %v2819_v24  ;;  %v2857_v26 = vld [vmem:[%s4334_s1 + $0x3c4] ss:$8 sps:$4 sm:$0xff]   ;;  %v2860_v8 = vld [vmem:[%s4334_s1 + $0x1d4] ss:$8 sps:$4 sm:$0xff]   ;;  %v876_v30 = vcombine.high %v3816_v20, %v3821_v22  ;;  %v2855_v56 = vld [vmem:[%s4334_s1 + $0x3c0] ss:$8 sps:$4 sm:$0xff]   ;;  %v912_v61 = vcombine.high %v3894_v29, %v3905_v43 }
  0x95   :  { %2001 = vmatmul.mubr.bf16.gmra.mrb[4].mxu0 %v1061_v39  ;;  %1937 = vmatprep.mubr.bf16.mxu1 %v1052_v6  ;;  %v946_v39 = vcombine.high %v3826_v18, %v3831_v14  ;;  %v2858_v23 = vld [vmem:[%s4334_s1 + $0x1d0] ss:$8 sps:$4 sm:$0xff]   ;;  %v2863_v41 = vld [vmem:[%s4334_s1 + $0x3d4] ss:$8 sps:$4 sm:$0xff]   ;;  %v2866_v54 = vld [vmem:[%s4334_s1 + $0x1e4] ss:$8 sps:$4 sm:$0xff]   ;;  %v890_v20 = vrot.slane %v874_v34, %v3299_v28  ;;  %v976_v14 = vrot.slane %v948_v40, %v3299_v28 }
  0x96   :  { %2025 = vmatprep.subr.bf16.mxu0 %v2827_v35  ;;  %1921 = vmatprep.subr.bf16.mxu1 %v2830_v3  ;;  %v1056_v38 = vpack.c.bf16 %v872_v60, %v800_v5  ;;  %v904_v22 = vrot.slane %v876_v30, %v3299_v28  ;;  %v2861_v15 = vld [vmem:[%s4334_s1 + $0x3d0] ss:$8 sps:$4 sm:$0xff]   ;;  %v2864_v55 = vld [vmem:[%s4334_s1 + $0x1e0] ss:$8 sps:$4 sm:$0xff]   ;;  %v982_v24 = vcombine.high %v3878_v7, %v3910_v45  ;;  %v2869_v48 = vld [vmem:[%s4334_s1 + $0x3e4] ss:$8 sps:$4 sm:$0xff]  }
  0x97   :  { %1922 = vmatpush1.bf16.msra.mxu1 %v2828_v17  ;;  %v962_v18 = vrot.slane %v946_v39, %v3299_v28  ;;  %v984_v1 = vcombine.high %v3915_v47, %v3920_v32  ;;  %v2872_v2 = vld [vmem:[%s4334_s1 + $0x1f4] ss:$8 sps:$4 sm:$0xff]   ;;  %v763_v5 = vcombine.low %v3941_v63, %v3956_v52  ;;  %v835_v29 = vcombine.low %v3981_v42, %v3984_v62  ;;  %v2867_v47 = vld [vmem:[%s4334_s1 + $0x3e0] ss:$8 sps:$4 sm:$0xff]   ;;  %v2870_v32 = vld [vmem:[%s4334_s1 + $0x1f0] ss:$8 sps:$4 sm:$0xff]  }
  0x98   :  { %2043 = vmatprep.mubr.bf16.mxu0 %v1056_v38  ;;  %2026 = vmatpush1.bf16.msra.mxu0 %v2825_v10  ;;  %v908_v7 = vcombine.high %v890_v20, %v904_v22  ;;  %v926_v45 = vrot.slane %v910_v44, %v3299_v28  ;;  %v940_v35 = vrot.slane %v912_v61, %v3299_v28  ;;  %v2875_v42 = vld [vmem:[%s4334_s1 + $0x3f4] ss:$8 sps:$4 sm:$0xff]   ;;  %v2873_v60 = vld [vmem:[%s4334_s1 + $0x3f0] ss:$8 sps:$4 sm:$0xff]   ;;  %v2219_v34 = vld [vmem:[%s4336_s3 + $0x20] sm:$0xff] }
  0x99   :  { %2027 = vmatprep.subr.bf16.mxu0 %v2833_v49  ;;  %1923 = vmatprep.subr.bf16.mxu1 %v2836_v9  ;;  %v980_v43 = vcombine.high %v962_v18, %v976_v14  ;;  %v998_v63 = vrot.slane %v982_v24, %v3299_v28  ;;  %v1012_v52 = vrot.slane %v984_v1, %v3299_v28  ;;  %v2220_v30 = vld [vmem:[%s4336_s3 + $0x28] sm:$0xff]  ;;  %v2237_v40 = vld [vmem:[%s4336_s3 + $0xb0] sm:$0xff]  ;;  %v2242_v61 = vld [vmem:[%s4336_s3 + $0xd8] sm:$0xff] }
  0x9a   :  { %v799_v62 = vcombine.low %v3987_v31, %v3990_v37  ;;  %v871_v3 = vcombine.low %v4013_v12, %v4016_v51  ;;  %v1051_v6 = vpack.c.bf16 %v835_v29, %v763_v5  ;;  %v944_v10 = vcombine.high %v926_v45, %v940_v35  ;;  %v2243_v5 = vld [vmem:[%s4336_s3 + $0xe0] sm:$0xff]  ;;  %v2244_v29 = vld [vmem:[%s4336_s3 + $0xe8] sm:$0xff] }
  0x9b   :  { %1924 = vmatpush1.bf16.msra.mxu1 %v2834_v53  ;;  %v1060_v28 = vpack.c.bf16 %v980_v43, %v908_v7  ;;  %v1016_v17 = vcombine.high %v998_v63, %v1012_v52  ;;  %v907_v9 = vcombine.low %v890_v20, %v904_v22  ;;  %v979_v38 = vcombine.low %v962_v18, %v976_v14  ;;  %v2231_v53 = vld [vmem:[%s4336_s3 + $0x80] sm:$0xff]  ;;  %v2240_v18 = vld [vmem:[%s4336_s3 + $0xc8] sm:$0xff] }
  0x9c   :  { %2028 = vmatpush1.bf16.msra.mxu0 %v2831_v33  ;;  %1925 = vmatprep.subr.bf16.mxu1 %v2842_v57  ;;  %v1055_v49 = vpack.c.bf16 %v871_v3, %v799_v62  ;;  %v943_v12 = vcombine.low %v926_v45, %v940_v35  ;;  %v1015_v51 = vcombine.low %v998_v63, %v1012_v52  ;;  %v2239_v22 = vld [vmem:[%s4336_s3 + $0xc0] sm:$0xff]  ;;  %v2246_v35 = vld [vmem:[%s4336_s3 + $0xf8] sm:$0xff] }
  0x9d   :  { %2029 = vmatprep.subr.bf16.mxu0 %v2839_v25  ;;  %v1064_v31 = vpack.c.bf16 %v1016_v17, %v944_v10  ;;  %v1059_v37 = vpack.c.bf16 %v979_v38, %v907_v9  ;;  %v2232_v25 = vld [vmem:[%s4336_s3 + $0x88] sm:$0xff]  ;;  %v2579_v39 = vpack.c.bf16 %v2220_v30, %v2219_v34  ;;  %v2223_v14 = vld [vmem:[%s4336_s3 + $0x40] sm:$0xff]  ;;  %v2585_v44 = vpack.c.bf16 %v2240_v18, %v2239_v22  ;;  %v2230_v62 = vld [vmem:[%s4336_s3 + $0x78] sm:$0xff] }
  0x9e   :  { %v1063_v33 = vpack.c.bf16 %v1015_v51, %v943_v12  ;;  %v2569_v57 = vpack.c.bf16 %v2232_v25, %v2231_v53  ;;  %v2593_v43 = vpack.c.bf16 %v2244_v29, %v2243_v5  ;;  %v2227_v45 = vld [vmem:[%s4336_s3 + $0x60] sm:$0xff] }
  0x9f   :  { %1926 = vmatpush1.bf16.msra.mxu1 %v2840_v11  ;;  %v2216_v11 = vld [vmem:[%s4336_s3 + $0x8] sm:$0xff] }
  0xa0   :  { %2030 = vmatpush1.bf16.msra.mxu0 %v2837_v19  ;;  %1927 = vmatprep.subr.bf16.mxu1 %v2848_v16  ;;  %v2215_v19 = vld [vmem:[%s4336_s3] sm:$0xff]  ;;  %v2233_v16 = vld [vmem:[%s4336_s3 + $0x90] sm:$0xff] }
  0xa1   :  { %2031 = vmatprep.subr.bf16.mxu0 %v2845_v21  ;;  %v2571_v21 = vpack.c.bf16 %v2216_v11, %v2215_v19 }
  0xa3   :  { %1928 = vmatpush1.bf16.msra.mxu1 %v2846_v36 }
  0xa4   :  { %2032 = vmatpush1.bf16.msra.mxu0 %v2843_v13  ;;  %1929 = vmatprep.subr.bf16.mxu1 %v2854_v46  ;;  %v2234_v13 = vld [vmem:[%s4336_s3 + $0x98] sm:$0xff] }
  0xa5   :  { %2033 = vmatprep.subr.bf16.mxu0 %v2851_v4  ;;  %v2573_v36 = vpack.c.bf16 %v2234_v13, %v2233_v16  ;;  %v2217_v4 = vld [vmem:[%s4336_s3 + $0x10] sm:$0xff]  ;;  %v2218_v46 = vld [vmem:[%s4336_s3 + $0x18] sm:$0xff] }
  0xa7   :  { %1930 = vmatpush1.bf16.msra.mxu1 %v2852_v58  ;;  %v2235_v58 = vld [vmem:[%s4336_s3 + $0xa0] sm:$0xff] }
  0xa8   :  { %2034 = vmatpush1.bf16.msra.mxu0 %v2849_v27  ;;  %1931 = vmatprep.subr.bf16.mxu1 %v2860_v8  ;;  %v2575_v27 = vpack.c.bf16 %v2218_v46, %v2217_v4 }
  0xa9   :  { %2035 = vmatprep.subr.bf16.mxu0 %v2857_v26  ;;  %v2236_v26 = vld [vmem:[%s4336_s3 + $0xa8] sm:$0xff] }
  0xaa   :  { %v2577_v8 = vpack.c.bf16 %v2236_v26, %v2235_v58 }
  0xab   :  { %1932 = vmatpush1.bf16.msra.mxu1 %v2858_v23 }
  0xac   :  { %2036 = vmatpush1.bf16.msra.mxu0 %v2855_v56  ;;  %1933 = vmatprep.subr.bf16.mxu1 %v2866_v54  ;;  %v2238_v56 = vld [vmem:[%s4336_s3 + $0xb8] sm:$0xff] }
  0xad   :  { %2037 = vmatprep.subr.bf16.mxu0 %v2863_v41  ;;  %v2581_v23 = vpack.c.bf16 %v2238_v56, %v2237_v40  ;;  %v2221_v41 = vld [vmem:[%s4336_s3 + $0x30] sm:$0xff]  ;;  %v2222_v54 = vld [vmem:[%s4336_s3 + $0x38] sm:$0xff] }
  0xae   :  { %v2583_v20 = vpack.c.bf16 %v2222_v54, %v2221_v41 }
  0xaf   :  { %1934 = vmatpush1.bf16.msra.mxu1 %v2864_v55  ;;  %v2241_v55 = vld [vmem:[%s4336_s3 + $0xd0] sm:$0xff] }
  0xb0   :  { %2038 = vmatpush1.bf16.msra.mxu0 %v2861_v15  ;;  %1935 = vmatprep.subr.bf16.mxu1 %v2872_v2  ;;  %v2224_v15 = vld [vmem:[%s4336_s3 + $0x48] sm:$0xff]  ;;  %v2589_v1 = vpack.c.bf16 %v2242_v61, %v2241_v55  ;;  %v2226_v2 = vld [vmem:[%s4336_s3 + $0x58] sm:$0xff] }
  0xb1   :  { %2039 = vmatprep.subr.bf16.mxu0 %v2869_v48  ;;  %v2587_v24 = vpack.c.bf16 %v2224_v15, %v2223_v14  ;;  %v2225_v48 = vld [vmem:[%s4336_s3 + $0x50] sm:$0xff] }
  0xb2   :  { %v2591_v7 = vpack.c.bf16 %v2226_v2, %v2225_v48 }
  0xb3   :  { %1936 = vmatpush1.bf16.msra.mxu1 %v2870_v32  ;;  %v2245_v32 = vld [vmem:[%s4336_s3 + $0xf0] sm:$0xff] }
  0xb4   :  { %2040 = vmatpush1.bf16.msra.mxu0 %v2867_v47  ;;  %2601 = vmatprep.subr.bf16.mxu1 %v2569_v57  ;;  %v2228_v47 = vld [vmem:[%s4336_s3 + $0x68] sm:$0xff]  ;;  %v2597_v52 = vpack.c.bf16 %v2246_v35, %v2245_v32 }
  0xb5   :  { %2041 = vmatprep.subr.bf16.mxu0 %v2875_v42  ;;  %v2595_v63 = vpack.c.bf16 %v2228_v47, %v2227_v45  ;;  %v2229_v42 = vld [vmem:[%s4336_s3 + $0x70] sm:$0xff] }
  0xb6   :  { %1938 = vmatmul.mubr.bf16.vlgmr.msra.gmra.mrb[0].mxu1 %v1051_v6  ;;  %v2599_v3 = vpack.c.bf16 %v2230_v62, %v2229_v42  ;;  %v4247_v6 = vld [vmem:[%s4337_s2] sm:$0x77] }
  0xb7   :  { %1947 = vmatprep.mubr.bf16.mxu1 %v1060_v28  ;;  %2609 = vmatpush3.bf16.msra.mxu1 %v2571_v21  ;;  %v1201_v10 = vrot.slane %v4247_v6, %v3354_v50 }
  0xb8   :  { %2042 = vmatpush1.bf16.msra.mxu0 %v2873_v60  ;;  %2602 = vmatprep.subr.bf16.mxu1 %v2573_v36  ;;  %v4424_v60 = vld [vmem:[#allocation2_spill] sm:$0xff] }
  0xb9   :  { %2570 = vmatprep.subr.bf16.mxu0 %v2569_v57  ;;  %v1197_v28 = vrot.slane %v4247_v6, %v4424_v60 }
  0xbb   :  { %2044 = vmatmul.mubr.bf16.vlgmr.msra.gmra.mrb[0].mxu0 %v1055_v49  ;;  %2610 = vmatpush3.bf16.msra.mxu1 %v2575_v27  ;;  %v1207_v17 = vrot.slane %v1197_v28, %v4424_v60  ;;  %v1211_v49 = vrot.slane %v1201_v10, %v4424_v60 }
  0xbc   :  { %2053 = vmatprep.mubr.bf16.mxu0 %v1064_v31  ;;  %2572 = vmatpush3.bf16.msra.mxu0 %v2571_v21 }
  0xbd   :  { %2574 = vmatprep.subr.bf16.mxu0 %v2573_v36  ;;  %2603 = vmatprep.subr.bf16.mxu1 %v2577_v8 }
  0xbe   :  { %1948 = vmatmul.mubr.bf16.gmra.mrb[4].mxu1 %v1059_v37 }
  0xbf   :  { %2611 = vmatpush3.bf16.msra.mxu1 %v2579_v39 }
  0xc0   :  { %2576 = vmatpush3.bf16.msra.mxu0 %v2575_v27  ;;  %2604 = vmatprep.subr.bf16.mxu1 %v2581_v23 }
  0xc1   :  { %2578 = vmatprep.subr.bf16.mxu0 %v2577_v8 }
  0xc3   :  { %2054 = vmatmul.mubr.bf16.gmra.mrb[4].mxu0 %v1063_v33  ;;  %2612 = vmatpush3.bf16.msra.mxu1 %v2583_v20 }
  0xc4   :  { %2580 = vmatpush3.bf16.msra.mxu0 %v2579_v39  ;;  %2605 = vmatprep.subr.bf16.mxu1 %v2585_v44 }
  0xc5   :  { %2582 = vmatprep.subr.bf16.mxu0 %v2581_v23 }
  0xc7   :  { %2613 = vmatpush3.bf16.msra.mxu1 %v2587_v24 }
  0xc8   :  { %2584 = vmatpush3.bf16.msra.mxu0 %v2583_v20  ;;  %2606 = vmatprep.subr.bf16.mxu1 %v2589_v1 }
  0xc9   :  { %2586 = vmatprep.subr.bf16.mxu0 %v2585_v44 }
  0xcb   :  { %2614 = vmatpush3.bf16.msra.mxu1 %v2591_v7 }
  0xcc   :  { %2588 = vmatpush3.bf16.msra.mxu0 %v2587_v24  ;;  %2607 = vmatprep.subr.bf16.mxu1 %v2593_v43 }
  0xcd   :  { %2590 = vmatprep.subr.bf16.mxu0 %v2589_v1 }
  0xcf   :  { %2615 = vmatpush3.bf16.msra.mxu1 %v2595_v63 }
  0xd0   :  { %2592 = vmatpush3.bf16.msra.mxu0 %v2591_v7  ;;  %2608 = vmatprep.subr.bf16.mxu1 %v2597_v52 }
  0xd1   :  { %2594 = vmatprep.subr.bf16.mxu0 %v2593_v43 }
  0xd3   :  { %2616 = vmatpush3.bf16.msra.mxu1 %v2599_v3 }
  0xd4   :  { %2596 = vmatpush3.bf16.msra.mxu0 %v2595_v63 }
  0xd5   :  { %2598 = vmatprep.subr.bf16.mxu0 %v2597_v52 }
  0xd8   :  { %2600 = vmatpush3.bf16.msra.mxu0 %v2599_v3 }
 0x189   :  { %v1939_v9 = vpop.f32.mrb[0].mxu1 }
 0x18a   :  { %v2617_v38 = vadd.f32 %v1939_v9, %v1207_v17  ;;  %v1941_v31 = vpop.f32.mrb[1].mxu1 }
 0x18b   :  { %v2619_v37 = vadd.f32 %v1941_v31, %v1211_v49  ;;  %v1943_v12 = vpop.f32.mrb[2].mxu1 }
 0x18c   :  { %v2621_v51 = vadd.f32 %v1943_v12, %v1207_v17  ;;  %v1945_v33 = vpop.f32.mrb[3].mxu1 }
 0x18d   :  { %v2623_v25 = vadd.f32 %v1945_v33, %v1211_v49 }
 0x18e   :  { %v2045_v53 = vpop.f32.mrb[0].mxu0 }
 0x18f   :  { %v4255_v57 = vadd.f32 %v2617_v38, %v2045_v53  ;;  %v2047_v19 = vpop.f32.mrb[1].mxu0 }
 0x190   :  { %v4257_v11 = vadd.f32 %v2619_v37, %v2047_v19  ;;  %v2049_v21 = vpop.f32.mrb[2].mxu0 }
 0x191   :  { %v4259_v50 = vadd.f32 %v2621_v51, %v2049_v21  ;;  %v2051_v16 = vpop.f32.mrb[3].mxu0  ;;  %v1949_v36 = vpop.f32.mrb[4].mxu1  ;;  %v2084_v4 = vmul.f32 %v4255_v57, %v4255_v57 }
 0x192   :  { %v4261_v13 = vadd.f32 %v2623_v25, %v2051_v16  ;;  %v2625_v58 = vadd.f32 %v1949_v36, %v1207_v17  ;;  %v1951_v26 = vpop.f32.mrb[5].mxu1  ;;  %v2085_v8 = vmul.f32 %v4257_v11, %v4257_v11 }
 0x193   :  { %v2064_v46 = vadd.f32 %v4259_v50, %v4255_v57  ;;  %v2086_v27 = vmul.f32 %v4259_v50, %v4259_v50  ;;  %v2627_v39 = vadd.f32 %v1951_v26, %v1211_v49  ;;  %v1953_v40 = vpop.f32.mrb[6].mxu1 }
 0x194   :  { %v2073_v34 = vadd.f32 %v4261_v13, %v4257_v11  ;;  %v2087_v30 = vmul.f32 %v4261_v13, %v4261_v13  ;;  %v2629_v23 = vadd.f32 %v1953_v40, %v1207_v17  ;;  %v1955_v41 = vpop.f32.mrb[7].mxu1 }
 0x195   :  { %v2092_v56 = vadd.f32 %v2086_v27, %v2084_v4  ;;  %v2631_v22 = vadd.f32 %v1955_v41, %v1211_v49 }
 0x196   :  { %v2101_v54 = vadd.f32 %v2087_v30, %v2085_v8  ;;  %v2055_v20 = vpop.f32.mrb[4].mxu0 }
 0x197   :  { %v4275_v18 = vadd.f32 %v2625_v58, %v2055_v20  ;;  %v2057_v14 = vpop.f32.mrb[5].mxu0 }
 0x198   :  { %v4277_v44 = vadd.f32 %v2627_v39, %v2057_v14  ;;  %v2059_v15 = vpop.f32.mrb[6].mxu0 }
 0x199   :  { %v2065_v55 = vadd.f32 %v4275_v18, %v2064_v46  ;;  %v2088_v61 = vmul.f32 %v4275_v18, %v4275_v18  ;;  %v4282_v24 = vadd.f32 %v2629_v23, %v2059_v15  ;;  %v2061_v1 = vpop.f32.mrb[7].mxu0 }
 0x19a   :  { %v2074_v48 = vadd.f32 %v4277_v44, %v2073_v34  ;;  %v2089_v2 = vmul.f32 %v4277_v44, %v4277_v44  ;;  %v4287_v5 = vadd.f32 %v2631_v22, %v2061_v1 }
 0x19b   :  { %v2093_v29 = vadd.f32 %v2092_v56, %v2088_v61  ;;  %v2066_v7 = vadd.f32 %v4282_v24, %v2065_v55  ;;  %v2090_v43 = vmul.f32 %v4282_v24, %v4282_v24 }
 0x19c   :  { %v2102_v45 = vadd.f32 %v2101_v54, %v2089_v2  ;;  %v2075_v47 = vadd.f32 %v4287_v5, %v2074_v48  ;;  %v2091_v32 = vmul.f32 %v4287_v5, %v4287_v5  ;;  %v4425_v48 = vld [vmem:[#allocation3_spill] sm:$0xff] }
 0x19d   :  { %v2067_v35 = vrot.slane %v2066_v7, 4  ;;  %v2094_v63 = vadd.f32 %v2093_v29, %v2090_v43  ;;  %v2129_v2 = vrot.slane %v4247_v6, %v4425_v48 }
 0x19e   :  { %v2076_v52 = vrot.slane %v2075_v47, 4  ;;  %v2103_v42 = vadd.f32 %v2102_v45, %v2091_v32 }
 0x19f   :  { %v2068_v62 = vadd.f32 %v2067_v35, %v2066_v7  ;;  %v2095_v3 = vrot.slane %v2094_v63, 4 }
 0x1a0   :  { %v2077_v28 = vadd.f32 %v2076_v52, %v2075_v47  ;;  %v2104_v10 = vrot.slane %v2103_v42, 4 }
 0x1a1   :  { %v2069_v17 = vrot.slane %v2068_v62, 2  ;;  %v2096_v49 = vadd.f32 %v2095_v3, %v2094_v63 }
 0x1a2   :  { %v2078_v9 = vrot.slane %v2077_v28, 2  ;;  %v2105_v38 = vadd.f32 %v2104_v10, %v2103_v42 }
 0x1a3   :  { %v2070_v31 = vadd.f32 %v2069_v17, %v2068_v62  ;;  %v2097_v37 = vrot.slane %v2096_v49, 2 }
 0x1a4   :  { %v2079_v12 = vadd.f32 %v2078_v9, %v2077_v28  ;;  %v2106_v51 = vrot.slane %v2105_v38, 2 }
 0x1a5   :  { %v2071_v33 = vrot.slane %v2070_v31, 1  ;;  %v2098_v53 = vadd.f32 %v2097_v37, %v2096_v49 }
 0x1a6   :  { %v2080_v25 = vrot.slane %v2079_v12, 1  ;;  %v2107_v19 = vadd.f32 %v2106_v51, %v2105_v38 }
 0x1a7   :  { %v2072_v21 = vadd.f32 %v2071_v33, %v2070_v31  ;;  %v2099_v16 = vrot.slane %v2098_v53, 1 }
 0x1a8   :  { %v2081_v36 = vadd.f32 %v2080_v25, %v2079_v12  ;;  %v2108_v4 = vrot.slane %v2107_v19, 1 }
 0x1a9   :  { %v2082_v46 = vmul.f32 0.03125, %v2072_v21  ;;  %v2100_v27 = vadd.f32 %v2099_v16, %v2098_v53 }
 0x1aa   :  { %v2083_v58 = vmul.f32 0.03125, %v2081_v36  ;;  %v2109_v26 = vadd.f32 %v2108_v4, %v2107_v19 }
 0x1ab   :  { %v2110_v8 = vmul.f32 0.03125, %v2100_v27  ;;  %v2112_v34 = vmul.f32 %v2082_v46, %v2082_v46  ;;  %v2124_v30 = vsub.f32 %v4282_v24, %v2082_v46  ;;  %v2118_v39 = vsub.f32 %v4255_v57, %v2082_v46 }
 0x1ac   :  { %v2111_v40 = vmul.f32 0.03125, %v2109_v26  ;;  %v2113_v56 = vmul.f32 %v2083_v58, %v2083_v58  ;;  %v2125_v23 = vsub.f32 %v4287_v5, %v2083_v58  ;;  %v2119_v41 = vsub.f32 %v4257_v11, %v2083_v58 }
 0x1ad   :  { %v2114_v54 = vsub.f32 %v2110_v8, %v2112_v34  ;;  %v2123_v20 = vsub.f32 %v4277_v44, %v2083_v58  ;;  %v2122_v14 = vsub.f32 %v4275_v18, %v2082_v46  ;;  %v2121_v55 = vsub.f32 %v4261_v13, %v2083_v58  ;;  %v4426_v18 = vld [vmem:[#allocation4_spill] sm:$0xff] }
 0x1ae   :  { %v2115_v22 = vsub.f32 %v2111_v40, %v2113_v56  ;;  %v2120_v61 = vsub.f32 %v4259_v50, %v2082_v46  ;;  %v2133_v11 = vrot.slane %v4247_v6, %v3357_v59  ;;  %v2171_v44 = vrot.slane %v4247_v6, %v3360_v0 }
 0x1af   :  { %v2116_v15 = vmax.f32 %v2114_v54, 0.0  ;;  %v2167_v5 = vrot.slane %v4247_v6, %v4426_v18  ;;  %v2139_v13 = vrot.slane %v2129_v2, %v4425_v48 }
 0x1b0   :  { %v2117_v24 = vmax.f32 %v2115_v22, 0.0  ;;  %v2143_v50 = vrot.slane %v2133_v11, %v4425_v48  ;;  %v2181_v29 = vrot.slane %v2171_v44, %v4426_v18 }
 0x1b1   :  { %v2152_v1 = vadd.f32 0.001, %v2116_v15  ;;  %v2177_v7 = vrot.slane %v2167_v5, %v4426_v18  ;;  %v2150_v43 = vmul.f32 %v2139_v13, %v2124_v30  ;;  %v2144_v45 = vmul.f32 %v2139_v13, %v2118_v39 }
 0x1b2   :  { %v2153_v57 = vadd.f32 0.001, %v2117_v24  ;;  %v2148_v47 = vmul.f32 %v2139_v13, %v2122_v14  ;;  %v2146_v32 = vmul.f32 %v2139_v13, %v2120_v61  ;;  %v2151_v59 = vmul.f32 %v2143_v50, %v2125_v23 }
 0x1b3   :  { %2884 = vrsqrt.f32 %v2152_v1  ;;  %v2145_v63 = vmul.f32 %v2143_v50, %v2119_v41  ;;  %v2149_v52 = vmul.f32 %v2143_v50, %v2123_v20  ;;  %v2147_v0 = vmul.f32 %v2143_v50, %v2121_v55  ;;  %v2214_v41 = vld [vmem:[%s4338_s4] sm:$0x7] }
 0x1b4   :  { %2886 = vrsqrt.f32 %v2153_v57  ;;  %v2250_v15 = vrot.slane %v2214_v41, %v4424_v60 }
 0x1bd   :  { %v2885_v35 = vpop.eup %2884 }
 0x1be   :  { %v2887_v42 = vpop.eup %2886  ;;  %v2156_v62 = vmul.f32 %v2885_v35, %v2144_v45  ;;  %v2160_v6 = vmul.f32 %v2885_v35, %v2148_v47  ;;  %v2158_v3 = vmul.f32 %v2885_v35, %v2146_v32  ;;  %v2162_v28 = vmul.f32 %v2885_v35, %v2150_v43 }
 0x1bf   :  { %v2157_v10 = vmul.f32 %v2887_v42, %v2145_v63  ;;  %v2161_v17 = vmul.f32 %v2887_v42, %v2149_v52  ;;  %v2159_v49 = vmul.f32 %v2887_v42, %v2147_v0  ;;  %v2163_v9 = vmul.f32 %v2887_v42, %v2151_v59 }
 0x1c0   :  { %v2182_v38 = vadd.f32 %v2177_v7, %v2156_v62  ;;  %v2186_v31 = vadd.f32 %v2177_v7, %v2160_v6  ;;  %v2184_v37 = vadd.f32 %v2177_v7, %v2158_v3  ;;  %v2188_v12 = vadd.f32 %v2177_v7, %v2162_v28 }
 0x1c1   :  { %v2183_v51 = vadd.f32 %v2181_v29, %v2157_v10  ;;  %v2187_v33 = vadd.f32 %v2181_v29, %v2161_v17  ;;  %v2185_v53 = vadd.f32 %v2181_v29, %v2159_v49  ;;  %v2189_v25 = vadd.f32 %v2181_v29, %v2163_v9 }
 0x1c2   :  { %vm2190_vm4 = vcmp.ge.f32.partialorder %v2182_v38, 0.0  ;;  %v2198_v19 = vmul.f32 0.3, %v2182_v38  ;;  %vm2194_vm5 = vcmp.ge.f32.partialorder %v2186_v31, 0.0  ;;  %v2202_v21 = vmul.f32 0.3, %v2186_v31 }
 0x1c3   :  { %vm2191_vm6 = vcmp.ge.f32.partialorder %v2183_v51, 0.0  ;;  %v2199_v16 = vmul.f32 0.3, %v2183_v51  ;;  %vm2195_vm7 = vcmp.ge.f32.partialorder %v2187_v33, 0.0  ;;  %v2203_v36 = vmul.f32 0.3, %v2187_v33 }
 0x1c4   :  { %vm2193_vm8 = vcmp.ge.f32.partialorder %v2185_v53, 0.0  ;;  %v2201_v4 = vmul.f32 0.3, %v2185_v53  ;;  %vm2197_vm9 = vcmp.ge.f32.partialorder %v2189_v25, 0.0  ;;  %v2205_v58 = vmul.f32 0.3, %v2189_v25 }
 0x1c5   :  { %v2207_v46 = vsel %vm2191_vm6, %v2183_v51, %v2199_v16  ;;  %v2211_v27 = vsel %vm2195_vm7, %v2187_v33, %v2203_v36  ;;  %v2206_v26 = vsel %vm2190_vm4, %v2182_v38, %v2198_v19  ;;  %v2210_v8 = vsel %vm2194_vm5, %v2186_v31, %v2202_v21 }
 0x1c6   :  { %2315 = vmatprep.mubr.f32.mxu0 %v2207_v46  ;;  %2325 = vmatprep.mubr.f32.mxu1 %v2211_v27  ;;  %v2209_v34 = vsel %vm2193_vm8, %v2185_v53, %v2201_v4  ;;  %v2200_v30 = vmul.f32 0.3, %v2184_v37  ;;  %v2213_v39 = vsel %vm2197_vm9, %v2189_v25, %v2205_v58  ;;  %vm2192_vm10 = vcmp.ge.f32.partialorder %v2184_v37, 0.0 }
 0x1c7   :  { %2316 = vmatmul.mubr.f32.vlgmr.msra.gmra.mrb[8].mxu0 %v2206_v26  ;;  %2326 = vmatmul.mubr.f32.vlgmr.msra.gmra.mrb[8].mxu1 %v2210_v8  ;;  %vm2196_vm11 = vcmp.ge.f32.partialorder %v2188_v12, 0.0  ;;  %v2204_v40 = vmul.f32 0.3, %v2188_v12  ;;  %v2370_v4 = vrot.slane %v2214_v41, %v4425_v48  ;;  %v2384_v46 = vrot.slane %v2214_v41, %v4426_v18 }
 0x1c8   :  { %2320 = vmatprep.mubr.f32.mxu0 %v2209_v34  ;;  %2330 = vmatprep.mubr.f32.mxu1 %v2213_v39  ;;  %v2208_v56 = vsel %vm2192_vm10, %v2184_v37, %v2200_v30 }
 0x1c9   :  { %v2212_v23 = vsel %vm2196_vm11, %v2188_v12, %v2204_v40 }
 0x1cb   :  { %2321 = vmatmul.mubr.f32.gmra.mrb[10].mxu0 %v2208_v56  ;;  %2331 = vmatmul.mubr.f32.gmra.mrb[10].mxu1 %v2212_v23 }
 0x29a   :  { %v2557_v54 = vpop.f32.mrb[8].mxu0  ;;  %v2563_v20 = vpop.f32.mrb[8].mxu1 }
 0x29b   :  { %v2558_v22 = vpop.f32.mrb[9].mxu0  ;;  %v2564_v14 = vpop.f32.mrb[9].mxu1 }
 0x29c   :  { %v2559_v55 = vadd.f32 %v2558_v22, %v2557_v54  ;;  %v2565_v61 = vadd.f32 %v2564_v14, %v2563_v20 }
 0x29e   :  { %v2560_v24 = vpop.f32.mrb[10].mxu0  ;;  %v2566_v1 = vpop.f32.mrb[10].mxu1  ;;  %v2318_v11 = vadd.f32 %v2559_v55, %v2250_v15  ;;  %v2328_v13 = vadd.f32 %v2565_v61, %v2250_v15 }
 0x29f   :  { %v2561_v57 = vpop.f32.mrb[11].mxu0  ;;  %v2567_v2 = vpop.f32.mrb[11].mxu1 }
 0x2a0   :  { %v2562_v44 = vadd.f32 %v2561_v57, %v2560_v24  ;;  %v2568_v5 = vadd.f32 %v2567_v2, %v2566_v1  ;;  %v2346_v29 = vmul.f32 %v2318_v11, %v2318_v11  ;;  %v2348_v47 = vmul.f32 %v2328_v13, %v2328_v13 }
 0x2a2   :  { %v2323_v50 = vadd.f32 %v2562_v44, %v2250_v15  ;;  %v2333_v45 = vadd.f32 %v2568_v5, %v2250_v15 }
 0x2a4   :  { %v2336_v7 = vadd.f32 %v2323_v50, %v2318_v11  ;;  %v2347_v43 = vmul.f32 %v2323_v50, %v2323_v50  ;;  %v2349_v60 = vmul.f32 %v2333_v45, %v2333_v45 }
 0x2a6   :  { %v2350_v32 = vadd.f32 %v2347_v43, %v2346_v29  ;;  %v2337_v35 = vadd.f32 %v2336_v7, %v2328_v13 }
 0x2a8   :  { %v2338_v59 = vadd.f32 %v2337_v35, %v2333_v45  ;;  %v2351_v63 = vadd.f32 %v2350_v32, %v2348_v47 }
 0x2aa   :  { %v2339_v52 = vrot.slane %v2338_v59, 4  ;;  %v2352_v0 = vadd.f32 %v2351_v63, %v2349_v60 }
 0x2ac   :  { %v2340_v42 = vadd.f32 %v2339_v52, %v2338_v59  ;;  %v2353_v62 = vrot.slane %v2352_v0, 4 }
 0x2ae   :  { %v2341_v6 = vrot.slane %v2340_v42, 2  ;;  %v2354_v3 = vadd.f32 %v2353_v62, %v2352_v0 }
 0x2b0   :  { %v2342_v28 = vadd.f32 %v2341_v6, %v2340_v42  ;;  %v2355_v10 = vrot.slane %v2354_v3, 2 }
 0x2b2   :  { %v2343_v17 = vrot.slane %v2342_v28, 1  ;;  %v2356_v49 = vadd.f32 %v2355_v10, %v2354_v3 }
 0x2b4   :  { %v2344_v9 = vadd.f32 %v2343_v17, %v2342_v28  ;;  %v2357_v38 = vrot.slane %v2356_v49, 1 }
 0x2b6   :  { %v2345_v31 = vmul.f32 0.03125, %v2344_v9  ;;  %v2358_v37 = vadd.f32 %v2357_v38, %v2356_v49 }
 0x2b8   :  { %v2359_v12 = vmul.f32 0.03125, %v2358_v37  ;;  %v2360_v51 = vmul.f32 %v2345_v31, %v2345_v31  ;;  %v2363_v33 = vsub.f32 %v2318_v11, %v2345_v31  ;;  %v2364_v53 = vsub.f32 %v2323_v50, %v2345_v31 }
 0x2b9   :  { %v2365_v25 = vsub.f32 %v2328_v13, %v2345_v31  ;;  %v2366_v19 = vsub.f32 %v2333_v45, %v2345_v31 }
 0x2ba   :  { %v2361_v21 = vsub.f32 %v2359_v12, %v2360_v51  ;;  %v2371_v27 = vmul.f32 %v2370_v4, %v2363_v33  ;;  %v2372_v58 = vmul.f32 %v2370_v4, %v2364_v53 }
 0x2bb   :  { %v2373_v26 = vmul.f32 %v2370_v4, %v2365_v25  ;;  %v2374_v8 = vmul.f32 %v2370_v4, %v2366_v19 }
 0x2bc   :  { %v2362_v16 = vmax.f32 %v2361_v21, 0.0 }
 0x2be   :  { %v2375_v36 = vadd.f32 1e-05, %v2362_v16 }
 0x2c0   :  { %2888 = vrsqrt.f32 %v2375_v36 }
 0x2ca   :  { %v2889_v34 = vpop.eup %2888 }
 0x2cb   :  { %v2377_v30 = vmul.f32 %v2889_v34, %v2371_v27  ;;  %v2378_v39 = vmul.f32 %v2889_v34, %v2372_v58  ;;  %v2379_v40 = vmul.f32 %v2889_v34, %v2373_v26  ;;  %v2380_v56 = vmul.f32 %v2889_v34, %v2374_v8 }
 0x2cd   :  { %v2385_v23 = vadd.f32 %v2384_v46, %v2377_v30  ;;  %v2386_v54 = vadd.f32 %v2384_v46, %v2378_v39  ;;  %v2387_v20 = vadd.f32 %v2384_v46, %v2379_v40  ;;  %v2388_v22 = vadd.f32 %v2384_v46, %v2380_v56 }
 0x2cf   :  { %2389 = vst [vmem:[%s4339_s5] sm:$0xff] %v2385_v23  ;;  %2390 = vst [vmem:[%s4339_s5 + $0x8] sm:$0xff] %v2386_v54 }
 0x2d0   :  { %2391 = vst [vmem:[%s4339_s5 + $0x10] sm:$0xff] %v2387_v20  ;;  %2392 = vst [vmem:[%s4339_s5 + $0x18] sm:$0xff] %v2388_v22 }

// kernel: vae_encoder_forward.2
= control target key start
LH: loop header
LB: loop body
LE: loop exit
PB: predicated region body
PF: predicated region fallthrough
CT: control target
= control target key end

     0   :  { %s7818_s24 = smov 0   ;;  %s7820_s25 = smov 0   ;;  %s11102_s0 = inlined_call_operand.vmem [shape: f32[32,8], index: 0, kind: input, shape index: {}]   ;;  %s11103_s1 = inlined_call_operand.vmem [shape: f32[8,64], index: 1, kind: input, shape index: {}]   ;;  %s11104_s2 = inlined_call_operand.vmem [shape: f32[3,64], index: 2, kind: input, shape index: {}]   ;;  %s11105_s3 = inlined_call_operand.vmem [shape: f32[64,128], index: 3, kind: input, shape index: {}]   ;;  %s11106_s4 = inlined_call_operand.vmem [shape: f32[3,128], index: 4, kind: input, shape index: {}]   ;;  %s11107_s5 = inlined_call_operand.vmem [shape: bf16[128,16384], index: 5, kind: input, shape index: {}]   ;;  %s11108_s6 = inlined_call_operand.vmem [shape: f32[3,16384], index: 6, kind: input, shape index: {}]   ;;  %s11109_s7 = inlined_call_operand.vmem [shape: f32[2,16384], index: 7, kind: output, shape index: {}]  }
   0x1   :  { %s7822_s26 = smov 0  }
   0x2 LB: > { %s7304_s27 = sadd.s32 4294967295, %s7774_s26   ;;  %s7835_s28 = sadd.s32 1, %s7774_s26   ;;  %s7774_s26 = sphi %s7822_s26, %s11348_s26   ;;  %s7770_s25 = sphi %s7820_s25, %s11347_s25   ;;  %s7766_s24 = sphi %s7818_s24, %s11346_s24  }
   0x3   : > { %s126_s29 = ssub.s32 %s7774_s26, %s7835_s28  ;;  %s129_s30 = sadd.s32 1, %s7770_s25 }
   0x4   : > { %p127_p0 = scmp.eq.s32.totalorder %s126_s29, 0  ;;  %p136_p1 = scmp.ne.s32.totalorder %s7770_s25, %s7766_s24 }
   0x5   : > { %p137_p2 = scmp.eq.s32.totalorder %s7774_s26, 0  ;;  %p7307_p4 = scmp.ge.s32.totalorder %s7774_s26, 4 }
   0x6   : > { %s7844_s8 = scalar_select %p127_p0, %s7770_s25, %s129_s30  }
   0x7   : > { %p138_p3 = por %p137_p2, %p136_p1  ;;  %229 = sbr.rel (%p7307_p4) target bundleno = 146 (0x92), region = 36 }
   0xe   : > { %232 = sbr.rel (!%p138_p3) target bundleno = 146 (0x92), region = 40  ;;  %s234_s9 = sand.u32 (%p138_p3), 1, %s7770_s25  }
   0xf   : > { %s7584_s10 = sshll.u32 (%p138_p3), %s7774_s26, 7  ;;  %s7308_s11 = sshll.u32 (%p138_p3), %s234_s9, 11 }
  0x10   : > { %s7852_s14 = scalar_lea.vmem (%p138_p3), %s11107_s5, %s7584_s10  ;;  %s7857_s15 = scalar_lea.vmem (%p138_p3), [#allocation3], %s7308_s11 }
  0x11   : > { %v252_v0 = vld [vmem:[%s7852_s14] sm:$0xff] (%p138_p3)  ;;  %v254_v1 = vld [vmem:[%s7852_s14 + $0x8] sm:$0xff] (%p138_p3)  ;;  %v256_v2 = vld [vmem:[%s7852_s14 + $0x10] sm:$0xff] (%p138_p3) }
  0x12   : > { %253 = vst [vmem:[%s7857_s15] sm:$0xff] (%p138_p3), %v252_v0  ;;  %255 = vst [vmem:[%s7857_s15 + $0x8] sm:$0xff] (%p138_p3), %v254_v1  ;;  %v258_v3 = vld [vmem:[%s7852_s14 + $0x18] sm:$0xff] (%p138_p3)  ;;  %v260_v4 = vld [vmem:[%s7852_s14 + $0x20] sm:$0xff] (%p138_p3) }
  0x13   : > { %257 = vst [vmem:[%s7857_s15 + $0x10] sm:$0xff] (%p138_p3), %v256_v2  ;;  %v262_v5 = vld [vmem:[%s7852_s14 + $0x28] sm:$0xff] (%p138_p3)  ;;  %259 = vst [vmem:[%s7857_s15 + $0x18] sm:$0xff] (%p138_p3), %v258_v3  ;;  %v264_v6 = vld [vmem:[%s7852_s14 + $0x30] sm:$0xff] (%p138_p3) }
  0x14   : > { %261 = vst [vmem:[%s7857_s15 + $0x20] sm:$0xff] (%p138_p3), %v260_v4  ;;  %263 = vst [vmem:[%s7857_s15 + $0x28] sm:$0xff] (%p138_p3), %v262_v5  ;;  %v266_v7 = vld [vmem:[%s7852_s14 + $0x38] sm:$0xff] (%p138_p3)  ;;  %v268_v8 = vld [vmem:[%s7852_s14 + $0x40] sm:$0xff] (%p138_p3) }
  0x15   : > { %265 = vst [vmem:[%s7857_s15 + $0x30] sm:$0xff] %v264_v6  ;;  %267 = vst [vmem:[%s7857_s15 + $0x38] sm:$0xff] %v266_v7  ;;  %v270_v9 = vld [vmem:[%s7852_s14 + $0x48] sm:$0xff]  ;;  %v272_v10 = vld [vmem:[%s7852_s14 + $0x50] sm:$0xff] }
  0x16   : > { %269 = vst [vmem:[%s7857_s15 + $0x40] sm:$0xff] %v268_v8  ;;  %v274_v11 = vld [vmem:[%s7852_s14 + $0x58] sm:$0xff]  ;;  %271 = vst [vmem:[%s7857_s15 + $0x48] sm:$0xff] %v270_v9  ;;  %v276_v12 = vld [vmem:[%s7852_s14 + $0x60] sm:$0xff] }
  0x17   : > { %273 = vst [vmem:[%s7857_s15 + $0x50] sm:$0xff] %v272_v10  ;;  %275 = vst [vmem:[%s7857_s15 + $0x58] sm:$0xff] %v274_v11  ;;  %v278_v13 = vld [vmem:[%s7852_s14 + $0x68] sm:$0xff]  ;;  %v280_v14 = vld [vmem:[%s7852_s14 + $0x70] sm:$0xff] }
  0x18   : > { %277 = vst [vmem:[%s7857_s15 + $0x60] sm:$0xff] %v276_v12  ;;  %279 = vst [vmem:[%s7857_s15 + $0x68] sm:$0xff] %v278_v13  ;;  %v282_v15 = vld [vmem:[%s7852_s14 + $0x78] sm:$0xff]  ;;  %v284_v16 = vld [vmem:[%s7852_s14 + $0x200] sm:$0xff] }
  0x19   : > { %281 = vst [vmem:[%s7857_s15 + $0x70] sm:$0xff] %v280_v14  ;;  %v286_v17 = vld [vmem:[%s7852_s14 + $0x208] sm:$0xff]  ;;  %283 = vst [vmem:[%s7857_s15 + $0x78] sm:$0xff] %v282_v15  ;;  %v288_v18 = vld [vmem:[%s7852_s14 + $0x210] sm:$0xff] }
  0x1a   : > { %285 = vst [vmem:[%s7857_s15 + $0x80] sm:$0xff] %v284_v16  ;;  %287 = vst [vmem:[%s7857_s15 + $0x88] sm:$0xff] %v286_v17  ;;  %v290_v19 = vld [vmem:[%s7852_s14 + $0x218] sm:$0xff]  ;;  %v292_v20 = vld [vmem:[%s7852_s14 + $0x220] sm:$0xff] }
  0x1b   : > { %289 = vst [vmem:[%s7857_s15 + $0x90] sm:$0xff] %v288_v18  ;;  %291 = vst [vmem:[%s7857_s15 + $0x98] sm:$0xff] %v290_v19  ;;  %v294_v21 = vld [vmem:[%s7852_s14 + $0x228] sm:$0xff]  ;;  %v296_v22 = vld [vmem:[%s7852_s14 + $0x230] sm:$0xff] }
  0x1c   : > { %293 = vst [vmem:[%s7857_s15 + $0xa0] sm:$0xff] %v292_v20  ;;  %v298_v23 = vld [vmem:[%s7852_s14 + $0x238] sm:$0xff]  ;;  %295 = vst [vmem:[%s7857_s15 + $0xa8] sm:$0xff] %v294_v21  ;;  %v300_v24 = vld [vmem:[%s7852_s14 + $0x240] sm:$0xff] }
  0x1d   : > { %297 = vst [vmem:[%s7857_s15 + $0xb0] sm:$0xff] %v296_v22  ;;  %299 = vst [vmem:[%s7857_s15 + $0xb8] sm:$0xff] %v298_v23  ;;  %v302_v25 = vld [vmem:[%s7852_s14 + $0x248] sm:$0xff]  ;;  %v304_v26 = vld [vmem:[%s7852_s14 + $0x250] sm:$0xff] }
  0x1e   : > { %301 = vst [vmem:[%s7857_s15 + $0xc0] sm:$0xff] %v300_v24  ;;  %303 = vst [vmem:[%s7857_s15 + $0xc8] sm:$0xff] %v302_v25  ;;  %v306_v27 = vld [vmem:[%s7852_s14 + $0x258] sm:$0xff]  ;;  %v308_v28 = vld [vmem:[%s7852_s14 + $0x260] sm:$0xff] }
  0x1f   : > { %305 = vst [vmem:[%s7857_s15 + $0xd0] sm:$0xff] %v304_v26  ;;  %v310_v29 = vld [vmem:[%s7852_s14 + $0x268] sm:$0xff]  ;;  %307 = vst [vmem:[%s7857_s15 + $0xd8] sm:$0xff] %v306_v27  ;;  %v312_v30 = vld [vmem:[%s7852_s14 + $0x270] sm:$0xff] }
  0x20   : > { %309 = vst [vmem:[%s7857_s15 + $0xe0] sm:$0xff] %v308_v28  ;;  %311 = vst [vmem:[%s7857_s15 + $0xe8] sm:$0xff] %v310_v29  ;;  %v314_v31 = vld [vmem:[%s7852_s14 + $0x278] sm:$0xff]  ;;  %v316_v32 = vld [vmem:[%s7852_s14 + $0x400] sm:$0xff] }
  0x21   : > { %313 = vst [vmem:[%s7857_s15 + $0xf0] sm:$0xff] %v312_v30  ;;  %315 = vst [vmem:[%s7857_s15 + $0xf8] sm:$0xff] %v314_v31  ;;  %v318_v33 = vld [vmem:[%s7852_s14 + $0x408] sm:$0xff]  ;;  %v320_v34 = vld [vmem:[%s7852_s14 + $0x410] sm:$0xff] }
  0x22   : > { %317 = vst [vmem:[%s7857_s15 + $0x100] sm:$0xff] %v316_v32  ;;  %v322_v35 = vld [vmem:[%s7852_s14 + $0x418] sm:$0xff]  ;;  %319 = vst [vmem:[%s7857_s15 + $0x108] sm:$0xff] %v318_v33  ;;  %v324_v36 = vld [vmem:[%s7852_s14 + $0x420] sm:$0xff] }
  0x23   : > { %321 = vst [vmem:[%s7857_s15 + $0x110] sm:$0xff] %v320_v34  ;;  %323 = vst [vmem:[%s7857_s15 + $0x118] sm:$0xff] %v322_v35  ;;  %v326_v37 = vld [vmem:[%s7852_s14 + $0x428] sm:$0xff]  ;;  %v328_v38 = vld [vmem:[%s7852_s14 + $0x430] sm:$0xff] }
  0x24   : > { %325 = vst [vmem:[%s7857_s15 + $0x120] sm:$0xff] %v324_v36  ;;  %327 = vst [vmem:[%s7857_s15 + $0x128] sm:$0xff] %v326_v37  ;;  %v330_v39 = vld [vmem:[%s7852_s14 + $0x438] sm:$0xff]  ;;  %v332_v40 = vld [vmem:[%s7852_s14 + $0x440] sm:$0xff] }
  0x25   : > { %329 = vst [vmem:[%s7857_s15 + $0x130] sm:$0xff] %v328_v38  ;;  %v334_v41 = vld [vmem:[%s7852_s14 + $0x448] sm:$0xff]  ;;  %331 = vst [vmem:[%s7857_s15 + $0x138] sm:$0xff] %v330_v39  ;;  %v336_v42 = vld [vmem:[%s7852_s14 + $0x450] sm:$0xff] }
  0x26   : > { %333 = vst [vmem:[%s7857_s15 + $0x140] sm:$0xff] %v332_v40  ;;  %335 = vst [vmem:[%s7857_s15 + $0x148] sm:$0xff] %v334_v41  ;;  %v338_v43 = vld [vmem:[%s7852_s14 + $0x458] sm:$0xff]  ;;  %v340_v44 = vld [vmem:[%s7852_s14 + $0x460] sm:$0xff] }
  0x27   : > { %337 = vst [vmem:[%s7857_s15 + $0x150] sm:$0xff] %v336_v42  ;;  %339 = vst [vmem:[%s7857_s15 + $0x158] sm:$0xff] %v338_v43  ;;  %v342_v45 = vld [vmem:[%s7852_s14 + $0x468] sm:$0xff]  ;;  %v344_v46 = vld [vmem:[%s7852_s14 + $0x470] sm:$0xff] }
  0x28   : > { %341 = vst [vmem:[%s7857_s15 + $0x160] sm:$0xff] %v340_v44  ;;  %v346_v47 = vld [vmem:[%s7852_s14 + $0x478] sm:$0xff]  ;;  %343 = vst [vmem:[%s7857_s15 + $0x168] sm:$0xff] %v342_v45  ;;  %v348_v48 = vld [vmem:[%s7852_s14 + $0x600] sm:$0xff] }
  0x29   : > { %345 = vst [vmem:[%s7857_s15 + $0x170] sm:$0xff] %v344_v46  ;;  %347 = vst [vmem:[%s7857_s15 + $0x178] sm:$0xff] %v346_v47  ;;  %v350_v49 = vld [vmem:[%s7852_s14 + $0x608] sm:$0xff]  ;;  %v352_v50 = vld [vmem:[%s7852_s14 + $0x610] sm:$0xff] }
  0x2a   : > { %349 = vst [vmem:[%s7857_s15 + $0x180] sm:$0xff] %v348_v48  ;;  %351 = vst [vmem:[%s7857_s15 + $0x188] sm:$0xff] %v350_v49  ;;  %v354_v51 = vld [vmem:[%s7852_s14 + $0x618] sm:$0xff]  ;;  %v356_v52 = vld [vmem:[%s7852_s14 + $0x620] sm:$0xff] }
  0x2b   : > { %353 = vst [vmem:[%s7857_s15 + $0x190] sm:$0xff] %v352_v50  ;;  %v358_v53 = vld [vmem:[%s7852_s14 + $0x628] sm:$0xff]  ;;  %355 = vst [vmem:[%s7857_s15 + $0x198] sm:$0xff] %v354_v51  ;;  %v360_v54 = vld [vmem:[%s7852_s14 + $0x630] sm:$0xff] }
  0x2c   : > { %357 = vst [vmem:[%s7857_s15 + $0x1a0] sm:$0xff] %v356_v52  ;;  %359 = vst [vmem:[%s7857_s15 + $0x1a8] sm:$0xff] %v358_v53  ;;  %v362_v55 = vld [vmem:[%s7852_s14 + $0x638] sm:$0xff]  ;;  %v364_v56 = vld [vmem:[%s7852_s14 + $0x640] sm:$0xff] }
  0x2d   : > { %361 = vst [vmem:[%s7857_s15 + $0x1b0] sm:$0xff] %v360_v54  ;;  %363 = vst [vmem:[%s7857_s15 + $0x1b8] sm:$0xff] %v362_v55  ;;  %v366_v57 = vld [vmem:[%s7852_s14 + $0x648] sm:$0xff]  ;;  %v368_v58 = vld [vmem:[%s7852_s14 + $0x650] sm:$0xff] }
  0x2e   : > { %365 = vst [vmem:[%s7857_s15 + $0x1c0] sm:$0xff] %v364_v56  ;;  %v370_v59 = vld [vmem:[%s7852_s14 + $0x658] sm:$0xff]  ;;  %367 = vst [vmem:[%s7857_s15 + $0x1c8] sm:$0xff] %v366_v57  ;;  %v372_v60 = vld [vmem:[%s7852_s14 + $0x660] sm:$0xff] }
  0x2f   : > { %369 = vst [vmem:[%s7857_s15 + $0x1d0] sm:$0xff] %v368_v58  ;;  %371 = vst [vmem:[%s7857_s15 + $0x1d8] sm:$0xff] %v370_v59  ;;  %v374_v61 = vld [vmem:[%s7852_s14 + $0x668] sm:$0xff]  ;;  %v376_v62 = vld [vmem:[%s7852_s14 + $0x670] sm:$0xff] }
  0x30   : > { %373 = vst [vmem:[%s7857_s15 + $0x1e0] sm:$0xff] %v372_v60  ;;  %375 = vst [vmem:[%s7857_s15 + $0x1e8] sm:$0xff] %v374_v61  ;;  %v378_v63 = vld [vmem:[%s7852_s14 + $0x678] sm:$0xff]  ;;  %v380_v0 = vld [vmem:[%s7852_s14 + $0x800] sm:$0xff] }
  0x31   : > { %377 = vst [vmem:[%s7857_s15 + $0x1f0] sm:$0xff] %v376_v62  ;;  %v382_v1 = vld [vmem:[%s7852_s14 + $0x808] sm:$0xff]  ;;  %379 = vst [vmem:[%s7857_s15 + $0x1f8] sm:$0xff] %v378_v63  ;;  %v384_v2 = vld [vmem:[%s7852_s14 + $0x810] sm:$0xff] }
  0x32   : > { %381 = vst [vmem:[%s7857_s15 + $0x200] sm:$0xff] %v380_v0  ;;  %383 = vst [vmem:[%s7857_s15 + $0x208] sm:$0xff] %v382_v1  ;;  %v386_v3 = vld [vmem:[%s7852_s14 + $0x818] sm:$0xff]  ;;  %v388_v4 = vld [vmem:[%s7852_s14 + $0x820] sm:$0xff] }
  0x33   : > { %385 = vst [vmem:[%s7857_s15 + $0x210] sm:$0xff] %v384_v2  ;;  %387 = vst [vmem:[%s7857_s15 + $0x218] sm:$0xff] %v386_v3  ;;  %v390_v5 = vld [vmem:[%s7852_s14 + $0x828] sm:$0xff]  ;;  %v392_v6 = vld [vmem:[%s7852_s14 + $0x830] sm:$0xff] }
  0x34   : > { %389 = vst [vmem:[%s7857_s15 + $0x220] sm:$0xff] %v388_v4  ;;  %v394_v7 = vld [vmem:[%s7852_s14 + $0x838] sm:$0xff]  ;;  %391 = vst [vmem:[%s7857_s15 + $0x228] sm:$0xff] %v390_v5  ;;  %v396_v8 = vld [vmem:[%s7852_s14 + $0x840] sm:$0xff] }
  0x35   : > { %393 = vst [vmem:[%s7857_s15 + $0x230] sm:$0xff] %v392_v6  ;;  %395 = vst [vmem:[%s7857_s15 + $0x238] sm:$0xff] %v394_v7  ;;  %v398_v9 = vld [vmem:[%s7852_s14 + $0x848] sm:$0xff]  ;;  %v400_v10 = vld [vmem:[%s7852_s14 + $0x850] sm:$0xff] }
  0x36   : > { %397 = vst [vmem:[%s7857_s15 + $0x240] sm:$0xff] %v396_v8  ;;  %399 = vst [vmem:[%s7857_s15 + $0x248] sm:$0xff] %v398_v9  ;;  %v402_v11 = vld [vmem:[%s7852_s14 + $0x858] sm:$0xff]  ;;  %v404_v12 = vld [vmem:[%s7852_s14 + $0x860] sm:$0xff] }
  0x37   : > { %401 = vst [vmem:[%s7857_s15 + $0x250] sm:$0xff] %v400_v10  ;;  %v406_v13 = vld [vmem:[%s7852_s14 + $0x868] sm:$0xff]  ;;  %403 = vst [vmem:[%s7857_s15 + $0x258] sm:$0xff] %v402_v11  ;;  %v408_v14 = vld [vmem:[%s7852_s14 + $0x870] sm:$0xff] }
  0x38   : > { %405 = vst [vmem:[%s7857_s15 + $0x260] sm:$0xff] %v404_v12  ;;  %407 = vst [vmem:[%s7857_s15 + $0x268] sm:$0xff] %v406_v13  ;;  %v410_v15 = vld [vmem:[%s7852_s14 + $0x878] sm:$0xff]  ;;  %v412_v16 = vld [vmem:[%s7852_s14 + $0xa00] sm:$0xff] }
  0x39   : > { %409 = vst [vmem:[%s7857_s15 + $0x270] sm:$0xff] %v408_v14  ;;  %411 = vst [vmem:[%s7857_s15 + $0x278] sm:$0xff] %v410_v15  ;;  %v414_v17 = vld [vmem:[%s7852_s14 + $0xa08] sm:$0xff]  ;;  %v416_v18 = vld [vmem:[%s7852_s14 + $0xa10] sm:$0xff] }
  0x3a   : > { %413 = vst [vmem:[%s7857_s15 + $0x280] sm:$0xff] %v412_v16  ;;  %v418_v19 = vld [vmem:[%s7852_s14 + $0xa18] sm:$0xff]  ;;  %415 = vst [vmem:[%s7857_s15 + $0x288] sm:$0xff] %v414_v17  ;;  %v420_v20 = vld [vmem:[%s7852_s14 + $0xa20] sm:$0xff] }
  0x3b   : > { %417 = vst [vmem:[%s7857_s15 + $0x290] sm:$0xff] %v416_v18  ;;  %419 = vst [vmem:[%s7857_s15 + $0x298] sm:$0xff] %v418_v19  ;;  %v422_v21 = vld [vmem:[%s7852_s14 + $0xa28] sm:$0xff]  ;;  %v424_v22 = vld [vmem:[%s7852_s14 + $0xa30] sm:$0xff] }
  0x3c   : > { %421 = vst [vmem:[%s7857_s15 + $0x2a0] sm:$0xff] %v420_v20  ;;  %423 = vst [vmem:[%s7857_s15 + $0x2a8] sm:$0xff] %v422_v21  ;;  %v426_v23 = vld [vmem:[%s7852_s14 + $0xa38] sm:$0xff]  ;;  %v428_v24 = vld [vmem:[%s7852_s14 + $0xa40] sm:$0xff] }
  0x3d   : > { %425 = vst [vmem:[%s7857_s15 + $0x2b0] sm:$0xff] %v424_v22  ;;  %v430_v25 = vld [vmem:[%s7852_s14 + $0xa48] sm:$0xff]  ;;  %427 = vst [vmem:[%s7857_s15 + $0x2b8] sm:$0xff] %v426_v23  ;;  %v432_v26 = vld [vmem:[%s7852_s14 + $0xa50] sm:$0xff] }
  0x3e   : > { %429 = vst [vmem:[%s7857_s15 + $0x2c0] sm:$0xff] %v428_v24  ;;  %431 = vst [vmem:[%s7857_s15 + $0x2c8] sm:$0xff] %v430_v25  ;;  %v434_v27 = vld [vmem:[%s7852_s14 + $0xa58] sm:$0xff]  ;;  %v436_v28 = vld [vmem:[%s7852_s14 + $0xa60] sm:$0xff] }
  0x3f   : > { %433 = vst [vmem:[%s7857_s15 + $0x2d0] sm:$0xff] %v432_v26  ;;  %435 = vst [vmem:[%s7857_s15 + $0x2d8] sm:$0xff] %v434_v27  ;;  %v438_v29 = vld [vmem:[%s7852_s14 + $0xa68] sm:$0xff]  ;;  %v440_v30 = vld [vmem:[%s7852_s14 + $0xa70] sm:$0xff] }
  0x40   : > { %437 = vst [vmem:[%s7857_s15 + $0x2e0] sm:$0xff] %v436_v28  ;;  %v442_v31 = vld [vmem:[%s7852_s14 + $0xa78] sm:$0xff]  ;;  %439 = vst [vmem:[%s7857_s15 + $0x2e8] sm:$0xff] %v438_v29  ;;  %v444_v32 = vld [vmem:[%s7852_s14 + $0xc00] sm:$0xff] }
  0x41   : > { %441 = vst [vmem:[%s7857_s15 + $0x2f0] sm:$0xff] %v440_v30  ;;  %443 = vst [vmem:[%s7857_s15 + $0x2f8] sm:$0xff] %v442_v31  ;;  %v446_v33 = vld [vmem:[%s7852_s14 + $0xc08] sm:$0xff]  ;;  %v448_v34 = vld [vmem:[%s7852_s14 + $0xc10] sm:$0xff] }
  0x42   : > { %445 = vst [vmem:[%s7857_s15 + $0x300] sm:$0xff] %v444_v32  ;;  %447 = vst [vmem:[%s7857_s15 + $0x308] sm:$0xff] %v446_v33  ;;  %v450_v35 = vld [vmem:[%s7852_s14 + $0xc18] sm:$0xff]  ;;  %v452_v36 = vld [vmem:[%s7852_s14 + $0xc20] sm:$0xff] }
  0x43   : > { %449 = vst [vmem:[%s7857_s15 + $0x310] sm:$0xff] %v448_v34  ;;  %v454_v37 = vld [vmem:[%s7852_s14 + $0xc28] sm:$0xff]  ;;  %451 = vst [vmem:[%s7857_s15 + $0x318] sm:$0xff] %v450_v35  ;;  %v456_v38 = vld [vmem:[%s7852_s14 + $0xc30] sm:$0xff] }
  0x44   : > { %453 = vst [vmem:[%s7857_s15 + $0x320] sm:$0xff] %v452_v36  ;;  %455 = vst [vmem:[%s7857_s15 + $0x328] sm:$0xff] %v454_v37  ;;  %v458_v39 = vld [vmem:[%s7852_s14 + $0xc38] sm:$0xff]  ;;  %v460_v40 = vld [vmem:[%s7852_s14 + $0xc40] sm:$0xff] }
  0x45   : > { %457 = vst [vmem:[%s7857_s15 + $0x330] sm:$0xff] %v456_v38  ;;  %459 = vst [vmem:[%s7857_s15 + $0x338] sm:$0xff] %v458_v39  ;;  %v462_v41 = vld [vmem:[%s7852_s14 + $0xc48] sm:$0xff]  ;;  %v464_v42 = vld [vmem:[%s7852_s14 + $0xc50] sm:$0xff] }
  0x46   : > { %461 = vst [vmem:[%s7857_s15 + $0x340] sm:$0xff] %v460_v40  ;;  %v466_v43 = vld [vmem:[%s7852_s14 + $0xc58] sm:$0xff]  ;;  %463 = vst [vmem:[%s7857_s15 + $0x348] sm:$0xff] %v462_v41  ;;  %v468_v44 = vld [vmem:[%s7852_s14 + $0xc60] sm:$0xff] }
  0x47   : > { %465 = vst [vmem:[%s7857_s15 + $0x350] sm:$0xff] %v464_v42  ;;  %467 = vst [vmem:[%s7857_s15 + $0x358] sm:$0xff] %v466_v43  ;;  %v470_v45 = vld [vmem:[%s7852_s14 + $0xc68] sm:$0xff]  ;;  %v472_v46 = vld [vmem:[%s7852_s14 + $0xc70] sm:$0xff] }
  0x48   : > { %469 = vst [vmem:[%s7857_s15 + $0x360] sm:$0xff] %v468_v44  ;;  %471 = vst [vmem:[%s7857_s15 + $0x368] sm:$0xff] %v470_v45  ;;  %v474_v47 = vld [vmem:[%s7852_s14 + $0xc78] sm:$0xff]  ;;  %v476_v48 = vld [vmem:[%s7852_s14 + $0xe00] sm:$0xff] }
  0x49   : > { %473 = vst [vmem:[%s7857_s15 + $0x370] sm:$0xff] %v472_v46  ;;  %v478_v49 = vld [vmem:[%s7852_s14 + $0xe08] sm:$0xff]  ;;  %475 = vst [vmem:[%s7857_s15 + $0x378] sm:$0xff] %v474_v47  ;;  %v480_v50 = vld [vmem:[%s7852_s14 + $0xe10] sm:$0xff] }
  0x4a   : > { %477 = vst [vmem:[%s7857_s15 + $0x380] sm:$0xff] %v476_v48  ;;  %479 = vst [vmem:[%s7857_s15 + $0x388] sm:$0xff] %v478_v49  ;;  %v482_v51 = vld [vmem:[%s7852_s14 + $0xe18] sm:$0xff]  ;;  %v484_v52 = vld [vmem:[%s7852_s14 + $0xe20] sm:$0xff] }
  0x4b   : > { %481 = vst [vmem:[%s7857_s15 + $0x390] sm:$0xff] %v480_v50  ;;  %483 = vst [vmem:[%s7857_s15 + $0x398] sm:$0xff] %v482_v51  ;;  %v486_v53 = vld [vmem:[%s7852_s14 + $0xe28] sm:$0xff]  ;;  %v488_v54 = vld [vmem:[%s7852_s14 + $0xe30] sm:$0xff] }
  0x4c   : > { %485 = vst [vmem:[%s7857_s15 + $0x3a0] sm:$0xff] %v484_v52  ;;  %v490_v55 = vld [vmem:[%s7852_s14 + $0xe38] sm:$0xff]  ;;  %487 = vst [vmem:[%s7857_s15 + $0x3a8] sm:$0xff] %v486_v53  ;;  %v492_v56 = vld [vmem:[%s7852_s14 + $0xe40] sm:$0xff] }
  0x4d   : > { %489 = vst [vmem:[%s7857_s15 + $0x3b0] sm:$0xff] %v488_v54  ;;  %491 = vst [vmem:[%s7857_s15 + $0x3b8] sm:$0xff] %v490_v55  ;;  %v494_v57 = vld [vmem:[%s7852_s14 + $0xe48] sm:$0xff]  ;;  %v496_v58 = vld [vmem:[%s7852_s14 + $0xe50] sm:$0xff] }
  0x4e   : > { %493 = vst [vmem:[%s7857_s15 + $0x3c0] sm:$0xff] %v492_v56  ;;  %495 = vst [vmem:[%s7857_s15 + $0x3c8] sm:$0xff] %v494_v57  ;;  %v498_v59 = vld [vmem:[%s7852_s14 + $0xe58] sm:$0xff]  ;;  %v500_v60 = vld [vmem:[%s7852_s14 + $0xe60] sm:$0xff] }
  0x4f   : > { %497 = vst [vmem:[%s7857_s15 + $0x3d0] sm:$0xff] %v496_v58  ;;  %v502_v61 = vld [vmem:[%s7852_s14 + $0xe68] sm:$0xff]  ;;  %499 = vst [vmem:[%s7857_s15 + $0x3d8] sm:$0xff] %v498_v59  ;;  %v504_v62 = vld [vmem:[%s7852_s14 + $0xe70] sm:$0xff] }
  0x50   : > { %501 = vst [vmem:[%s7857_s15 + $0x3e0] sm:$0xff] %v500_v60  ;;  %503 = vst [vmem:[%s7857_s15 + $0x3e8] sm:$0xff] %v502_v61  ;;  %v506_v63 = vld [vmem:[%s7852_s14 + $0xe78] sm:$0xff]  ;;  %v508_v0 = vld [vmem:[%s7852_s14 + $0x1000] sm:$0xff] }
  0x51   : > { %505 = vst [vmem:[%s7857_s15 + $0x3f0] sm:$0xff] %v504_v62  ;;  %507 = vst [vmem:[%s7857_s15 + $0x3f8] sm:$0xff] %v506_v63  ;;  %v510_v1 = vld [vmem:[%s7852_s14 + $0x1008] sm:$0xff]  ;;  %v512_v2 = vld [vmem:[%s7852_s14 + $0x1010] sm:$0xff] }
  0x52   : > { %509 = vst [vmem:[%s7857_s15 + $0x400] sm:$0xff] %v508_v0  ;;  %v514_v3 = vld [vmem:[%s7852_s14 + $0x1018] sm:$0xff]  ;;  %511 = vst [vmem:[%s7857_s15 + $0x408] sm:$0xff] %v510_v1  ;;  %v516_v4 = vld [vmem:[%s7852_s14 + $0x1020] sm:$0xff] }
  0x53   : > { %513 = vst [vmem:[%s7857_s15 + $0x410] sm:$0xff] %v512_v2  ;;  %515 = vst [vmem:[%s7857_s15 + $0x418] sm:$0xff] %v514_v3  ;;  %v518_v5 = vld [vmem:[%s7852_s14 + $0x1028] sm:$0xff]  ;;  %v520_v6 = vld [vmem:[%s7852_s14 + $0x1030] sm:$0xff] }
  0x54   : > { %517 = vst [vmem:[%s7857_s15 + $0x420] sm:$0xff] %v516_v4  ;;  %519 = vst [vmem:[%s7857_s15 + $0x428] sm:$0xff] %v518_v5  ;;  %v522_v7 = vld [vmem:[%s7852_s14 + $0x1038] sm:$0xff]  ;;  %v524_v8 = vld [vmem:[%s7852_s14 + $0x1040] sm:$0xff] }
  0x55   : > { %521 = vst [vmem:[%s7857_s15 + $0x430] sm:$0xff] %v520_v6  ;;  %v526_v9 = vld [vmem:[%s7852_s14 + $0x1048] sm:$0xff]  ;;  %523 = vst [vmem:[%s7857_s15 + $0x438] sm:$0xff] %v522_v7  ;;  %v528_v10 = vld [vmem:[%s7852_s14 + $0x1050] sm:$0xff] }
  0x56   : > { %525 = vst [vmem:[%s7857_s15 + $0x440] sm:$0xff] %v524_v8  ;;  %527 = vst [vmem:[%s7857_s15 + $0x448] sm:$0xff] %v526_v9  ;;  %v530_v11 = vld [vmem:[%s7852_s14 + $0x1058] sm:$0xff]  ;;  %v532_v12 = vld [vmem:[%s7852_s14 + $0x1060] sm:$0xff] }
  0x57   : > { %529 = vst [vmem:[%s7857_s15 + $0x450] sm:$0xff] %v528_v10  ;;  %531 = vst [vmem:[%s7857_s15 + $0x458] sm:$0xff] %v530_v11  ;;  %v534_v13 = vld [vmem:[%s7852_s14 + $0x1068] sm:$0xff]  ;;  %v536_v14 = vld [vmem:[%s7852_s14 + $0x1070] sm:$0xff] }
  0x58   : > { %533 = vst [vmem:[%s7857_s15 + $0x460] sm:$0xff] %v532_v12  ;;  %v538_v15 = vld [vmem:[%s7852_s14 + $0x1078] sm:$0xff]  ;;  %535 = vst [vmem:[%s7857_s15 + $0x468] sm:$0xff] %v534_v13  ;;  %v540_v16 = vld [vmem:[%s7852_s14 + $0x1200] sm:$0xff] }
  0x59   : > { %537 = vst [vmem:[%s7857_s15 + $0x470] sm:$0xff] %v536_v14  ;;  %539 = vst [vmem:[%s7857_s15 + $0x478] sm:$0xff] %v538_v15  ;;  %v542_v17 = vld [vmem:[%s7852_s14 + $0x1208] sm:$0xff]  ;;  %v544_v18 = vld [vmem:[%s7852_s14 + $0x1210] sm:$0xff] }
  0x5a   : > { %541 = vst [vmem:[%s7857_s15 + $0x480] sm:$0xff] %v540_v16  ;;  %543 = vst [vmem:[%s7857_s15 + $0x488] sm:$0xff] %v542_v17  ;;  %v546_v19 = vld [vmem:[%s7852_s14 + $0x1218] sm:$0xff]  ;;  %v548_v20 = vld [vmem:[%s7852_s14 + $0x1220] sm:$0xff] }
  0x5b   : > { %545 = vst [vmem:[%s7857_s15 + $0x490] sm:$0xff] %v544_v18  ;;  %v550_v21 = vld [vmem:[%s7852_s14 + $0x1228] sm:$0xff]  ;;  %547 = vst [vmem:[%s7857_s15 + $0x498] sm:$0xff] %v546_v19  ;;  %v552_v22 = vld [vmem:[%s7852_s14 + $0x1230] sm:$0xff] }
  0x5c   : > { %549 = vst [vmem:[%s7857_s15 + $0x4a0] sm:$0xff] %v548_v20  ;;  %551 = vst [vmem:[%s7857_s15 + $0x4a8] sm:$0xff] %v550_v21  ;;  %v554_v23 = vld [vmem:[%s7852_s14 + $0x1238] sm:$0xff]  ;;  %v556_v24 = vld [vmem:[%s7852_s14 + $0x1240] sm:$0xff] }
  0x5d   : > { %553 = vst [vmem:[%s7857_s15 + $0x4b0] sm:$0xff] %v552_v22  ;;  %555 = vst [vmem:[%s7857_s15 + $0x4b8] sm:$0xff] %v554_v23  ;;  %v558_v25 = vld [vmem:[%s7852_s14 + $0x1248] sm:$0xff]  ;;  %v560_v26 = vld [vmem:[%s7852_s14 + $0x1250] sm:$0xff] }
  0x5e   : > { %557 = vst [vmem:[%s7857_s15 + $0x4c0] sm:$0xff] %v556_v24  ;;  %v562_v27 = vld [vmem:[%s7852_s14 + $0x1258] sm:$0xff]  ;;  %559 = vst [vmem:[%s7857_s15 + $0x4c8] sm:$0xff] %v558_v25  ;;  %v564_v28 = vld [vmem:[%s7852_s14 + $0x1260] sm:$0xff] }
  0x5f   : > { %561 = vst [vmem:[%s7857_s15 + $0x4d0] sm:$0xff] %v560_v26  ;;  %563 = vst [vmem:[%s7857_s15 + $0x4d8] sm:$0xff] %v562_v27  ;;  %v566_v29 = vld [vmem:[%s7852_s14 + $0x1268] sm:$0xff]  ;;  %v568_v30 = vld [vmem:[%s7852_s14 + $0x1270] sm:$0xff] }
  0x60   : > { %565 = vst [vmem:[%s7857_s15 + $0x4e0] sm:$0xff] %v564_v28  ;;  %567 = vst [vmem:[%s7857_s15 + $0x4e8] sm:$0xff] %v566_v29  ;;  %v570_v31 = vld [vmem:[%s7852_s14 + $0x1278] sm:$0xff]  ;;  %v572_v32 = vld [vmem:[%s7852_s14 + $0x1400] sm:$0xff] }
  0x61   : > { %569 = vst [vmem:[%s7857_s15 + $0x4f0] sm:$0xff] %v568_v30  ;;  %v574_v33 = vld [vmem:[%s7852_s14 + $0x1408] sm:$0xff]  ;;  %571 = vst [vmem:[%s7857_s15 + $0x4f8] sm:$0xff] %v570_v31  ;;  %v576_v34 = vld [vmem:[%s7852_s14 + $0x1410] sm:$0xff] }
  0x62   : > { %573 = vst [vmem:[%s7857_s15 + $0x500] sm:$0xff] %v572_v32  ;;  %575 = vst [vmem:[%s7857_s15 + $0x508] sm:$0xff] %v574_v33  ;;  %v578_v35 = vld [vmem:[%s7852_s14 + $0x1418] sm:$0xff]  ;;  %v580_v36 = vld [vmem:[%s7852_s14 + $0x1420] sm:$0xff] }
  0x63   : > { %577 = vst [vmem:[%s7857_s15 + $0x510] sm:$0xff] %v576_v34  ;;  %579 = vst [vmem:[%s7857_s15 + $0x518] sm:$0xff] %v578_v35  ;;  %v582_v37 = vld [vmem:[%s7852_s14 + $0x1428] sm:$0xff]  ;;  %v584_v38 = vld [vmem:[%s7852_s14 + $0x1430] sm:$0xff] }
  0x64   : > { %581 = vst [vmem:[%s7857_s15 + $0x520] sm:$0xff] %v580_v36  ;;  %v586_v39 = vld [vmem:[%s7852_s14 + $0x1438] sm:$0xff]  ;;  %583 = vst [vmem:[%s7857_s15 + $0x528] sm:$0xff] %v582_v37  ;;  %v588_v40 = vld [vmem:[%s7852_s14 + $0x1440] sm:$0xff] }
  0x65   : > { %585 = vst [vmem:[%s7857_s15 + $0x530] sm:$0xff] %v584_v38  ;;  %587 = vst [vmem:[%s7857_s15 + $0x538] sm:$0xff] %v586_v39  ;;  %v590_v41 = vld [vmem:[%s7852_s14 + $0x1448] sm:$0xff]  ;;  %v592_v42 = vld [vmem:[%s7852_s14 + $0x1450] sm:$0xff] }
  0x66   : > { %589 = vst [vmem:[%s7857_s15 + $0x540] sm:$0xff] %v588_v40  ;;  %591 = vst [vmem:[%s7857_s15 + $0x548] sm:$0xff] %v590_v41  ;;  %v594_v43 = vld [vmem:[%s7852_s14 + $0x1458] sm:$0xff]  ;;  %v596_v44 = vld [vmem:[%s7852_s14 + $0x1460] sm:$0xff] }
  0x67   : > { %593 = vst [vmem:[%s7857_s15 + $0x550] sm:$0xff] %v592_v42  ;;  %v598_v45 = vld [vmem:[%s7852_s14 + $0x1468] sm:$0xff]  ;;  %595 = vst [vmem:[%s7857_s15 + $0x558] sm:$0xff] %v594_v43  ;;  %v600_v46 = vld [vmem:[%s7852_s14 + $0x1470] sm:$0xff] }
  0x68   : > { %597 = vst [vmem:[%s7857_s15 + $0x560] sm:$0xff] %v596_v44  ;;  %599 = vst [vmem:[%s7857_s15 + $0x568] sm:$0xff] %v598_v45  ;;  %v602_v47 = vld [vmem:[%s7852_s14 + $0x1478] sm:$0xff]  ;;  %v604_v48 = vld [vmem:[%s7852_s14 + $0x1600] sm:$0xff] }
  0x69   : > { %601 = vst [vmem:[%s7857_s15 + $0x570] sm:$0xff] %v600_v46  ;;  %603 = vst [vmem:[%s7857_s15 + $0x578] sm:$0xff] %v602_v47  ;;  %v606_v49 = vld [vmem:[%s7852_s14 + $0x1608] sm:$0xff]  ;;  %v608_v50 = vld [vmem:[%s7852_s14 + $0x1610] sm:$0xff] }
  0x6a   : > { %605 = vst [vmem:[%s7857_s15 + $0x580] sm:$0xff] %v604_v48  ;;  %v610_v51 = vld [vmem:[%s7852_s14 + $0x1618] sm:$0xff]  ;;  %607 = vst [vmem:[%s7857_s15 + $0x588] sm:$0xff] %v606_v49  ;;  %v612_v52 = vld [vmem:[%s7852_s14 + $0x1620] sm:$0xff] }
  0x6b   : > { %609 = vst [vmem:[%s7857_s15 + $0x590] sm:$0xff] %v608_v50  ;;  %611 = vst [vmem:[%s7857_s15 + $0x598] sm:$0xff] %v610_v51  ;;  %v614_v53 = vld [vmem:[%s7852_s14 + $0x1628] sm:$0xff]  ;;  %v616_v54 = vld [vmem:[%s7852_s14 + $0x1630] sm:$0xff] }
  0x6c   : > { %613 = vst [vmem:[%s7857_s15 + $0x5a0] sm:$0xff] %v612_v52  ;;  %615 = vst [vmem:[%s7857_s15 + $0x5a8] sm:$0xff] %v614_v53  ;;  %v618_v55 = vld [vmem:[%s7852_s14 + $0x1638] sm:$0xff]  ;;  %v620_v56 = vld [vmem:[%s7852_s14 + $0x1640] sm:$0xff] }
  0x6d   : > { %617 = vst [vmem:[%s7857_s15 + $0x5b0] sm:$0xff] %v616_v54  ;;  %v622_v57 = vld [vmem:[%s7852_s14 + $0x1648] sm:$0xff]  ;;  %619 = vst [vmem:[%s7857_s15 + $0x5b8] sm:$0xff] %v618_v55  ;;  %v624_v58 = vld [vmem:[%s7852_s14 + $0x1650] sm:$0xff] }
  0x6e   : > { %621 = vst [vmem:[%s7857_s15 + $0x5c0] sm:$0xff] %v620_v56  ;;  %623 = vst [vmem:[%s7857_s15 + $0x5c8] sm:$0xff] %v622_v57  ;;  %v626_v59 = vld [vmem:[%s7852_s14 + $0x1658] sm:$0xff]  ;;  %v628_v60 = vld [vmem:[%s7852_s14 + $0x1660] sm:$0xff] }
  0x6f   : > { %625 = vst [vmem:[%s7857_s15 + $0x5d0] sm:$0xff] %v624_v58  ;;  %627 = vst [vmem:[%s7857_s15 + $0x5d8] sm:$0xff] %v626_v59  ;;  %v630_v61 = vld [vmem:[%s7852_s14 + $0x1668] sm:$0xff]  ;;  %v632_v62 = vld [vmem:[%s7852_s14 + $0x1670] sm:$0xff] }
  0x70   : > { %629 = vst [vmem:[%s7857_s15 + $0x5e0] sm:$0xff] %v628_v60  ;;  %v634_v63 = vld [vmem:[%s7852_s14 + $0x1678] sm:$0xff]  ;;  %631 = vst [vmem:[%s7857_s15 + $0x5e8] sm:$0xff] %v630_v61  ;;  %v636_v0 = vld [vmem:[%s7852_s14 + $0x1800] sm:$0xff] }
  0x71   : > { %633 = vst [vmem:[%s7857_s15 + $0x5f0] sm:$0xff] %v632_v62  ;;  %635 = vst [vmem:[%s7857_s15 + $0x5f8] sm:$0xff] %v634_v63  ;;  %v638_v1 = vld [vmem:[%s7852_s14 + $0x1808] sm:$0xff]  ;;  %v640_v2 = vld [vmem:[%s7852_s14 + $0x1810] sm:$0xff] }
  0x72   : > { %637 = vst [vmem:[%s7857_s15 + $0x600] sm:$0xff] %v636_v0  ;;  %639 = vst [vmem:[%s7857_s15 + $0x608] sm:$0xff] %v638_v1  ;;  %v642_v3 = vld [vmem:[%s7852_s14 + $0x1818] sm:$0xff]  ;;  %v644_v4 = vld [vmem:[%s7852_s14 + $0x1820] sm:$0xff] }
  0x73   : > { %641 = vst [vmem:[%s7857_s15 + $0x610] sm:$0xff] %v640_v2  ;;  %v646_v5 = vld [vmem:[%s7852_s14 + $0x1828] sm:$0xff]  ;;  %643 = vst [vmem:[%s7857_s15 + $0x618] sm:$0xff] %v642_v3  ;;  %v648_v6 = vld [vmem:[%s7852_s14 + $0x1830] sm:$0xff] }
  0x74   : > { %645 = vst [vmem:[%s7857_s15 + $0x620] sm:$0xff] %v644_v4  ;;  %647 = vst [vmem:[%s7857_s15 + $0x628] sm:$0xff] %v646_v5  ;;  %v650_v7 = vld [vmem:[%s7852_s14 + $0x1838] sm:$0xff]  ;;  %v652_v8 = vld [vmem:[%s7852_s14 + $0x1840] sm:$0xff] }
  0x75   : > { %649 = vst [vmem:[%s7857_s15 + $0x630] sm:$0xff] %v648_v6  ;;  %651 = vst [vmem:[%s7857_s15 + $0x638] sm:$0xff] %v650_v7  ;;  %v654_v9 = vld [vmem:[%s7852_s14 + $0x1848] sm:$0xff]  ;;  %v656_v10 = vld [vmem:[%s7852_s14 + $0x1850] sm:$0xff] }
  0x76   : > { %653 = vst [vmem:[%s7857_s15 + $0x640] sm:$0xff] %v652_v8  ;;  %v658_v11 = vld [vmem:[%s7852_s14 + $0x1858] sm:$0xff]  ;;  %655 = vst [vmem:[%s7857_s15 + $0x648] sm:$0xff] %v654_v9  ;;  %v660_v12 = vld [vmem:[%s7852_s14 + $0x1860] sm:$0xff] }
  0x77   : > { %657 = vst [vmem:[%s7857_s15 + $0x650] sm:$0xff] %v656_v10  ;;  %659 = vst [vmem:[%s7857_s15 + $0x658] sm:$0xff] %v658_v11  ;;  %v662_v13 = vld [vmem:[%s7852_s14 + $0x1868] sm:$0xff]  ;;  %v664_v14 = vld [vmem:[%s7852_s14 + $0x1870] sm:$0xff] }
  0x78   : > { %661 = vst [vmem:[%s7857_s15 + $0x660] sm:$0xff] %v660_v12  ;;  %663 = vst [vmem:[%s7857_s15 + $0x668] sm:$0xff] %v662_v13  ;;  %v666_v15 = vld [vmem:[%s7852_s14 + $0x1878] sm:$0xff]  ;;  %v668_v16 = vld [vmem:[%s7852_s14 + $0x1a00] sm:$0xff] }
  0x79   : > { %665 = vst [vmem:[%s7857_s15 + $0x670] sm:$0xff] %v664_v14  ;;  %v670_v17 = vld [vmem:[%s7852_s14 + $0x1a08] sm:$0xff]  ;;  %667 = vst [vmem:[%s7857_s15 + $0x678] sm:$0xff] %v666_v15  ;;  %v672_v18 = vld [vmem:[%s7852_s14 + $0x1a10] sm:$0xff] }
  0x7a   : > { %669 = vst [vmem:[%s7857_s15 + $0x680] sm:$0xff] %v668_v16  ;;  %671 = vst [vmem:[%s7857_s15 + $0x688] sm:$0xff] %v670_v17  ;;  %v674_v19 = vld [vmem:[%s7852_s14 + $0x1a18] sm:$0xff]  ;;  %v676_v20 = vld [vmem:[%s7852_s14 + $0x1a20] sm:$0xff] }
  0x7b   : > { %673 = vst [vmem:[%s7857_s15 + $0x690] sm:$0xff] %v672_v18  ;;  %675 = vst [vmem:[%s7857_s15 + $0x698] sm:$0xff] %v674_v19  ;;  %v678_v21 = vld [vmem:[%s7852_s14 + $0x1a28] sm:$0xff]  ;;  %v680_v22 = vld [vmem:[%s7852_s14 + $0x1a30] sm:$0xff] }
  0x7c   : > { %677 = vst [vmem:[%s7857_s15 + $0x6a0] sm:$0xff] %v676_v20  ;;  %v682_v23 = vld [vmem:[%s7852_s14 + $0x1a38] sm:$0xff]  ;;  %679 = vst [vmem:[%s7857_s15 + $0x6a8] sm:$0xff] %v678_v21  ;;  %v684_v24 = vld [vmem:[%s7852_s14 + $0x1a40] sm:$0xff] }
  0x7d   : > { %681 = vst [vmem:[%s7857_s15 + $0x6b0] sm:$0xff] %v680_v22  ;;  %683 = vst [vmem:[%s7857_s15 + $0x6b8] sm:$0xff] %v682_v23  ;;  %v686_v25 = vld [vmem:[%s7852_s14 + $0x1a48] sm:$0xff]  ;;  %v688_v26 = vld [vmem:[%s7852_s14 + $0x1a50] sm:$0xff] }
  0x7e   : > { %685 = vst [vmem:[%s7857_s15 + $0x6c0] sm:$0xff] %v684_v24  ;;  %687 = vst [vmem:[%s7857_s15 + $0x6c8] sm:$0xff] %v686_v25  ;;  %v690_v27 = vld [vmem:[%s7852_s14 + $0x1a58] sm:$0xff]  ;;  %v692_v28 = vld [vmem:[%s7852_s14 + $0x1a60] sm:$0xff] }
  0x7f   : > { %689 = vst [vmem:[%s7857_s15 + $0x6d0] sm:$0xff] %v688_v26  ;;  %v694_v29 = vld [vmem:[%s7852_s14 + $0x1a68] sm:$0xff]  ;;  %691 = vst [vmem:[%s7857_s15 + $0x6d8] sm:$0xff] %v690_v27  ;;  %v696_v30 = vld [vmem:[%s7852_s14 + $0x1a70] sm:$0xff] }
  0x80   : > { %693 = vst [vmem:[%s7857_s15 + $0x6e0] sm:$0xff] %v692_v28  ;;  %695 = vst [vmem:[%s7857_s15 + $0x6e8] sm:$0xff] %v694_v29  ;;  %v698_v31 = vld [vmem:[%s7852_s14 + $0x1a78] sm:$0xff]  ;;  %v700_v32 = vld [vmem:[%s7852_s14 + $0x1c00] sm:$0xff] }
  0x81   : > { %697 = vst [vmem:[%s7857_s15 + $0x6f0] sm:$0xff] %v696_v30  ;;  %699 = vst [vmem:[%s7857_s15 + $0x6f8] sm:$0xff] %v698_v31  ;;  %v702_v33 = vld [vmem:[%s7852_s14 + $0x1c08] sm:$0xff]  ;;  %v704_v34 = vld [vmem:[%s7852_s14 + $0x1c10] sm:$0xff] }
  0x82   : > { %701 = vst [vmem:[%s7857_s15 + $0x700] sm:$0xff] %v700_v32  ;;  %v706_v35 = vld [vmem:[%s7852_s14 + $0x1c18] sm:$0xff]  ;;  %703 = vst [vmem:[%s7857_s15 + $0x708] sm:$0xff] %v702_v33  ;;  %v708_v36 = vld [vmem:[%s7852_s14 + $0x1c20] sm:$0xff] }
  0x83   : > { %705 = vst [vmem:[%s7857_s15 + $0x710] sm:$0xff] %v704_v34  ;;  %707 = vst [vmem:[%s7857_s15 + $0x718] sm:$0xff] %v706_v35  ;;  %v710_v37 = vld [vmem:[%s7852_s14 + $0x1c28] sm:$0xff]  ;;  %v712_v38 = vld [vmem:[%s7852_s14 + $0x1c30] sm:$0xff] }
  0x84   : > { %709 = vst [vmem:[%s7857_s15 + $0x720] sm:$0xff] %v708_v36  ;;  %711 = vst [vmem:[%s7857_s15 + $0x728] sm:$0xff] %v710_v37  ;;  %v714_v39 = vld [vmem:[%s7852_s14 + $0x1c38] sm:$0xff]  ;;  %v716_v40 = vld [vmem:[%s7852_s14 + $0x1c40] sm:$0xff] }
  0x85   : > { %713 = vst [vmem:[%s7857_s15 + $0x730] sm:$0xff] %v712_v38  ;;  %v718_v41 = vld [vmem:[%s7852_s14 + $0x1c48] sm:$0xff]  ;;  %715 = vst [vmem:[%s7857_s15 + $0x738] sm:$0xff] %v714_v39  ;;  %v720_v42 = vld [vmem:[%s7852_s14 + $0x1c50] sm:$0xff] }
  0x86   : > { %717 = vst [vmem:[%s7857_s15 + $0x740] sm:$0xff] %v716_v40  ;;  %719 = vst [vmem:[%s7857_s15 + $0x748] sm:$0xff] %v718_v41  ;;  %v722_v43 = vld [vmem:[%s7852_s14 + $0x1c58] sm:$0xff]  ;;  %v724_v44 = vld [vmem:[%s7852_s14 + $0x1c60] sm:$0xff] }
  0x87   : > { %721 = vst [vmem:[%s7857_s15 + $0x750] sm:$0xff] %v720_v42  ;;  %723 = vst [vmem:[%s7857_s15 + $0x758] sm:$0xff] %v722_v43  ;;  %v726_v45 = vld [vmem:[%s7852_s14 + $0x1c68] sm:$0xff]  ;;  %v728_v46 = vld [vmem:[%s7852_s14 + $0x1c70] sm:$0xff] }
  0x88   : > { %725 = vst [vmem:[%s7857_s15 + $0x760] sm:$0xff] %v724_v44  ;;  %v730_v47 = vld [vmem:[%s7852_s14 + $0x1c78] sm:$0xff]  ;;  %727 = vst [vmem:[%s7857_s15 + $0x768] sm:$0xff] %v726_v45  ;;  %v732_v48 = vld [vmem:[%s7852_s14 + $0x1e00] sm:$0xff] }
  0x89   : > { %729 = vst [vmem:[%s7857_s15 + $0x770] sm:$0xff] %v728_v46  ;;  %731 = vst [vmem:[%s7857_s15 + $0x778] sm:$0xff] %v730_v47  ;;  %v734_v49 = vld [vmem:[%s7852_s14 + $0x1e08] sm:$0xff]  ;;  %v736_v50 = vld [vmem:[%s7852_s14 + $0x1e10] sm:$0xff] }
  0x8a   : > { %733 = vst [vmem:[%s7857_s15 + $0x780] sm:$0xff] %v732_v48  ;;  %735 = vst [vmem:[%s7857_s15 + $0x788] sm:$0xff] %v734_v49  ;;  %v738_v51 = vld [vmem:[%s7852_s14 + $0x1e18] sm:$0xff]  ;;  %v740_v52 = vld [vmem:[%s7852_s14 + $0x1e20] sm:$0xff] }
  0x8b   : > { %737 = vst [vmem:[%s7857_s15 + $0x790] sm:$0xff] %v736_v50  ;;  %v742_v53 = vld [vmem:[%s7852_s14 + $0x1e28] sm:$0xff]  ;;  %739 = vst [vmem:[%s7857_s15 + $0x798] sm:$0xff] %v738_v51  ;;  %v744_v54 = vld [vmem:[%s7852_s14 + $0x1e30] sm:$0xff] }
  0x8c   : > { %741 = vst [vmem:[%s7857_s15 + $0x7a0] sm:$0xff] %v740_v52  ;;  %743 = vst [vmem:[%s7857_s15 + $0x7a8] sm:$0xff] %v742_v53  ;;  %v746_v55 = vld [vmem:[%s7852_s14 + $0x1e38] sm:$0xff]  ;;  %v748_v56 = vld [vmem:[%s7852_s14 + $0x1e40] sm:$0xff] }
  0x8d   : > { %745 = vst [vmem:[%s7857_s15 + $0x7b0] sm:$0xff] %v744_v54  ;;  %747 = vst [vmem:[%s7857_s15 + $0x7b8] sm:$0xff] %v746_v55  ;;  %v750_v57 = vld [vmem:[%s7852_s14 + $0x1e48] sm:$0xff]  ;;  %v752_v58 = vld [vmem:[%s7852_s14 + $0x1e50] sm:$0xff] }
  0x8e   : > { %749 = vst [vmem:[%s7857_s15 + $0x7c0] sm:$0xff] %v748_v56  ;;  %v754_v59 = vld [vmem:[%s7852_s14 + $0x1e58] sm:$0xff]  ;;  %751 = vst [vmem:[%s7857_s15 + $0x7c8] sm:$0xff] %v750_v57  ;;  %v756_v60 = vld [vmem:[%s7852_s14 + $0x1e60] sm:$0xff] }
  0x8f   : > { %753 = vst [vmem:[%s7857_s15 + $0x7d0] sm:$0xff] %v752_v58  ;;  %755 = vst [vmem:[%s7857_s15 + $0x7d8] sm:$0xff] %v754_v59  ;;  %v758_v61 = vld [vmem:[%s7852_s14 + $0x1e68] sm:$0xff]  ;;  %v760_v62 = vld [vmem:[%s7852_s14 + $0x1e70] sm:$0xff] }
  0x90   : > { %757 = vst [vmem:[%s7857_s15 + $0x7e0] sm:$0xff] %v756_v60  ;;  %759 = vst [vmem:[%s7857_s15 + $0x7e8] sm:$0xff] %v758_v61  ;;  %v762_v63 = vld [vmem:[%s7852_s14 + $0x1e78] sm:$0xff] }
  0x91   : > { %761 = vst [vmem:[%s7857_s15 + $0x7f0] sm:$0xff] %v760_v62  ;;  %763 = vst [vmem:[%s7857_s15 + $0x7f8] sm:$0xff] %v762_v63 }
  0x92 PF: > { %p7311_p5 = scmp.ge.s32.totalorder %s7774_s26, 1  ;;  %p777_p6 = scmp.lt.s32.totalorder %s7774_s26, 5 }
  0x94   : > { %p778_p7 = pnand %p7311_p5, %p777_p6 }
  0x96   : > { %781 = sbr.rel (%p778_p7) target bundleno = 1586 (0x632), region = 67 }
  0x9d   : > { %s784_s16 = sand.u32 1, %s7766_s24   ;;  %s7313_s17 = sshll.u32 %s7304_s27, 5 }
  0x9e   : > { %s7312_s18 = sshll.u32 %s784_s16, 11  ;;  %p822_p8 = scmp.lt.s32.totalorder %s7313_s17, 127 }
  0x9f   : > { %s8383_s10 = scalar_lea.vmem [#allocation3], %s7312_s18  ;;  %p7317_p9 = scmp.ne.s32.totalorder %s7304_s27, 0 }
  0xa0   : > { %s11350_s17 = smov (!%p822_p8, %s7313_s17), 127  ;;  %v842_v0 = vld [vmem:[%s11103_s1] sm:$0xff] (!%p7317_p9)  ;;  %vm848_vm0 = vcmask (!%p7317_p9), 64512   ;;  %v839_v2 = vld [vmem:[%s11102_s0 + $0x8] sm:$0xff] (!%p7317_p9)  ;;  %v840_v3 = vld [vmem:[%s11102_s0 + $0x10] sm:$0xff] (!%p7317_p9)  ;;  %v844_v17 = vlaneseq (!%p7317_p9)  ;;  %vm946_vm1 = vcmask (!%p7317_p9), 523264  }
  0xa1   : > { %s7314_s19 = sshll.u32 %s11350_s17, 2  ;;  %s7316_s20 = sshll.u32 %s11350_s17, 1  ;;  %v838_v1 = vld [vmem:[%s11102_s0] sm:$0xff] (!%p7317_p9)  ;;  %7602 = vmatprep.subr.mxu0 (!%p7317_p9), %v842_v0  ;;  %v841_v4 = vld [vmem:[%s11102_s0 + $0x18] sm:$0xff] (!%p7317_p9)  ;;  %v1021_v6 = vld [vmem:[%s11105_s3 + $0x8] sm:$0xff] (!%p7317_p9) }
  0xa2   : > { %s8376_s23 = scalar_lea.vmem %s11108_s6, %s7314_s19  ;;  %s8381_s9 = scalar_lea.vmem %s11109_s7, %s7316_s20  ;;  %7604 = vmatprep.mubr.msk.f32.mxu0 (!%p7317_p9), %vm848_vm0, %v838_v1  ;;  %7603 = vmatpush3.msra.mxu0 (!%p7317_p9), %v842_v0  ;;  %v1020_v5 = vld [vmem:[%s11105_s3] sm:$0xff] (!%p7317_p9)  ;;  %v1022_v7 = vld [vmem:[%s11105_s3 + $0x10] sm:$0xff] (!%p7317_p9)  ;;  %v1023_v9 = vld [vmem:[%s11105_s3 + $0x18] sm:$0xff] (!%p7317_p9)  ;;  %v8426_v18 = vshrl.u32 (!%p7317_p9), %v844_v17, 7 }
  0xa3   : > { %837 = sbr.rel (%p7317_p9) target bundleno = 692 (0x2b4), region = 75  ;;  %7605 = vmatmul.mubr.msk.f32.vlgmr.msra.gmra.mrb[0].mxu0 (!%p7317_p9), %vm848_vm0, %v839_v2  ;;  %v7632_v8 = vpack.c.bf16 (!%p7317_p9), %v1021_v6, %v1020_v5  ;;  %v7636_v10 = vpack.c.bf16 (!%p7317_p9), %v1023_v9, %v1022_v7  ;;  %v1024_v11 = vld [vmem:[%s11105_s3 + $0x20] sm:$0xff] (!%p7317_p9)  ;;  %v1025_v12 = vld [vmem:[%s11105_s3 + $0x28] sm:$0xff] (!%p7317_p9)  ;;  %v1026_v14 = vld [vmem:[%s11105_s3 + $0x30] sm:$0xff] (!%p7317_p9) }
  0xa4   : > { %7607 = vmatprep.mubr.msk.f32.mxu0 (!%p7317_p9), %vm848_vm0, %v840_v3  ;;  %v7640_v13 = vpack.c.bf16 (!%p7317_p9), %v1025_v12, %v1024_v11  ;;  %v1027_v15 = vld [vmem:[%s11105_s3 + $0x38] sm:$0xff] (!%p7317_p9)  ;;  %v846_v19 = vsub.s32 (!%p7317_p9), 0, %v8426_v18  ;;  %v843_v20 = vld [vmem:[%s11104_s2] sm:$0x7] (!%p7317_p9)  ;;  %v988_v6 = vsub.s32 (!%p7317_p9), 1, %v8426_v18  ;;  %v1002_v7 = vsub.s32 (!%p7317_p9), 2, %v8426_v18 }
  0xa5   : > { %7633 = vmatprep.subr.bf16.mxu0 (!%p7317_p9), %v7632_v8  ;;  %7648 = vmatprep.subr.bf16.mxu1 (!%p7317_p9), %v7632_v8  ;;  %v7644_v16 = vpack.c.bf16 (!%p7317_p9), %v1027_v15, %v1026_v14 }
  0xa6   : > { %7635 = vmatpush3.bf16.msra.mxu0 (!%p7317_p9), %v7632_v8  ;;  %7652 = vmatpush3.bf16.msra.mxu1 (!%p7317_p9), %v7632_v8  ;;  %v847_v21 = vrot.slane (!%p7317_p9), %v843_v20, %v846_v19  ;;  %v989_v8 = vrot.slane (!%p7317_p9), %v843_v20, %v988_v6  ;;  %v1003_v9 = vrot.slane (!%p7317_p9), %v843_v20, %v1002_v7 }
  0xa7   : > { %7608 = vmatmul.mubr.msk.f32.gmra.mrb[2].mxu0 (!%p7317_p9), %vm848_vm0, %v841_v4  ;;  %7637 = vmatprep.subr.bf16.mxu0 (!%p7317_p9), %v7636_v10 }
  0xa8   : > { %7649 = vmatprep.subr.bf16.mxu1 (!%p7317_p9), %v7636_v10 }
  0xaa   : > { %7639 = vmatpush3.bf16.msra.mxu0 %v7636_v10  ;;  %7653 = vmatpush3.bf16.msra.mxu1 %v7636_v10 }
  0xab   : > { %7641 = vmatprep.subr.bf16.mxu0 %v7640_v13  ;;  %7650 = vmatprep.subr.bf16.mxu1 %v7640_v13 }
  0xae   : > { %7643 = vmatpush3.bf16.msra.mxu0 %v7640_v13  ;;  %7654 = vmatpush3.bf16.msra.mxu1 %v7640_v13 }
  0xaf   : > { %7645 = vmatprep.subr.bf16.mxu0 %v7644_v16  ;;  %7651 = vmatprep.subr.bf16.mxu1 %v7644_v16 }
  0xb2   : > { %7647 = vmatpush3.bf16.msra.mxu0 %v7644_v16  ;;  %7655 = vmatpush3.bf16.msra.mxu1 %v7644_v16 }
 0x176   : > { %v7606_v22 = vpop.f32.mrb[0].mxu0 }
 0x177   : > { %v933_v23 = vadd.f32 %v7606_v22, %v847_v21  ;;  %v927_v24 = vpop.f32.mrb[1].mxu0 }
 0x178   : > { %v928_v25 = vadd.f32 %v927_v24, %v847_v21 }
 0x179   : > { %v948_v26 = vsel %vm946_vm1, %v933_v23, 0.0  ;;  %v962_v27 = vmul.f32 %v933_v23, %v933_v23 }
 0x17a   : > { %v947_v28 = vsel %vm946_vm1, %v928_v25, 0.0  ;;  %v961_v29 = vmul.f32 %v928_v25, %v928_v25  ;;  %v7609_v30 = vpop.f32.mrb[2].mxu0 }
 0x17b   : > { %v966_v31 = vsel %vm946_vm1, %v962_v27, 0.0  ;;  %v949_v32 = vadd.f32 %v948_v26, %v947_v28  ;;  %v943_v33 = vadd.f32 %v7609_v30, %v847_v21  ;;  %v937_v34 = vpop.f32.mrb[3].mxu0 }
 0x17c   : > { %v965_v35 = vsel %vm946_vm1, %v961_v29, 0.0  ;;  %v938_v36 = vadd.f32 %v937_v34, %v847_v21 }
 0x17d   : > { %v967_v37 = vadd.f32 %v966_v31, %v965_v35  ;;  %v964_v38 = vmul.f32 %v943_v33, %v943_v33  ;;  %v952_v42 = vsel %vm946_vm1, %v943_v33, 0.0 }
 0x17e   : > { %v950_v39 = vsel %vm946_vm1, %v938_v36, 0.0  ;;  %v963_v40 = vmul.f32 %v938_v36, %v938_v36 }
 0x17f   : > { %v951_v41 = vadd.f32 %v950_v39, %v949_v32  ;;  %v970_v46 = vsel %vm946_vm1, %v964_v38, 0.0 }
 0x180   : > { %v968_v43 = vsel %vm946_vm1, %v963_v40, 0.0 }
 0x181   : > { %v953_v44 = vadd.f32 %v952_v42, %v951_v41  ;;  %v969_v45 = vadd.f32 %v968_v43, %v967_v37 }
 0x183   : > { %v954_v47 = vrot.slane %v953_v44, 4  ;;  %v971_v48 = vadd.f32 %v970_v46, %v969_v45 }
 0x185   : > { %v955_v49 = vadd.f32 %v954_v47, %v953_v44  ;;  %v972_v50 = vrot.slane %v971_v48, 4 }
 0x187   : > { %v956_v51 = vrot.slane %v955_v49, 2  ;;  %v973_v52 = vadd.f32 %v972_v50, %v971_v48 }
 0x189   : > { %v957_v53 = vadd.f32 %v956_v51, %v955_v49  ;;  %v974_v54 = vrot.slane %v973_v52, 2 }
 0x18b   : > { %v958_v55 = vrot.slane %v957_v53, 1  ;;  %v975_v56 = vadd.f32 %v974_v54, %v973_v52 }
 0x18d   : > { %v959_v57 = vadd.f32 %v958_v55, %v957_v53  ;;  %v976_v58 = vrot.slane %v975_v56, 1 }
 0x18f   : > { %v960_v59 = vmul.f32 0.03125, %v959_v57  ;;  %v977_v60 = vadd.f32 %v976_v58, %v975_v56 }
 0x191   : > { %v978_v61 = vmul.f32 0.03125, %v977_v60  ;;  %v979_v62 = vmul.f32 %v960_v59, %v960_v59  ;;  %v984_v63 = vsub.f32 %v938_v36, %v960_v59  ;;  %v982_v0 = vsub.f32 %v928_v25, %v960_v59 }
 0x192   : > { %v983_v1 = vsub.f32 %v933_v23, %v960_v59  ;;  %v985_v2 = vsub.f32 %v943_v33, %v960_v59  ;;  %v1028_v33 = vld [vmem:[%s11106_s4] sm:$0x7] }
 0x193   : > { %v980_v3 = vsub.f32 %v978_v61, %v979_v62  ;;  %v992_v10 = vmul.f32 %v989_v8, %v984_v63  ;;  %v990_v11 = vmul.f32 %v989_v8, %v982_v0  ;;  %v1032_v34 = vrot.slane %v1028_v33, %v846_v19 }
 0x194   : > { %v991_v12 = vmul.f32 %v989_v8, %v983_v1  ;;  %v993_v13 = vmul.f32 %v989_v8, %v985_v2 }
 0x195   : > { %v981_v4 = vmax.f32 %v980_v3, 0.0 }
 0x197   : > { %v994_v5 = vadd.f32 0.001, %v981_v4 }
 0x199   : > { %7682 = vrsqrt.f32 %v994_v5 }
 0x1a3   : > { %v7683_v14 = vpop.eup %7682 }
 0x1a4   : > { %v996_v15 = vmul.f32 %v7683_v14, %v990_v11  ;;  %v998_v16 = vmul.f32 %v7683_v14, %v992_v10  ;;  %v997_v17 = vmul.f32 %v7683_v14, %v991_v12  ;;  %v999_v21 = vmul.f32 %v7683_v14, %v993_v13 }
 0x1a5   : > { %v1164_v12 = vrot.slane %v1028_v33, %v988_v6  ;;  %v1178_v13 = vrot.slane %v1028_v33, %v1002_v7 }
 0x1a6   : > { %v1004_v22 = vadd.f32 %v1003_v9, %v996_v15  ;;  %v1006_v23 = vadd.f32 %v1003_v9, %v998_v16  ;;  %v1005_v24 = vadd.f32 %v1003_v9, %v997_v17  ;;  %v1007_v25 = vadd.f32 %v1003_v9, %v999_v21 }
 0x1a8   : > { %vm1008_vm2 = vcmp.ge.f32.partialorder %v1004_v22, 0.0  ;;  %v1012_v26 = vmul.f32 0.3, %v1004_v22  ;;  %vm1010_vm3 = vcmp.ge.f32.partialorder %v1006_v23, 0.0  ;;  %v1014_v27 = vmul.f32 0.3, %v1006_v23 }
 0x1a9   : > { %vm1009_vm4 = vcmp.ge.f32.partialorder %v1005_v24, 0.0  ;;  %v1013_v28 = vmul.f32 0.3, %v1005_v24  ;;  %vm1011_vm5 = vcmp.ge.f32.partialorder %v1007_v25, 0.0  ;;  %v1015_v20 = vmul.f32 0.3, %v1007_v25 }
 0x1aa   : > { %v1016_v29 = vsel %vm1008_vm2, %v1004_v22, %v1012_v26  ;;  %v1018_v30 = vsel %vm1010_vm3, %v1006_v23, %v1014_v27 }
 0x1ab   : > { %7626 = vmatprep.mubr.msk.f32.mxu0 %vm946_vm1, %v1016_v29  ;;  %7629 = vmatprep.mubr.msk.f32.mxu1 %vm946_vm1, %v1018_v30  ;;  %v1017_v31 = vsel %vm1009_vm4, %v1005_v24, %v1013_v28  ;;  %v1019_v32 = vsel %vm1011_vm5, %v1007_v25, %v1015_v20 }
 0x1ac   : > { %7627 = vmatmul.mubr.msk.f32.vlgmr.msra.gmra.mrb[4].mxu0 %vm946_vm1, %v1017_v31  ;;  %7630 = vmatmul.mubr.msk.f32.vlgmr.msra.gmra.mrb[0].mxu1 %vm946_vm1, %v1019_v32 }
 0x27f   : > { %v7628_v35 = vpop.f32.mrb[4].mxu0  ;;  %v7631_v36 = vpop.f32.mrb[0].mxu1 }
 0x280   : > { %v1117_v37 = vadd.f32 %v7628_v35, %v1032_v34  ;;  %v1111_v38 = vpop.f32.mrb[5].mxu0  ;;  %v1121_v39 = vpop.f32.mrb[1].mxu1  ;;  %v1127_v43 = vadd.f32 %v7631_v36, %v1032_v34 }
 0x281   : > { %v1112_v40 = vadd.f32 %v1111_v38, %v1032_v34  ;;  %v1122_v41 = vadd.f32 %v1121_v39, %v1032_v34 }
 0x282   : > { %v1141_v42 = vmul.f32 %v1117_v37, %v1117_v37  ;;  %v1143_v49 = vmul.f32 %v1127_v43, %v1127_v43 }
 0x283   : > { %v1130_v44 = vadd.f32 %v1117_v37, %v1112_v40  ;;  %v1140_v45 = vmul.f32 %v1112_v40, %v1112_v40  ;;  %v1142_v48 = vmul.f32 %v1122_v41, %v1122_v41 }
 0x285   : > { %v1144_v46 = vadd.f32 %v1141_v42, %v1140_v45  ;;  %v1131_v47 = vadd.f32 %v1130_v44, %v1122_v41 }
 0x287   : > { %v1132_v50 = vadd.f32 %v1131_v47, %v1127_v43  ;;  %v1145_v51 = vadd.f32 %v1144_v46, %v1142_v48 }
 0x289   : > { %v1133_v52 = vrot.slane %v1132_v50, 4  ;;  %v1146_v53 = vadd.f32 %v1145_v51, %v1143_v49 }
 0x28b   : > { %v1134_v19 = vadd.f32 %v1133_v52, %v1132_v50  ;;  %v1147_v54 = vrot.slane %v1146_v53, 4 }
 0x28d   : > { %v1135_v55 = vrot.slane %v1134_v19, 2  ;;  %v1148_v56 = vadd.f32 %v1147_v54, %v1146_v53 }
 0x28f   : > { %v1136_v57 = vadd.f32 %v1135_v55, %v1134_v19  ;;  %v1149_v58 = vrot.slane %v1148_v56, 2 }
 0x291   : > { %v1137_v59 = vrot.slane %v1136_v57, 1  ;;  %v1150_v60 = vadd.f32 %v1149_v58, %v1148_v56 }
 0x293   : > { %v1138_v61 = vadd.f32 %v1137_v59, %v1136_v57  ;;  %v1151_v62 = vrot.slane %v1150_v60, 1 }
 0x295   : > { %v1139_v63 = vmul.f32 0.03125, %v1138_v61  ;;  %v1152_v0 = vadd.f32 %v1151_v62, %v1150_v60 }
 0x297   : > { %v1153_v1 = vmul.f32 0.03125, %v1152_v0  ;;  %v1154_v2 = vmul.f32 %v1139_v63, %v1139_v63  ;;  %v1157_v3 = vsub.f32 %v1112_v40, %v1139_v63  ;;  %v1158_v4 = vsub.f32 %v1117_v37, %v1139_v63 }
 0x298   : > { %v1159_v5 = vsub.f32 %v1122_v41, %v1139_v63  ;;  %v1160_v8 = vsub.f32 %v1127_v43, %v1139_v63 }
 0x299   : > { %v1155_v9 = vsub.f32 %v1153_v1, %v1154_v2  ;;  %v1165_v14 = vmul.f32 %v1164_v12, %v1157_v3  ;;  %v1166_v15 = vmul.f32 %v1164_v12, %v1158_v4 }
 0x29a   : > { %v1167_v16 = vmul.f32 %v1164_v12, %v1159_v5  ;;  %v1168_v17 = vmul.f32 %v1164_v12, %v1160_v8 }
 0x29b   : > { %v1156_v10 = vmax.f32 %v1155_v9, 0.0 }
 0x29d   : > { %v1169_v11 = vadd.f32 0.001, %v1156_v10 }
 0x29f   : > { %7684 = vrsqrt.f32 %v1169_v11 }
 0x2a9   : > { %v7685_v21 = vpop.eup %7684 }
 0x2aa   : > { %v1171_v22 = vmul.f32 %v7685_v21, %v1165_v14  ;;  %v1172_v23 = vmul.f32 %v7685_v21, %v1166_v15  ;;  %v1173_v24 = vmul.f32 %v7685_v21, %v1167_v16  ;;  %v1174_v25 = vmul.f32 %v7685_v21, %v1168_v17 }
 0x2ac   : > { %v1179_v26 = vadd.f32 %v1178_v13, %v1171_v22  ;;  %v1180_v27 = vadd.f32 %v1178_v13, %v1172_v23  ;;  %v1181_v28 = vadd.f32 %v1178_v13, %v1173_v24  ;;  %v1182_v20 = vadd.f32 %v1178_v13, %v1174_v25 }
 0x2ae   : > { %vm1183_vm6 = vcmp.ge.f32.partialorder %v1179_v26, 0.0  ;;  %vm1184_vm7 = vcmp.ge.f32.partialorder %v1180_v27, 0.0  ;;  %vm1185_vm8 = vcmp.ge.f32.partialorder %v1181_v28, 0.0  ;;  %vm1186_vm9 = vcmp.ge.f32.partialorder %v1182_v20, 0.0 }
 0x2af   : > { %v1187_v6 = vmul.f32 0.3, %v1179_v26  ;;  %v1188_v18 = vmul.f32 0.3, %v1180_v27  ;;  %v1189_v7 = vmul.f32 0.3, %v1181_v28 }
 0x2b0   : > { %v1190_v29 = vmul.f32 0.3, %v1182_v20 }
 0x2b1   : > { %v1191_v30 = vsel %vm1183_vm6, %v1179_v26, %v1187_v6  ;;  %v1192_v31 = vsel %vm1184_vm7, %v1180_v27, %v1188_v18  ;;  %v1193_v32 = vsel %vm1185_vm8, %v1181_v28, %v1189_v7 }
 0x2b2   : > { %v1194_v33 = vsel %vm1186_vm9, %v1182_v20, %v1190_v29  ;;  %1195 = vst [vmem:[#allocation2] sm:$0xff] %v1191_v30  ;;  %1196 = vst [vmem:[#allocation2 + $0x8] sm:$0xff] %v1192_v31 }
 0x2b3   : > { %1197 = vst [vmem:[#allocation2 + $0x10] sm:$0xff] %v1193_v32  ;;  %1198 = vst [vmem:[#allocation2 + $0x18] sm:$0xff] %v1194_v33 }
 0x2b4 PF: > { %v1221_v34 = vld [vmem:[%s8383_s10] sm:$0xff]  ;;  %v1222_v36 = vld [vmem:[%s8383_s10 + $0x8] sm:$0xff]  ;;  %v11110_v42 = vmov 0   ;;  %v1223_v33 = vld [vmem:[%s8383_s10 + $0x10] sm:$0xff]  ;;  %vm6053_vm14 = vcmask 1041409  }
 0x2b5   : > { %v1237_v35 = vld [vmem:[%s8383_s10 + $0x80] sm:$0xff]  ;;  %v1238_v38 = vld [vmem:[%s8383_s10 + $0x88] sm:$0xff]  ;;  %3093 = vmatprep.mubr.bf16.mxu0 %v11110_v42  ;;  %3146 = vmatprep.mubr.bf16.mxu1 %v11110_v42 }
 0x2b6   : > { %v7327_v37 = vcombine.high %v1221_v34, %v1237_v35  ;;  %v7326_v39 = vcombine.low %v1221_v34, %v1237_v35  ;;  %v1253_v40 = vld [vmem:[%s8383_s10 + $0x100] sm:$0xff]  ;;  %v7329_v43 = vcombine.high %v1222_v36, %v1238_v38  ;;  %v7328_v44 = vcombine.low %v1222_v36, %v1238_v38  ;;  %v1254_v46 = vld [vmem:[%s8383_s10 + $0x108] sm:$0xff]  ;;  %v1239_v34 = vld [vmem:[%s8383_s10 + $0x90] sm:$0xff] }
 0x2b7   : > { %v1269_v41 = vld [vmem:[%s8383_s10 + $0x180] sm:$0xff]  ;;  %v1270_v47 = vld [vmem:[%s8383_s10 + $0x188] sm:$0xff]  ;;  %v1224_v35 = vld [vmem:[%s8383_s10 + $0x18] sm:$0xff] }
 0x2b8   : > { %v7359_v45 = vcombine.high %v1253_v40, %v1269_v41  ;;  %v1285_v48 = vld [vmem:[%s8383_s10 + $0x200] sm:$0xff]  ;;  %3061 = vmatprep.subr.bf16.mxu0 %v7327_v37  ;;  %v7361_v49 = vcombine.high %v1254_v46, %v1270_v47  ;;  %v1286_v51 = vld [vmem:[%s8383_s10 + $0x208] sm:$0xff]  ;;  %3114 = vmatprep.subr.bf16.mxu1 %v7329_v43  ;;  %v7358_v53 = vcombine.low %v1253_v40, %v1269_v41  ;;  %v1240_v36 = vld [vmem:[%s8383_s10 + $0x98] sm:$0xff] }
 0x2b9   : > { %v1301_v50 = vld [vmem:[%s8383_s10 + $0x280] sm:$0xff]  ;;  %v1302_v52 = vld [vmem:[%s8383_s10 + $0x288] sm:$0xff]  ;;  %3062 = vmatpush1.bf16.msra.mxu0 %v7326_v39  ;;  %3115 = vmatpush1.bf16.msra.mxu1 %v7328_v44  ;;  %v7360_v19 = vcombine.low %v1254_v46, %v1270_v47  ;;  %v7331_v41 = vcombine.high %v1223_v33, %v1239_v34  ;;  %v7333_v43 = vcombine.high %v1224_v35, %v1240_v36  ;;  %v1255_v44 = vld [vmem:[%s8383_s10 + $0x110] sm:$0xff] }
 0x2ba   : > { %3063 = vmatprep.subr.bf16.mxu0 %v7359_v45  ;;  %v7391_v54 = vcombine.high %v1285_v48, %v1301_v50  ;;  %3116 = vmatprep.subr.bf16.mxu1 %v7361_v49  ;;  %v7393_v55 = vcombine.high %v1286_v51, %v1302_v52  ;;  %v1317_v56 = vld [vmem:[%s8383_s10 + $0x300] sm:$0xff]  ;;  %v1318_v58 = vld [vmem:[%s8383_s10 + $0x308] sm:$0xff]  ;;  %v7390_v60 = vcombine.low %v1285_v48, %v1301_v50  ;;  %v1271_v45 = vld [vmem:[%s8383_s10 + $0x190] sm:$0xff] }
 0x2bb   : > { %v1333_v57 = vld [vmem:[%s8383_s10 + $0x380] sm:$0xff]  ;;  %v1334_v59 = vld [vmem:[%s8383_s10 + $0x388] sm:$0xff]  ;;  %v7392_v61 = vcombine.low %v1286_v51, %v1302_v52  ;;  %v1256_v47 = vld [vmem:[%s8383_s10 + $0x118] sm:$0xff]  ;;  %v7330_v49 = vcombine.low %v1223_v33, %v1239_v34  ;;  %v7332_v50 = vcombine.low %v1224_v35, %v1240_v36  ;;  %v7363_v51 = vcombine.high %v1255_v44, %v1271_v45 }
 0x2bc   : > { %v7423_v62 = vcombine.high %v1317_v56, %v1333_v57  ;;  %v7425_v63 = vcombine.high %v1318_v58, %v1334_v59  ;;  %v1349_v0 = vld [vmem:[%s8383_s10 + $0x400] sm:$0xff]  ;;  %v1350_v2 = vld [vmem:[%s8383_s10 + $0x408] sm:$0xff]  ;;  %v7422_v4 = vcombine.low %v1317_v56, %v1333_v57  ;;  %v7424_v5 = vcombine.low %v1318_v58, %v1334_v59  ;;  %v1272_v48 = vld [vmem:[%s8383_s10 + $0x198] sm:$0xff] }
 0x2bd   : > { %3064 = vmatpush1.bf16.msra.mxu0 %v7358_v53  ;;  %3117 = vmatpush1.bf16.msra.mxu1 %v7360_v19  ;;  %v1365_v1 = vld [vmem:[%s8383_s10 + $0x480] sm:$0xff]  ;;  %v1366_v3 = vld [vmem:[%s8383_s10 + $0x488] sm:$0xff]  ;;  %v7365_v52 = vcombine.high %v1256_v47, %v1272_v48  ;;  %v1287_v53 = vld [vmem:[%s8383_s10 + $0x210] sm:$0xff]  ;;  %v7362_v56 = vcombine.low %v1255_v44, %v1271_v45  ;;  %v7364_v59 = vcombine.low %v1256_v47, %v1272_v48 }
 0x2be   : > { %3065 = vmatprep.subr.bf16.mxu0 %v7391_v54  ;;  %3118 = vmatprep.subr.bf16.mxu1 %v7393_v55  ;;  %v7455_v8 = vcombine.high %v1349_v0, %v1365_v1  ;;  %v7457_v9 = vcombine.high %v1350_v2, %v1366_v3  ;;  %v1381_v10 = vld [vmem:[%s8383_s10 + $0x500] sm:$0xff]  ;;  %v1382_v12 = vld [vmem:[%s8383_s10 + $0x508] sm:$0xff]  ;;  %v7454_v14 = vcombine.low %v1349_v0, %v1365_v1  ;;  %v1303_v19 = vld [vmem:[%s8383_s10 + $0x290] sm:$0xff] }
 0x2bf   : > { %v1397_v11 = vld [vmem:[%s8383_s10 + $0x580] sm:$0xff]  ;;  %v1398_v13 = vld [vmem:[%s8383_s10 + $0x588] sm:$0xff]  ;;  %v7456_v15 = vcombine.low %v1350_v2, %v1366_v3  ;;  %v1288_v54 = vld [vmem:[%s8383_s10 + $0x218] sm:$0xff]  ;;  %v7394_v3 = vcombine.low %v1287_v53, %v1303_v19 }
 0x2c0   : > { %v7487_v16 = vcombine.high %v1381_v10, %v1397_v11  ;;  %v7489_v17 = vcombine.high %v1382_v12, %v1398_v13  ;;  %v1413_v21 = vld [vmem:[%s8383_s10 + $0x600] sm:$0xff]  ;;  %v1414_v23 = vld [vmem:[%s8383_s10 + $0x608] sm:$0xff]  ;;  %v7486_v25 = vcombine.low %v1381_v10, %v1397_v11  ;;  %v7488_v26 = vcombine.low %v1382_v12, %v1398_v13  ;;  %v1304_v55 = vld [vmem:[%s8383_s10 + $0x298] sm:$0xff] }
 0x2c1   : > { %3066 = vmatpush1.bf16.msra.mxu0 %v7390_v60  ;;  %3119 = vmatpush1.bf16.msra.mxu1 %v7392_v61  ;;  %v1429_v22 = vld [vmem:[%s8383_s10 + $0x680] sm:$0xff]  ;;  %v1430_v24 = vld [vmem:[%s8383_s10 + $0x688] sm:$0xff]  ;;  %v1217_v57 = vld [vmem:[#allocation2 + $0x10] sm:$0xff]  ;;  %v7395_v60 = vcombine.high %v1287_v53, %v1303_v19  ;;  %v7397_v61 = vcombine.high %v1288_v54, %v1304_v55 }
 0x2c2   : > { %3067 = vmatprep.subr.bf16.mxu0 %v7423_v62  ;;  %3120 = vmatprep.subr.bf16.mxu1 %v7425_v63  ;;  %v7519_v27 = vcombine.high %v1413_v21, %v1429_v22  ;;  %v7521_v28 = vcombine.high %v1414_v23, %v1430_v24  ;;  %v1445_v20 = vld [vmem:[%s8383_s10 + $0x700] sm:$0xff]  ;;  %v1446_v18 = vld [vmem:[%s8383_s10 + $0x708] sm:$0xff]  ;;  %v7518_v29 = vcombine.low %v1413_v21, %v1429_v22  ;;  %v1218_v58 = vld [vmem:[#allocation2 + $0x18] sm:$0xff] }
 0x2c3   : > { %v1461_v6 = vld [vmem:[%s8383_s10 + $0x780] sm:$0xff]  ;;  %v1462_v7 = vld [vmem:[%s8383_s10 + $0x788] sm:$0xff]  ;;  %v7520_v30 = vcombine.low %v1414_v23, %v1430_v24  ;;  %v1319_v62 = vld [vmem:[%s8383_s10 + $0x310] sm:$0xff]  ;;  %v8515_v0 = vpack.c.bf16 %v1218_v58, %v1217_v57 }
 0x2c4   : > { %v7551_v31 = vcombine.high %v1445_v20, %v1461_v6  ;;  %v7553_v32 = vcombine.high %v1446_v18, %v1462_v7  ;;  %v7550_v37 = vcombine.low %v1445_v20, %v1461_v6  ;;  %v1215_v38 = vld [vmem:[#allocation2] sm:$0xff]  ;;  %v1216_v39 = vld [vmem:[#allocation2 + $0x8] sm:$0xff]  ;;  %v7552_v40 = vcombine.low %v1446_v18, %v1462_v7  ;;  %v1335_v63 = vld [vmem:[%s8383_s10 + $0x390] sm:$0xff] }
 0x2c5   : > { %3068 = vmatpush1.bf16.msra.mxu0 %v7422_v4  ;;  %3121 = vmatpush1.bf16.msra.mxu1 %v7424_v5  ;;  %v8501_v46 = vpack.c.bf16 %v1216_v39, %v1215_v38  ;;  %v1320_v1 = vld [vmem:[%s8383_s10 + $0x318] sm:$0xff]  ;;  %v7396_v4 = vcombine.low %v1288_v54, %v1304_v55  ;;  %v7427_v5 = vcombine.high %v1319_v62, %v1335_v63  ;;  %v1367_v10 = vld [vmem:[%s8383_s10 + $0x490] sm:$0xff]  ;;  %v1242_v44 = vld [vmem:[%s8383_s10 + $0xa8] sm:$0xff] }
 0x2c6   : > { %3069 = vmatprep.subr.bf16.mxu0 %v7455_v8  ;;  %3122 = vmatprep.subr.bf16.mxu1 %v7457_v9  ;;  %v1336_v2 = vld [vmem:[%s8383_s10 + $0x398] sm:$0xff]  ;;  %v1351_v9 = vld [vmem:[%s8383_s10 + $0x410] sm:$0xff]  ;;  %v7426_v13 = vcombine.low %v1319_v62, %v1335_v63  ;;  %v1274_v53 = vld [vmem:[%s8383_s10 + $0x1a8] sm:$0xff] }
 0x2c7   : > { %v7429_v8 = vcombine.high %v1320_v1, %v1336_v2  ;;  %v1352_v11 = vld [vmem:[%s8383_s10 + $0x418] sm:$0xff]  ;;  %v1399_v21 = vld [vmem:[%s8383_s10 + $0x590] sm:$0xff]  ;;  %v7458_v24 = vcombine.low %v1351_v9, %v1367_v10  ;;  %v1289_v57 = vld [vmem:[%s8383_s10 + $0x220] sm:$0xff] }
 0x2c8   : > { %v1368_v12 = vld [vmem:[%s8383_s10 + $0x498] sm:$0xff]  ;;  %v1431_v20 = vld [vmem:[%s8383_s10 + $0x690] sm:$0xff]  ;;  %v1305_v58 = vld [vmem:[%s8383_s10 + $0x2a0] sm:$0xff] }
 0x2c9   : > { %3070 = vmatpush1.bf16.msra.mxu0 %v7454_v14  ;;  %3123 = vmatpush1.bf16.msra.mxu1 %v7456_v15  ;;  %v7428_v14 = vcombine.low %v1320_v1, %v1336_v2  ;;  %v7459_v15 = vcombine.high %v1351_v9, %v1367_v10  ;;  %v1384_v22 = vld [vmem:[%s8383_s10 + $0x518] sm:$0xff]  ;;  %v1463_v33 = vld [vmem:[%s8383_s10 + $0x790] sm:$0xff]  ;;  %v7399_v63 = vcombine.high %v1289_v57, %v1305_v58  ;;  %v1321_v2 = vld [vmem:[%s8383_s10 + $0x320] sm:$0xff] }
 0x2ca   : > { %3071 = vmatprep.subr.bf16.mxu0 %v7487_v16  ;;  %3124 = vmatprep.subr.bf16.mxu1 %v7489_v17  ;;  %v7461_v16 = vcombine.high %v1352_v11, %v1368_v12  ;;  %v1383_v17 = vld [vmem:[%s8383_s10 + $0x510] sm:$0xff]  ;;  %v1400_v23 = vld [vmem:[%s8383_s10 + $0x598] sm:$0xff] }
 0x2cb   : > { %v1416_v6 = vld [vmem:[%s8383_s10 + $0x618] sm:$0xff]  ;;  %v7490_v7 = vcombine.low %v1383_v17, %v1399_v21 }
 0x2cc   : > { %v1432_v18 = vld [vmem:[%s8383_s10 + $0x698] sm:$0xff] }
 0x2cd   : > { %3072 = vmatpush1.bf16.msra.mxu0 %v7486_v25  ;;  %3125 = vmatpush1.bf16.msra.mxu1 %v7488_v26  ;;  %v7460_v25 = vcombine.low %v1352_v11, %v1368_v12  ;;  %v7491_v26 = vcombine.high %v1383_v17, %v1399_v21  ;;  %v1448_v34 = vld [vmem:[%s8383_s10 + $0x718] sm:$0xff]  ;;  %v1353_v12 = vld [vmem:[%s8383_s10 + $0x420] sm:$0xff] }
 0x2ce   : > { %3073 = vmatprep.subr.bf16.mxu0 %v7519_v27  ;;  %3126 = vmatprep.subr.bf16.mxu1 %v7521_v28  ;;  %v7493_v27 = vcombine.high %v1384_v22, %v1400_v23  ;;  %v1415_v28 = vld [vmem:[%s8383_s10 + $0x610] sm:$0xff]  ;;  %v1464_v35 = vld [vmem:[%s8383_s10 + $0x798] sm:$0xff] }
 0x2cf   : > { %v7522_v36 = vcombine.low %v1415_v28, %v1431_v20  ;;  %v7557_v39 = vcombine.high %v1448_v34, %v1464_v35  ;;  %v7556_v47 = vcombine.low %v1448_v34, %v1464_v35  ;;  %v1449_v35 = vld [vmem:[%s8383_s10 + $0x720] sm:$0xff] }
 0x2d1   : > { %3074 = vmatpush1.bf16.msra.mxu0 %v7518_v29  ;;  %3127 = vmatpush1.bf16.msra.mxu1 %v7520_v30  ;;  %v7492_v29 = vcombine.low %v1384_v22, %v1400_v23  ;;  %v7523_v30 = vcombine.high %v1415_v28, %v1431_v20  ;;  %v1385_v23 = vld [vmem:[%s8383_s10 + $0x520] sm:$0xff] }
 0x2d2   : > { %3075 = vmatprep.subr.bf16.mxu0 %v7551_v31  ;;  %3128 = vmatprep.subr.bf16.mxu1 %v7553_v32  ;;  %v7525_v31 = vcombine.high %v1416_v6, %v1432_v18  ;;  %v1447_v32 = vld [vmem:[%s8383_s10 + $0x710] sm:$0xff] }
 0x2d3   : > { %v7555_v38 = vcombine.high %v1447_v32, %v1463_v33  ;;  %v7554_v45 = vcombine.low %v1447_v32, %v1463_v33 }
 0x2d5   : > { %3076 = vmatpush1.bf16.msra.mxu0 %v7550_v37  ;;  %3129 = vmatpush1.bf16.msra.mxu1 %v7552_v40  ;;  %v7524_v37 = vcombine.low %v1416_v6, %v1432_v18  ;;  %v1225_v40 = vld [vmem:[%s8383_s10 + $0x20] sm:$0xff] }
 0x2d6   : > { %3167 = vmatprep.subr.bf16.mxu0 %v7331_v41  ;;  %3220 = vmatprep.subr.bf16.mxu1 %v7333_v43  ;;  %v1241_v41 = vld [vmem:[%s8383_s10 + $0xa0] sm:$0xff]  ;;  %v1226_v43 = vld [vmem:[%s8383_s10 + $0x28] sm:$0xff] }
 0x2d7   : > { %v7335_v48 = vcombine.high %v1225_v40, %v1241_v41  ;;  %v7334_v19 = vcombine.low %v1225_v40, %v1241_v41  ;;  %v7336_v54 = vcombine.low %v1226_v43, %v1242_v44  ;;  %v1417_v18 = vld [vmem:[%s8383_s10 + $0x620] sm:$0xff] }
 0x2d8   : > { %3094 = vmatmul.mubr.bf16.vlgmr.msra.gmra.mrb[0].mxu0 %v8501_v46  ;;  %3147 = vmatmul.mubr.bf16.vlgmr.msra.gmra.mrb[0].mxu1 %v8501_v46 }
 0x2d9   : > { %3168 = vmatpush1.bf16.msra.mxu0 %v7330_v49  ;;  %3221 = vmatpush1.bf16.msra.mxu1 %v7332_v50  ;;  %v7337_v49 = vcombine.high %v1226_v43, %v1242_v44  ;;  %v1257_v50 = vld [vmem:[%s8383_s10 + $0x120] sm:$0xff]  ;;  %v1227_v44 = vld [vmem:[%s8383_s10 + $0x30] sm:$0xff] }
 0x2da   : > { %3169 = vmatprep.subr.bf16.mxu0 %v7363_v51  ;;  %3222 = vmatprep.subr.bf16.mxu1 %v7365_v52  ;;  %v1273_v51 = vld [vmem:[%s8383_s10 + $0x1a0] sm:$0xff]  ;;  %v1258_v52 = vld [vmem:[%s8383_s10 + $0x128] sm:$0xff] }
 0x2db   : > { %3103 = vmatprep.mubr.bf16.mxu0 %v11110_v42  ;;  %3156 = vmatprep.mubr.bf16.mxu1 %v11110_v42  ;;  %v7367_v55 = vcombine.high %v1257_v50, %v1273_v51  ;;  %v7368_v62 = vcombine.low %v1258_v52, %v1274_v53 }
 0x2dd   : > { %3170 = vmatpush1.bf16.msra.mxu0 %v7362_v56  ;;  %3223 = vmatpush1.bf16.msra.mxu1 %v7364_v59  ;;  %v7369_v56 = vcombine.high %v1258_v52, %v1274_v53  ;;  %v1290_v59 = vld [vmem:[%s8383_s10 + $0x228] sm:$0xff]  ;;  %v1259_v53 = vld [vmem:[%s8383_s10 + $0x130] sm:$0xff] }
 0x2de   : > { %3171 = vmatprep.subr.bf16.mxu0 %v7395_v60  ;;  %3224 = vmatprep.subr.bf16.mxu1 %v7397_v61  ;;  %v1306_v60 = vld [vmem:[%s8383_s10 + $0x2a8] sm:$0xff]  ;;  %v7366_v61 = vcombine.low %v1257_v50, %v1273_v51 }
 0x2df   : > { %v7401_v1 = vcombine.high %v1290_v59, %v1306_v60  ;;  %v7400_v9 = vcombine.low %v1290_v59, %v1306_v60  ;;  %v1291_v60 = vld [vmem:[%s8383_s10 + $0x230] sm:$0xff] }
 0x2e0   : > { %3104 = vmatmul.mubr.bf16.gmra.mrb[4].mxu0 %v8515_v0  ;;  %3157 = vmatmul.mubr.bf16.gmra.mrb[4].mxu1 %v8515_v0 }
 0x2e1   : > { %3172 = vmatpush1.bf16.msra.mxu0 %v7394_v3  ;;  %3225 = vmatpush1.bf16.msra.mxu1 %v7396_v4  ;;  %v1337_v3 = vld [vmem:[%s8383_s10 + $0x3a0] sm:$0xff]  ;;  %v1322_v4 = vld [vmem:[%s8383_s10 + $0x328] sm:$0xff] }
 0x2e2   : > { %3173 = vmatprep.subr.bf16.mxu0 %v7427_v5  ;;  %3226 = vmatprep.subr.bf16.mxu1 %v7429_v8  ;;  %v1338_v5 = vld [vmem:[%s8383_s10 + $0x3a8] sm:$0xff]  ;;  %v7398_v8 = vcombine.low %v1289_v57, %v1305_v58  ;;  %v7431_v10 = vcombine.high %v1321_v2, %v1337_v3 }
 0x2e3   : > { %3199 = vmatprep.mubr.bf16.mxu0 %v11110_v42  ;;  %3252 = vmatprep.mubr.bf16.mxu1 %v11110_v42  ;;  %v7433_v11 = vcombine.high %v1322_v4, %v1338_v5  ;;  %v7432_v17 = vcombine.low %v1322_v4, %v1338_v5  ;;  %v1323_v5 = vld [vmem:[%s8383_s10 + $0x330] sm:$0xff] }
 0x2e5   : > { %3174 = vmatpush1.bf16.msra.mxu0 %v7426_v13  ;;  %3227 = vmatpush1.bf16.msra.mxu1 %v7428_v14  ;;  %v1369_v13 = vld [vmem:[%s8383_s10 + $0x4a0] sm:$0xff]  ;;  %v1354_v14 = vld [vmem:[%s8383_s10 + $0x428] sm:$0xff] }
 0x2e6   : > { %3175 = vmatprep.subr.bf16.mxu0 %v7459_v15  ;;  %3228 = vmatprep.subr.bf16.mxu1 %v7461_v16  ;;  %v1370_v15 = vld [vmem:[%s8383_s10 + $0x4a8] sm:$0xff]  ;;  %v7430_v16 = vcombine.low %v1321_v2, %v1337_v3  ;;  %v7463_v21 = vcombine.high %v1353_v12, %v1369_v13 }
 0x2e7   : > { %v7465_v22 = vcombine.high %v1354_v14, %v1370_v15  ;;  %v7464_v28 = vcombine.low %v1354_v14, %v1370_v15  ;;  %v1355_v15 = vld [vmem:[%s8383_s10 + $0x430] sm:$0xff] }
 0x2e9   : > { %3176 = vmatpush1.bf16.msra.mxu0 %v7458_v24  ;;  %3229 = vmatpush1.bf16.msra.mxu1 %v7460_v25  ;;  %v1401_v24 = vld [vmem:[%s8383_s10 + $0x5a0] sm:$0xff]  ;;  %v1386_v25 = vld [vmem:[%s8383_s10 + $0x528] sm:$0xff] }
 0x2ea   : > { %3177 = vmatprep.subr.bf16.mxu0 %v7491_v26  ;;  %3230 = vmatprep.subr.bf16.mxu1 %v7493_v27  ;;  %v1402_v26 = vld [vmem:[%s8383_s10 + $0x5a8] sm:$0xff]  ;;  %v7462_v27 = vcombine.low %v1353_v12, %v1369_v13  ;;  %v7495_v20 = vcombine.high %v1385_v23, %v1401_v24 }
 0x2eb   : > { %v7497_v6 = vcombine.high %v1386_v25, %v1402_v26  ;;  %v7496_v32 = vcombine.low %v1386_v25, %v1402_v26  ;;  %v1387_v26 = vld [vmem:[%s8383_s10 + $0x530] sm:$0xff] }
 0x2ed   : > { %3178 = vmatpush1.bf16.msra.mxu0 %v7490_v7  ;;  %3231 = vmatpush1.bf16.msra.mxu1 %v7492_v29  ;;  %v1433_v7 = vld [vmem:[%s8383_s10 + $0x6a0] sm:$0xff]  ;;  %v1418_v29 = vld [vmem:[%s8383_s10 + $0x628] sm:$0xff] }
 0x2ee   : > { %3179 = vmatprep.subr.bf16.mxu0 %v7523_v30  ;;  %3232 = vmatprep.subr.bf16.mxu1 %v7525_v31  ;;  %v1434_v30 = vld [vmem:[%s8383_s10 + $0x6a8] sm:$0xff]  ;;  %v7494_v31 = vcombine.low %v1385_v23, %v1401_v24  ;;  %v7527_v33 = vcombine.high %v1417_v18, %v1433_v7 }
 0x2ef   : > { %v7529_v34 = vcombine.high %v1418_v29, %v1434_v30  ;;  %v7528_v40 = vcombine.low %v1418_v29, %v1434_v30  ;;  %v1419_v30 = vld [vmem:[%s8383_s10 + $0x630] sm:$0xff] }
 0x2f1   : > { %3180 = vmatpush1.bf16.msra.mxu0 %v7522_v36  ;;  %3233 = vmatpush1.bf16.msra.mxu1 %v7524_v37  ;;  %v1465_v36 = vld [vmem:[%s8383_s10 + $0x7a0] sm:$0xff]  ;;  %v1450_v37 = vld [vmem:[%s8383_s10 + $0x728] sm:$0xff] }
 0x2f2   : > { %3181 = vmatprep.subr.bf16.mxu0 %v7555_v38  ;;  %3234 = vmatprep.subr.bf16.mxu1 %v7557_v39  ;;  %v1466_v38 = vld [vmem:[%s8383_s10 + $0x7a8] sm:$0xff]  ;;  %v7526_v39 = vcombine.low %v1417_v18, %v1433_v7  ;;  %v7559_v41 = vcombine.high %v1449_v35, %v1465_v36 }
 0x2f3   : > { %v7561_v43 = vcombine.high %v1450_v37, %v1466_v38  ;;  %v7560_v50 = vcombine.low %v1450_v37, %v1466_v38  ;;  %v1451_v38 = vld [vmem:[%s8383_s10 + $0x730] sm:$0xff] }
 0x2f5   : > { %3182 = vmatpush1.bf16.msra.mxu0 %v7554_v45  ;;  %3235 = vmatpush1.bf16.msra.mxu1 %v7556_v47  ;;  %v1243_v45 = vld [vmem:[%s8383_s10 + $0xb0] sm:$0xff]  ;;  %v1228_v47 = vld [vmem:[%s8383_s10 + $0x38] sm:$0xff] }
 0x2f6   : > { %3273 = vmatprep.subr.bf16.mxu0 %v7335_v48  ;;  %3326 = vmatprep.subr.bf16.mxu1 %v7337_v49  ;;  %v1244_v48 = vld [vmem:[%s8383_s10 + $0xb8] sm:$0xff]  ;;  %v7558_v49 = vcombine.low %v1449_v35, %v1465_v36  ;;  %v7339_v51 = vcombine.high %v1227_v44, %v1243_v45 }
 0x2f7   : > { %v7341_v52 = vcombine.high %v1228_v47, %v1244_v48  ;;  %v7340_v57 = vcombine.low %v1228_v47, %v1244_v48  ;;  %v1229_v48 = vld [vmem:[%s8383_s10 + $0x40] sm:$0xff] }
 0x2f8   : > { %3200 = vmatmul.mubr.bf16.vlgmr.msra.gmra.mrb[8].mxu0 %v8501_v46  ;;  %3253 = vmatmul.mubr.bf16.vlgmr.msra.gmra.mrb[8].mxu1 %v8501_v46 }
 0x2f9   : > { %3274 = vmatpush1.bf16.msra.mxu0 %v7334_v19  ;;  %3327 = vmatpush1.bf16.msra.mxu1 %v7336_v54  ;;  %v1275_v19 = vld [vmem:[%s8383_s10 + $0x1b0] sm:$0xff]  ;;  %v1260_v54 = vld [vmem:[%s8383_s10 + $0x138] sm:$0xff] }
 0x2fa   : > { %3275 = vmatprep.subr.bf16.mxu0 %v7367_v55  ;;  %3328 = vmatprep.subr.bf16.mxu1 %v7369_v56  ;;  %v1276_v55 = vld [vmem:[%s8383_s10 + $0x1b8] sm:$0xff]  ;;  %v7338_v56 = vcombine.low %v1227_v44, %v1243_v45  ;;  %v7371_v58 = vcombine.high %v1259_v53, %v1275_v19 }
 0x2fb   : > { %3209 = vmatprep.mubr.bf16.mxu0 %v11110_v42  ;;  %3262 = vmatprep.mubr.bf16.mxu1 %v11110_v42  ;;  %v7373_v59 = vcombine.high %v1260_v54, %v1276_v55  ;;  %v7372_v2 = vcombine.low %v1260_v54, %v1276_v55  ;;  %v1261_v55 = vld [vmem:[%s8383_s10 + $0x140] sm:$0xff] }
 0x2fd   : > { %3276 = vmatpush1.bf16.msra.mxu0 %v7366_v61  ;;  %3329 = vmatpush1.bf16.msra.mxu1 %v7368_v62  ;;  %v1307_v61 = vld [vmem:[%s8383_s10 + $0x2b0] sm:$0xff]  ;;  %v1292_v62 = vld [vmem:[%s8383_s10 + $0x238] sm:$0xff] }
 0x2fe   : > { %3277 = vmatprep.subr.bf16.mxu0 %v7399_v63  ;;  %3330 = vmatprep.subr.bf16.mxu1 %v7401_v1  ;;  %v1308_v63 = vld [vmem:[%s8383_s10 + $0x2b8] sm:$0xff]  ;;  %v7370_v1 = vcombine.low %v1259_v53, %v1275_v19  ;;  %v7403_v3 = vcombine.high %v1291_v60, %v1307_v61 }
 0x2ff   : > { %v7405_v4 = vcombine.high %v1292_v62, %v1308_v63  ;;  %v7404_v12 = vcombine.low %v1292_v62, %v1308_v63  ;;  %v1293_v63 = vld [vmem:[%s8383_s10 + $0x240] sm:$0xff] }
 0x300   : > { %3210 = vmatmul.mubr.bf16.gmra.mrb[12].mxu0 %v8515_v0  ;;  %3263 = vmatmul.mubr.bf16.gmra.mrb[12].mxu1 %v8515_v0 }
 0x301   : > { %3278 = vmatpush1.bf16.msra.mxu0 %v7398_v8  ;;  %3331 = vmatpush1.bf16.msra.mxu1 %v7400_v9  ;;  %v1339_v8 = vld [vmem:[%s8383_s10 + $0x3b0] sm:$0xff]  ;;  %v1324_v9 = vld [vmem:[%s8383_s10 + $0x338] sm:$0xff] }
 0x302   : > { %3279 = vmatprep.subr.bf16.mxu0 %v7431_v10  ;;  %3332 = vmatprep.subr.bf16.mxu1 %v7433_v11  ;;  %v1340_v10 = vld [vmem:[%s8383_s10 + $0x3b8] sm:$0xff]  ;;  %v7402_v11 = vcombine.low %v1291_v60, %v1307_v61  ;;  %v7435_v13 = vcombine.high %v1323_v5, %v1339_v8 }
 0x303   : > { %3305 = vmatprep.mubr.bf16.mxu0 %v11110_v42  ;;  %3358 = vmatprep.mubr.bf16.mxu1 %v11110_v42  ;;  %v7437_v14 = vcombine.high %v1324_v9, %v1340_v10  ;;  %v7436_v23 = vcombine.low %v1324_v9, %v1340_v10  ;;  %v1325_v10 = vld [vmem:[%s8383_s10 + $0x340] sm:$0xff] }
 0x305   : > { %3280 = vmatpush1.bf16.msra.mxu0 %v7430_v16  ;;  %3333 = vmatpush1.bf16.msra.mxu1 %v7432_v17  ;;  %v1371_v16 = vld [vmem:[%s8383_s10 + $0x4b0] sm:$0xff]  ;;  %v1356_v17 = vld [vmem:[%s8383_s10 + $0x438] sm:$0xff] }
 0x306   : > { %3281 = vmatprep.subr.bf16.mxu0 %v7463_v21  ;;  %3334 = vmatprep.subr.bf16.mxu1 %v7465_v22  ;;  %v1372_v21 = vld [vmem:[%s8383_s10 + $0x4b8] sm:$0xff]  ;;  %v7434_v22 = vcombine.low %v1323_v5, %v1339_v8  ;;  %v7467_v24 = vcombine.high %v1355_v15, %v1371_v16 }
 0x307   : > { %v7469_v25 = vcombine.high %v1356_v17, %v1372_v21  ;;  %v7468_v18 = vcombine.low %v1356_v17, %v1372_v21  ;;  %v1357_v21 = vld [vmem:[%s8383_s10 + $0x440] sm:$0xff] }
 0x309   : > { %3282 = vmatpush1.bf16.msra.mxu0 %v7462_v27  ;;  %3335 = vmatpush1.bf16.msra.mxu1 %v7464_v28  ;;  %v1403_v27 = vld [vmem:[%s8383_s10 + $0x5b0] sm:$0xff]  ;;  %v1388_v28 = vld [vmem:[%s8383_s10 + $0x538] sm:$0xff] }
 0x30a   : > { %3283 = vmatprep.subr.bf16.mxu0 %v7495_v20  ;;  %3336 = vmatprep.subr.bf16.mxu1 %v7497_v6  ;;  %v1404_v20 = vld [vmem:[%s8383_s10 + $0x5b8] sm:$0xff]  ;;  %v7466_v6 = vcombine.low %v1355_v15, %v1371_v16  ;;  %v7499_v7 = vcombine.high %v1387_v26, %v1403_v27 }
 0x30b   : > { %v7501_v29 = vcombine.high %v1388_v28, %v1404_v20  ;;  %v7500_v35 = vcombine.low %v1388_v28, %v1404_v20  ;;  %v1389_v20 = vld [vmem:[%s8383_s10 + $0x540] sm:$0xff] }
 0x30d   : > { %3284 = vmatpush1.bf16.msra.mxu0 %v7494_v31  ;;  %3337 = vmatpush1.bf16.msra.mxu1 %v7496_v32  ;;  %v1435_v31 = vld [vmem:[%s8383_s10 + $0x6b0] sm:$0xff]  ;;  %v1420_v32 = vld [vmem:[%s8383_s10 + $0x638] sm:$0xff] }
 0x30e   : > { %3285 = vmatprep.subr.bf16.mxu0 %v7527_v33  ;;  %3338 = vmatprep.subr.bf16.mxu1 %v7529_v34  ;;  %v1436_v33 = vld [vmem:[%s8383_s10 + $0x6b8] sm:$0xff]  ;;  %v7498_v34 = vcombine.low %v1387_v26, %v1403_v27  ;;  %v7531_v36 = vcombine.high %v1419_v30, %v1435_v31 }
 0x30f   : > { %v7533_v37 = vcombine.high %v1420_v32, %v1436_v33  ;;  %v7532_v44 = vcombine.low %v1420_v32, %v1436_v33  ;;  %v1421_v33 = vld [vmem:[%s8383_s10 + $0x640] sm:$0xff] }
 0x311   : > { %3286 = vmatpush1.bf16.msra.mxu0 %v7526_v39  ;;  %3339 = vmatpush1.bf16.msra.mxu1 %v7528_v40  ;;  %v1467_v39 = vld [vmem:[%s8383_s10 + $0x7b0] sm:$0xff]  ;;  %v1452_v40 = vld [vmem:[%s8383_s10 + $0x738] sm:$0xff] }
 0x312   : > { %3287 = vmatprep.subr.bf16.mxu0 %v7559_v41  ;;  %3340 = vmatprep.subr.bf16.mxu1 %v7561_v43  ;;  %v1468_v41 = vld [vmem:[%s8383_s10 + $0x7b8] sm:$0xff]  ;;  %v7530_v43 = vcombine.low %v1419_v30, %v1435_v31  ;;  %v7563_v45 = vcombine.high %v1451_v38, %v1467_v39 }
 0x313   : > { %v7565_v47 = vcombine.high %v1452_v40, %v1468_v41  ;;  %v7564_v53 = vcombine.low %v1452_v40, %v1468_v41  ;;  %v1453_v41 = vld [vmem:[%s8383_s10 + $0x740] sm:$0xff] }
 0x315   : > { %3288 = vmatpush1.bf16.msra.mxu0 %v7558_v49  ;;  %3341 = vmatpush1.bf16.msra.mxu1 %v7560_v50  ;;  %v1245_v49 = vld [vmem:[%s8383_s10 + $0xc0] sm:$0xff]  ;;  %v1230_v50 = vld [vmem:[%s8383_s10 + $0x48] sm:$0xff] }
 0x316   : > { %3379 = vmatprep.subr.bf16.mxu0 %v7339_v51  ;;  %3432 = vmatprep.subr.bf16.mxu1 %v7341_v52  ;;  %v1246_v51 = vld [vmem:[%s8383_s10 + $0xc8] sm:$0xff]  ;;  %v7562_v52 = vcombine.low %v1451_v38, %v1467_v39  ;;  %v7343_v19 = vcombine.high %v1229_v48, %v1245_v49 }
 0x317   : > { %v7345_v54 = vcombine.high %v1230_v50, %v1246_v51  ;;  %v7344_v60 = vcombine.low %v1230_v50, %v1246_v51  ;;  %v1231_v51 = vld [vmem:[%s8383_s10 + $0x50] sm:$0xff] }
 0x318   : > { %3306 = vmatmul.mubr.bf16.vlgmr.msra.gmra.mrb[16].mxu0 %v8501_v46  ;;  %3359 = vmatmul.mubr.bf16.vlgmr.msra.gmra.mrb[16].mxu1 %v8501_v46 }
 0x319   : > { %3380 = vmatpush1.bf16.msra.mxu0 %v7338_v56  ;;  %3433 = vmatpush1.bf16.msra.mxu1 %v7340_v57  ;;  %v1277_v56 = vld [vmem:[%s8383_s10 + $0x1c0] sm:$0xff]  ;;  %v1262_v57 = vld [vmem:[%s8383_s10 + $0x148] sm:$0xff] }
 0x31a   : > { %3381 = vmatprep.subr.bf16.mxu0 %v7371_v58  ;;  %3434 = vmatprep.subr.bf16.mxu1 %v7373_v59  ;;  %v1278_v58 = vld [vmem:[%s8383_s10 + $0x1c8] sm:$0xff]  ;;  %v7342_v59 = vcombine.low %v1229_v48, %v1245_v49  ;;  %v7375_v61 = vcombine.high %v1261_v55, %v1277_v56 }
 0x31b   : > { %3315 = vmatprep.mubr.bf16.mxu0 %v11110_v42  ;;  %3368 = vmatprep.mubr.bf16.mxu1 %v11110_v42  ;;  %v7377_v62 = vcombine.high %v1262_v57, %v1278_v58  ;;  %v7376_v5 = vcombine.low %v1262_v57, %v1278_v58  ;;  %v1263_v58 = vld [vmem:[%s8383_s10 + $0x150] sm:$0xff] }
 0x31d   : > { %3382 = vmatpush1.bf16.msra.mxu0 %v7370_v1  ;;  %3435 = vmatpush1.bf16.msra.mxu1 %v7372_v2  ;;  %v1309_v1 = vld [vmem:[%s8383_s10 + $0x2c0] sm:$0xff]  ;;  %v1294_v2 = vld [vmem:[%s8383_s10 + $0x248] sm:$0xff] }
 0x31e   : > { %3383 = vmatprep.subr.bf16.mxu0 %v7403_v3  ;;  %3436 = vmatprep.subr.bf16.mxu1 %v7405_v4  ;;  %v1310_v3 = vld [vmem:[%s8383_s10 + $0x2c8] sm:$0xff]  ;;  %v7374_v4 = vcombine.low %v1261_v55, %v1277_v56  ;;  %v7407_v8 = vcombine.high %v1293_v63, %v1309_v1 }
 0x31f   : > { %v7409_v9 = vcombine.high %v1294_v2, %v1310_v3  ;;  %v7408_v15 = vcombine.low %v1294_v2, %v1310_v3  ;;  %v1295_v3 = vld [vmem:[%s8383_s10 + $0x250] sm:$0xff] }
 0x320   : > { %3316 = vmatmul.mubr.bf16.gmra.mrb[20].mxu0 %v8515_v0  ;;  %3369 = vmatmul.mubr.bf16.gmra.mrb[20].mxu1 %v8515_v0 }
 0x321   : > { %3384 = vmatpush1.bf16.msra.mxu0 %v7402_v11  ;;  %3437 = vmatpush1.bf16.msra.mxu1 %v7404_v12  ;;  %v1341_v11 = vld [vmem:[%s8383_s10 + $0x3c0] sm:$0xff]  ;;  %v1326_v12 = vld [vmem:[%s8383_s10 + $0x348] sm:$0xff] }
 0x322   : > { %3385 = vmatprep.subr.bf16.mxu0 %v7435_v13  ;;  %3438 = vmatprep.subr.bf16.mxu1 %v7437_v14  ;;  %v1342_v13 = vld [vmem:[%s8383_s10 + $0x3c8] sm:$0xff]  ;;  %v7406_v14 = vcombine.low %v1293_v63, %v1309_v1  ;;  %v7439_v16 = vcombine.high %v1325_v10, %v1341_v11 }
 0x323   : > { %3411 = vmatprep.mubr.bf16.mxu0 %v11110_v42  ;;  %3464 = vmatprep.mubr.bf16.mxu1 %v11110_v42  ;;  %v7441_v17 = vcombine.high %v1326_v12, %v1342_v13  ;;  %v7440_v26 = vcombine.low %v1326_v12, %v1342_v13  ;;  %v1327_v13 = vld [vmem:[%s8383_s10 + $0x350] sm:$0xff] }
 0x325   : > { %3386 = vmatpush1.bf16.msra.mxu0 %v7434_v22  ;;  %3439 = vmatpush1.bf16.msra.mxu1 %v7436_v23  ;;  %v1373_v22 = vld [vmem:[%s8383_s10 + $0x4c0] sm:$0xff]  ;;  %v1358_v23 = vld [vmem:[%s8383_s10 + $0x448] sm:$0xff] }
 0x326   : > { %3387 = vmatprep.subr.bf16.mxu0 %v7467_v24  ;;  %3440 = vmatprep.subr.bf16.mxu1 %v7469_v25  ;;  %v1374_v24 = vld [vmem:[%s8383_s10 + $0x4c8] sm:$0xff]  ;;  %v7438_v25 = vcombine.low %v1325_v10, %v1341_v11  ;;  %v7471_v27 = vcombine.high %v1357_v21, %v1373_v22 }
 0x327   : > { %v7473_v28 = vcombine.high %v1358_v23, %v1374_v24  ;;  %v7472_v30 = vcombine.low %v1358_v23, %v1374_v24  ;;  %v1359_v24 = vld [vmem:[%s8383_s10 + $0x450] sm:$0xff] }
 0x329   : > { %3388 = vmatpush1.bf16.msra.mxu0 %v7466_v6  ;;  %3441 = vmatpush1.bf16.msra.mxu1 %v7468_v18  ;;  %v1405_v6 = vld [vmem:[%s8383_s10 + $0x5c0] sm:$0xff]  ;;  %v1390_v18 = vld [vmem:[%s8383_s10 + $0x548] sm:$0xff] }
 0x32a   : > { %3389 = vmatprep.subr.bf16.mxu0 %v7499_v7  ;;  %3442 = vmatprep.subr.bf16.mxu1 %v7501_v29  ;;  %v1406_v7 = vld [vmem:[%s8383_s10 + $0x5c8] sm:$0xff]  ;;  %v7470_v29 = vcombine.low %v1357_v21, %v1373_v22  ;;  %v7503_v31 = vcombine.high %v1389_v20, %v1405_v6 }
 0x32b   : > { %v7505_v32 = vcombine.high %v1390_v18, %v1406_v7  ;;  %v7504_v38 = vcombine.low %v1390_v18, %v1406_v7  ;;  %v1391_v7 = vld [vmem:[%s8383_s10 + $0x550] sm:$0xff] }
 0x32d   : > { %3390 = vmatpush1.bf16.msra.mxu0 %v7498_v34  ;;  %3443 = vmatpush1.bf16.msra.mxu1 %v7500_v35  ;;  %v1437_v34 = vld [vmem:[%s8383_s10 + $0x6c0] sm:$0xff]  ;;  %v1422_v35 = vld [vmem:[%s8383_s10 + $0x648] sm:$0xff] }
 0x32e   : > { %3391 = vmatprep.subr.bf16.mxu0 %v7531_v36  ;;  %3444 = vmatprep.subr.bf16.mxu1 %v7533_v37  ;;  %v1438_v36 = vld [vmem:[%s8383_s10 + $0x6c8] sm:$0xff]  ;;  %v7502_v37 = vcombine.low %v1389_v20, %v1405_v6  ;;  %v7535_v39 = vcombine.high %v1421_v33, %v1437_v34 }
 0x32f   : > { %v7537_v40 = vcombine.high %v1422_v35, %v1438_v36  ;;  %v7536_v48 = vcombine.low %v1422_v35, %v1438_v36  ;;  %v1423_v36 = vld [vmem:[%s8383_s10 + $0x650] sm:$0xff] }
 0x331   : > { %3392 = vmatpush1.bf16.msra.mxu0 %v7530_v43  ;;  %3445 = vmatpush1.bf16.msra.mxu1 %v7532_v44  ;;  %v1469_v43 = vld [vmem:[%s8383_s10 + $0x7c0] sm:$0xff]  ;;  %v1454_v44 = vld [vmem:[%s8383_s10 + $0x748] sm:$0xff] }
 0x332   : > { %3393 = vmatprep.subr.bf16.mxu0 %v7563_v45  ;;  %3446 = vmatprep.subr.bf16.mxu1 %v7565_v47  ;;  %v1470_v45 = vld [vmem:[%s8383_s10 + $0x7c8] sm:$0xff]  ;;  %v7534_v47 = vcombine.low %v1421_v33, %v1437_v34  ;;  %v7567_v49 = vcombine.high %v1453_v41, %v1469_v43 }
 0x333   : > { %v7569_v50 = vcombine.high %v1454_v44, %v1470_v45  ;;  %v7568_v55 = vcombine.low %v1454_v44, %v1470_v45  ;;  %v1455_v45 = vld [vmem:[%s8383_s10 + $0x750] sm:$0xff] }
 0x335   : > { %3394 = vmatpush1.bf16.msra.mxu0 %v7562_v52  ;;  %3447 = vmatpush1.bf16.msra.mxu1 %v7564_v53  ;;  %v1247_v52 = vld [vmem:[%s8383_s10 + $0xd0] sm:$0xff]  ;;  %v1232_v53 = vld [vmem:[%s8383_s10 + $0x58] sm:$0xff] }
 0x336   : > { %3485 = vmatprep.subr.bf16.mxu0 %v7343_v19  ;;  %3538 = vmatprep.subr.bf16.mxu1 %v7345_v54  ;;  %v1248_v19 = vld [vmem:[%s8383_s10 + $0xd8] sm:$0xff]  ;;  %v7566_v54 = vcombine.low %v1453_v41, %v1469_v43  ;;  %v7347_v56 = vcombine.high %v1231_v51, %v1247_v52 }
 0x337   : > { %v7349_v57 = vcombine.high %v1232_v53, %v1248_v19  ;;  %v7348_v63 = vcombine.low %v1232_v53, %v1248_v19  ;;  %v1233_v19 = vld [vmem:[%s8383_s10 + $0x60] sm:$0xff] }
 0x338   : > { %3412 = vmatmul.mubr.bf16.vlgmr.msra.gmra.mrb[24].mxu0 %v8501_v46  ;;  %3465 = vmatmul.mubr.bf16.vlgmr.msra.gmra.mrb[24].mxu1 %v8501_v46 }
 0x339   : > { %3486 = vmatpush1.bf16.msra.mxu0 %v7342_v59  ;;  %3539 = vmatpush1.bf16.msra.mxu1 %v7344_v60  ;;  %v1279_v59 = vld [vmem:[%s8383_s10 + $0x1d0] sm:$0xff]  ;;  %v1264_v60 = vld [vmem:[%s8383_s10 + $0x158] sm:$0xff] }
 0x33a   : > { %3487 = vmatprep.subr.bf16.mxu0 %v7375_v61  ;;  %3540 = vmatprep.subr.bf16.mxu1 %v7377_v62  ;;  %v1280_v61 = vld [vmem:[%s8383_s10 + $0x1d8] sm:$0xff]  ;;  %v7346_v62 = vcombine.low %v1231_v51, %v1247_v52  ;;  %v7379_v1 = vcombine.high %v1263_v58, %v1279_v59 }
 0x33b   : > { %3421 = vmatprep.mubr.bf16.mxu0 %v11110_v42  ;;  %3474 = vmatprep.mubr.bf16.mxu1 %v11110_v42  ;;  %v7381_v2 = vcombine.high %v1264_v60, %v1280_v61  ;;  %v7380_v10 = vcombine.low %v1264_v60, %v1280_v61  ;;  %v1265_v61 = vld [vmem:[%s8383_s10 + $0x160] sm:$0xff] }
 0x33d   : > { %3488 = vmatpush1.bf16.msra.mxu0 %v7374_v4  ;;  %3541 = vmatpush1.bf16.msra.mxu1 %v7376_v5  ;;  %v1311_v4 = vld [vmem:[%s8383_s10 + $0x2d0] sm:$0xff]  ;;  %v1296_v5 = vld [vmem:[%s8383_s10 + $0x258] sm:$0xff] }
 0x33e   : > { %3489 = vmatprep.subr.bf16.mxu0 %v7407_v8  ;;  %3542 = vmatprep.subr.bf16.mxu1 %v7409_v9  ;;  %v1312_v8 = vld [vmem:[%s8383_s10 + $0x2d8] sm:$0xff]  ;;  %v7378_v9 = vcombine.low %v1263_v58, %v1279_v59  ;;  %v7411_v11 = vcombine.high %v1295_v3, %v1311_v4 }
 0x33f   : > { %v7413_v12 = vcombine.high %v1296_v5, %v1312_v8  ;;  %v7412_v21 = vcombine.low %v1296_v5, %v1312_v8  ;;  %v1297_v8 = vld [vmem:[%s8383_s10 + $0x260] sm:$0xff] }
 0x340   : > { %3422 = vmatmul.mubr.bf16.gmra.mrb[28].mxu0 %v8515_v0  ;;  %3475 = vmatmul.mubr.bf16.gmra.mrb[28].mxu1 %v8515_v0 }
 0x341   : > { %3490 = vmatpush1.bf16.msra.mxu0 %v7406_v14  ;;  %3543 = vmatpush1.bf16.msra.mxu1 %v7408_v15  ;;  %v1343_v14 = vld [vmem:[%s8383_s10 + $0x3d0] sm:$0xff]  ;;  %v1328_v15 = vld [vmem:[%s8383_s10 + $0x358] sm:$0xff] }
 0x342   : > { %3491 = vmatprep.subr.bf16.mxu0 %v7439_v16  ;;  %3544 = vmatprep.subr.bf16.mxu1 %v7441_v17  ;;  %v1344_v16 = vld [vmem:[%s8383_s10 + $0x3d8] sm:$0xff]  ;;  %v7410_v17 = vcombine.low %v1295_v3, %v1311_v4  ;;  %v7443_v22 = vcombine.high %v1327_v13, %v1343_v14 }
 0x343   : > { %3517 = vmatprep.mubr.bf16.mxu0 %v11110_v42  ;;  %3570 = vmatprep.mubr.bf16.mxu1 %v11110_v42  ;;  %v7445_v23 = vcombine.high %v1328_v15, %v1344_v16  ;;  %v7444_v20 = vcombine.low %v1328_v15, %v1344_v16  ;;  %v1329_v16 = vld [vmem:[%s8383_s10 + $0x360] sm:$0xff] }
 0x345   : > { %3492 = vmatpush1.bf16.msra.mxu0 %v7438_v25  ;;  %3545 = vmatpush1.bf16.msra.mxu1 %v7440_v26  ;;  %v1375_v25 = vld [vmem:[%s8383_s10 + $0x4d0] sm:$0xff]  ;;  %v1360_v26 = vld [vmem:[%s8383_s10 + $0x458] sm:$0xff] }
 0x346   : > { %3493 = vmatprep.subr.bf16.mxu0 %v7471_v27  ;;  %3546 = vmatprep.subr.bf16.mxu1 %v7473_v28  ;;  %v1376_v27 = vld [vmem:[%s8383_s10 + $0x4d8] sm:$0xff]  ;;  %v7442_v28 = vcombine.low %v1327_v13, %v1343_v14  ;;  %v7475_v6 = vcombine.high %v1359_v24, %v1375_v25 }
 0x347   : > { %v7477_v18 = vcombine.high %v1360_v26, %v1376_v27  ;;  %v7476_v33 = vcombine.low %v1360_v26, %v1376_v27  ;;  %v1361_v27 = vld [vmem:[%s8383_s10 + $0x460] sm:$0xff] }
 0x349   : > { %3494 = vmatpush1.bf16.msra.mxu0 %v7470_v29  ;;  %3547 = vmatpush1.bf16.msra.mxu1 %v7472_v30  ;;  %v1407_v29 = vld [vmem:[%s8383_s10 + $0x5d0] sm:$0xff]  ;;  %v1392_v30 = vld [vmem:[%s8383_s10 + $0x558] sm:$0xff] }
 0x34a   : > { %3495 = vmatprep.subr.bf16.mxu0 %v7503_v31  ;;  %3548 = vmatprep.subr.bf16.mxu1 %v7505_v32  ;;  %v1408_v31 = vld [vmem:[%s8383_s10 + $0x5d8] sm:$0xff]  ;;  %v7474_v32 = vcombine.low %v1359_v24, %v1375_v25  ;;  %v7507_v34 = vcombine.high %v1391_v7, %v1407_v29 }
 0x34b   : > { %v7509_v35 = vcombine.high %v1392_v30, %v1408_v31  ;;  %v7508_v41 = vcombine.low %v1392_v30, %v1408_v31  ;;  %v1393_v31 = vld [vmem:[%s8383_s10 + $0x560] sm:$0xff] }
 0x34d   : > { %3496 = vmatpush1.bf16.msra.mxu0 %v7502_v37  ;;  %3549 = vmatpush1.bf16.msra.mxu1 %v7504_v38  ;;  %v1439_v37 = vld [vmem:[%s8383_s10 + $0x6d0] sm:$0xff]  ;;  %v1424_v38 = vld [vmem:[%s8383_s10 + $0x658] sm:$0xff] }
 0x34e   : > { %3497 = vmatprep.subr.bf16.mxu0 %v7535_v39  ;;  %3550 = vmatprep.subr.bf16.mxu1 %v7537_v40  ;;  %v1440_v39 = vld [vmem:[%s8383_s10 + $0x6d8] sm:$0xff]  ;;  %v7506_v40 = vcombine.low %v1391_v7, %v1407_v29  ;;  %v7539_v43 = vcombine.high %v1423_v36, %v1439_v37 }
 0x34f   : > { %v7541_v44 = vcombine.high %v1424_v38, %v1440_v39  ;;  %v7540_v51 = vcombine.low %v1424_v38, %v1440_v39  ;;  %v1425_v39 = vld [vmem:[%s8383_s10 + $0x660] sm:$0xff] }
 0x351   : > { %3498 = vmatpush1.bf16.msra.mxu0 %v7534_v47  ;;  %3551 = vmatpush1.bf16.msra.mxu1 %v7536_v48  ;;  %v1471_v47 = vld [vmem:[%s8383_s10 + $0x7d0] sm:$0xff]  ;;  %v1456_v48 = vld [vmem:[%s8383_s10 + $0x758] sm:$0xff] }
 0x352   : > { %3499 = vmatprep.subr.bf16.mxu0 %v7567_v49  ;;  %3552 = vmatprep.subr.bf16.mxu1 %v7569_v50  ;;  %v1472_v49 = vld [vmem:[%s8383_s10 + $0x7d8] sm:$0xff]  ;;  %v7538_v50 = vcombine.low %v1423_v36, %v1439_v37  ;;  %v7571_v52 = vcombine.high %v1455_v45, %v1471_v47 }
 0x353   : > { %v7573_v53 = vcombine.high %v1456_v48, %v1472_v49  ;;  %v7572_v58 = vcombine.low %v1456_v48, %v1472_v49  ;;  %v1457_v49 = vld [vmem:[%s8383_s10 + $0x760] sm:$0xff] }
 0x355   : > { %3500 = vmatpush1.bf16.msra.mxu0 %v7566_v54  ;;  %3553 = vmatpush1.bf16.msra.mxu1 %v7568_v55  ;;  %v1249_v54 = vld [vmem:[%s8383_s10 + $0xe0] sm:$0xff]  ;;  %v1234_v55 = vld [vmem:[%s8383_s10 + $0x68] sm:$0xff] }
 0x356   : > { %3591 = vmatprep.subr.bf16.mxu0 %v7347_v56  ;;  %3644 = vmatprep.subr.bf16.mxu1 %v7349_v57  ;;  %v1250_v56 = vld [vmem:[%s8383_s10 + $0xe8] sm:$0xff]  ;;  %v7570_v57 = vcombine.low %v1455_v45, %v1471_v47  ;;  %v7351_v59 = vcombine.high %v1233_v19, %v1249_v54 }
 0x357   : > { %v7353_v60 = vcombine.high %v1234_v55, %v1250_v56  ;;  %v7352_v3 = vcombine.low %v1234_v55, %v1250_v56 }
 0x358   : > { %3518 = vmatmul.mubr.bf16.vlgmr.msra.gmra.mrb[32].mxu0 %v8501_v46  ;;  %3571 = vmatmul.mubr.bf16.vlgmr.msra.gmra.mrb[32].mxu1 %v8501_v46 }
 0x359   : > { %3592 = vmatpush1.bf16.msra.mxu0 %v7346_v62  ;;  %3645 = vmatpush1.bf16.msra.mxu1 %v7348_v63  ;;  %v1281_v62 = vld [vmem:[%s8383_s10 + $0x1e0] sm:$0xff]  ;;  %v1266_v63 = vld [vmem:[%s8383_s10 + $0x168] sm:$0xff] }
 0x35a   : > { %3593 = vmatprep.subr.bf16.mxu0 %v7379_v1  ;;  %3646 = vmatprep.subr.bf16.mxu1 %v7381_v2  ;;  %v1282_v1 = vld [vmem:[%s8383_s10 + $0x1e8] sm:$0xff]  ;;  %v7350_v2 = vcombine.low %v1233_v19, %v1249_v54  ;;  %v7383_v4 = vcombine.high %v1265_v61, %v1281_v62 }
 0x35b   : > { %3527 = vmatprep.mubr.bf16.mxu0 %v11110_v42  ;;  %3580 = vmatprep.mubr.bf16.mxu1 %v11110_v42  ;;  %v7385_v5 = vcombine.high %v1266_v63, %v1282_v1  ;;  %v7384_v13 = vcombine.low %v1266_v63, %v1282_v1  ;;  %v8746_v63 = vld [vmem:[%s8383_s10 + $0x170] sm:$0xff] }
 0x35d   : > { %3594 = vmatpush1.bf16.msra.mxu0 %v7378_v9  ;;  %3647 = vmatpush1.bf16.msra.mxu1 %v7380_v10  ;;  %v1313_v9 = vld [vmem:[%s8383_s10 + $0x2e0] sm:$0xff]  ;;  %v1298_v10 = vld [vmem:[%s8383_s10 + $0x268] sm:$0xff] }
 0x35e   : > { %3595 = vmatprep.subr.bf16.mxu0 %v7411_v11  ;;  %3648 = vmatprep.subr.bf16.mxu1 %v7413_v12  ;;  %v1314_v11 = vld [vmem:[%s8383_s10 + $0x2e8] sm:$0xff]  ;;  %v7382_v12 = vcombine.low %v1265_v61, %v1281_v62  ;;  %v7415_v14 = vcombine.high %v1297_v8, %v1313_v9 }
 0x35f   : > { %v7417_v15 = vcombine.high %v1298_v10, %v1314_v11  ;;  %v7416_v24 = vcombine.low %v1298_v10, %v1314_v11  ;;  %v8761_v10 = vld [vmem:[%s8383_s10 + $0x2f0] sm:$0xff]  ;;  %v8764_v11 = vld [vmem:[%s8383_s10 + $0x278] sm:$0xff] }
 0x360   : > { %3528 = vmatmul.mubr.bf16.gmra.mrb[36].mxu0 %v8515_v0  ;;  %3581 = vmatmul.mubr.bf16.gmra.mrb[36].mxu1 %v8515_v0 }
 0x361   : > { %3596 = vmatpush1.bf16.msra.mxu0 %v7410_v17  ;;  %3649 = vmatpush1.bf16.msra.mxu1 %v7412_v21  ;;  %v1345_v17 = vld [vmem:[%s8383_s10 + $0x3e0] sm:$0xff]  ;;  %v1330_v21 = vld [vmem:[%s8383_s10 + $0x368] sm:$0xff] }
 0x362   : > { %3597 = vmatprep.subr.bf16.mxu0 %v7443_v22  ;;  %3650 = vmatprep.subr.bf16.mxu1 %v7445_v23  ;;  %v1346_v22 = vld [vmem:[%s8383_s10 + $0x3e8] sm:$0xff]  ;;  %v7414_v23 = vcombine.low %v1297_v8, %v1313_v9  ;;  %v7447_v25 = vcombine.high %v1329_v16, %v1345_v17  ;;  %v8758_v9 = vld [vmem:[%s8383_s10 + $0x270] sm:$0xff] }
 0x363   : > { %3623 = vmatprep.mubr.bf16.mxu0 %v11110_v42  ;;  %3676 = vmatprep.mubr.bf16.mxu1 %v11110_v42  ;;  %v7449_v26 = vcombine.high %v1330_v21, %v1346_v22  ;;  %v7448_v7 = vcombine.low %v1330_v21, %v1346_v22 }
 0x365   : > { %3598 = vmatpush1.bf16.msra.mxu0 %v7442_v28  ;;  %3651 = vmatpush1.bf16.msra.mxu1 %v7444_v20  ;;  %v1377_v28 = vld [vmem:[%s8383_s10 + $0x4e0] sm:$0xff]  ;;  %v1362_v20 = vld [vmem:[%s8383_s10 + $0x468] sm:$0xff] }
 0x366   : > { %3599 = vmatprep.subr.bf16.mxu0 %v7475_v6  ;;  %3652 = vmatprep.subr.bf16.mxu1 %v7477_v18  ;;  %v1378_v6 = vld [vmem:[%s8383_s10 + $0x4e8] sm:$0xff]  ;;  %v7446_v18 = vcombine.low %v1329_v16, %v1345_v17  ;;  %v7479_v29 = vcombine.high %v1361_v27, %v1377_v28 }
 0x367   : > { %v7481_v30 = vcombine.high %v1362_v20, %v1378_v6  ;;  %v7480_v36 = vcombine.low %v1362_v20, %v1378_v6  ;;  %v8798_v20 = vld [vmem:[%s8383_s10 + $0x378] sm:$0xff] }
 0x368   : > { %v8801_v6 = vld [vmem:[%s8383_s10 + $0x3f8] sm:$0xff] }
 0x369   : > { %3600 = vmatpush1.bf16.msra.mxu0 %v7474_v32  ;;  %3653 = vmatpush1.bf16.msra.mxu1 %v7476_v33  ;;  %v1409_v32 = vld [vmem:[%s8383_s10 + $0x5e0] sm:$0xff]  ;;  %v1394_v33 = vld [vmem:[%s8383_s10 + $0x568] sm:$0xff] }
 0x36a   : > { %3601 = vmatprep.subr.bf16.mxu0 %v7507_v34  ;;  %3654 = vmatprep.subr.bf16.mxu1 %v7509_v35  ;;  %v1410_v34 = vld [vmem:[%s8383_s10 + $0x5e8] sm:$0xff]  ;;  %v7478_v35 = vcombine.low %v1361_v27, %v1377_v28  ;;  %v7511_v37 = vcombine.high %v1393_v31, %v1409_v32  ;;  %v7419_v28 = vcombine.high %v8758_v9, %v8761_v10 }
 0x36b   : > { %v7513_v38 = vcombine.high %v1394_v33, %v1410_v34  ;;  %v7512_v45 = vcombine.low %v1394_v33, %v1410_v34  ;;  %v8818_v33 = vld [vmem:[%s8383_s10 + $0x478] sm:$0xff] }
 0x36c   : > { %v8822_v34 = vld [vmem:[%s8383_s10 + $0x4f8] sm:$0xff] }
 0x36d   : > { %3602 = vmatpush1.bf16.msra.mxu0 %v7506_v40  ;;  %3655 = vmatpush1.bf16.msra.mxu1 %v7508_v41  ;;  %v1441_v40 = vld [vmem:[%s8383_s10 + $0x6e0] sm:$0xff]  ;;  %v1426_v41 = vld [vmem:[%s8383_s10 + $0x668] sm:$0xff] }
 0x36e   : > { %3603 = vmatprep.subr.bf16.mxu0 %v7539_v43  ;;  %3656 = vmatprep.subr.bf16.mxu1 %v7541_v44  ;;  %v1442_v43 = vld [vmem:[%s8383_s10 + $0x6e8] sm:$0xff]  ;;  %v7510_v44 = vcombine.low %v1393_v31, %v1409_v32  ;;  %v7543_v47 = vcombine.high %v1425_v39, %v1441_v40  ;;  %v7542_v19 = vcombine.low %v1425_v39, %v1441_v40  ;;  %v8812_v31 = vld [vmem:[%s8383_s10 + $0x470] sm:$0xff] }
 0x36f   : > { %v7545_v48 = vcombine.high %v1426_v41, %v1442_v43  ;;  %v7544_v54 = vcombine.low %v1426_v41, %v1442_v43  ;;  %v8815_v32 = vld [vmem:[%s8383_s10 + $0x4f0] sm:$0xff]  ;;  %v7452_v41 = vcombine.low %v8798_v20, %v8801_v6 }
 0x370   : > { %v8834_v39 = vld [vmem:[%s8383_s10 + $0x5f0] sm:$0xff] }
 0x371   : > { %3604 = vmatpush1.bf16.msra.mxu0 %v7538_v50  ;;  %3657 = vmatpush1.bf16.msra.mxu1 %v7540_v51  ;;  %v1473_v50 = vld [vmem:[%s8383_s10 + $0x7e0] sm:$0xff]  ;;  %v1458_v51 = vld [vmem:[%s8383_s10 + $0x768] sm:$0xff] }
 0x372   : > { %3605 = vmatprep.subr.bf16.mxu0 %v7571_v52  ;;  %3658 = vmatprep.subr.bf16.mxu1 %v7573_v53  ;;  %v1474_v52 = vld [vmem:[%s8383_s10 + $0x7e8] sm:$0xff]  ;;  %v1493_v53 = vlaneseq  ;;  %v7575_v55 = vcombine.high %v1457_v49, %v1473_v50  ;;  %v7574_v62 = vcombine.low %v1457_v49, %v1473_v50  ;;  %v8855_v49 = vld [vmem:[%s8383_s10 + $0x5f8] sm:$0xff] }
 0x373   : > { %v7577_v56 = vcombine.high %v1458_v51, %v1474_v52  ;;  %v7576_v1 = vcombine.low %v1458_v51, %v1474_v52  ;;  %v7484_v51 = vcombine.low %v8818_v33, %v8822_v34  ;;  %v7485_v52 = vcombine.high %v8818_v33, %v8822_v34 }
 0x374   : > { %v8743_v61 = vshrl.u32 %v1493_v53, 7 }
 0x375   : > { %3606 = vmatpush1.bf16.msra.mxu0 %v7570_v57  ;;  %3659 = vmatpush1.bf16.msra.mxu1 %v7572_v58  ;;  %v1235_v57 = vld [vmem:[%s8383_s10 + $0x70] sm:$0xff] }
 0x376   : > { %3697 = vmatprep.subr.bf16.mxu0 %v7351_v59  ;;  %3750 = vmatprep.subr.bf16.mxu1 %v7353_v60  ;;  %v1251_v58 = vld [vmem:[%s8383_s10 + $0xf0] sm:$0xff]  ;;  %v1236_v59 = vld [vmem:[%s8383_s10 + $0x78] sm:$0xff]  ;;  %v8779_v16 = vsub.s32 4, %v8743_v61  ;;  %v8858_v50 = vsub.s32 1, %v8743_v61 }
 0x377   : > { %v1252_v60 = vld [vmem:[%s8383_s10 + $0xf8] sm:$0xff]  ;;  %v7354_v17 = vcombine.low %v1235_v57, %v1251_v58 }
 0x378   : > { %3624 = vmatmul.mubr.bf16.vlgmr.msra.gmra.mrb[40].mxu0 %v8501_v46  ;;  %3677 = vmatmul.mubr.bf16.vlgmr.msra.gmra.mrb[40].mxu1 %v8501_v46  ;;  %v7357_v8 = vcombine.high %v1236_v59, %v1252_v60  ;;  %11131 = vst [vmem:[#allocation5_spill] sm:$0xff] %v8779_v16  ;;  %v7356_v21 = vcombine.low %v1236_v59, %v1252_v60  ;;  %v8889_v59 = vld [vmem:[%s8383_s10 + $0x678] sm:$0xff] }
 0x379   : > { %3698 = vmatpush1.bf16.msra.mxu0 %v7350_v2  ;;  %3751 = vmatpush1.bf16.msra.mxu1 %v7352_v3  ;;  %v7355_v2 = vcombine.high %v1235_v57, %v1251_v58  ;;  %v8749_v3 = vld [vmem:[%s8383_s10 + $0x1f0] sm:$0xff]  ;;  %v8892_v60 = vld [vmem:[%s8383_s10 + $0x6f8] sm:$0xff] }
 0x37a   : > { %3699 = vmatprep.subr.bf16.mxu0 %v7383_v4  ;;  %3752 = vmatprep.subr.bf16.mxu1 %v7385_v5  ;;  %v8752_v4 = vld [vmem:[%s8383_s10 + $0x178] sm:$0xff]  ;;  %v7386_v22 = vcombine.low %v8746_v63, %v8749_v3 }
 0x37b   : > { %3633 = vmatprep.mubr.bf16.mxu0 %v11110_v42  ;;  %3686 = vmatprep.mubr.bf16.mxu1 %v11110_v42  ;;  %v8755_v5 = vld [vmem:[%s8383_s10 + $0x1f8] sm:$0xff] }
 0x37c   : > { %v7389_v27 = vcombine.high %v8752_v4, %v8755_v5 }
 0x37d   : > { %3700 = vmatpush1.bf16.msra.mxu0 %v7382_v12  ;;  %3753 = vmatpush1.bf16.msra.mxu1 %v7384_v13  ;;  %v8767_v12 = vld [vmem:[%s8383_s10 + $0x2f8] sm:$0xff]  ;;  %v8770_v13 = vld [vmem:[%s8383_s10 + $0x370] sm:$0xff] }
 0x37e   : > { %3701 = vmatprep.subr.bf16.mxu0 %v7415_v14  ;;  %3754 = vmatprep.subr.bf16.mxu1 %v7417_v15  ;;  %v8773_v14 = vld [vmem:[%s8383_s10 + $0x3f0] sm:$0xff]  ;;  %v8776_v15 = vsub.s32 0, %v8743_v61 }
 0x37f   : > { %v7451_v40 = vcombine.high %v8770_v13, %v8773_v14 }
 0x380   : > { %3634 = vmatmul.mubr.bf16.gmra.mrb[44].mxu0 %v8515_v0  ;;  %3687 = vmatmul.mubr.bf16.gmra.mrb[44].mxu1 %v8515_v0  ;;  %11130 = vst [vmem:[#allocation4_spill] sm:$0xff] %v8776_v15 }
 0x381   : > { %3702 = vmatpush1.bf16.msra.mxu0 %v7414_v23  ;;  %3755 = vmatpush1.bf16.msra.mxu1 %v7416_v24  ;;  %v7387_v23 = vcombine.high %v8746_v63, %v8749_v3  ;;  %v8786_v24 = vld [vmem:[%s8376_s23] sm:$0x77] }
 0x382   : > { %3703 = vmatprep.subr.bf16.mxu0 %v7447_v25  ;;  %3756 = vmatprep.subr.bf16.mxu1 %v7449_v26  ;;  %v8789_v25 = vld [vmem:[%s8376_s23 + $0x8] sm:$0x77]  ;;  %v7388_v26 = vcombine.low %v8752_v4, %v8755_v5  ;;  %vm5669_vm10 = vcmp.ge.f32.partialorder %v8786_v24, 0.0  ;;  %v8909_v4 = vld [vmem:[%s8383_s10 + $0x770] sm:$0xff] }
 0x383   : > { %3729 = vmatprep.mubr.bf16.mxu0 %v11110_v42  ;;  %3782 = vmatprep.mubr.bf16.mxu1 %v11110_v42  ;;  %v1508_v43 = vrot.slane %v8789_v25, %v8779_v16  ;;  %vm5670_vm11 = vcmp.ge.f32.partialorder %v8789_v25, 0.0 }
 0x385   : > { %3704 = vmatpush1.bf16.msra.mxu0 %v7446_v18  ;;  %3757 = vmatpush1.bf16.msra.mxu1 %v7448_v7  ;;  %v7418_v18 = vcombine.low %v8758_v9, %v8761_v10  ;;  %v7420_v7 = vcombine.low %v8764_v11, %v8767_v12  ;;  %v8900_v63 = vrot.slane %v1508_v43, %v8776_v15 }
 0x386   : > { %3705 = vmatprep.subr.bf16.mxu0 %v7479_v29  ;;  %3758 = vmatprep.subr.bf16.mxu1 %v7481_v30  ;;  %v7421_v29 = vcombine.high %v8764_v11, %v8767_v12  ;;  %v7450_v30 = vcombine.low %v8770_v13, %v8773_v14  ;;  %v8976_v11 = vsub.s32 6, %v8743_v61  ;;  %v7777_v12 = vmov 1983009808  }
 0x388   : > { %11134 = vst [vmem:[#allocation8_spill] sm:$0xff] %v8976_v11 }
 0x389   : > { %3706 = vmatpush1.bf16.msra.mxu0 %v7478_v35  ;;  %3759 = vmatpush1.bf16.msra.mxu1 %v7480_v36  ;;  %v1496_v35 = vrot.slane %v8786_v24, %v8776_v15  ;;  %v1504_v36 = vrot.slane %v8789_v25, %v8776_v15 }
 0x38a   : > { %3707 = vmatprep.subr.bf16.mxu0 %v7511_v37  ;;  %3760 = vmatprep.subr.bf16.mxu1 %v7513_v38  ;;  %v1500_v37 = vrot.slane %v8786_v24, %v8779_v16  ;;  %v8831_v38 = vld [vmem:[%s8383_s10 + $0x570] sm:$0xff] }
 0x38b   : > { %v7515_v53 = vcombine.high %v8831_v38, %v8834_v39  ;;  %v8883_v57 = vrot.slane %v1504_v36, %v8776_v15  ;;  %v8936_v36 = vsub.s32 2, %v8743_v61 }
 0x38c   : > { %v8886_v58 = vrot.slane %v1500_v37, %v8776_v15  ;;  %v8941_v37 = vsub.s32 5, %v8743_v61 }
 0x38d   : > { %3708 = vmatpush1.bf16.msra.mxu0 %v7510_v44  ;;  %3761 = vmatpush1.bf16.msra.mxu1 %v7512_v45  ;;  %v7453_v44 = vcombine.high %v8798_v20, %v8801_v6  ;;  %v7482_v45 = vcombine.low %v8812_v31, %v8815_v32  ;;  %11132 = vst [vmem:[#allocation6_spill] sm:$0xff] %v8936_v36 }
 0x38e   : > { %3709 = vmatprep.subr.bf16.mxu0 %v7543_v47  ;;  %3762 = vmatprep.subr.bf16.mxu1 %v7545_v48  ;;  %v7483_v47 = vcombine.high %v8812_v31, %v8815_v32  ;;  %v8852_v48 = vld [vmem:[%s8383_s10 + $0x578] sm:$0xff]  ;;  %v6325_v13 = vrot.slane %v8789_v25, %v8941_v37  ;;  %v6733_v20 = vrot.slane %v8786_v24, %v8976_v11 }
 0x38f   : > { %v7517_v3 = vcombine.high %v8852_v48, %v8855_v49 }
 0x390   : > { %v9058_v31 = vrot.slane %v6325_v13, %v8858_v50  ;;  %v9070_v33 = vrot.slane %v6733_v20, %v8936_v36 }
 0x391   : > { %3710 = vmatpush1.bf16.msra.mxu0 %v7542_v19  ;;  %3763 = vmatpush1.bf16.msra.mxu1 %v7544_v54  ;;  %v8868_v19 = vld [vmem:[%s8383_s10 + $0x670] sm:$0xff] }
 0x392   : > { %3711 = vmatprep.subr.bf16.mxu0 %v7575_v55  ;;  %3764 = vmatprep.subr.bf16.mxu1 %v7577_v56  ;;  %v8871_v54 = vld [vmem:[%s8383_s10 + $0x6f0] sm:$0xff]  ;;  %v8876_v55 = vsel %vm5669_vm10, 1, %v11110_v42  ;;  %v8880_v56 = vrot.slane %v1496_v35, %v8776_v15  ;;  %11138 = vst [vmem:[#allocation12_spill] sm:$0xff] %v9058_v31  ;;  %11139 = vst [vmem:[#allocation13_spill] sm:$0xff] %v9070_v33 }
 0x395   : > { %3712 = vmatpush1.bf16.msra.mxu0 %v7574_v62  ;;  %3765 = vmatpush1.bf16.msra.mxu1 %v7576_v1  ;;  %v8897_v62 = vsel %vm5670_vm11, 1, %v11110_v42  ;;  %v7514_v1 = vcombine.low %v8831_v38, %v8834_v39  ;;  %v11146_v38 = vcombine.high %v8868_v19, %v8871_v54 }
 0x396   : > { %3803 = vmatprep.subr.bf16.mxu0 %v7355_v2  ;;  %3856 = vmatprep.subr.bf16.mxu1 %v7357_v8  ;;  %v7516_v2 = vcombine.low %v8852_v48, %v8855_v49  ;;  %v5712_v35 = vrot.slane %v8897_v62, %v8858_v50  ;;  %v8957_v8 = vld [vmem:[%s8376_s23 + $0x18] sm:$0x77] }
 0x397   : > { %vm5672_vm13 = vcmp.ge.f32.partialorder %v8957_v8, 0.0 }
 0x398   : > { %3730 = vmatmul.mubr.bf16.vlgmr.msra.gmra.mrb[48].mxu0 %v8501_v46  ;;  %3783 = vmatmul.mubr.bf16.vlgmr.msra.gmra.mrb[48].mxu1 %v8501_v46  ;;  %v8973_v5 = vrot.slane %v5712_v35, %v8858_v50  ;;  %v6737_v35 = vrot.slane %v8789_v25, %v8936_v36 }
 0x399   : > { %3804 = vmatpush1.bf16.msra.mxu0 %v7354_v17  ;;  %3857 = vmatpush1.bf16.msra.mxu1 %v7356_v21  ;;  %v8916_v17 = vld [vmem:[%s8383_s10 + $0x7f0] sm:$0xff]  ;;  %v8919_v21 = vld [vmem:[%s8383_s10 + $0x778] sm:$0xff] }
 0x39a   : > { %3805 = vmatprep.subr.bf16.mxu0 %v7387_v23  ;;  %3858 = vmatprep.subr.bf16.mxu1 %v7389_v27  ;;  %v5704_v23 = vrot.slane %v8876_v55, %v8858_v50  ;;  %v8954_v27 = vld [vmem:[%s8376_s23 + $0x10] sm:$0x77]  ;;  %v11152_v31 = vcombine.low %v8909_v4, %v8916_v17  ;;  %vm5959_vm0 = vcmp.eq.s32.totalorder %v8973_v5, 1 }
 0x39b   : > { %3739 = vmatprep.mubr.bf16.mxu0 %v11110_v42  ;;  %3792 = vmatprep.mubr.bf16.mxu1 %v11110_v42  ;;  %11133 = vst [vmem:[#allocation7_spill] sm:$0xff] %v8954_v27  ;;  %vm5671_vm12 = vcmp.ge.f32.partialorder %v8954_v27, 0.0  ;;  %v1512_v14 = vrot.slane %v8954_v27, %v8776_v15 }
 0x39c   : > { %v8965_v10 = vrot.slane %v5704_v23, %v8858_v50 }
 0x39d   : > { %3806 = vmatpush1.bf16.msra.mxu0 %v7386_v22  ;;  %3859 = vmatpush1.bf16.msra.mxu1 %v7388_v26  ;;  %v8922_v22 = vld [vmem:[%s8383_s10 + $0x7f8] sm:$0xff]  ;;  %v9061_v32 = vrot.slane %v1512_v14, %v8776_v15 }
 0x39e   : > { %3807 = vmatprep.subr.bf16.mxu0 %v7419_v28  ;;  %3860 = vmatprep.subr.bf16.mxu1 %v7421_v29  ;;  %v6313_v28 = vrot.slane %v8786_v24, %v8858_v50  ;;  %v6321_v29 = vrot.slane %v8789_v25, %v8858_v50  ;;  %vm5957_vm15 = vcmp.eq.s32.totalorder %v8965_v10, 1 }
 0x3a0   : > { %3740 = vmatmul.mubr.bf16.gmra.mrb[52].mxu0 %v8515_v0  ;;  %3793 = vmatmul.mubr.bf16.gmra.mrb[52].mxu1 %v8515_v0  ;;  %v8982_v23 = vrot.slane %v6321_v29, %v8858_v50  ;;  %v8999_v29 = vsel %vm5671_vm12, 1, %v11110_v42 }
 0x3a1   : > { %3808 = vmatpush1.bf16.msra.mxu0 %v7418_v18  ;;  %3861 = vmatpush1.bf16.msra.mxu1 %v7420_v7  ;;  %v8970_v18 = vrot.slane %v6313_v28, %v8858_v50  ;;  %v7081_v7 = vunpack.c.l.s4 %v7777_v12  ;;  %v6317_v28 = vrot.slane %v8786_v24, %v8941_v37  ;;  %v5716_v12 = vrot.slane %v8897_v62, %v8941_v37 }
 0x3a2   : > { %3809 = vmatprep.subr.bf16.mxu0 %v7451_v40  ;;  %3862 = vmatprep.subr.bf16.mxu1 %v7453_v44  ;;  %v6729_v40 = vrot.slane %v8786_v24, %v8936_v36  ;;  %v5708_v44 = vrot.slane %v8876_v55, %v8941_v37  ;;  %v9004_v55 = vsel %vm5672_vm13, 1, %v11110_v42  ;;  %v5720_v43 = vrot.slane %v8999_v29, %v8858_v50 }
 0x3a3   : > { %3835 = vmatprep.mubr.bf16.mxu0 %v11110_v42  ;;  %3888 = vmatprep.mubr.bf16.mxu1 %v11110_v42  ;;  %11135 = vst [vmem:[#allocation9_spill] sm:$0xff] %v9004_v55  ;;  %v7082_v6 = vunpack.c.0.s8 %v7081_v7  ;;  %v6741_v42 = vrot.slane %v8789_v25, %v8976_v11  ;;  %v9043_v7 = vrot.slane %v6737_v35, %v8936_v36 }
 0x3a4   : > { %v9028_v62 = vrot.slane %v5708_v44, %v8858_v50  ;;  %v9040_v24 = vrot.slane %v6729_v40, %v8936_v36  ;;  %v9046_v44 = vrot.slane %v6317_v28, %v8858_v50  ;;  %v9049_v25 = vrot.slane %v5716_v12, %v8858_v50 }
 0x3a5   : > { %3810 = vmatpush1.bf16.msra.mxu0 %v7450_v30  ;;  %3863 = vmatpush1.bf16.msra.mxu1 %v7452_v41  ;;  %v1520_v30 = vrot.slane %v8957_v8, %v8776_v15  ;;  %v1516_v41 = vrot.slane %v8954_v27, %v8779_v16  ;;  %11137 = vst [vmem:[#allocation11_spill] sm:$0xff] %v9043_v7 }
 0x3a6   : > { %3811 = vmatprep.subr.bf16.mxu0 %v7483_v47  ;;  %3864 = vmatprep.subr.bf16.mxu1 %v7485_v52  ;;  %v1524_v47 = vrot.slane %v8957_v8, %v8779_v16  ;;  %v5728_v52 = vrot.slane %v9004_v55, %v8858_v50  ;;  %11136 = vst [vmem:[#allocation10_spill] sm:$0xff] %v9040_v24  ;;  %vm5958_vm1 = vcmp.eq.s32.totalorder %v9028_v62, 1  ;;  %vm5960_vm2 = vcmp.eq.s32.totalorder %v9049_v25, 1 }
 0x3a7   : > { %v9073_v34 = vsub.s32 %v7082_v6, %v8743_v61  ;;  %v9083_v13 = vrot.slane %v6741_v42, %v8936_v36  ;;  %v11149_v11 = vcombine.low %v8889_v59, %v8892_v60 }
 0x3a8   : > { %v9089_v14 = vrot.slane %v5728_v52, %v8858_v50 }
 0x3a9   : > { %3812 = vmatpush1.bf16.msra.mxu0 %v7482_v45  ;;  %3865 = vmatpush1.bf16.msra.mxu1 %v7484_v51  ;;  %v9064_v45 = vrot.slane %v1520_v30, %v8776_v15  ;;  %11140 = vst [vmem:[#allocation14_spill] sm:$0xff] %v9073_v34  ;;  %v9076_v51 = vrot.slane %v1516_v41, %v8776_v15  ;;  %11143 = vst [vmem:[#allocation17_spill] sm:$0xff] %v9083_v13 }
 0x3aa   : > { %3813 = vmatprep.subr.bf16.mxu0 %v7515_v53  ;;  %3866 = vmatprep.subr.bf16.mxu1 %v7517_v3  ;;  %v9079_v53 = vrot.slane %v1524_v47, %v8776_v15  ;;  %v9086_v3 = vrot.slane %v5720_v43, %v8858_v50  ;;  %11145 = vst [vmem:[#allocation19_spill] sm:$0xff] %v9089_v14 }
 0x3ab   : > { %v3095_v40 = vpop.f32.mrb[0].mxu0  ;;  %11141 = vst [vmem:[#allocation15_spill] sm:$0xff] %v9076_v51  ;;  %v3148_v35 = vpop.f32.mrb[0].mxu1 }
 0x3ac   : > { %11142 = vst [vmem:[#allocation16_spill] sm:$0xff] %v9079_v53  ;;  %v3096_v28 = vadd.f32 %v3095_v40, %v8880_v56  ;;  %v3097_v12 = vpop.f32.mrb[1].mxu0  ;;  %11144 = vst [vmem:[#allocation18_spill] sm:$0xff] %v9086_v3  ;;  %v3149_v61 = vadd.f32 %v3148_v35, %v8883_v57  ;;  %v3150_v20 = vpop.f32.mrb[1].mxu1  ;;  %v11154_v53 = vmov 0  }
 0x3ad   : > { %v3098_v30 = vadd.f32 %v3097_v12, %v8886_v58  ;;  %v3099_v6 = vpop.f32.mrb[2].mxu0  ;;  %3814 = vmatpush1.bf16.msra.mxu0 %v7514_v1  ;;  %v9101_v47 = vadd.f32 %v3150_v20, %v8900_v63  ;;  %v3152_v40 = vpop.f32.mrb[2].mxu1  ;;  %3867 = vmatpush1.bf16.msra.mxu1 %v7516_v2 }
 0x3ae   : > { %v4229_v41 = vmul.f32 %v3096_v28, %v3096_v28  ;;  %v3100_v52 = vadd.f32 %v3099_v6, %v8880_v56  ;;  %v3101_v35 = vpop.f32.mrb[3].mxu0  ;;  %3815 = vmatprep.subr.bf16.mxu0 %v11146_v38  ;;  %v4231_v39 = vmul.f32 %v3149_v61, %v3149_v61  ;;  %v3153_v12 = vadd.f32 %v3152_v40, %v8883_v57  ;;  %v3154_v20 = vpop.f32.mrb[3].mxu1 }
 0x3af   : > { %v4230_v1 = vmul.f32 %v3098_v30, %v3098_v30  ;;  %v3102_v43 = vadd.f32 %v3101_v35, %v8886_v58  ;;  %v11147_v6 = vcombine.high %v8889_v59, %v8892_v60  ;;  %v4232_v48 = vmul.f32 %v9101_v47, %v9101_v47 }
 0x3b0   : > { %v9117_v49 = vadd.f32 %v3100_v52, %v3096_v28  ;;  %v4261_v2 = vmul.f32 %v3100_v52, %v3100_v52  ;;  %v4773_v42 = vmax.f32 %v3096_v28, %v3100_v52  ;;  %v5221_v9 = vmin.f32 %v3096_v28, %v3100_v52 }
 0x3b1   : > { %3868 = vmatprep.subr.bf16.mxu1 %v11147_v6  ;;  %v9119_v38 = vadd.f32 %v3153_v12, %v3149_v61  ;;  %v4263_v26 = vmul.f32 %v3153_v12, %v3153_v12  ;;  %v4787_v16 = vmax.f32 %v3149_v61, %v3153_v12  ;;  %v11148_v40 = vcombine.low %v8868_v19, %v8871_v54 }
 0x3b2   : > { %v9124_v35 = vadd.f32 %v4261_v2, %v4229_v41  ;;  %v4774_v15 = vrot.slane %v4773_v42, 4  ;;  %v5235_v6 = vmin.f32 %v3149_v61, %v3153_v12  ;;  %v9126_v55 = vadd.f32 %v3102_v43, %v3098_v30  ;;  %3869 = vmatpush1.bf16.msra.mxu1 %v11149_v11 }
 0x3b3   : > { %3816 = vmatpush1.bf16.msra.mxu0 %v11148_v40  ;;  %v11150_v28 = vcombine.high %v8909_v4, %v8916_v17  ;;  %v5222_v52 = vrot.slane %v5221_v9, 4  ;;  %v9134_v14 = vadd.f32 %v4263_v26, %v4231_v39  ;;  %v4788_v3 = vrot.slane %v4787_v16, 4  ;;  %v3105_v54 = vpop.f32.mrb[4].mxu0  ;;  %v3158_v59 = vpop.f32.mrb[4].mxu1 }
 0x3b4   : > { %v4262_v19 = vmul.f32 %v3102_v43, %v3102_v43  ;;  %v11151_v41 = vcombine.high %v8919_v21, %v8922_v22  ;;  %v4775_v61 = vmax.f32 %v4773_v42, %v4774_v15  ;;  %v5236_v12 = vrot.slane %v5235_v6, 4  ;;  %v3107_v60 = vpop.f32.mrb[5].mxu0  ;;  %v9142_v39 = vpop.f32.mrb[5].mxu1 }
 0x3b5   : > { %3817 = vmatprep.subr.bf16.mxu0 %v11150_v28  ;;  %v4780_v2 = vmax.f32 %v3098_v30, %v3102_v43  ;;  %v5228_v40 = vmin.f32 %v3098_v30, %v3102_v43  ;;  %v5223_v11 = vmin.f32 %v5221_v9, %v5222_v52  ;;  %v4789_v34 = vmax.f32 %v4787_v16, %v4788_v3  ;;  %v9144_v28 = vpop.f32.mrb[6].mxu0  ;;  %v9149_v43 = vpop.f32.mrb[6].mxu1 }
 0x3b6   : > { %3870 = vmatprep.subr.bf16.mxu1 %v11151_v41  ;;  %v9139_v13 = vadd.f32 %v4262_v19, %v4230_v1  ;;  %v3155_v26 = vadd.f32 %v3154_v20, %v8900_v63  ;;  %v4776_v15 = vrot.slane %v4775_v61, 2  ;;  %v5237_v42 = vmin.f32 %v5235_v6, %v5236_v12  ;;  %v9154_v9 = vpop.f32.mrb[7].mxu0  ;;  %v9157_v19 = vpop.f32.mrb[7].mxu1 }
 0x3b7   : > { %3818 = vmatpush1.bf16.msra.mxu0 %v11152_v31  ;;  %v4781_v41 = vrot.slane %v4780_v2, 4  ;;  %v5229_v30 = vrot.slane %v5228_v40, 4  ;;  %v11153_v16 = vcombine.low %v8919_v21, %v8922_v22  ;;  %v5224_v3 = vrot.slane %v5223_v11, 2 }
 0x3b8   : > { %v4790_v1 = vrot.slane %v4789_v34, 2  ;;  %v3936_v20 = vadd.f32 %v3155_v26, %v9101_v47  ;;  %v4264_v52 = vmul.f32 %v3155_v26, %v3155_v26  ;;  %v4777_v4 = vmax.f32 %v4775_v61, %v4776_v15 }
 0x3b9   : > { %3871 = vmatpush1.bf16.msra.mxu1 %v11153_v16  ;;  %v5238_v17 = vrot.slane %v5237_v42, 2  ;;  %v4782_v31 = vmax.f32 %v4780_v2, %v4781_v41  ;;  %v5230_v6 = vmin.f32 %v5228_v40, %v5229_v30  ;;  %v5225_v12 = vmin.f32 %v5223_v11, %v5224_v3 }
 0x3ba   : > { %3836 = vmatmul.mubr.bf16.vlgmr.msra.gmra.mrb[56].mxu0 %v8501_v46  ;;  %v4791_v33 = vmax.f32 %v4789_v34, %v4790_v1  ;;  %v4384_v7 = vadd.f32 %v4264_v52, %v4232_v48  ;;  %v4794_v21 = vmax.f32 %v9101_v47, %v3155_v26  ;;  %v4778_v22 = vrot.slane %v4777_v4, 1 }
 0x3bb   : > { %v5239_v16 = vmin.f32 %v5237_v42, %v5238_v17  ;;  %v4783_v24 = vrot.slane %v4782_v31, 2  ;;  %v5231_v36 = vrot.slane %v5230_v6, 2  ;;  %3845 = vmatprep.mubr.bf16.mxu0 %v11154_v53  ;;  %v5226_v61 = vrot.slane %v5225_v12, 1 }
 0x3bc   : > { %3889 = vmatmul.mubr.bf16.vlgmr.msra.gmra.mrb[56].mxu1 %v8501_v46  ;;  %v4795_v2 = vrot.slane %v4794_v21, 4  ;;  %v5242_v40 = vmin.f32 %v9101_v47, %v3155_v26  ;;  %v11155_v34 = vrot.slane %v8954_v27, %v8858_v50  ;;  %v4792_v11 = vrot.slane %v4791_v33, 1 }
 0x3bd   : > { %3898 = vmatprep.mubr.bf16.mxu1 %v11154_v53  ;;  %v5240_v46 = vrot.slane %v5239_v16, 1  ;;  %v4784_v15 = vmax.f32 %v4782_v31, %v4783_v24  ;;  %v11157_v42 = vrot.slane %v8957_v8, %v8858_v50  ;;  %v5232_v30 = vmin.f32 %v5230_v6, %v5231_v36 }
 0x3be   : > { %v9169_v48 = vrot.slane %v11155_v34, %v8858_v50  ;;  %v4796_v3 = vmax.f32 %v4794_v21, %v4795_v2  ;;  %v5243_v1 = vrot.slane %v5242_v40, 4  ;;  %v9179_v26 = vmax.f32 %v4777_v4, %v4778_v22 }
 0x3bf   : > { %v9175_v41 = vrot.slane %v11157_v42, %v8858_v50  ;;  %v9181_v52 = vmin.f32 %v5225_v12, %v5226_v61  ;;  %v4785_v17 = vrot.slane %v4784_v15, 1  ;;  %v3106_v34 = vadd.f32 %v3105_v54, %v8880_v56 }
 0x3c0   : > { %11156 = vst [vmem:[#allocation20_spill] sm:$0xff] %v9169_v48  ;;  %v4797_v24 = vrot.slane %v4796_v3, 2  ;;  %v5244_v31 = vmin.f32 %v5242_v40, %v5243_v1  ;;  %v3159_v53 = vadd.f32 %v3158_v59, %v8883_v57  ;;  %v9186_v8 = vadd.f32 %v3107_v60, %v8886_v58 }
 0x3c1   : > { %11158 = vst [vmem:[#allocation21_spill] sm:$0xff] %v9175_v41  ;;  %v9188_v36 = vmax.f32 %v4791_v33, %v4792_v11  ;;  %v9190_v6 = vmin.f32 %v5239_v16, %v5240_v46  ;;  %v3910_v21 = vadd.f32 %v9117_v49, %v3106_v34  ;;  %v4293_v4 = vmul.f32 %v3106_v34, %v3106_v34 }
 0x3c2   : > { %3846 = vmatmul.mubr.bf16.gmra.mrb[60].mxu0 %v8515_v0  ;;  %v5233_v12 = vrot.slane %v5232_v30, 1  ;;  %v9194_v22 = vmax.f32 %v4796_v3, %v4797_v24  ;;  %v3928_v54 = vadd.f32 %v9119_v38, %v3159_v53  ;;  %v4295_v61 = vmul.f32 %v3159_v53, %v3159_v53 }
 0x3c3   : > { %v4358_v59 = vadd.f32 %v9124_v35, %v4293_v4  ;;  %v9201_v33 = vadd.f32 %v9126_v55, %v9186_v8  ;;  %v4294_v49 = vmul.f32 %v9186_v8, %v9186_v8  ;;  %v9207_v60 = vadd.f32 %v9142_v39, %v8900_v63 }
 0x3c4   : > { %3899 = vmatmul.mubr.bf16.gmra.mrb[60].mxu1 %v8515_v0  ;;  %v9209_v16 = vmax.f32 %v4784_v15, %v4785_v17  ;;  %v5245_v2 = vrot.slane %v5244_v31, 2  ;;  %v4376_v38 = vadd.f32 %v9134_v14, %v4295_v61  ;;  %v3110_v0 = vadd.f32 %v9144_v28, %v8880_v56 }
 0x3c5   : > { %v9215_v35 = vadd.f32 %v9139_v13, %v4294_v49  ;;  %v9218_v55 = vadd.f32 %v3936_v20, %v9207_v60  ;;  %v4296_v40 = vmul.f32 %v9207_v60, %v9207_v60  ;;  %v3163_v39 = vadd.f32 %v9149_v43, %v8883_v57 }
 0x3c6   : > { %v9224_v11 = vmin.f32 %v5232_v30, %v5233_v12  ;;  %v3911_v14 = vadd.f32 %v3910_v21, %v3110_v0  ;;  %v4325_v15 = vmul.f32 %v3110_v0, %v3110_v0  ;;  %v4997_v56 = vmax.f32 %v3106_v34, %v3110_v0 }
 0x3c7   : > { %v9227_v42 = vadd.f32 %v4384_v7, %v4296_v40  ;;  %v5445_v13 = vmin.f32 %v3106_v34, %v3110_v0  ;;  %v3929_v28 = vadd.f32 %v3928_v54, %v3163_v39  ;;  %v9229_v3 = vmin.f32 %v5244_v31, %v5245_v2 }
 0x3c8   : > { %v3912_v20 = vrot.slane %v3911_v14, 4  ;;  %v4359_v1 = vadd.f32 %v4358_v59, %v4325_v15  ;;  %v4327_v17 = vmul.f32 %v3163_v39, %v3163_v39  ;;  %v4998_v24 = vrot.slane %v4997_v56, 4 }
 0x3c9   : > { %v5446_v4 = vrot.slane %v5445_v13, 4  ;;  %v3930_v61 = vrot.slane %v3929_v28, 4  ;;  %v5011_v57 = vmax.f32 %v3159_v53, %v3163_v39  ;;  %v5459_v21 = vmin.f32 %v3159_v53, %v3163_v39 }
 0x3ca   : > { %v3913_v43 = vadd.f32 %v3912_v20, %v3911_v14  ;;  %v4360_v30 = vrot.slane %v4359_v1, 4  ;;  %v4377_v12 = vadd.f32 %v4376_v38, %v4327_v17  ;;  %v4999_v49 = vmax.f32 %v4997_v56, %v4998_v24 }
 0x3cb   : > { %v5447_v7 = vmin.f32 %v5445_v13, %v5446_v4  ;;  %v3931_v34 = vadd.f32 %v3930_v61, %v3929_v28  ;;  %v5012_v54 = vrot.slane %v5011_v57, 4  ;;  %v5460_v59 = vrot.slane %v5459_v21, 4  ;;  %v9232_v40 = vpop.f32.mrb[8].mxu0  ;;  %v9234_v20 = vpop.f32.mrb[8].mxu1 }
 0x3cc   : > { %v3914_v31 = vrot.slane %v3913_v43, 2  ;;  %v4361_v2 = vadd.f32 %v4360_v30, %v4359_v1  ;;  %v4378_v0 = vrot.slane %v4377_v12, 4  ;;  %v5000_v15 = vrot.slane %v4999_v49, 2  ;;  %v9236_v38 = vpop.f32.mrb[9].mxu0  ;;  %v9238_v28 = vpop.f32.mrb[9].mxu1 }
 0x3cd   : > { %v5448_v46 = vrot.slane %v5447_v7, 2  ;;  %v3932_v47 = vrot.slane %v3931_v34, 2  ;;  %v5013_v14 = vmax.f32 %v5011_v57, %v5012_v54  ;;  %11159 = vst [vmem:[#allocation22_spill] sm:$0xff] %v9236_v38  ;;  %v5461_v13 = vmin.f32 %v5459_v21, %v5460_v59  ;;  %11160 = vst [vmem:[#allocation23_spill] sm:$0xff] %v9238_v28  ;;  %v9240_v17 = vpop.f32.mrb[10].mxu0  ;;  %v9243_v30 = vpop.f32.mrb[10].mxu1 }
 0x3ce   : > { %v3915_v53 = vadd.f32 %v3914_v31, %v3913_v43  ;;  %v4362_v39 = vrot.slane %v4361_v2, 2  ;;  %v4379_v56 = vadd.f32 %v4378_v0, %v4377_v12  ;;  %v5001_v1 = vmax.f32 %v4999_v49, %v5000_v15  ;;  %v9245_v57 = vpop.f32.mrb[11].mxu0  ;;  %v9247_v12 = vpop.f32.mrb[11].mxu1 }
 0x3cf   : > { %v5449_v24 = vmin.f32 %v5447_v7, %v5448_v46  ;;  %v3933_v4 = vadd.f32 %v3932_v47, %v3931_v34  ;;  %v5014_v61 = vrot.slane %v5013_v14, 2  ;;  %11161 = vst [vmem:[#allocation24_spill] sm:$0xff] %v9245_v57  ;;  %v5462_v31 = vrot.slane %v5461_v13, 2  ;;  %11162 = vst [vmem:[#allocation25_spill] sm:$0xff] %v9247_v12 }
 0x3d0   : > { %v3916_v54 = vrot.slane %v3915_v53, 1  ;;  %v4363_v41 = vadd.f32 %v4362_v39, %v4361_v2  ;;  %v4380_v43 = vrot.slane %v4379_v56, 2  ;;  %v5002_v21 = vrot.slane %v5001_v1, 1 }
 0x3d1   : > { %v5450_v0 = vrot.slane %v5449_v24, 1  ;;  %v3934_v59 = vrot.slane %v3933_v4, 1  ;;  %v5015_v48 = vmax.f32 %v5013_v14, %v5014_v61  ;;  %v5463_v7 = vmin.f32 %v5461_v13, %v5462_v31 }
 0x3d2   : > { %v3917_v49 = vadd.f32 %v3916_v54, %v3915_v53  ;;  %v4364_v46 = vrot.slane %v4363_v41, 1  ;;  %v4381_v47 = vadd.f32 %v4380_v43, %v4379_v56  ;;  %v5003_v34 = vmax.f32 %v5001_v1, %v5002_v21 }
 0x3d3   : > { %v5451_v15 = vmin.f32 %v5449_v24, %v5450_v0  ;;  %v3935_v27 = vadd.f32 %v3934_v59, %v3933_v4  ;;  %v5016_v28 = vrot.slane %v5015_v48, 1  ;;  %v5464_v2 = vrot.slane %v5463_v7, 1  ;;  %v9249_v39 = vpop.f32.mrb[12].mxu0  ;;  %v9255_v56 = vpop.f32.mrb[12].mxu1 }
 0x3d4   : > { %v4197_v38 = vmul.f32 0.03125, %v3917_v49  ;;  %v4365_v57 = vadd.f32 %v4364_v46, %v4363_v41  ;;  %v4382_v51 = vrot.slane %v4381_v47, 1  ;;  %v6054_v12 = vsel %vm6053_vm14, %v5003_v34, %v9179_v26  ;;  %v9257_v13 = vpop.f32.mrb[13].mxu0  ;;  %v9261_v54 = vpop.f32.mrb[13].mxu1 }
 0x3d5   : > { %v6182_v14 = vsel %vm6053_vm14, %v5451_v15, %v9181_v52  ;;  %v4199_v53 = vmul.f32 0.03125, %v3935_v27  ;;  %v5017_v61 = vmax.f32 %v5015_v48, %v5016_v28  ;;  %v9263_v43 = vpop.f32.mrb[14].mxu0  ;;  %v5465_v21 = vmin.f32 %v5463_v7, %v5464_v2  ;;  %v9267_v48 = vpop.f32.mrb[14].mxu1 }
 0x3d6   : > { %v4645_v1 = vmul.f32 0.03125, %v4365_v57  ;;  %v4677_v24 = vmul.f32 %v4197_v38, %v4197_v38  ;;  %v6246_v41 = vsel %vm5957_vm15, %v6054_v12, %v6182_v14  ;;  %v4383_v4 = vadd.f32 %v4382_v51, %v4381_v47  ;;  %v9269_v52 = vpop.f32.mrb[15].mxu0  ;;  %v9275_v12 = vpop.f32.mrb[15].mxu1 }
 0x3d7   : > { %v6278_v26 = vsub.f32 %v6246_v41, %v4197_v38  ;;  %v4679_v31 = vmul.f32 %v4199_v53, %v4199_v53  ;;  %v6056_v27 = vsel %vm6053_vm14, %v5017_v61, %v9188_v36  ;;  %v3112_v10 = vadd.f32 %v9154_v9, %v8886_v58 }
 0x3d8   : > { %v4709_v28 = vsub.f32 %v4645_v1, %v4677_v24  ;;  %v4647_v57 = vmul.f32 0.03125, %v4383_v4  ;;  %v3165_v51 = vadd.f32 %v9157_v19, %v8900_v63  ;;  %v5247_v38 = vrot.slane %v9229_v3, 1 }
 0x3d9   : > { %v9279_v0 = vmul.f32 %v8970_v18, %v6278_v26  ;;  %v6184_v36 = vsel %vm6053_vm14, %v5465_v21, %v9190_v6  ;;  %v9285_v59 = vadd.f32 %v9232_v40, %v9061_v32  ;;  %v3920_v63 = vadd.f32 %v9201_v33, %v3112_v10 }
 0x3da   : > { %v4741_v49 = vmax.f32 %v4709_v28, 0.0  ;;  %v4711_v46 = vsub.f32 %v4647_v57, %v4679_v31  ;;  %v6248_v58 = vsel %vm5959_vm0, %v6056_v27, %v6184_v36  ;;  %v4326_v19 = vmul.f32 %v3112_v10, %v3112_v10 }
 0x3db   : > { %v6280_v9 = vsub.f32 %v6248_v58, %v4199_v53  ;;  %v5004_v47 = vmax.f32 %v9186_v8, %v3112_v10  ;;  %v5452_v18 = vmin.f32 %v9186_v8, %v3112_v10  ;;  %v3921_v6 = vrot.slane %v3920_v63, 4 }
 0x3dc   : > { %v6630_v7 = vadd.f32 1e-05, %v4741_v49  ;;  %v4743_v34 = vmax.f32 %v4711_v46, 0.0  ;;  %v3938_v15 = vadd.f32 %v9218_v55, %v3165_v51  ;;  %v4368_v2 = vadd.f32 %v9215_v35, %v4326_v19 }
 0x3dd   : > { %v6600_v40 = vmul.f32 %v8982_v23, %v6280_v9  ;;  %v5005_v14 = vrot.slane %v5004_v47, 4  ;;  %v5453_v5 = vrot.slane %v5452_v18, 4  ;;  %v3922_v33 = vadd.f32 %v3921_v6, %v3920_v63 }
 0x3de   : > { %7686 = vrsqrt.f32 %v6630_v7  ;;  %v6632_v61 = vadd.f32 1e-05, %v4743_v34  ;;  %v3939_v53 = vrot.slane %v3938_v15, 4  ;;  %v4369_v1 = vrot.slane %v4368_v2, 4 }
 0x3df   : > { %v5006_v24 = vmax.f32 %v5004_v47, %v5005_v14  ;;  %v5454_v41 = vmin.f32 %v5452_v18, %v5453_v5  ;;  %v4328_v8 = vmul.f32 %v3165_v51, %v3165_v51  ;;  %v3923_v4 = vrot.slane %v3922_v33, 2 }
 0x3e0   : > { %7688 = vrsqrt.f32 %v6632_v61  ;;  %v3940_v26 = vadd.f32 %v3939_v53, %v3938_v15  ;;  %v5018_v55 = vmax.f32 %v9207_v60, %v3165_v51  ;;  %v4370_v23 = vadd.f32 %v4369_v1, %v4368_v2 }
 0x3e1   : > { %v5007_v31 = vrot.slane %v5006_v24, 2  ;;  %v5455_v35 = vrot.slane %v5454_v41, 2  ;;  %v4386_v21 = vadd.f32 %v9227_v42, %v4328_v8  ;;  %v3924_v27 = vadd.f32 %v3923_v4, %v3922_v33 }
 0x3e2   : > { %v3941_v28 = vrot.slane %v3940_v26, 2  ;;  %v5019_v57 = vrot.slane %v5018_v55, 4  ;;  %v5466_v10 = vmin.f32 %v9207_v60, %v3165_v51  ;;  %v4371_v36 = vrot.slane %v4370_v23, 2 }
 0x3e3   : > { %v5008_v49 = vmax.f32 %v5006_v24, %v5007_v31  ;;  %v5456_v46 = vmin.f32 %v5454_v41, %v5455_v35  ;;  %v4387_v58 = vrot.slane %v4386_v21, 4  ;;  %v3925_v63 = vrot.slane %v3924_v27, 1 }
 0x3e4   : > { %v3942_v9 = vadd.f32 %v3941_v28, %v3940_v26  ;;  %v5020_v19 = vmax.f32 %v5018_v55, %v5019_v57  ;;  %v5467_v47 = vrot.slane %v5466_v10, 4  ;;  %v4372_v18 = vadd.f32 %v4371_v36, %v4370_v23 }
 0x3e5   : > { %v5009_v7 = vrot.slane %v5008_v49, 1  ;;  %v5457_v34 = vrot.slane %v5456_v46, 1  ;;  %v4388_v6 = vadd.f32 %v4387_v58, %v4386_v21  ;;  %v3926_v15 = vadd.f32 %v3925_v63, %v3924_v27 }
 0x3e6   : > { %v3943_v2 = vrot.slane %v3942_v9, 1  ;;  %v5021_v42 = vrot.slane %v5020_v19, 2  ;;  %v5468_v14 = vmin.f32 %v5466_v10, %v5467_v47  ;;  %v4373_v5 = vrot.slane %v4372_v18, 1 }
 0x3e7   : > { %v5010_v61 = vmax.f32 %v5008_v49, %v5009_v7  ;;  %v5458_v33 = vmin.f32 %v5456_v46, %v5457_v34  ;;  %v4389_v60 = vrot.slane %v4388_v6, 2  ;;  %v4198_v53 = vmul.f32 0.03125, %v3926_v15 }
 0x3e8   : > { %v7687_v51 = vpop.eup %7686  ;;  %v3944_v1 = vadd.f32 %v3943_v2, %v3942_v9  ;;  %v5022_v24 = vmax.f32 %v5020_v19, %v5021_v42  ;;  %v5469_v41 = vrot.slane %v5468_v14, 2  ;;  %v4374_v4 = vadd.f32 %v4373_v5, %v4372_v18 }
 0x3e9   : > { %v9301_v8 = vmul.f32 %v7687_v51, %v9279_v0  ;;  %v6055_v26 = vsel %vm6053_vm14, %v5010_v61, %v9209_v16  ;;  %v6183_v55 = vsel %vm6053_vm14, %v5458_v33, %v9224_v11  ;;  %v4678_v31 = vmul.f32 %v4198_v53, %v4198_v53 }
 0x3ea   : > { %v7689_v23 = vpop.eup %7688  ;;  %v6247_v35 = vsel %vm5958_vm1, %v6055_v26, %v6183_v55  ;;  %v9309_v21 = vmul.f32 0.03125, %v3944_v1  ;;  %v4390_v27 = vadd.f32 %v4389_v60, %v4388_v6  ;;  %v4646_v57 = vmul.f32 0.03125, %v4374_v4  ;;  %v11169_v1 = vld [vmem:[#allocation22_spill] sm:$0xff]  ;;  %v11171_v4 = vld [vmem:[#allocation23_spill] sm:$0xff] }
 0x3eb   : > { %v9311_v28 = vmul.f32 %v7689_v23, %v6600_v40  ;;  %v6279_v0 = vsub.f32 %v6247_v35, %v4198_v53  ;;  %v3255_v10 = vadd.f32 %v9234_v20, %v9064_v45  ;;  %v5023_v16 = vrot.slane %v5022_v24, 1  ;;  %v9321_v62 = vpop.f32.mrb[16].mxu0  ;;  %v9331_v19 = vpop.f32.mrb[16].mxu1  ;;  %v11168_v53 = vld [vmem:[#allocation15_spill] sm:$0xff] }
 0x3ec   : > { %v4391_v36 = vrot.slane %v4390_v27, 1  ;;  %v5470_v49 = vmin.f32 %v5468_v14, %v5469_v41  ;;  %v11163_v11 = vrot.slane %v8999_v29, %v8941_v37  ;;  %v11164_v58 = vrot.slane %v9194_v22, 1  ;;  %v9333_v47 = vpop.f32.mrb[17].mxu0  ;;  %v9338_v6 = vpop.f32.mrb[17].mxu1  ;;  %v11170_v41 = vld [vmem:[#allocation16_spill] sm:$0xff] }
 0x3ed   : > { %v5248_v63 = vmin.f32 %v9229_v3, %v5247_v38  ;;  %v4710_v20 = vsub.f32 %v4646_v57, %v4678_v31  ;;  %v4680_v9 = vmul.f32 %v9309_v21, %v9309_v21  ;;  %v9336_v29 = vmul.f32 %v9046_v44, %v6279_v0  ;;  %11165 = vst [vmem:[#allocation26_spill] sm:$0xff] %v9338_v6  ;;  %v9346_v42 = vpop.f32.mrb[18].mxu1 }
 0x3ee   : > { %v9319_v46 = vrot.slane %v11163_v11, %v8858_v50  ;;  %v4800_v40 = vmax.f32 %v9194_v22, %v11164_v58  ;;  %v4392_v18 = vadd.f32 %v4391_v36, %v4390_v27  ;;  %v5024_v7 = vmax.f32 %v5022_v24, %v5023_v16  ;;  %v9340_v22 = vpop.f32.mrb[18].mxu0  ;;  %v9353_v60 = vpop.f32.mrb[19].mxu1 }
 0x3ef   : > { %v5471_v34 = vrot.slane %v5470_v49, 1  ;;  %v4742_v15 = vmax.f32 %v4710_v20, 0.0  ;;  %v4233_v3 = vmul.f32 %v9285_v59, %v9285_v59  ;;  %v4235_v38 = vmul.f32 %v3255_v10, %v3255_v10  ;;  %v9348_v14 = vpop.f32.mrb[19].mxu0  ;;  %11167 = vst [vmem:[#allocation28_spill] sm:$0xff] %v9353_v60 }
 0x3f0   : > { %v3206_v2 = vadd.f32 %v9240_v17, %v9061_v32  ;;  %11166 = vst [vmem:[#allocation27_spill] sm:$0xff] %v9348_v14  ;;  %v4648_v44 = vmul.f32 0.03125, %v4392_v18  ;;  %v6057_v61 = vsel %vm6053_vm14, %v5024_v7, %v4800_v40  ;;  %v3259_v33 = vadd.f32 %v9243_v30, %v9064_v45  ;;  %v11186_v14 = vld [vmem:[#allocation13_spill] sm:$0xff] }
 0x3f1   : > { %v5472_v5 = vmin.f32 %v5470_v49, %v5471_v34  ;;  %v6631_v51 = vadd.f32 1e-05, %v4742_v15  ;;  %v3204_v24 = vadd.f32 %v11169_v1, %v11168_v53  ;;  %v9359_v17 = vadd.f32 %v11171_v4, %v11170_v41  ;;  %v11175_v34 = vld [vmem:[#allocation24_spill] sm:$0xff] }
 0x3f2   : > { %v9362_v26 = vadd.f32 %v3206_v2, %v9285_v59  ;;  %v4712_v55 = vsub.f32 %v4648_v44, %v4680_v9  ;;  %v4265_v31 = vmul.f32 %v3206_v2, %v3206_v2  ;;  %v4801_v35 = vmax.f32 %v9285_v59, %v3206_v2 }
 0x3f3   : > { %v6185_v23 = vsel %vm6053_vm14, %v5472_v5, %v5248_v63  ;;  %7690 = vrsqrt.f32 %v6631_v51  ;;  %v5249_v27 = vmin.f32 %v9285_v59, %v3206_v2  ;;  %v9371_v57 = vadd.f32 %v3259_v33, %v3255_v10  ;;  %v9377_v11 = vpop.f32.mrb[20].mxu0  ;;  %v9379_v25 = vpop.f32.mrb[20].mxu1 }
 0x3f4   : > { %v9368_v30 = vsel %vm5960_vm2, %v6057_v61, %v6185_v23  ;;  %v4744_v0 = vmax.f32 %v4712_v55, 0.0  ;;  %v9375_v16 = vadd.f32 %v4265_v31, %v4233_v3  ;;  %v4802_v49 = vrot.slane %v4801_v35, 4  ;;  %11172 = vst [vmem:[#allocation15_spill] sm:$0xff] %v9377_v11  ;;  %11173 = vst [vmem:[#allocation22_spill] sm:$0xff] %v9379_v25  ;;  %v9381_v9 = vpop.f32.mrb[21].mxu0 }
 0x3f5   : > { %v6281_v36 = vsub.f32 %v9368_v30, %v9309_v21  ;;  %v5250_v58 = vrot.slane %v5249_v27, 4  ;;  %v4267_v40 = vmul.f32 %v3259_v33, %v3259_v33  ;;  %v4815_v63 = vmax.f32 %v3255_v10, %v3259_v33  ;;  %11174 = vst [vmem:[#allocation16_spill] sm:$0xff] %v9381_v9  ;;  %v9385_v21 = vpop.f32.mrb[21].mxu1  ;;  %v9387_v3 = vpop.f32.mrb[22].mxu0 }
 0x3f6   : > { %v5263_v20 = vmin.f32 %v3255_v10, %v3259_v33  ;;  %v6633_v59 = vadd.f32 1e-05, %v4744_v0  ;;  %v4234_v18 = vmul.f32 %v3204_v24, %v3204_v24  ;;  %v4803_v7 = vmax.f32 %v4801_v35, %v4802_v49  ;;  %11176 = vst [vmem:[#allocation23_spill] sm:$0xff] %v9385_v21  ;;  %11177 = vst [vmem:[#allocation24_spill] sm:$0xff] %v9387_v3  ;;  %v9391_v10 = vpop.f32.mrb[22].mxu1  ;;  %v9393_v33 = vpop.f32.mrb[23].mxu0 }
 0x3f7   : > { %v3208_v15 = vadd.f32 %v11175_v34, %v11168_v53  ;;  %v5251_v2 = vmin.f32 %v5249_v27, %v5250_v58  ;;  %v9389_v44 = vadd.f32 %v4267_v40, %v4235_v38  ;;  %v4816_v5 = vrot.slane %v4815_v63, 4  ;;  %11178 = vst [vmem:[#allocation29_spill] sm:$0xff] %v9391_v10  ;;  %11179 = vst [vmem:[#allocation30_spill] sm:$0xff] %v9393_v33  ;;  %v9397_v55 = vpop.f32.mrb[23].mxu1  ;;  %v11181_v49 = vld [vmem:[#allocation25_spill] sm:$0xff]  ;;  %v11185_v21 = vld [vmem:[#allocation11_spill] sm:$0xff] }
 0x3f8   : > { %v5264_v61 = vrot.slane %v5263_v20, 4  ;;  %7692 = vrsqrt.f32 %v6633_v59  ;;  %v4804_v51 = vrot.slane %v4803_v7, 2  ;;  %11180 = vst [vmem:[#allocation31_spill] sm:$0xff] %v9397_v55  ;;  %v3261_v58 = vadd.f32 %v11181_v49, %v11170_v41 }
 0x3f9   : > { %v9395_v1 = vadd.f32 %v3208_v15, %v3204_v24  ;;  %v4266_v4 = vmul.f32 %v3208_v15, %v3208_v15  ;;  %v5252_v23 = vrot.slane %v5251_v2, 2  ;;  %v4817_v31 = vmax.f32 %v4815_v63, %v4816_v5 }
 0x3fa   : > { %v5265_v35 = vmin.f32 %v5263_v20, %v5264_v61  ;;  %v4808_v30 = vmax.f32 %v3204_v24, %v3208_v15  ;;  %v4805_v27 = vmax.f32 %v4803_v7, %v4804_v51  ;;  %v5256_v0 = vmin.f32 %v3204_v24, %v3208_v15  ;;  %v11182_v61 = vld [vmem:[#allocation6_spill] sm:$0xff]  ;;  %v11183_v24 = vld [vmem:[#allocation7_spill] sm:$0xff] }
 0x3fb   : > { %v9399_v38 = vadd.f32 %v4266_v4, %v4234_v18  ;;  %v5253_v40 = vmin.f32 %v5251_v2, %v5252_v23  ;;  %v4818_v34 = vrot.slane %v4817_v31, 2  ;;  %v4236_v10 = vmul.f32 %v9359_v17, %v9359_v17  ;;  %v11184_v51 = vld [vmem:[#allocation10_spill] sm:$0xff] }
 0x3fc   : > { %v5266_v59 = vrot.slane %v5265_v35, 2  ;;  %v4809_v33 = vrot.slane %v4808_v30, 4  ;;  %v5257_v3 = vrot.slane %v5256_v0, 4  ;;  %v3972_v55 = vadd.f32 %v3261_v58, %v9359_v17 }
 0x3fd   : > { %v4268_v63 = vmul.f32 %v3261_v58, %v3261_v58  ;;  %v7691_v20 = vpop.eup %7690  ;;  %v4806_v5 = vrot.slane %v4805_v27, 1  ;;  %v4819_v7 = vmax.f32 %v4817_v31, %v4818_v34  ;;  %v7014_v2 = vadd.f32 %v11184_v51, %v9301_v8  ;;  %v11187_v34 = vld [vmem:[#allocation12_spill] sm:$0xff] }
 0x3fe   : > { %v4810_v18 = vmax.f32 %v4808_v30, %v4809_v33  ;;  %v6695_v4 = vmul.f32 %v7691_v20, %v9336_v29  ;;  %v5258_v23 = vmin.f32 %v5256_v0, %v5257_v3  ;;  %v7016_v9 = vadd.f32 %v11185_v21, %v9311_v28 }
 0x3ff   : > { %v4420_v49 = vadd.f32 %v4268_v63, %v4236_v10  ;;  %v5254_v25 = vrot.slane %v5253_v40, 1  ;;  %v5267_v11 = vmin.f32 %v5265_v35, %v5266_v59  ;;  %v4820_v31 = vrot.slane %v4819_v7, 1 }
 0x400   : > { %v4811_v60 = vrot.slane %v4810_v18, 2  ;;  %v7015_v6 = vadd.f32 %v11186_v14, %v6695_v4  ;;  %v4822_v33 = vmax.f32 %v9359_v17, %v3261_v58  ;;  %v5270_v30 = vmin.f32 %v9359_v17, %v3261_v58 }
 0x401   : > { %v6601_v15 = vmul.f32 %v11187_v34, %v6281_v36  ;;  %v9417_v8 = vmax.f32 %v4805_v27, %v4806_v5  ;;  %v5259_v29 = vrot.slane %v5258_v23, 2  ;;  %v3212_v3 = vadd.f32 %v9249_v39, %v9061_v32  ;;  %v11188_v5 = vld [vmem:[#allocation17_spill] sm:$0xff] }
 0x402   : > { %v7693_v10 = vpop.eup %7692  ;;  %v7078_v28 = vcombine.low %v7014_v2, %v7015_v6  ;;  %v4812_v21 = vmax.f32 %v4810_v18, %v4811_v60  ;;  %v4823_v35 = vrot.slane %v4822_v33, 4  ;;  %v5271_v0 = vrot.slane %v5270_v30, 4  ;;  %v11189_v60 = vld [vmem:[#allocation14_spill] sm:$0xff] }
 0x403   : > { %v6697_v59 = vmul.f32 %v7693_v10, %v6601_v15  ;;  %v9421_v14 = vmin.f32 %v5253_v40, %v5254_v25  ;;  %v3946_v63 = vadd.f32 %v9362_v26, %v3212_v3  ;;  %v4297_v20 = vmul.f32 %v3212_v3, %v3212_v3 }
 0x404   : > { %v9424_v17 = vmax.f32 %v4819_v7, %v4820_v31  ;;  %v5268_v36 = vrot.slane %v5267_v11, 1  ;;  %v4824_v27 = vmax.f32 %v4822_v33, %v4823_v35  ;;  %v5272_v58 = vmin.f32 %v5270_v30, %v5271_v0 }
 0x405   : > { %v7017_v51 = vadd.f32 %v11188_v5, %v6697_v59  ;;  %v9427_v4 = vmin.f32 %v5258_v23, %v5259_v29  ;;  %v4394_v39 = vadd.f32 %v9375_v16, %v4297_v20  ;;  %v3265_v6 = vadd.f32 %v9255_v56, %v9064_v45 }
 0x406   : > { %v7086_v25 = vrot.slane %v7078_v28, %v11189_v60  ;;  %v4813_v40 = vrot.slane %v4812_v21, 1  ;;  %v4825_v18 = vrot.slane %v4824_v27, 2  ;;  %v9435_v26 = vadd.f32 %v9257_v13, %v11168_v53 }
 0x407   : > { %v7079_v7 = vcombine.low %v7016_v9, %v7017_v51  ;;  %v3964_v15 = vadd.f32 %v9371_v57, %v3265_v6  ;;  %v4299_v2 = vmul.f32 %v3265_v6, %v3265_v6  ;;  %v9440_v23 = vadd.f32 %v9261_v54, %v11170_v41 }
 0x408   : > { %v9442_v16 = vmax.f32 %v4824_v27, %v4825_v18  ;;  %v5273_v31 = vrot.slane %v5272_v58, 2  ;;  %v9446_v56 = vadd.f32 %v9395_v1, %v9435_v26  ;;  %v4298_v33 = vmul.f32 %v9435_v26, %v9435_v26 }
 0x409   : > { %v7093_v13 = vrot.slane %v7079_v7, %v11189_v60  ;;  %v4412_v57 = vadd.f32 %v9389_v44, %v4299_v2  ;;  %v9453_v9 = vadd.f32 %v3972_v55, %v9440_v23  ;;  %v4300_v54 = vmul.f32 %v9440_v23, %v9440_v23 }
 0x40a   : > { %v9457_v30 = vmin.f32 %v5267_v11, %v5268_v36  ;;  %v9461_v1 = vadd.f32 %v9399_v38, %v4298_v33  ;;  %v3216_v29 = vadd.f32 %v9263_v43, %v9061_v32  ;;  %v9465_v28 = vmax.f32 %v4812_v21, %v4813_v40 }
 0x40b   : > { %v7094_v10 = vcombine.low %v7086_v25, %v7093_v13  ;;  %v9467_v44 = vadd.f32 %v4420_v49, %v4300_v54  ;;  %v3269_v55 = vadd.f32 %v9267_v48, %v9064_v45  ;;  %v9472_v11 = vmin.f32 %v5272_v58, %v5273_v31  ;;  %v9475_v32 = vpop.f32.mrb[24].mxu0  ;;  %v9477_v43 = vpop.f32.mrb[24].mxu1  ;;  %v11197_v13 = vld [vmem:[#allocation18_spill] sm:$0xff] }
 0x40c   : > { %v3947_v0 = vadd.f32 %v3946_v63, %v3216_v29  ;;  %v4329_v59 = vmul.f32 %v3216_v29, %v3216_v29  ;;  %v5025_v38 = vmax.f32 %v3212_v3, %v3216_v29  ;;  %v5473_v20 = vmin.f32 %v3212_v3, %v3216_v29  ;;  %11190 = vst [vmem:[#allocation25_spill] sm:$0xff] %v9475_v32  ;;  %v9479_v45 = vpop.f32.mrb[25].mxu0  ;;  %v9481_v48 = vpop.f32.mrb[25].mxu1 }
 0x40d   : > { %7222 = vst [vmem:[%s8381_s9] sm:$0xff] %v7094_v10  ;;  %v3965_v36 = vadd.f32 %v3964_v15, %v3269_v55  ;;  %v4331_v27 = vmul.f32 %v3269_v55, %v3269_v55  ;;  %11191 = vst [vmem:[#allocation6_spill] sm:$0xff] %v9477_v43  ;;  %v5039_v5 = vmax.f32 %v3265_v6, %v3269_v55  ;;  %v9483_v18 = vpop.f32.mrb[26].mxu0  ;;  %v9485_v3 = vpop.f32.mrb[26].mxu1  ;;  %vm5961_vm3 = vcmp.eq.s32.totalorder %v11197_v13, 1 }
 0x40e   : > { %v3948_v49 = vrot.slane %v3947_v0, 4  ;;  %v4395_v21 = vadd.f32 %v4394_v39, %v4329_v59  ;;  %v5487_v51 = vmin.f32 %v3265_v6, %v3269_v55  ;;  %11192 = vst [vmem:[#allocation7_spill] sm:$0xff] %v9479_v45  ;;  %11193 = vst [vmem:[#allocation10_spill] sm:$0xff] %v9481_v48  ;;  %v5026_v58 = vrot.slane %v5025_v38, 4  ;;  %v9487_v33 = vpop.f32.mrb[27].mxu0 }
 0x40f   : > { %v5474_v63 = vrot.slane %v5473_v20, 4  ;;  %v3966_v25 = vrot.slane %v3965_v36, 4  ;;  %v4413_v40 = vadd.f32 %v4412_v57, %v4331_v27  ;;  %11194 = vst [vmem:[#allocation11_spill] sm:$0xff] %v9483_v18  ;;  %11195 = vst [vmem:[#allocation13_spill] sm:$0xff] %v9485_v3  ;;  %v5040_v2 = vrot.slane %v5039_v5, 4  ;;  %v9490_v27 = vpop.f32.mrb[27].mxu1 }
 0x410   : > { %v3949_v7 = vadd.f32 %v3948_v49, %v3947_v0  ;;  %v4396_v15 = vrot.slane %v4395_v21, 4  ;;  %v5488_v31 = vrot.slane %v5487_v51, 4  ;;  %11196 = vst [vmem:[#allocation12_spill] sm:$0xff] %v9487_v33  ;;  %v5027_v39 = vmax.f32 %v5025_v38, %v5026_v58  ;;  %11198 = vst [vmem:[#allocation17_spill] sm:$0xff] %v9490_v27  ;;  %v11199_v3 = vld [vmem:[#allocation19_spill] sm:$0xff] }
 0x411   : > { %v5475_v6 = vmin.f32 %v5473_v20, %v5474_v63  ;;  %v3967_v54 = vadd.f32 %v3966_v25, %v3965_v36  ;;  %v4414_v29 = vrot.slane %v4413_v40, 4  ;;  %v5041_v59 = vmax.f32 %v5039_v5, %v5040_v2 }
 0x412   : > { %v3950_v10 = vrot.slane %v3949_v7, 2  ;;  %v4397_v55 = vadd.f32 %v4396_v15, %v4395_v21  ;;  %v5489_v57 = vmin.f32 %v5487_v51, %v5488_v31  ;;  %v5028_v35 = vrot.slane %v5027_v39, 2 }
 0x413   : > { %v5476_v34 = vrot.slane %v5475_v6, 2  ;;  %v3968_v0 = vrot.slane %v3967_v54, 2  ;;  %v4415_v49 = vadd.f32 %v4414_v29, %v4413_v40  ;;  %vm5963_vm4 = vcmp.eq.s32.totalorder %v11199_v3, 1 }
 0x414   : > { %v3951_v48 = vadd.f32 %v3950_v10, %v3949_v7  ;;  %v4398_v33 = vrot.slane %v4397_v55, 2  ;;  %v5042_v38 = vrot.slane %v5041_v59, 2  ;;  %v5490_v20 = vrot.slane %v5489_v57, 2 }
 0x415   : > { %v5029_v58 = vmax.f32 %v5027_v39, %v5028_v35  ;;  %v5477_v63 = vmin.f32 %v5475_v6, %v5476_v34  ;;  %v3969_v36 = vadd.f32 %v3968_v0, %v3967_v54  ;;  %v4416_v25 = vrot.slane %v4415_v49, 2 }
 0x416   : > { %v3952_v45 = vrot.slane %v3951_v48, 1  ;;  %v4399_v21 = vadd.f32 %v4398_v33, %v4397_v55  ;;  %v5043_v5 = vmax.f32 %v5041_v59, %v5042_v38  ;;  %v5491_v51 = vmin.f32 %v5489_v57, %v5490_v20  ;;  %v9505_v20 = vpop.f32.mrb[28].mxu1 }
 0x417   : > { %v5030_v15 = vrot.slane %v5029_v58, 1  ;;  %v5478_v2 = vrot.slane %v5477_v63, 1  ;;  %v3970_v31 = vrot.slane %v3969_v36, 1  ;;  %v4417_v27 = vadd.f32 %v4416_v25, %v4415_v49 }
 0x418   : > { %v3953_v43 = vadd.f32 %v3952_v45, %v3951_v48  ;;  %v4400_v40 = vrot.slane %v4399_v21, 1  ;;  %v5044_v29 = vrot.slane %v5043_v5, 1  ;;  %v5492_v18 = vrot.slane %v5491_v51, 1 }
 0x419   : > { %v5031_v7 = vmax.f32 %v5029_v58, %v5030_v15  ;;  %v5479_v10 = vmin.f32 %v5477_v63, %v5478_v2  ;;  %v3971_v32 = vadd.f32 %v3970_v31, %v3969_v36  ;;  %v4418_v60 = vrot.slane %v4417_v27, 1 }
 0x41a   : > { %v4201_v35 = vmul.f32 0.03125, %v3953_v43  ;;  %v4401_v34 = vadd.f32 %v4400_v40, %v4399_v21  ;;  %v5045_v39 = vmax.f32 %v5043_v5, %v5044_v29  ;;  %v5493_v6 = vmin.f32 %v5491_v51, %v5492_v18  ;;  %v11203_v40 = vld [vmem:[#allocation20_spill] sm:$0xff] }
 0x41b   : > { %v6058_v33 = vsel %vm6053_vm14, %v5031_v7, %v9417_v8  ;;  %v6186_v54 = vsel %vm6053_vm14, %v5479_v10, %v9421_v14  ;;  %v4203_v55 = vmul.f32 0.03125, %v3971_v32  ;;  %v4419_v59 = vadd.f32 %v4418_v60, %v4417_v27  ;;  %v9503_v8 = vpop.f32.mrb[28].mxu0 }
 0x41c   : > { %v4649_v45 = vmul.f32 0.03125, %v4401_v34  ;;  %v4681_v48 = vmul.f32 %v4201_v35, %v4201_v35  ;;  %v6250_v57 = vsel %vm5961_vm3, %v6058_v33, %v6186_v54  ;;  %v6060_v0 = vsel %vm6053_vm14, %v5045_v39, %v9424_v17 }
 0x41d   : > { %v6282_v43 = vsub.f32 %v6250_v57, %v4201_v35  ;;  %v4651_v49 = vmul.f32 0.03125, %v4419_v59  ;;  %v4683_v38 = vmul.f32 %v4203_v55, %v4203_v55  ;;  %v6188_v18 = vsel %vm6053_vm14, %v5493_v6, %v9457_v30  ;;  %v9545_v6 = vld [vmem:[%s8376_s23 + $0x10] sm:$0x77] }
 0x41e   : > { %v11200_v14 = vrot.slane %v9427_v4, 1  ;;  %v4713_v32 = vsub.f32 %v4649_v45, %v4681_v48  ;;  %v6252_v17 = vsel %vm5963_vm4, %v6060_v0, %v6188_v18  ;;  %v3218_v13 = vadd.f32 %v9269_v52, %v11168_v53  ;;  %v9529_v52 = vpop.f32.mrb[29].mxu0  ;;  %v9531_v53 = vpop.f32.mrb[29].mxu1  ;;  %v11205_v45 = vld [vmem:[#allocation21_spill] sm:$0xff] }
 0x41f   : > { %v5275_v27 = vrot.slane %v9472_v11, 1  ;;  %v11201_v30 = vrot.slane %v11183_v24, %v11182_v61  ;;  %v4715_v63 = vsub.f32 %v4651_v49, %v4683_v38  ;;  %v6284_v36 = vsub.f32 %v6252_v17, %v4203_v55  ;;  %v9534_v24 = vld [vmem:[%s8376_s23 + $0x18] sm:$0x77]  ;;  %v9540_v31 = vpop.f32.mrb[30].mxu0  ;;  %v9549_v54 = vpop.f32.mrb[30].mxu1 }
 0x420   : > { %v9510_v60 = vmin.f32 %v9427_v4, %v11200_v14  ;;  %v11202_v4 = vrot.slane %v9442_v16, 1  ;;  %v4745_v3 = vmax.f32 %v4713_v32, 0.0  ;;  %v3956_v21 = vadd.f32 %v9446_v56, %v3218_v13  ;;  %11204 = vst [vmem:[#allocation18_spill] sm:$0xff] %v9549_v54 }
 0x421   : > { %v9521_v58 = vrot.slane %v11201_v30, %v11182_v61  ;;  %v4330_v5 = vmul.f32 %v3218_v13, %v3218_v13  ;;  %v4747_v51 = vmax.f32 %v4715_v63, 0.0  ;;  %v6753_v15 = vrot.slane %v9534_v24, %v11182_v61 }
 0x422   : > { %v9526_v25 = vmax.f32 %v9442_v16, %v11202_v4  ;;  %v5032_v2 = vmax.f32 %v9435_v26, %v3218_v13  ;;  %v5480_v16 = vmin.f32 %v9435_v26, %v3218_v13  ;;  %v6602_v56 = vmul.f32 %v11203_v40, %v6282_v43 }
 0x423   : > { %v6634_v29 = vadd.f32 1e-05, %v4745_v3  ;;  %v3957_v7 = vrot.slane %v3956_v21, 4  ;;  %v4404_v10 = vadd.f32 %v9461_v1, %v4330_v5  ;;  %v6636_v35 = vadd.f32 1e-05, %v4747_v51 }
 0x424   : > { %v5033_v34 = vrot.slane %v5032_v2, 4  ;;  %v5481_v39 = vrot.slane %v5480_v16, 4  ;;  %v6333_v33 = vrot.slane %v9545_v6, %v8941_v37  ;;  %v3271_v59 = vadd.f32 %v9275_v12, %v11170_v41 }
 0x425   : > { %7694 = vrsqrt.f32 %v6634_v29  ;;  %v3958_v26 = vadd.f32 %v3957_v7, %v3956_v21  ;;  %v4405_v55 = vrot.slane %v4404_v10, 4  ;;  %v6604_v48 = vmul.f32 %v11205_v45, %v6284_v36 }
 0x426   : > { %7696 = vrsqrt.f32 %v6636_v35  ;;  %v5034_v1 = vmax.f32 %v5032_v2, %v5033_v34  ;;  %v5482_v57 = vmin.f32 %v5480_v16, %v5481_v39  ;;  %vm5962_vm5 = vcmp.eq.s32.totalorder %v9319_v46, 1 }
 0x427   : > { %v3959_v0 = vrot.slane %v3958_v26, 2  ;;  %v4406_v43 = vadd.f32 %v4405_v55, %v4404_v10  ;;  %v3974_v49 = vadd.f32 %v9453_v9, %v3271_v59  ;;  %v4332_v38 = vmul.f32 %v3271_v59, %v3271_v59  ;;  %v9559_v55 = vpop.f32.mrb[31].mxu0 }
 0x428   : > { %v5035_v18 = vrot.slane %v5034_v1, 2  ;;  %v5483_v14 = vrot.slane %v5482_v57, 2  ;;  %v5046_v32 = vmax.f32 %v9440_v23, %v3271_v59  ;;  %v5494_v17 = vmin.f32 %v9440_v23, %v3271_v59  ;;  %11206 = vst [vmem:[#allocation19_spill] sm:$0xff] %v9559_v55 }
 0x429   : > { %v3960_v13 = vadd.f32 %v3959_v0, %v3958_v26  ;;  %v4407_v12 = vrot.slane %v4406_v43, 2  ;;  %v3975_v41 = vrot.slane %v3974_v49, 4  ;;  %v4422_v30 = vadd.f32 %v9467_v44, %v4332_v38 }
 0x42a   : > { %v5036_v63 = vmax.f32 %v5034_v1, %v5035_v18  ;;  %v5484_v36 = vmin.f32 %v5482_v57, %v5483_v14  ;;  %v5047_v4 = vrot.slane %v5046_v32, 4  ;;  %v5495_v3 = vrot.slane %v5494_v17, 4 }
 0x42b   : > { %v3961_v21 = vrot.slane %v3960_v13, 1  ;;  %v4408_v5 = vadd.f32 %v4407_v12, %v4406_v43  ;;  %v3976_v51 = vadd.f32 %v3975_v41, %v3974_v49  ;;  %v4423_v9 = vrot.slane %v4422_v30, 4 }
 0x42c   : > { %v5037_v2 = vrot.slane %v5036_v63, 1  ;;  %v5485_v16 = vrot.slane %v5484_v36, 1  ;;  %v5048_v40 = vmax.f32 %v5046_v32, %v5047_v4  ;;  %v5496_v29 = vmin.f32 %v5494_v17, %v5495_v3 }
 0x42d   : > { %v3962_v7 = vadd.f32 %v3961_v21, %v3960_v13  ;;  %v4409_v10 = vrot.slane %v4408_v5, 1  ;;  %v3977_v23 = vrot.slane %v3976_v51, 2  ;;  %v4424_v35 = vadd.f32 %v4423_v9, %v4422_v30  ;;  %v11207_v30 = vld [vmem:[#allocation8_spill] sm:$0xff] }
 0x42e   : > { %v5038_v34 = vmax.f32 %v5036_v63, %v5037_v2  ;;  %v5486_v39 = vmin.f32 %v5484_v36, %v5485_v16  ;;  %v5049_v26 = vrot.slane %v5048_v40, 2  ;;  %v5497_v44 = vrot.slane %v5496_v29, 2 }
 0x42f   : > { %v7695_v59 = vpop.eup %7694  ;;  %v4202_v45 = vmul.f32 0.03125, %v3962_v7  ;;  %v4410_v1 = vadd.f32 %v4409_v10, %v4408_v5  ;;  %v3978_v57 = vadd.f32 %v3977_v23, %v3976_v51  ;;  %v4425_v0 = vrot.slane %v4424_v35, 2  ;;  %v11208_v5 = vld [vmem:[#allocation9_spill] sm:$0xff]  ;;  %v9591_v7 = vld [vmem:[%s8376_s23 + $0x20] sm:$0x77] }
 0x430   : > { %v7697_v43 = vpop.eup %7696  ;;  %v6698_v49 = vmul.f32 %v7695_v59, %v6602_v56  ;;  %v6059_v38 = vsel %vm6053_vm14, %v5038_v34, %v9465_v28  ;;  %v6187_v18 = vsel %vm6053_vm14, %v5486_v39, %v9510_v60  ;;  %v5050_v14 = vmax.f32 %v5048_v40, %v5049_v26  ;;  %v9594_v10 = vld [vmem:[%s8376_s23 + $0x28] sm:$0x77]  ;;  %v11209_v59 = vld [vmem:[#allocation4_spill] sm:$0xff] }
 0x431   : > { %v9565_v32 = vmul.f32 %v7697_v43, %v6604_v48  ;;  %v4650_v17 = vmul.f32 0.03125, %v4410_v1  ;;  %v4682_v13 = vmul.f32 %v4202_v45, %v4202_v45  ;;  %v6251_v12 = vsel %vm5962_vm5, %v6059_v38, %v6187_v18 }
 0x432   : > { %v6283_v41 = vsub.f32 %v6251_v12, %v4202_v45  ;;  %v6749_v63 = vrot.slane %v9545_v6, %v11207_v30  ;;  %v3979_v36 = vrot.slane %v3978_v57, 1  ;;  %v4426_v56 = vadd.f32 %v4425_v0, %v4424_v35  ;;  %v11210_v0 = vld [vmem:[#allocation5_spill] sm:$0xff] }
 0x433   : > { %v5276_v28 = vmin.f32 %v9472_v11, %v5275_v27  ;;  %v4714_v60 = vsub.f32 %v4650_v17, %v4682_v13  ;;  %v5051_v48 = vrot.slane %v5050_v14, 1  ;;  %v5498_v4 = vmin.f32 %v5496_v29, %v5497_v44 }
 0x434   : > { %v9578_v46 = vrot.slane %v6753_v15, %v11182_v61  ;;  %v3980_v3 = vadd.f32 %v3979_v36, %v3978_v57  ;;  %v4427_v21 = vrot.slane %v4426_v56, 1  ;;  %v5732_v51 = vrot.slane %v11208_v5, %v8941_v37 }
 0x435   : > { %v4746_v9 = vmax.f32 %v4714_v60, 0.0  ;;  %v6493_v11 = vrot.slane %v6333_v33, %v8858_v50  ;;  %v5052_v27 = vmax.f32 %v5050_v14, %v5051_v48  ;;  %v5499_v2 = vrot.slane %v5498_v4, 1 }
 0x436   : > { %v9587_v16 = vrot.slane %v6749_v63, %v11182_v61  ;;  %v4204_v40 = vmul.f32 0.03125, %v3980_v3  ;;  %v4428_v29 = vadd.f32 %v4427_v21, %v4426_v56  ;;  %v5860_v15 = vrot.slane %v5732_v51, %v8858_v50  ;;  %v11212_v51 = vld [vmem:[#allocation26_spill] sm:$0xff] }
 0x437   : > { %v6635_v23 = vadd.f32 1e-05, %v4746_v9  ;;  %v5500_v35 = vmin.f32 %v5498_v4, %v5499_v2  ;;  %v6061_v34 = vsel %vm6053_vm14, %v5052_v27, %v9526_v25  ;;  %v6341_v6 = vrot.slane %v9534_v24, %v8941_v37 }
 0x438   : > { %v4652_v33 = vmul.f32 0.03125, %v4428_v29  ;;  %v4684_v39 = vmul.f32 %v4204_v40, %v4204_v40  ;;  %vm5964_vm6 = vcmp.eq.s32.totalorder %v5860_v15, 1  ;;  %v6757_v26 = vrot.slane %v9534_v24, %v11207_v30 }
 0x439   : > { %7698 = vrsqrt.f32 %v6635_v23  ;;  %v6189_v44 = vsel %vm6053_vm14, %v5500_v35, %v5276_v28  ;;  %v1528_v45 = vrot.slane %v9591_v7, %v11209_v59  ;;  %v1536_v1 = vrot.slane %v9594_v10, %v11209_v59  ;;  %v11213_v23 = vld [vmem:[#allocation27_spill] sm:$0xff] }
 0x43a   : > { %v4716_v57 = vsub.f32 %v4652_v33, %v4684_v39  ;;  %v6253_v25 = vsel %vm5964_vm6, %v6061_v34, %v6189_v44  ;;  %v1532_v43 = vrot.slane %v9591_v7, %v11210_v0  ;;  %v1540_v38 = vrot.slane %v9594_v10, %v11210_v0 }
 0x43b   : > { %v9612_v18 = vadd.f32 %v9521_v58, %v6698_v49  ;;  %v6285_v24 = vsub.f32 %v6253_v25, %v4204_v40  ;;  %v9615_v14 = vrot.slane %v1528_v45, %v11209_v59  ;;  %v9618_v17 = vrot.slane %v1536_v1, %v11209_v59 }
 0x43c   : > { %v4748_v13 = vmax.f32 %v4716_v57, 0.0  ;;  %v6501_v12 = vrot.slane %v6341_v6, %v8858_v50  ;;  %v9622_v63 = vrot.slane %v1532_v43, %v11209_v59  ;;  %v9625_v36 = vrot.slane %v1540_v38, %v11209_v59 }
 0x43d   : > { %v6603_v56 = vmul.f32 %v6493_v11, %v6283_v41  ;;  %v3308_v58 = vadd.f32 %v9321_v62, %v9615_v14  ;;  %v3361_v49 = vadd.f32 %v9331_v19, %v9618_v17  ;;  %v3312_v28 = vadd.f32 %v9340_v22, %v9615_v14  ;;  %v9640_v41 = vpop.f32.mrb[31].mxu1 }
 0x43e   : > { %v6637_v60 = vadd.f32 1e-05, %v4748_v13  ;;  %v9634_v48 = vrot.slane %v6757_v26, %v11182_v61  ;;  %v3310_v4 = vadd.f32 %v9333_v47, %v9622_v63  ;;  %v3365_v3 = vadd.f32 %v9346_v42, %v9618_v17  ;;  %11211 = vst [vmem:[#allocation20_spill] sm:$0xff] %v9640_v41  ;;  %v11214_v26 = vld [vmem:[#allocation28_spill] sm:$0xff] }
 0x43f   : > { %v4237_v21 = vmul.f32 %v3308_v58, %v3308_v58  ;;  %v4239_v62 = vmul.f32 %v3361_v49, %v3361_v49  ;;  %v9642_v5 = vadd.f32 %v3312_v28, %v3308_v58  ;;  %v4269_v19 = vmul.f32 %v3312_v28, %v3312_v28 }
 0x440   : > { %vm5673_vm7 = vcmp.ge.f32.partialorder %v9591_v7, 0.0  ;;  %v6605_v22 = vmul.f32 %v6501_v12, %v6285_v24  ;;  %7700 = vrsqrt.f32 %v6637_v60  ;;  %v9647_v9 = vadd.f32 %v11212_v51, %v9625_v36 }
 0x441   : > { %v4829_v11 = vmax.f32 %v3308_v58, %v3312_v28  ;;  %v9649_v47 = vadd.f32 %v4269_v19, %v4237_v21  ;;  %v5277_v27 = vmin.f32 %v3308_v58, %v3312_v28  ;;  %v9651_v42 = vadd.f32 %v3365_v3, %v3361_v49 }
 0x442   : > { %v4271_v2 = vmul.f32 %v3365_v3, %v3365_v3  ;;  %v4843_v29 = vmax.f32 %v3361_v49, %v3365_v3  ;;  %v5291_v15 = vmin.f32 %v3361_v49, %v3365_v3  ;;  %v3314_v35 = vadd.f32 %v11213_v23, %v9622_v63 }
 0x443   : > { %v4830_v40 = vrot.slane %v4829_v11, 4  ;;  %v7699_v34 = vpop.eup %7698  ;;  %v4238_v6 = vmul.f32 %v3310_v4, %v3310_v4  ;;  %v5278_v33 = vrot.slane %v5277_v27, 4  ;;  %v3367_v44 = vadd.f32 %v11214_v26, %v9625_v36 }
 0x444   : > { %v9655_v39 = vadd.f32 %v4271_v2, %v4239_v62  ;;  %v6699_v45 = vmul.f32 %v7699_v34, %v6603_v56  ;;  %v4844_v57 = vrot.slane %v4843_v29, 4  ;;  %v5292_v25 = vrot.slane %v5291_v15, 4 }
 0x445   : > { %v4831_v1 = vmax.f32 %v4829_v11, %v4830_v40  ;;  %v5279_v43 = vmin.f32 %v5277_v27, %v5278_v33  ;;  %v9659_v38 = vadd.f32 %v3314_v35, %v3310_v4  ;;  %v4270_v24 = vmul.f32 %v3314_v35, %v3314_v35 }
 0x446   : > { %v4836_v13 = vmax.f32 %v3310_v4, %v3314_v35  ;;  %v7019_v12 = vadd.f32 %v9587_v16, %v6699_v45  ;;  %v4845_v49 = vmax.f32 %v4843_v29, %v4844_v57  ;;  %v5293_v28 = vmin.f32 %v5291_v15, %v5292_v25  ;;  %v11216_v45 = vld [vmem:[#allocation14_spill] sm:$0xff] }
 0x447   : > { %v4832_v58 = vrot.slane %v4831_v1, 2  ;;  %v5280_v60 = vrot.slane %v5279_v43, 2  ;;  %v9662_v3 = vadd.f32 %v4270_v24, %v4238_v6  ;;  %v5284_v62 = vmin.f32 %v3310_v4, %v3314_v35 }
 0x448   : > { %v4837_v21 = vrot.slane %v4836_v13, 4  ;;  %v7095_v56 = vcombine.low %v9612_v18, %v7019_v12  ;;  %v4846_v51 = vrot.slane %v4845_v49, 2  ;;  %v5294_v11 = vrot.slane %v5293_v28, 2 }
 0x449   : > { %v4833_v19 = vmax.f32 %v4831_v1, %v4832_v58  ;;  %v5281_v27 = vmin.f32 %v5279_v43, %v5280_v60  ;;  %v5285_v40 = vrot.slane %v5284_v62, 4  ;;  %v4008_v23 = vadd.f32 %v3367_v44, %v9647_v9  ;;  %v11217_v43 = vld [vmem:[#allocation15_spill] sm:$0xff] }
 0x44a   : > { %v4838_v2 = vmax.f32 %v4836_v13, %v4837_v21  ;;  %v7701_v34 = vpop.eup %7700  ;;  %v7020_v16 = vadd.f32 %v9578_v46, %v9565_v32  ;;  %v4847_v15 = vmax.f32 %v4845_v49, %v4846_v51  ;;  %v11215_v6 = vmov 0  }
 0x44b   : > { %v4834_v29 = vrot.slane %v4833_v19, 1  ;;  %v9671_v4 = vsel %vm5673_vm7, 1, %v11215_v6  ;;  %v6701_v18 = vmul.f32 %v7701_v34, %v6605_v22  ;;  %v5295_v35 = vmin.f32 %v5293_v28, %v5294_v11 }
 0x44c   : > { %v4839_v33 = vrot.slane %v4838_v2, 2  ;;  %v5286_v26 = vmin.f32 %v5284_v62, %v5285_v40  ;;  %v7103_v1 = vrot.slane %v7095_v56, %v11216_v45  ;;  %v4240_v57 = vmul.f32 %v9647_v9, %v9647_v9 }
 0x44d   : > { %v4272_v25 = vmul.f32 %v3367_v44, %v3367_v44  ;;  %v3318_v32 = vadd.f32 %v11217_v43, %v9615_v14  ;;  %v7021_v46 = vadd.f32 %v9634_v48, %v6701_v18  ;;  %v5282_v24 = vrot.slane %v5281_v27, 1  ;;  %v11218_v48 = vld [vmem:[#allocation22_spill] sm:$0xff] }
 0x44e   : > { %v4840_v13 = vmax.f32 %v4838_v2, %v4839_v33  ;;  %v5287_v12 = vrot.slane %v5286_v26, 2  ;;  %v9679_v58 = vmax.f32 %v4833_v19, %v4834_v29  ;;  %v4848_v22 = vrot.slane %v4847_v15, 1 }
 0x44f   : > { %v4456_v49 = vadd.f32 %v4272_v25, %v4240_v57  ;;  %v4850_v28 = vmax.f32 %v9647_v9, %v3367_v44  ;;  %v7096_v60 = vcombine.low %v7020_v16, %v7021_v46  ;;  %v5296_v21 = vrot.slane %v5295_v35, 1  ;;  %v11219_v25 = vld [vmem:[#allocation16_spill] sm:$0xff] }
 0x450   : > { %v5288_v62 = vmin.f32 %v5286_v26, %v5287_v12  ;;  %v5298_v56 = vmin.f32 %v9647_v9, %v3367_v44  ;;  %v3982_v11 = vadd.f32 %v9642_v5, %v3318_v32  ;;  %v4301_v40 = vmul.f32 %v3318_v32, %v3318_v32 }
 0x451   : > { %v4851_v51 = vrot.slane %v4850_v28, 4  ;;  %v9686_v34 = vadd.f32 %v11218_v48, %v9618_v17  ;;  %v7110_v19 = vrot.slane %v7096_v60, %v11216_v45  ;;  %v9689_v2 = vmin.f32 %v5281_v27, %v5282_v24  ;;  %v11220_v24 = vld [vmem:[#allocation23_spill] sm:$0xff] }
 0x452   : > { %v4841_v29 = vrot.slane %v4840_v13, 1  ;;  %v5299_v18 = vrot.slane %v5298_v56, 4  ;;  %v4430_v33 = vadd.f32 %v9649_v47, %v4301_v40  ;;  %v5289_v26 = vrot.slane %v5288_v62, 1  ;;  %v11221_v47 = vld [vmem:[#allocation24_spill] sm:$0xff] }
 0x453   : > { %v4852_v16 = vmax.f32 %v4850_v28, %v4851_v51  ;;  %v4000_v9 = vadd.f32 %v9651_v42, %v9686_v34  ;;  %v4303_v5 = vmul.f32 %v9686_v34, %v9686_v34  ;;  %v7111_v44 = vcombine.low %v7103_v1, %v7110_v19 }
 0x454   : > { %v5300_v57 = vmin.f32 %v5298_v56, %v5299_v18  ;;  %v9698_v43 = vadd.f32 %v11219_v25, %v9622_v63  ;;  %v9703_v12 = vadd.f32 %v11220_v24, %v9625_v36  ;;  %v3322_v42 = vadd.f32 %v11221_v47, %v9615_v14 }
 0x455   : > { %v4853_v27 = vrot.slane %v4852_v16, 2  ;;  %v4448_v46 = vadd.f32 %v9655_v39, %v4303_v5  ;;  %7223 = vst [vmem:[%s8381_s9 + $0x8] sm:$0xff] %v7111_v44  ;;  %v5736_v56 = vrot.slane %v9671_v4, %v8858_v50  ;;  %v9732_v41 = vmax.f32 %v4840_v13, %v4841_v29 }
 0x456   : > { %v5301_v28 = vrot.slane %v5300_v57, 2  ;;  %v9710_v1 = vadd.f32 %v9659_v38, %v9698_v43  ;;  %v4302_v60 = vmul.f32 %v9698_v43, %v9698_v43  ;;  %v9717_v51 = vadd.f32 %v4008_v23, %v9703_v12 }
 0x457   : > { %v4854_v39 = vmax.f32 %v4852_v16, %v4853_v27  ;;  %v4304_v40 = vmul.f32 %v9703_v12, %v9703_v12  ;;  %v3983_v14 = vadd.f32 %v3982_v11, %v3322_v42  ;;  %v4333_v38 = vmul.f32 %v3322_v42, %v3322_v42 }
 0x458   : > { %v9721_v48 = vmin.f32 %v5300_v57, %v5301_v28  ;;  %v9724_v19 = vadd.f32 %v9662_v3, %v4302_v60  ;;  %v5053_v18 = vmax.f32 %v3318_v32, %v3322_v42  ;;  %v5501_v24 = vmin.f32 %v3318_v32, %v3322_v42  ;;  %v9748_v42 = vpop.f32.mrb[32].mxu0 }
 0x459   : > { %v4855_v5 = vrot.slane %v4854_v39, 1  ;;  %v9726_v44 = vadd.f32 %v4456_v49, %v4304_v40  ;;  %v3984_v25 = vrot.slane %v3983_v14, 4  ;;  %v9728_v16 = vmax.f32 %v4847_v15, %v4848_v22  ;;  %11223 = vst [vmem:[#allocation21_spill] sm:$0xff] %v9748_v42 }
 0x45a   : > { %v9730_v23 = vmin.f32 %v5295_v35, %v5296_v21  ;;  %v4431_v27 = vadd.f32 %v4430_v33, %v4333_v38  ;;  %v5054_v47 = vrot.slane %v5053_v18, 4  ;;  %v5502_v57 = vrot.slane %v5501_v24, 4  ;;  %v11222_v21 = vld [vmem:[#allocation29_spill] sm:$0xff] }
 0x45b   : > { %v3985_v11 = vadd.f32 %v3984_v25, %v3983_v14  ;;  %v5864_v3 = vrot.slane %v5736_v56, %v8858_v50  ;;  %v9735_v28 = vmin.f32 %v5288_v62, %v5289_v26  ;;  %v9738_v55 = vmax.f32 %v4854_v39, %v4855_v5  ;;  %v9750_v56 = vpop.f32.mrb[32].mxu1  ;;  %v9752_v5 = vpop.f32.mrb[33].mxu0 }
 0x45c   : > { %v4432_v49 = vrot.slane %v4431_v27, 4  ;;  %v5055_v40 = vmax.f32 %v5053_v18, %v5054_v47  ;;  %v5503_v32 = vmin.f32 %v5501_v24, %v5502_v57  ;;  %v3375_v29 = vadd.f32 %v11222_v21, %v9618_v17  ;;  %11224 = vst [vmem:[#allocation8_spill] sm:$0xff] %v9750_v56  ;;  %11225 = vst [vmem:[#allocation9_spill] sm:$0xff] %v9752_v5  ;;  %v9754_v25 = vpop.f32.mrb[33].mxu1 }
 0x45d   : > { %v3986_v15 = vrot.slane %v3985_v11, 2  ;;  %vm5674_vm8 = vcmp.ge.f32.partialorder %v9594_v10, 0.0  ;;  %vm5965_vm9 = vcmp.eq.s32.totalorder %v5864_v3, 1  ;;  %11226 = vst [vmem:[#allocation4_spill] sm:$0xff] %v9754_v25  ;;  %v9760_v57 = vpop.f32.mrb[34].mxu1 }
 0x45e   : > { %v4433_v22 = vadd.f32 %v4432_v49, %v4431_v27  ;;  %v5056_v13 = vrot.slane %v5055_v40, 2  ;;  %v5504_v33 = vrot.slane %v5503_v32, 2  ;;  %v9746_v26 = vsel %vm5674_vm8, 1, %v11215_v6  ;;  %11228 = vst [vmem:[#allocation26_spill] sm:$0xff] %v9760_v57  ;;  %v9764_v5 = vpop.f32.mrb[35].mxu1 }
 0x45f   : > { %v3987_v62 = vadd.f32 %v3986_v15, %v3985_v11  ;;  %v4001_v38 = vadd.f32 %v4000_v9, %v3375_v29  ;;  %v4335_v18 = vmul.f32 %v3375_v29, %v3375_v29  ;;  %v5067_v27 = vmax.f32 %v9686_v34, %v3375_v29  ;;  %v9758_v11 = vpop.f32.mrb[34].mxu0  ;;  %11230 = vst [vmem:[#allocation28_spill] sm:$0xff] %v9764_v5 }
 0x460   : > { %v4434_v39 = vrot.slane %v4433_v22, 2  ;;  %v5057_v14 = vmax.f32 %v5055_v40, %v5056_v13  ;;  %v5505_v24 = vmin.f32 %v5503_v32, %v5504_v33  ;;  %v5515_v47 = vmin.f32 %v9686_v34, %v3375_v29  ;;  %11227 = vst [vmem:[#allocation5_spill] sm:$0xff] %v9758_v11  ;;  %v9762_v9 = vpop.f32.mrb[35].mxu0 }
 0x461   : > { %v3988_v17 = vrot.slane %v3987_v62, 1  ;;  %v4002_v21 = vrot.slane %v4001_v38, 4  ;;  %v4449_v40 = vadd.f32 %v4448_v46, %v4335_v18  ;;  %11229 = vst [vmem:[#allocation27_spill] sm:$0xff] %v9762_v9  ;;  %v5068_v60 = vrot.slane %v5067_v27, 4 }
 0x462   : > { %v4435_v49 = vadd.f32 %v4434_v39, %v4433_v22  ;;  %v5058_v15 = vrot.slane %v5057_v14, 1  ;;  %v5506_v35 = vrot.slane %v5505_v24, 1  ;;  %v5516_v25 = vrot.slane %v5515_v47, 4 }
 0x463   : > { %v3989_v13 = vadd.f32 %v3988_v17, %v3987_v62  ;;  %v4003_v56 = vadd.f32 %v4002_v21, %v4001_v38  ;;  %v4450_v34 = vrot.slane %v4449_v40, 4  ;;  %v5069_v42 = vmax.f32 %v5067_v27, %v5068_v60 }
 0x464   : > { %v4436_v32 = vrot.slane %v4435_v49, 1  ;;  %v5059_v33 = vmax.f32 %v5057_v14, %v5058_v15  ;;  %v5507_v11 = vmin.f32 %v5505_v24, %v5506_v35  ;;  %v5517_v57 = vmin.f32 %v5515_v47, %v5516_v25 }
 0x465   : > { %v4205_v29 = vmul.f32 0.03125, %v3989_v13  ;;  %v4004_v39 = vrot.slane %v4003_v56, 2  ;;  %v4451_v18 = vadd.f32 %v4450_v34, %v4449_v40  ;;  %v5070_v9 = vrot.slane %v5069_v42, 2 }
 0x466   : > { %v4437_v22 = vadd.f32 %v4436_v32, %v4435_v49  ;;  %v6062_v46 = vsel %vm6053_vm14, %v5059_v33, %v9679_v58  ;;  %v6190_v17 = vsel %vm6053_vm14, %v5507_v11, %v9689_v2  ;;  %v5518_v5 = vrot.slane %v5517_v57, 2 }
 0x467   : > { %v4685_v62 = vmul.f32 %v4205_v29, %v4205_v29  ;;  %v6254_v14 = vsel %vm5965_vm9, %v6062_v46, %v6190_v17  ;;  %v4005_v38 = vadd.f32 %v4004_v39, %v4003_v56  ;;  %v4452_v15 = vrot.slane %v4451_v18, 2  ;;  %v9796_v17 = vpop.f32.mrb[36].mxu0 }
 0x468   : > { %v4653_v54 = vmul.f32 0.03125, %v4437_v22  ;;  %v6286_v35 = vsub.f32 %v6254_v14, %v4205_v29  ;;  %v5071_v60 = vmax.f32 %v5069_v42, %v5070_v9  ;;  %v5519_v25 = vmin.f32 %v5517_v57, %v5518_v5  ;;  %v11233_v29 = vld [vmem:[#allocation30_spill] sm:$0xff]  ;;  %v9798_v14 = vpop.f32.mrb[36].mxu1 }
 0x469   : > { %v5744_v24 = vrot.slane %v9746_v26, %v8858_v50  ;;  %v11231_v58 = vrot.slane %v9721_v48, 1  ;;  %v4006_v2 = vrot.slane %v4005_v38, 1  ;;  %v4453_v11 = vadd.f32 %v4452_v15, %v4451_v18  ;;  %11234 = vst [vmem:[#allocation14_spill] sm:$0xff] %v9798_v14 }
 0x46a   : > { %v4717_v47 = vsub.f32 %v4653_v54, %v4685_v62  ;;  %v5072_v49 = vrot.slane %v5071_v60, 1  ;;  %v5520_v21 = vrot.slane %v5519_v25, 1  ;;  %v6353_v56 = vrot.slane %v9594_v10, %v8858_v50 }
 0x46b   : > { %v9776_v27 = vmin.f32 %v9721_v48, %v11231_v58  ;;  %v5872_v3 = vrot.slane %v5744_v24, %v8858_v50  ;;  %v11232_v5 = vrot.slane %v9591_v7, %v8858_v50  ;;  %v4007_v40 = vadd.f32 %v4006_v2, %v4005_v38 }
 0x46c   : > { %v4749_v42 = vmax.f32 %v4717_v47, 0.0  ;;  %v4454_v9 = vrot.slane %v4453_v11, 1  ;;  %v6761_v54 = vrot.slane %v9591_v7, %v11182_v61  ;;  %v5073_v48 = vmax.f32 %v5071_v60, %v5072_v49 }
 0x46d   : > { %v6505_v57 = vrot.slane %v11232_v5, %v8858_v50  ;;  %v5521_v13 = vmin.f32 %v5519_v25, %v5520_v21  ;;  %vm5967_vm10 = vcmp.eq.s32.totalorder %v5872_v3, 1  ;;  %v4207_v33 = vmul.f32 0.03125, %v4007_v40  ;;  %v9802_v25 = vpop.f32.mrb[37].mxu1 }
 0x46e   : > { %v6638_v32 = vadd.f32 1e-05, %v4749_v42  ;;  %v4455_v34 = vadd.f32 %v4454_v9, %v4453_v11  ;;  %v3324_v22 = vadd.f32 %v11233_v29, %v9622_v63  ;;  %v6064_v46 = vsel %vm6053_vm14, %v5073_v48, %v9728_v16  ;;  %v9800_v63 = vpop.f32.mrb[37].mxu0  ;;  %11236 = vst [vmem:[#allocation22_spill] sm:$0xff] %v9802_v25 }
 0x46f   : > { %v6192_v39 = vsel %vm6053_vm14, %v5521_v13, %v9730_v23  ;;  %v6513_v18 = vrot.slane %v6353_v56, %v8858_v50  ;;  %v5740_v62 = vrot.slane %v9671_v4, %v8941_v37  ;;  %v4687_v15 = vmul.f32 %v4207_v33, %v4207_v33  ;;  %11235 = vst [vmem:[#allocation15_spill] sm:$0xff] %v9800_v63  ;;  %v9818_v9 = vpop.f32.mrb[38].mxu0 }
 0x470   : > { %7702 = vrsqrt.f32 %v6638_v32  ;;  %v4655_v38 = vmul.f32 0.03125, %v4455_v34  ;;  %v6256_v60 = vsel %vm5967_vm10, %v6064_v46, %v6192_v39  ;;  %v3992_v23 = vadd.f32 %v9710_v1, %v3324_v22  ;;  %11237 = vst [vmem:[#allocation16_spill] sm:$0xff] %v9818_v9 }
 0x471   : > { %v6288_v16 = vsub.f32 %v6256_v60, %v4207_v33  ;;  %v4334_v24 = vmul.f32 %v3324_v22, %v3324_v22  ;;  %v5060_v58 = vmax.f32 %v9698_v43, %v3324_v22  ;;  %v9807_v4 = vrot.slane %v6761_v54, %v11182_v61  ;;  %v9820_v54 = vpop.f32.mrb[38].mxu1 }
 0x472   : > { %v4719_v47 = vsub.f32 %v4655_v38, %v4687_v15  ;;  %v5508_v2 = vmin.f32 %v9698_v43, %v3324_v22  ;;  %v9811_v11 = vrot.slane %v5740_v62, %v8858_v50  ;;  %v6606_v49 = vmul.f32 %v6505_v57, %v6286_v35  ;;  %11238 = vst [vmem:[#allocation23_spill] sm:$0xff] %v9820_v54 }
 0x473   : > { %v3993_v21 = vrot.slane %v3992_v23, 4  ;;  %v4440_v3 = vadd.f32 %v9724_v19, %v4334_v24  ;;  %v5061_v56 = vrot.slane %v5060_v58, 4  ;;  %v6769_v1 = vrot.slane %v9594_v10, %v11182_v61  ;;  %v11239_v19 = vld [vmem:[#allocation31_spill] sm:$0xff] }
 0x474   : > { %v4751_v42 = vmax.f32 %v4719_v47, 0.0  ;;  %v5509_v5 = vrot.slane %v5508_v2, 4  ;;  %v6349_v40 = vrot.slane %v9591_v7, %v8941_v37  ;;  %v6608_v43 = vmul.f32 %v6513_v18, %v6288_v16 }
 0x475   : > { %v3994_v48 = vadd.f32 %v3993_v21, %v3992_v23  ;;  %v4441_v13 = vrot.slane %v4440_v3, 4  ;;  %v5062_v35 = vmax.f32 %v5060_v58, %v5061_v56  ;;  %vm5966_vm11 = vcmp.eq.s32.totalorder %v9811_v11, 1 }
 0x476   : > { %v6640_v57 = vadd.f32 1e-05, %v4751_v42  ;;  %v5510_v32 = vmin.f32 %v5508_v2, %v5509_v5  ;;  %v3377_v33 = vadd.f32 %v11239_v19, %v9625_v36  ;;  %v6765_v46 = vrot.slane %v9591_v7, %v11207_v30 }
 0x477   : > { %v3995_v34 = vrot.slane %v3994_v48, 2  ;;  %v4442_v29 = vadd.f32 %v4441_v13, %v4440_v3  ;;  %v5063_v22 = vrot.slane %v5062_v35, 2  ;;  %v5748_v19 = vrot.slane %v9746_v26, %v8941_v37 }
 0x478   : > { %7704 = vrsqrt.f32 %v6640_v57  ;;  %v5511_v39 = vrot.slane %v5510_v32, 2  ;;  %v4010_v18 = vadd.f32 %v9717_v51, %v3377_v33  ;;  %v4336_v62 = vmul.f32 %v3377_v33, %v3377_v33 }
 0x479   : > { %v3996_v38 = vadd.f32 %v3995_v34, %v3994_v48  ;;  %v4443_v15 = vrot.slane %v4442_v29, 2  ;;  %v5064_v60 = vmax.f32 %v5062_v35, %v5063_v22  ;;  %v5074_v16 = vmax.f32 %v9703_v12, %v3377_v33 }
 0x47a   : > { %v7703_v23 = vpop.eup %7702  ;;  %v5512_v24 = vmin.f32 %v5510_v32, %v5511_v39  ;;  %v4011_v58 = vrot.slane %v4010_v18, 4  ;;  %v4458_v36 = vadd.f32 %v9726_v44, %v4336_v62  ;;  %v5522_v47 = vmin.f32 %v9703_v12, %v3377_v33 }
 0x47b   : > { %v6702_v2 = vmul.f32 %v7703_v23, %v6606_v49  ;;  %v3997_v21 = vrot.slane %v3996_v38, 1  ;;  %v4444_v3 = vadd.f32 %v4443_v15, %v4442_v29  ;;  %v5065_v56 = vrot.slane %v5064_v60, 1  ;;  %v9835_v29 = vpop.f32.mrb[39].mxu0 }
 0x47c   : > { %v5513_v42 = vrot.slane %v5512_v24, 1  ;;  %v4012_v5 = vadd.f32 %v4011_v58, %v4010_v18  ;;  %v4459_v51 = vrot.slane %v4458_v36, 4  ;;  %v5075_v13 = vrot.slane %v5074_v16, 4  ;;  %11240 = vst [vmem:[#allocation24_spill] sm:$0xff] %v9835_v29 }
 0x47d   : > { %v3998_v48 = vadd.f32 %v3997_v21, %v3996_v38  ;;  %v4445_v57 = vrot.slane %v4444_v3, 1  ;;  %v5066_v35 = vmax.f32 %v5064_v60, %v5065_v56  ;;  %v5523_v33 = vrot.slane %v5522_v47, 4 }
 0x47e   : > { %v5514_v32 = vmin.f32 %v5512_v24, %v5513_v42  ;;  %v4013_v34 = vrot.slane %v4012_v5, 2  ;;  %v4460_v22 = vadd.f32 %v4459_v51, %v4458_v36  ;;  %v5076_v44 = vmax.f32 %v5074_v16, %v5075_v13 }
 0x47f   : > { %v4206_v39 = vmul.f32 0.03125, %v3998_v48  ;;  %v4446_v12 = vadd.f32 %v4445_v57, %v4444_v3  ;;  %v6063_v49 = vsel %vm6053_vm14, %v5066_v35, %v9732_v41  ;;  %v5524_v23 = vmin.f32 %v5522_v47, %v5523_v33  ;;  %v9847_v47 = vld [vmem:[%s8376_s23 + $0x30] sm:$0x77] }
 0x480   : > { %v6191_v18 = vsel %vm6053_vm14, %v5514_v32, %v9735_v28  ;;  %v4014_v62 = vadd.f32 %v4013_v34, %v4012_v5  ;;  %v4461_v38 = vrot.slane %v4460_v22, 2  ;;  %v5077_v15 = vrot.slane %v5076_v44, 2 }
 0x481   : > { %v4654_v60 = vmul.f32 0.03125, %v4446_v12  ;;  %v4686_v26 = vmul.f32 %v4206_v39, %v4206_v39  ;;  %v6255_v16 = vsel %vm5966_vm11, %v6063_v49, %v6191_v18  ;;  %v6509_v28 = vrot.slane %v6349_v40, %v8858_v50  ;;  %v9864_v12 = vld [vmem:[%s8376_s23 + $0x38] sm:$0x77] }
 0x482   : > { %v7705_v24 = vpop.eup %7704  ;;  %v6287_v58 = vsub.f32 %v6255_v16, %v4206_v39  ;;  %v4015_v36 = vrot.slane %v4014_v62, 1  ;;  %v4462_v41 = vadd.f32 %v4461_v38, %v4460_v22  ;;  %v5078_v21 = vmax.f32 %v5076_v44, %v5077_v15  ;;  %v11242_v16 = vld [vmem:[#allocation11_spill] sm:$0xff] }
 0x483   : > { %v6704_v3 = vmul.f32 %v7705_v24, %v6608_v43  ;;  %v4718_v56 = vsub.f32 %v4654_v60, %v4686_v26  ;;  %v5525_v42 = vrot.slane %v5524_v23, 2  ;;  %v5876_v13 = vrot.slane %v5748_v19, %v8858_v50  ;;  %v11241_v60 = vld [vmem:[#allocation25_spill] sm:$0xff] }
 0x484   : > { %v4016_v5 = vadd.f32 %v4015_v36, %v4014_v62  ;;  %v4463_v51 = vrot.slane %v4462_v41, 1  ;;  %v5079_v11 = vrot.slane %v5078_v21, 1  ;;  %v6929_v43 = vrot.slane %v6769_v1, %v11182_v61 }
 0x485   : > { %v4750_v48 = vmax.f32 %v4718_v56, 0.0  ;;  %v9854_v57 = vrot.slane %v6765_v46, %v11182_v61  ;;  %v5526_v7 = vmin.f32 %v5524_v23, %v5525_v42  ;;  %v9857_v40 = vadd.f32 %v9807_v4, %v6702_v2  ;;  %v9897_v56 = vpop.f32.mrb[39].mxu1 }
 0x486   : > { %v9859_v35 = vmul.f32 0.03125, %v4016_v5  ;;  %v4464_v32 = vadd.f32 %v4463_v51, %v4462_v41  ;;  %v5080_v34 = vmax.f32 %v5078_v21, %v5079_v11  ;;  %v6607_v19 = vmul.f32 %v6509_v28, %v6287_v58  ;;  %11243 = vst [vmem:[#allocation29_spill] sm:$0xff] %v9897_v56 }
 0x487   : > { %v6639_v22 = vadd.f32 1e-05, %v4750_v48  ;;  %v5527_v44 = vrot.slane %v5526_v7, 1  ;;  %v1544_v39 = vrot.slane %v9847_v47, %v11209_v59  ;;  %vm5968_vm12 = vcmp.eq.s32.totalorder %v5876_v13, 1  ;;  %v11245_v13 = vld [vmem:[#allocation7_spill] sm:$0xff] }
 0x488   : > { %v4656_v1 = vmul.f32 0.03125, %v4464_v32  ;;  %v4688_v46 = vmul.f32 %v9859_v35, %v9859_v35  ;;  %v6065_v4 = vsel %vm6053_vm14, %v5080_v34, %v9738_v55  ;;  %v6357_v49 = vrot.slane %v9594_v10, %v8941_v37 }
 0x489   : > { %7706 = vrsqrt.f32 %v6639_v22  ;;  %v5528_v2 = vmin.f32 %v5526_v7, %v5527_v44  ;;  %v9873_v33 = vrot.slane %v1544_v39, %v11209_v59  ;;  %v1552_v62 = vrot.slane %v9864_v12, %v11209_v59  ;;  %v11246_v39 = vld [vmem:[#allocation10_spill] sm:$0xff] }
 0x48a   : > { %v4720_v18 = vsub.f32 %v4656_v1, %v4688_v46  ;;  %v1548_v38 = vrot.slane %v9847_v47, %v11210_v0  ;;  %v1556_v15 = vrot.slane %v9864_v12, %v11210_v0  ;;  %v9907_v32 = vadd.f32 %v6929_v43, %v6704_v3 }
 0x48b   : > { %v6193_v55 = vsel %vm6053_vm14, %v5528_v2, %v9776_v27  ;;  %v3414_v26 = vadd.f32 %v11241_v60, %v9873_v33  ;;  %v3418_v23 = vadd.f32 %v11242_v16, %v9873_v33  ;;  %v9889_v24 = vadd.f32 %v9503_v8, %v9873_v33  ;;  %v11244_v8 = vld [vmem:[#allocation6_spill] sm:$0xff] }
 0x48c   : > { %v4752_v58 = vmax.f32 %v4720_v18, 0.0  ;;  %v6257_v36 = vsel %vm5968_vm12, %v6065_v4, %v6193_v55  ;;  %v9892_v41 = vrot.slane %v1552_v62, %v11209_v59  ;;  %v9895_v21 = vrot.slane %v1548_v38, %v11209_v59  ;;  %v11247_v62 = vld [vmem:[#allocation13_spill] sm:$0xff]  ;;  %v11248_v38 = vld [vmem:[#allocation12_spill] sm:$0xff] }
 0x48d   : > { %v6289_v27 = vsub.f32 %v6257_v36, %v9859_v35  ;;  %v4241_v28 = vmul.f32 %v3414_v26, %v3414_v26  ;;  %v9901_v42 = vrot.slane %v1556_v15, %v11209_v59  ;;  %v4017_v5 = vadd.f32 %v3418_v23, %v3414_v26  ;;  %v11249_v15 = vld [vmem:[#allocation17_spill] sm:$0xff] }
 0x48e   : > { %v6641_v51 = vadd.f32 1e-05, %v4752_v58  ;;  %v3467_v11 = vadd.f32 %v11244_v8, %v9892_v41  ;;  %v3416_v48 = vadd.f32 %v11245_v13, %v9895_v21  ;;  %v4273_v7 = vmul.f32 %v3418_v23, %v3418_v23 }
 0x48f   : > { %v6773_v34 = vrot.slane %v9594_v10, %v11207_v30  ;;  %v4857_v22 = vmax.f32 %v3414_v26, %v3418_v23  ;;  %v5305_v35 = vmin.f32 %v3414_v26, %v3418_v23  ;;  %v6517_v44 = vrot.slane %v6357_v49, %v8858_v50 }
 0x490   : > { %7708 = vrsqrt.f32 %v6641_v51  ;;  %v3469_v1 = vadd.f32 %v11246_v39, %v9901_v42  ;;  %v9914_v46 = vadd.f32 %v4273_v7, %v4241_v28  ;;  %v4243_v4 = vmul.f32 %v3467_v11, %v3467_v11 }
 0x491   : > { %v4858_v2 = vrot.slane %v4857_v22, 4  ;;  %v5306_v18 = vrot.slane %v5305_v35, 4  ;;  %v3471_v3 = vadd.f32 %v11247_v62, %v9892_v41  ;;  %v4242_v43 = vmul.f32 %v3416_v48, %v3416_v48 }
 0x492   : > { %v3420_v10 = vadd.f32 %v11248_v38, %v9895_v21  ;;  %v3473_v55 = vadd.f32 %v11249_v15, %v9901_v42  ;;  %v9923_v49 = vadd.f32 %v4017_v5, %v9889_v24  ;;  %v6609_v29 = vmul.f32 %v6517_v44, %v6289_v27 }
 0x493   : > { %v7707_v60 = vpop.eup %7706  ;;  %v4859_v26 = vmax.f32 %v4857_v22, %v4858_v2  ;;  %v5307_v16 = vmin.f32 %v5305_v35, %v5306_v18  ;;  %v9925_v23 = vadd.f32 %v3471_v3, %v3467_v11  ;;  %v4275_v58 = vmul.f32 %v3471_v3, %v3471_v3 }
 0x494   : > { %v6703_v36 = vmul.f32 %v7707_v60, %v6607_v19  ;;  %v4871_v28 = vmax.f32 %v3467_v11, %v3471_v3  ;;  %v5319_v51 = vmin.f32 %v3467_v11, %v3471_v3  ;;  %v9927_v8 = vadd.f32 %v3420_v10, %v3416_v48 }
 0x495   : > { %v4860_v13 = vrot.slane %v4859_v26, 2  ;;  %v5308_v7 = vrot.slane %v5307_v16, 2  ;;  %v9929_v39 = vadd.f32 %v4275_v58, %v4243_v4  ;;  %v4274_v62 = vmul.f32 %v3420_v10, %v3420_v10 }
 0x496   : > { %v7023_v38 = vadd.f32 %v9854_v57, %v6703_v36  ;;  %v4872_v5 = vrot.slane %v4871_v28, 4  ;;  %v5320_v15 = vrot.slane %v5319_v51, 4  ;;  %v4864_v56 = vmax.f32 %v3416_v48, %v3420_v10 }
 0x497   : > { %v4861_v22 = vmax.f32 %v4859_v26, %v4860_v13  ;;  %v5309_v35 = vmin.f32 %v5307_v16, %v5308_v7  ;;  %v4474_v2 = vadd.f32 %v4274_v62, %v4242_v43  ;;  %v5312_v18 = vmin.f32 %v3416_v48, %v3420_v10 }
 0x498   : > { %v7112_v19 = vcombine.low %v9857_v40, %v7023_v38  ;;  %v4873_v60 = vmax.f32 %v4871_v28, %v4872_v5  ;;  %v5321_v11 = vmin.f32 %v5319_v51, %v5320_v15  ;;  %v4865_v3 = vrot.slane %v4864_v56, 4 }
 0x499   : > { %v6933_v54 = vrot.slane %v6773_v34, %v11182_v61  ;;  %v5313_v4 = vrot.slane %v5312_v18, 4  ;;  %v4044_v58 = vadd.f32 %v3473_v55, %v3469_v1  ;;  %v4244_v25 = vmul.f32 %v3469_v1, %v3469_v1 }
 0x49a   : > { %v7709_v9 = vpop.eup %7708  ;;  %v4874_v57 = vrot.slane %v4873_v60, 2  ;;  %v5322_v36 = vrot.slane %v5321_v11, 2  ;;  %v4866_v63 = vmax.f32 %v4864_v56, %v4865_v3  ;;  %v4862_v26 = vrot.slane %v4861_v22, 1 }
 0x49b   : > { %v6705_v14 = vmul.f32 %v7709_v9, %v6609_v29  ;;  %v5314_v16 = vmin.f32 %v5312_v18, %v5313_v4  ;;  %v4305_v48 = vmul.f32 %v9889_v24, %v9889_v24  ;;  %v5310_v40 = vrot.slane %v5309_v35, 1 }
 0x49c   : > { %v4875_v43 = vmax.f32 %v4873_v60, %v4874_v57  ;;  %v4867_v10 = vrot.slane %v4866_v63, 2  ;;  %v4276_v28 = vmul.f32 %v3473_v55, %v3473_v55  ;;  %v4878_v34 = vmax.f32 %v3469_v1, %v3473_v55 }
 0x49d   : > { %v7025_v27 = vadd.f32 %v6933_v54, %v6705_v14  ;;  %v5315_v44 = vrot.slane %v5314_v16, 2  ;;  %v5326_v51 = vmin.f32 %v3469_v1, %v3473_v55  ;;  %v7120_v13 = vrot.slane %v7112_v19, %v11216_v45 }
 0x49e   : > { %v5323_v7 = vmin.f32 %v5321_v11, %v5322_v36  ;;  %v4492_v62 = vadd.f32 %v4276_v28, %v4244_v25  ;;  %v4876_v9 = vrot.slane %v4875_v43, 1  ;;  %v4879_v29 = vrot.slane %v4878_v34, 4 }
 0x49f   : > { %v7113_v56 = vcombine.low %v9907_v32, %v7025_v27  ;;  %v5327_v38 = vrot.slane %v5326_v51, 4  ;;  %v9938_v5 = vmax.f32 %v4861_v22, %v4862_v26  ;;  %v9940_v15 = vmin.f32 %v5309_v35, %v5310_v40 }
 0x4a0   : > { %v4868_v18 = vmax.f32 %v4866_v63, %v4867_v10  ;;  %v4466_v60 = vadd.f32 %v9914_v46, %v4305_v48  ;;  %v5316_v54 = vmin.f32 %v5314_v16, %v5315_v44  ;;  %v4880_v1 = vmax.f32 %v4878_v34, %v4879_v29 }
 0x4a1   : > { %v7127_v14 = vrot.slane %v7113_v56, %v11216_v45  ;;  %v5328_v55 = vmin.f32 %v5326_v51, %v5327_v38  ;;  %v5324_v19 = vrot.slane %v5323_v7, 1  ;;  %v3477_v25 = vadd.f32 %v9505_v20, %v9892_v41 }
 0x4a2   : > { %v9948_v32 = vadd.f32 %v9529_v52, %v9895_v21  ;;  %v9952_v22 = vadd.f32 %v9531_v53, %v9901_v42  ;;  %v9954_v46 = vmax.f32 %v4875_v43, %v4876_v9  ;;  %v4881_v35 = vrot.slane %v4880_v1, 2 }
 0x4a3   : > { %v7128_v63 = vcombine.low %v7120_v13, %v7127_v14  ;;  %v5329_v11 = vrot.slane %v5328_v55, 2  ;;  %v4036_v3 = vadd.f32 %v9925_v23, %v3477_v25  ;;  %v4307_v4 = vmul.f32 %v3477_v25, %v3477_v25 }
 0x4a4   : > { %v9959_v57 = vadd.f32 %v9927_v8, %v9948_v32  ;;  %v4306_v20 = vmul.f32 %v9948_v32, %v9948_v32  ;;  %v4869_v52 = vrot.slane %v4868_v18, 1  ;;  %v5317_v36 = vrot.slane %v5316_v54, 1 }
 0x4a5   : > { %7224 = vst [vmem:[%s8381_s9 + $0x10] sm:$0xff] %v7128_v63  ;;  %v9965_v53 = vadd.f32 %v4044_v58, %v9952_v22  ;;  %v4308_v26 = vmul.f32 %v9952_v22, %v9952_v22  ;;  %v4484_v16 = vadd.f32 %v9929_v39, %v4307_v4  ;;  %v3428_v8 = vadd.f32 %v9540_v31, %v9873_v33 }
 0x4a6   : > { %v9970_v23 = vadd.f32 %v4474_v2, %v4306_v20  ;;  %vm5675_vm13 = vcmp.ge.f32.partialorder %v9847_v47, 0.0  ;;  %v9975_v48 = vmax.f32 %v4880_v1, %v4881_v35  ;;  %v9977_v40 = vmin.f32 %v5328_v55, %v5329_v11 }
 0x4a7   : > { %v9979_v43 = vadd.f32 %v4492_v62, %v4308_v26  ;;  %v9982_v58 = vsel %vm5675_vm13, 1, %v11215_v6  ;;  %v4019_v10 = vadd.f32 %v9923_v49, %v3428_v8  ;;  %v4337_v28 = vmul.f32 %v3428_v8, %v3428_v8 }
 0x4a8   : > { %v5081_v39 = vmax.f32 %v9889_v24, %v3428_v8  ;;  %v5529_v2 = vmin.f32 %v9889_v24, %v3428_v8  ;;  %v9987_v27 = vmin.f32 %v5323_v7, %v5324_v19  ;;  %v9989_v31 = vmax.f32 %v4868_v18, %v4869_v52  ;;  %v11250_v24 = vld [vmem:[#allocation18_spill] sm:$0xff] }
 0x4a9   : > { %v9991_v33 = vmin.f32 %v5316_v54, %v5317_v36  ;;  %v5752_v44 = vrot.slane %v9982_v58, %v8858_v50  ;;  %v4020_v34 = vrot.slane %v4019_v10, 4  ;;  %v4467_v51 = vadd.f32 %v4466_v60, %v4337_v28  ;;  %v10004_v28 = vpop.f32.mrb[40].mxu1 }
 0x4aa   : > { %v5082_v13 = vrot.slane %v5081_v39, 4  ;;  %v5530_v62 = vrot.slane %v5529_v2, 4  ;;  %v3481_v7 = vadd.f32 %v11250_v24, %v9892_v41  ;;  %vm5676_vm0 = vcmp.ge.f32.partialorder %v9864_v12, 0.0 }
 0x4ab   : > { %v5880_v9 = vrot.slane %v5752_v44, %v8858_v50  ;;  %v4021_v29 = vadd.f32 %v4020_v34, %v4019_v10  ;;  %v4468_v38 = vrot.slane %v4467_v51, 4  ;;  %v10002_v10 = vpop.f32.mrb[40].mxu0 }
 0x4ac   : > { %v5083_v18 = vmax.f32 %v5081_v39, %v5082_v13  ;;  %v5531_v14 = vmin.f32 %v5529_v2, %v5530_v62  ;;  %v4037_v60 = vadd.f32 %v4036_v3, %v3481_v7  ;;  %v4339_v1 = vmul.f32 %v3481_v7, %v3481_v7  ;;  %v10006_v34 = vpop.f32.mrb[41].mxu0 }
 0x4ad   : > { %vm5969_vm15 = vcmp.eq.s32.totalorder %v5880_v9, 1  ;;  %v4022_v55 = vrot.slane %v4021_v29, 2  ;;  %v4469_v19 = vadd.f32 %v4468_v38, %v4467_v51  ;;  %v5095_v20 = vmax.f32 %v3477_v25, %v3481_v7  ;;  %11251 = vst [vmem:[#allocation30_spill] sm:$0xff] %v10006_v34  ;;  %v10008_v51 = vpop.f32.mrb[41].mxu1  ;;  %v10010_v24 = vpop.f32.mrb[42].mxu0 }
 0x4ae   : > { %v5084_v63 = vrot.slane %v5083_v18, 2  ;;  %v5532_v35 = vrot.slane %v5531_v14, 2  ;;  %v4038_v11 = vrot.slane %v4037_v60, 4  ;;  %v4485_v4 = vadd.f32 %v4484_v16, %v4339_v1  ;;  %11252 = vst [vmem:[#allocation31_spill] sm:$0xff] %v10008_v51 }
 0x4af   : > { %v5543_v52 = vmin.f32 %v3477_v25, %v3481_v7  ;;  %v4023_v36 = vadd.f32 %v4022_v55, %v4021_v29  ;;  %v4470_v41 = vrot.slane %v4469_v19, 2  ;;  %v5096_v3 = vrot.slane %v5095_v20, 4  ;;  %v10012_v7 = vpop.f32.mrb[42].mxu1 }
 0x4b0   : > { %v5085_v26 = vmax.f32 %v5083_v18, %v5084_v63  ;;  %v5533_v8 = vmin.f32 %v5531_v14, %v5532_v35  ;;  %v4039_v39 = vadd.f32 %v4038_v11, %v4037_v60  ;;  %v4486_v2 = vrot.slane %v4485_v4, 4  ;;  %v10014_v60 = vpop.f32.mrb[43].mxu0  ;;  %v10016_v1 = vpop.f32.mrb[43].mxu1 }
 0x4b1   : > { %v5544_v44 = vrot.slane %v5543_v52, 4  ;;  %v4024_v13 = vrot.slane %v4023_v36, 1  ;;  %v4471_v16 = vadd.f32 %v4470_v41, %v4469_v19  ;;  %v5097_v18 = vmax.f32 %v5095_v20, %v5096_v3  ;;  %11253 = vst [vmem:[#allocation25_spill] sm:$0xff] %v10016_v1 }
 0x4b2   : > { %v5086_v62 = vrot.slane %v5085_v26, 1  ;;  %v5534_v25 = vrot.slane %v5533_v8, 1  ;;  %v4040_v29 = vrot.slane %v4039_v39, 2  ;;  %v4487_v38 = vadd.f32 %v4486_v2, %v4485_v4 }
 0x4b3   : > { %v5545_v14 = vmin.f32 %v5543_v52, %v5544_v44  ;;  %v4025_v55 = vadd.f32 %v4024_v13, %v4023_v36  ;;  %v4472_v63 = vrot.slane %v4471_v16, 1  ;;  %v5098_v41 = vrot.slane %v5097_v18, 2 }
 0x4b4   : > { %v5087_v35 = vmax.f32 %v5085_v26, %v5086_v62  ;;  %v5535_v11 = vmin.f32 %v5533_v8, %v5534_v25  ;;  %v4041_v56 = vadd.f32 %v4040_v29, %v4039_v39  ;;  %v4488_v19 = vrot.slane %v4487_v38, 2 }
 0x4b5   : > { %v5546_v54 = vrot.slane %v5545_v14, 2  ;;  %v4209_v49 = vmul.f32 0.03125, %v4025_v55  ;;  %v4473_v51 = vadd.f32 %v4472_v63, %v4471_v16  ;;  %v5099_v36 = vmax.f32 %v5097_v18, %v5098_v41 }
 0x4b6   : > { %v6066_v34 = vsel %vm6053_vm14, %v5087_v35, %v9938_v5  ;;  %v6194_v4 = vsel %vm6053_vm14, %v5535_v11, %v9940_v15  ;;  %v4042_v52 = vrot.slane %v4041_v56, 1  ;;  %v4489_v2 = vadd.f32 %v4488_v19, %v4487_v38  ;;  %v10043_v11 = vpop.f32.mrb[44].mxu0  ;;  %v10045_v19 = vpop.f32.mrb[44].mxu1 }
 0x4b7   : > { %v6258_v20 = vsel %vm5969_vm15, %v6066_v34, %v6194_v4  ;;  %v4657_v3 = vmul.f32 0.03125, %v4473_v51  ;;  %v4689_v26 = vmul.f32 %v4209_v49, %v4209_v49  ;;  %v5547_v39 = vmin.f32 %v5545_v14, %v5546_v54  ;;  %11256 = vst [vmem:[#allocation11_spill] sm:$0xff] %v10043_v11  ;;  %11257 = vst [vmem:[#allocation6_spill] sm:$0xff] %v10045_v19 }
 0x4b8   : > { %v6290_v8 = vsub.f32 %v6258_v20, %v4209_v49  ;;  %v4043_v44 = vadd.f32 %v4042_v52, %v4041_v56  ;;  %v4490_v13 = vrot.slane %v4489_v2, 1  ;;  %v5100_v62 = vrot.slane %v5099_v36, 1 }
 0x4b9   : > { %v11254_v16 = vrot.slane %v9975_v48, 1  ;;  %v4721_v15 = vsub.f32 %v4657_v3, %v4689_v26  ;;  %v5548_v9 = vrot.slane %v5547_v39, 1  ;;  %v10030_v34 = vsel %vm5676_vm0, 1, %v11215_v6 }
 0x4ba   : > { %v4211_v25 = vmul.f32 0.03125, %v4043_v44  ;;  %v4491_v51 = vadd.f32 %v4490_v13, %v4489_v2  ;;  %v5101_v29 = vmax.f32 %v5099_v36, %v5100_v62  ;;  %v5760_v49 = vrot.slane %v10030_v34, %v8858_v50  ;;  %v10062_v44 = vpop.f32.mrb[45].mxu1 }
 0x4bb   : > { %v10027_v5 = vmax.f32 %v9975_v48, %v11254_v16  ;;  %v4753_v56 = vmax.f32 %v4721_v15, 0.0  ;;  %v11255_v54 = vrot.slane %v9847_v47, %v8858_v50  ;;  %v6777_v48 = vrot.slane %v9847_v47, %v11182_v61  ;;  %11261 = vst [vmem:[#allocation10_spill] sm:$0xff] %v10062_v44 }
 0x4bc   : > { %v5549_v18 = vmin.f32 %v5547_v39, %v5548_v9  ;;  %v4659_v14 = vmul.f32 0.03125, %v4491_v51  ;;  %v4691_v55 = vmul.f32 %v4211_v25, %v4211_v25  ;;  %v5888_v63 = vrot.slane %v5760_v49, %v8858_v50  ;;  %v10060_v39 = vpop.f32.mrb[45].mxu0 }
 0x4bd   : > { %v6521_v38 = vrot.slane %v11255_v54, %v8858_v50  ;;  %v6068_v35 = vsel %vm6053_vm14, %v5101_v29, %v9954_v46  ;;  %v11258_v41 = vrot.slane %v9977_v40, 1  ;;  %v6642_v20 = vadd.f32 1e-05, %v4753_v56  ;;  %v11259_v46 = vld [vmem:[#allocation19_spill] sm:$0xff]  ;;  %11260 = vst [vmem:[#allocation7_spill] sm:$0xff] %v10060_v39 }
 0x4be   : > { %v6196_v52 = vsel %vm6053_vm14, %v5549_v18, %v9987_v27  ;;  %v6369_v2 = vrot.slane %v9864_v12, %v8858_v50  ;;  %v4723_v36 = vsub.f32 %v4659_v14, %v4691_v55  ;;  %vm5971_vm1 = vcmp.eq.s32.totalorder %v5888_v63, 1  ;;  %v11264_v63 = vld [vmem:[#allocation20_spill] sm:$0xff] }
 0x4bf   : > { %v10050_v4 = vmin.f32 %v9977_v40, %v11258_v41  ;;  %v3430_v3 = vadd.f32 %v11259_v46, %v9895_v21  ;;  %v5756_v26 = vrot.slane %v9982_v58, %v8941_v37  ;;  %v6610_v40 = vmul.f32 %v6521_v38, %v6290_v8 }
 0x4c0   : > { %7710 = vrsqrt.f32 %v6642_v20  ;;  %v10065_v13 = vrot.slane %v6777_v48, %v11182_v61  ;;  %v6260_v27 = vsel %vm5971_vm1, %v6068_v35, %v6196_v52  ;;  %v4755_v62 = vmax.f32 %v4723_v36, 0.0 }
 0x4c1   : > { %v6292_v16 = vsub.f32 %v6260_v27, %v4211_v25  ;;  %v4028_v15 = vadd.f32 %v9959_v57, %v3430_v3  ;;  %v4338_v9 = vmul.f32 %v3430_v3, %v3430_v3  ;;  %v6529_v21 = vrot.slane %v6369_v2, %v8858_v50  ;;  %v10077_v25 = vpop.f32.mrb[46].mxu0  ;;  %v10079_v57 = vpop.f32.mrb[46].mxu1 }
 0x4c2   : > { %v5088_v51 = vmax.f32 %v9948_v32, %v3430_v3  ;;  %v5536_v58 = vmin.f32 %v9948_v32, %v3430_v3  ;;  %v10072_v29 = vrot.slane %v5756_v26, %v8858_v50  ;;  %v6644_v8 = vadd.f32 1e-05, %v4755_v62  ;;  %11262 = vst [vmem:[#allocation13_spill] sm:$0xff] %v10077_v25  ;;  %11263 = vst [vmem:[#allocation12_spill] sm:$0xff] %v10079_v57 }
 0x4c3   : > { %v4029_v56 = vrot.slane %v4028_v15, 4  ;;  %v4476_v54 = vadd.f32 %v9970_v23, %v4338_v9  ;;  %v6365_v18 = vrot.slane %v9847_v47, %v8941_v37  ;;  %v3483_v35 = vadd.f32 %v11264_v63, %v9901_v42 }
 0x4c4   : > { %v5089_v38 = vrot.slane %v5088_v51, 4  ;;  %v5537_v48 = vrot.slane %v5536_v58, 4  ;;  %7712 = vrsqrt.f32 %v6644_v8  ;;  %v6612_v41 = vmul.f32 %v6529_v21, %v6292_v16 }
 0x4c5   : > { %v4030_v14 = vadd.f32 %v4029_v56, %v4028_v15  ;;  %v4477_v55 = vrot.slane %v4476_v54, 4  ;;  %vm5970_vm2 = vcmp.eq.s32.totalorder %v10072_v29, 1  ;;  %v4046_v36 = vadd.f32 %v9965_v53, %v3483_v35 }
 0x4c6   : > { %v5090_v23 = vmax.f32 %v5088_v51, %v5089_v38  ;;  %v5538_v20 = vmin.f32 %v5536_v58, %v5537_v48  ;;  %v4340_v46 = vmul.f32 %v3483_v35, %v3483_v35  ;;  %v5102_v27 = vmax.f32 %v9952_v22, %v3483_v35 }
 0x4c7   : > { %v4031_v52 = vrot.slane %v4030_v14, 2  ;;  %v4478_v2 = vadd.f32 %v4477_v55, %v4476_v54  ;;  %v5550_v62 = vmin.f32 %v9952_v22, %v3483_v35  ;;  %v4047_v8 = vrot.slane %v4046_v36, 4 }
 0x4c8   : > { %v5091_v3 = vrot.slane %v5090_v23, 2  ;;  %v5539_v26 = vrot.slane %v5538_v20, 2  ;;  %v4494_v42 = vadd.f32 %v9979_v43, %v4340_v46  ;;  %v5103_v58 = vrot.slane %v5102_v27, 4  ;;  %v10094_v46 = vpop.f32.mrb[47].mxu0 }
 0x4c9   : > { %v4032_v15 = vadd.f32 %v4031_v52, %v4030_v14  ;;  %v4479_v9 = vrot.slane %v4478_v2, 2  ;;  %v5551_v56 = vrot.slane %v5550_v62, 4  ;;  %v4048_v48 = vadd.f32 %v4047_v8, %v4046_v36  ;;  %11265 = vst [vmem:[#allocation17_spill] sm:$0xff] %v10094_v46 }
 0x4ca   : > { %v7711_v16 = vpop.eup %7710  ;;  %v5092_v21 = vmax.f32 %v5090_v23, %v5091_v3  ;;  %v5540_v51 = vmin.f32 %v5538_v20, %v5539_v26  ;;  %v4495_v32 = vrot.slane %v4494_v42, 4  ;;  %v5104_v49 = vmax.f32 %v5102_v27, %v5103_v58 }
 0x4cb   : > { %v6706_v54 = vmul.f32 %v7711_v16, %v6610_v40  ;;  %v4033_v38 = vrot.slane %v4032_v15, 1  ;;  %v4480_v53 = vadd.f32 %v4479_v9, %v4478_v2  ;;  %v4049_v14 = vrot.slane %v4048_v48, 2 }
 0x4cc   : > { %v5093_v55 = vrot.slane %v5092_v21, 1  ;;  %v5541_v63 = vrot.slane %v5540_v51, 1  ;;  %v5764_v35 = vrot.slane %v10030_v34, %v8941_v37  ;;  %v4496_v23 = vadd.f32 %v4495_v32, %v4494_v42 }
 0x4cd   : > { %v4034_v57 = vadd.f32 %v4033_v38, %v4032_v15  ;;  %v4481_v22 = vrot.slane %v4480_v53, 1  ;;  %v5105_v20 = vrot.slane %v5104_v49, 2  ;;  %v4050_v36 = vadd.f32 %v4049_v14, %v4048_v48  ;;  %v10112_v38 = vld [vmem:[%s8376_s23 + $0x40] sm:$0x77] }
 0x4ce   : > { %v5094_v43 = vmax.f32 %v5092_v21, %v5093_v55  ;;  %v5542_v52 = vmin.f32 %v5540_v51, %v5541_v63  ;;  %v7713_v40 = vpop.eup %7712  ;;  %v5552_v26 = vmin.f32 %v5550_v62, %v5551_v56  ;;  %v4497_v15 = vrot.slane %v4496_v23, 2 }
 0x4cf   : > { %v4210_v3 = vmul.f32 0.03125, %v4034_v57  ;;  %v4482_v2 = vadd.f32 %v4481_v22, %v4480_v53  ;;  %v10096_v9 = vmul.f32 %v7713_v40, %v6612_v41  ;;  %v4051_v57 = vrot.slane %v4050_v36, 1  ;;  %v10122_v22 = vld [vmem:[%s8376_s23 + $0x48] sm:$0x77] }
 0x4d0   : > { %v6067_v27 = vsel %vm6053_vm14, %v5094_v43, %v9989_v31  ;;  %v6195_v34 = vsel %vm6053_vm14, %v5542_v52, %v9991_v33  ;;  %v11266_v41 = vrot.slane %v9864_v12, %v11182_v61  ;;  %v4498_v21 = vadd.f32 %v4497_v15, %v4496_v23 }
 0x4d1   : > { %v4658_v8 = vmul.f32 0.03125, %v4482_v2  ;;  %v4690_v32 = vmul.f32 %v4210_v3, %v4210_v3  ;;  %v6259_v42 = vsel %vm5970_vm2, %v6067_v27, %v6195_v34  ;;  %v5106_v31 = vmax.f32 %v5104_v49, %v5105_v20 }
 0x4d2   : > { %v10108_v62 = vrot.slane %v11266_v41, %v11182_v61  ;;  %v6291_v16 = vsub.f32 %v6259_v42, %v4210_v3  ;;  %v6525_v33 = vrot.slane %v6365_v18, %v8858_v50  ;;  %v4052_v58 = vadd.f32 %v4051_v57, %v4050_v36 }
 0x4d3   : > { %v4722_v51 = vsub.f32 %v4658_v8, %v4690_v32  ;;  %v5553_v56 = vrot.slane %v5552_v26, 2  ;;  %v11267_v29 = vrot.slane %v9847_v47, %v11207_v30  ;;  %v4499_v48 = vrot.slane %v4498_v21, 1  ;;  %v11268_v8 = vld [vmem:[#allocation21_spill] sm:$0xff] }
 0x4d4   : > { %v5107_v55 = vrot.slane %v5106_v31, 1  ;;  %v5892_v63 = vrot.slane %v5764_v35, %v8858_v50  ;;  %v10124_v14 = vmul.f32 0.03125, %v4052_v58  ;;  %v6373_v43 = vrot.slane %v9864_v12, %v8941_v37  ;;  %v11271_v58 = vld [vmem:[#allocation26_spill] sm:$0xff] }
 0x4d5   : > { %v10118_v53 = vrot.slane %v11267_v29, %v11182_v61  ;;  %v4754_v49 = vmax.f32 %v4722_v51, 0.0  ;;  %v5554_v18 = vmin.f32 %v5552_v26, %v5553_v56  ;;  %v10129_v52 = vadd.f32 %v10065_v13, %v6706_v54 }
 0x4d6   : > { %v4500_v23 = vadd.f32 %v4499_v48, %v4498_v21  ;;  %v5108_v47 = vmax.f32 %v5106_v31, %v5107_v55  ;;  %v1560_v20 = vrot.slane %v10112_v38, %v11209_v59  ;;  %v4692_v35 = vmul.f32 %v10124_v14, %v10124_v14  ;;  %v11270_v21 = vld [vmem:[#allocation8_spill] sm:$0xff] }
 0x4d7   : > { %v6643_v40 = vadd.f32 1e-05, %v4754_v49  ;;  %v5555_v3 = vrot.slane %v5554_v18, 1  ;;  %v1568_v2 = vrot.slane %v10122_v22, %v11209_v59  ;;  %vm5972_vm3 = vcmp.eq.s32.totalorder %v5892_v63, 1 }
 0x4d8   : > { %v4660_v36 = vmul.f32 0.03125, %v4500_v23  ;;  %v6069_v26 = vsel %vm6053_vm14, %v5108_v47, %v10027_v5  ;;  %v10140_v13 = vrot.slane %v1560_v20, %v11209_v59  ;;  %v1564_v34 = vrot.slane %v10112_v38, %v11210_v0  ;;  %v11269_v5 = vld [vmem:[#allocation5_spill] sm:$0xff]  ;;  %v10170_v20 = vpop.f32.mrb[47].mxu1 }
 0x4d9   : > { %7714 = vrsqrt.f32 %v6643_v40  ;;  %v5556_v54 = vmin.f32 %v5554_v18, %v5555_v3  ;;  %v10143_v27 = vrot.slane %v1568_v2, %v11209_v59  ;;  %v1572_v42 = vrot.slane %v10122_v22, %v11210_v0  ;;  %11272 = vst [vmem:[#allocation18_spill] sm:$0xff] %v10170_v20 }
 0x4da   : > { %v4724_v15 = vsub.f32 %v4660_v36, %v4692_v35  ;;  %v3520_v32 = vadd.f32 %v11268_v8, %v10140_v13  ;;  %v3524_v57 = vadd.f32 %v11269_v5, %v10140_v13  ;;  %v10158_v51 = vrot.slane %v1564_v34, %v11209_v59  ;;  %v11273_v35 = vld [vmem:[#allocation9_spill] sm:$0xff] }
 0x4db   : > { %v6197_v41 = vsel %vm6053_vm14, %v5556_v54, %v10050_v4  ;;  %v3573_v31 = vadd.f32 %v11270_v21, %v10143_v27  ;;  %v3577_v56 = vadd.f32 %v11271_v58, %v10143_v27  ;;  %v10164_v49 = vrot.slane %v1572_v42, %v11209_v59  ;;  %v11275_v58 = vld [vmem:[#allocation27_spill] sm:$0xff] }
 0x4dc   : > { %v4756_v29 = vmax.f32 %v4724_v15, 0.0  ;;  %v6261_v48 = vsel %vm5972_vm3, %v6069_v26, %v6197_v41  ;;  %v4245_v55 = vmul.f32 %v3520_v32, %v3520_v32  ;;  %v6611_v18 = vmul.f32 %v6525_v33, %v6291_v16  ;;  %v11274_v33 = vld [vmem:[#allocation4_spill] sm:$0xff] }
 0x4dd   : > { %v6293_v23 = vsub.f32 %v6261_v48, %v10124_v14  ;;  %v6533_v4 = vrot.slane %v6373_v43, %v8858_v50  ;;  %v10168_v47 = vadd.f32 %v3524_v57, %v3520_v32  ;;  %v3522_v3 = vadd.f32 %v11273_v35, %v10158_v51 }
 0x4de   : > { %v6645_v40 = vadd.f32 1e-05, %v4756_v29  ;;  %v4277_v2 = vmul.f32 %v3524_v57, %v3524_v57  ;;  %v4885_v63 = vmax.f32 %v3520_v32, %v3524_v57  ;;  %v6789_v36 = vrot.slane %v9864_v12, %v11207_v30 }
 0x4df   : > { %v4247_v26 = vmul.f32 %v3573_v31, %v3573_v31  ;;  %v5333_v54 = vmin.f32 %v3520_v32, %v3524_v57  ;;  %v10176_v16 = vadd.f32 %v3577_v56, %v3573_v31  ;;  %v3575_v14 = vadd.f32 %v11274_v33, %v10164_v49  ;;  %v11276_v32 = vld [vmem:[#allocation28_spill] sm:$0xff] }
 0x4e0   : > { %7716 = vrsqrt.f32 %v6645_v40  ;;  %v10180_v43 = vadd.f32 %v4277_v2, %v4245_v55  ;;  %v4886_v34 = vrot.slane %v4885_v63, 4  ;;  %v4279_v8 = vmul.f32 %v3577_v56, %v3577_v56 }
 0x4e1   : > { %v5334_v15 = vrot.slane %v5333_v54, 4  ;;  %v4899_v42 = vmax.f32 %v3573_v31, %v3577_v56  ;;  %v5347_v5 = vmin.f32 %v3573_v31, %v3577_v56  ;;  %v4246_v41 = vmul.f32 %v3522_v3, %v3522_v3 }
 0x4e2   : > { %v4887_v21 = vmax.f32 %v4885_v63, %v4886_v34  ;;  %v3526_v12 = vadd.f32 %v11275_v58, %v10158_v51  ;;  %v3579_v57 = vadd.f32 %v11276_v32, %v10164_v49  ;;  %v10186_v40 = vadd.f32 %v4279_v8, %v4247_v26 }
 0x4e3   : > { %v7715_v29 = vpop.eup %7714  ;;  %v5335_v48 = vmin.f32 %v5333_v54, %v5334_v15  ;;  %v4900_v35 = vrot.slane %v4899_v42, 4  ;;  %v5348_v55 = vrot.slane %v5347_v5, 4  ;;  %v6949_v32 = vrot.slane %v6789_v36, %v11182_v61 }
 0x4e4   : > { %v6707_v2 = vmul.f32 %v7715_v29, %v6611_v18  ;;  %v4888_v33 = vrot.slane %v4887_v21, 2  ;;  %v4062_v20 = vadd.f32 %v3526_v12, %v3522_v3  ;;  %v4278_v46 = vmul.f32 %v3526_v12, %v3526_v12 }
 0x4e5   : > { %v5336_v25 = vrot.slane %v5335_v48, 2  ;;  %v4901_v31 = vmax.f32 %v4899_v42, %v4900_v35  ;;  %v5349_v56 = vmin.f32 %v5347_v5, %v5348_v55  ;;  %v4892_v63 = vmax.f32 %v3522_v3, %v3526_v12 }
 0x4e6   : > { %v7027_v34 = vadd.f32 %v10118_v53, %v6707_v2  ;;  %v4889_v58 = vmax.f32 %v4887_v21, %v4888_v33  ;;  %v4510_v44 = vadd.f32 %v4278_v46, %v4246_v41  ;;  %v5340_v39 = vmin.f32 %v3522_v3, %v3526_v12 }
 0x4e7   : > { %v5337_v54 = vmin.f32 %v5335_v48, %v5336_v25  ;;  %v4902_v26 = vrot.slane %v4901_v31, 2  ;;  %v4893_v15 = vrot.slane %v4892_v63, 4  ;;  %v5350_v18 = vrot.slane %v5349_v56, 2 }
 0x4e8   : > { %v7129_v8 = vcombine.low %v10129_v52, %v7027_v34  ;;  %v5341_v29 = vrot.slane %v5340_v39, 4  ;;  %v4080_v19 = vadd.f32 %v3579_v57, %v3575_v14  ;;  %v6613_v11 = vmul.f32 %v6533_v4, %v6293_v23 }
 0x4e9   : > { %v4248_v1 = vmul.f32 %v3575_v14, %v3575_v14  ;;  %v4890_v42 = vrot.slane %v4889_v58, 1  ;;  %v4894_v5 = vmax.f32 %v4892_v63, %v4893_v15  ;;  %v4903_v55 = vmax.f32 %v4901_v31, %v4902_v26 }
 0x4ea   : > { %v7717_v35 = vpop.eup %7716  ;;  %v5342_v53 = vmin.f32 %v5340_v39, %v5341_v29  ;;  %v4280_v21 = vmul.f32 %v3579_v57, %v3579_v57  ;;  %v3530_v46 = vadd.f32 %v9796_v17, %v10140_v13  ;;  %v7028_v25 = vadd.f32 %v10108_v62, %v10096_v9 }
 0x4eb   : > { %v6709_v3 = vmul.f32 %v7717_v35, %v6613_v11  ;;  %v5338_v36 = vrot.slane %v5337_v54, 1  ;;  %v5351_v52 = vmin.f32 %v5349_v56, %v5350_v18  ;;  %v4895_v41 = vrot.slane %v4894_v5, 2  ;;  %v11277_v11 = vld [vmem:[#allocation14_spill] sm:$0xff] }
 0x4ec   : > { %v4528_v12 = vadd.f32 %v4280_v21, %v4248_v1  ;;  %v4906_v48 = vmax.f32 %v3575_v14, %v3579_v57  ;;  %v7137_v23 = vrot.slane %v7129_v8, %v11216_v45  ;;  %v10196_v2 = vmax.f32 %v4889_v58, %v4890_v42 }
 0x4ed   : > { %v7029_v4 = vadd.f32 %v6949_v32, %v6709_v3  ;;  %v5354_v33 = vmin.f32 %v3575_v14, %v3579_v57  ;;  %v4904_v39 = vrot.slane %v4903_v55, 1  ;;  %v5343_v31 = vrot.slane %v5342_v53, 2  ;;  %v11278_v32 = vld [vmem:[#allocation15_spill] sm:$0xff] }
 0x4ee   : > { %v4907_v63 = vrot.slane %v4906_v48, 4  ;;  %v4054_v17 = vadd.f32 %v10168_v47, %v3530_v46  ;;  %v4309_v9 = vmul.f32 %v3530_v46, %v3530_v46  ;;  %v10201_v62 = vadd.f32 %v11277_v11, %v10143_v27 }
 0x4ef   : > { %v7130_v34 = vcombine.low %v7028_v25, %v7029_v4  ;;  %v5355_v26 = vrot.slane %v5354_v33, 4  ;;  %v5352_v1 = vrot.slane %v5351_v52, 1  ;;  %v4896_v56 = vmax.f32 %v4894_v5, %v4895_v41 }
 0x4f0   : > { %v4908_v15 = vmax.f32 %v4906_v48, %v4907_v63  ;;  %v10205_v58 = vadd.f32 %v11278_v32, %v10158_v51  ;;  %v4502_v47 = vadd.f32 %v10180_v43, %v4309_v9  ;;  %v4072_v8 = vadd.f32 %v10176_v16, %v10201_v62  ;;  %v11279_v16 = vld [vmem:[#allocation22_spill] sm:$0xff] }
 0x4f1   : > { %v7144_v14 = vrot.slane %v7130_v34, %v11216_v45  ;;  %v5356_v57 = vmin.f32 %v5354_v33, %v5355_v26  ;;  %v10211_v18 = vmin.f32 %v5337_v54, %v5338_v36  ;;  %v10213_v29 = vmax.f32 %v4903_v55, %v4904_v39  ;;  %v11280_v55 = vld [vmem:[#allocation16_spill] sm:$0xff] }
 0x4f2   : > { %v5344_v42 = vmin.f32 %v5342_v53, %v5343_v31  ;;  %v4311_v5 = vmul.f32 %v10201_v62, %v10201_v62  ;;  %v4909_v21 = vrot.slane %v4908_v15, 2  ;;  %v10218_v25 = vadd.f32 %v4062_v20, %v10205_v58 }
 0x4f3   : > { %v7145_v35 = vcombine.low %v7137_v23, %v7144_v14  ;;  %v4310_v3 = vmul.f32 %v10205_v58, %v10205_v58  ;;  %v5357_v43 = vrot.slane %v5356_v57, 2  ;;  %v10225_v54 = vadd.f32 %v11279_v16, %v10164_v49 }
 0x4f4   : > { %v4520_v41 = vadd.f32 %v10186_v40, %v4311_v5  ;;  %v3534_v53 = vadd.f32 %v11280_v55, %v10140_v13  ;;  %v10230_v36 = vmin.f32 %v5351_v52, %v5352_v1  ;;  %v4897_v48 = vrot.slane %v4896_v56, 1  ;;  %v11281_v5 = vld [vmem:[#allocation23_spill] sm:$0xff] }
 0x4f5   : > { %7225 = vst [vmem:[%s8381_s9 + $0x18] sm:$0xff] %v7145_v35  ;;  %v10232_v23 = vadd.f32 %v4510_v44, %v4310_v3  ;;  %vm5677_vm4 = vcmp.ge.f32.partialorder %v10112_v38, 0.0  ;;  %v5345_v20 = vrot.slane %v5344_v42, 1  ;;  %v10236_v4 = vadd.f32 %v4080_v19, %v10225_v54 }
 0x4f6   : > { %v4312_v40 = vmul.f32 %v10225_v54, %v10225_v54  ;;  %v4055_v33 = vadd.f32 %v4054_v17, %v3534_v53  ;;  %v10240_v39 = vmax.f32 %v4908_v15, %v4909_v21  ;;  %v4341_v31 = vmul.f32 %v3534_v53, %v3534_v53 }
 0x4f7   : > { %v5109_v13 = vmax.f32 %v3530_v46, %v3534_v53  ;;  %v5557_v63 = vmin.f32 %v3530_v46, %v3534_v53  ;;  %v10242_v52 = vmin.f32 %v5356_v57, %v5357_v43  ;;  %v10247_v26 = vsel %vm5677_vm4, 1, %v11215_v6 }
 0x4f8   : > { %v10244_v34 = vadd.f32 %v4528_v12, %v4312_v40  ;;  %v4056_v44 = vrot.slane %v4055_v33, 4  ;;  %v10249_v9 = vmax.f32 %v4896_v56, %v4897_v48  ;;  %v4503_v19 = vadd.f32 %v4502_v47, %v4341_v31 }
 0x4f9   : > { %v5110_v11 = vrot.slane %v5109_v13, 4  ;;  %v5558_v1 = vrot.slane %v5557_v63, 4  ;;  %v10251_v32 = vmin.f32 %v5344_v42, %v5345_v20  ;;  %v5768_v15 = vrot.slane %v10247_v26, %v8858_v50 }
 0x4fa   : > { %v4057_v17 = vadd.f32 %v4056_v44, %v4055_v33  ;;  %v4504_v12 = vrot.slane %v4503_v19, 4  ;;  %v3587_v35 = vadd.f32 %v11281_v5, %v10143_v27  ;;  %v4911_v56 = vrot.slane %v10240_v39, 1 }
 0x4fb   : > { %v5111_v14 = vmax.f32 %v5109_v13, %v5110_v11  ;;  %v5559_v57 = vmin.f32 %v5557_v63, %v5558_v1  ;;  %v5896_v42 = vrot.slane %v5768_v15, %v8858_v50  ;;  %vm5678_vm5 = vcmp.ge.f32.partialorder %v10122_v22, 0.0  ;;  %v10264_v13 = vpop.f32.mrb[48].mxu0  ;;  %v10266_v63 = vpop.f32.mrb[48].mxu1 }
 0x4fc   : > { %v4058_v21 = vrot.slane %v4057_v17, 2  ;;  %v4505_v3 = vadd.f32 %v4504_v12, %v4503_v19  ;;  %v4073_v55 = vadd.f32 %v4072_v8, %v3587_v35  ;;  %v4343_v48 = vmul.f32 %v3587_v35, %v3587_v35  ;;  %11282 = vst [vmem:[#allocation19_spill] sm:$0xff] %v10266_v63  ;;  %v10269_v1 = vpop.f32.mrb[49].mxu0 }
 0x4fd   : > { %v5112_v43 = vrot.slane %v5111_v14, 2  ;;  %v5560_v16 = vrot.slane %v5559_v57, 2  ;;  %vm5973_vm6 = vcmp.eq.s32.totalorder %v5896_v42, 1  ;;  %v5123_v20 = vmax.f32 %v10201_v62, %v3587_v35  ;;  %11283 = vst [vmem:[#allocation20_spill] sm:$0xff] %v10269_v1 }
 0x4fe   : > { %v4059_v53 = vadd.f32 %v4058_v21, %v4057_v17  ;;  %v4506_v40 = vrot.slane %v4505_v3, 2  ;;  %v4074_v31 = vrot.slane %v4073_v55, 4  ;;  %v4521_v19 = vadd.f32 %v4520_v41, %v4343_v48  ;;  %v10271_v17 = vpop.f32.mrb[49].mxu1 }
 0x4ff   : > { %v5113_v27 = vmax.f32 %v5111_v14, %v5112_v43  ;;  %v5561_v33 = vmin.f32 %v5559_v57, %v5560_v16  ;;  %v5124_v11 = vrot.slane %v5123_v20, 4  ;;  %v5571_v8 = vmin.f32 %v10201_v62, %v3587_v35  ;;  %11284 = vst [vmem:[#allocation21_spill] sm:$0xff] %v10271_v17  ;;  %v10273_v14 = vpop.f32.mrb[50].mxu0  ;;  %v10275_v57 = vpop.f32.mrb[50].mxu1 }
 0x500   : > { %v4060_v44 = vrot.slane %v4059_v53, 1  ;;  %v4507_v15 = vadd.f32 %v4506_v40, %v4505_v3  ;;  %v4075_v21 = vadd.f32 %v4074_v31, %v4073_v55  ;;  %v4522_v16 = vrot.slane %v4521_v19, 4  ;;  %v10277_v41 = vpop.f32.mrb[51].mxu0  ;;  %v10279_v48 = vpop.f32.mrb[51].mxu1 }
 0x501   : > { %v5114_v12 = vrot.slane %v5113_v27, 1  ;;  %v5562_v5 = vrot.slane %v5561_v33, 1  ;;  %v5125_v47 = vmax.f32 %v5123_v20, %v5124_v11  ;;  %v5572_v46 = vrot.slane %v5571_v8, 4 }
 0x502   : > { %v4061_v43 = vadd.f32 %v4060_v44, %v4059_v53  ;;  %v4508_v62 = vrot.slane %v4507_v15, 1  ;;  %v4076_v17 = vrot.slane %v4075_v21, 2  ;;  %v4523_v40 = vadd.f32 %v4522_v16, %v4521_v19 }
 0x503   : > { %v5115_v35 = vmax.f32 %v5113_v27, %v5114_v12  ;;  %v5563_v1 = vmin.f32 %v5561_v33, %v5562_v5  ;;  %v5126_v55 = vrot.slane %v5125_v47, 2  ;;  %v5573_v31 = vmin.f32 %v5571_v8, %v5572_v46 }
 0x504   : > { %v10281_v3 = vmul.f32 0.03125, %v4061_v43  ;;  %v4509_v63 = vadd.f32 %v4508_v62, %v4507_v15  ;;  %v4077_v44 = vadd.f32 %v4076_v17, %v4075_v21  ;;  %v4524_v33 = vrot.slane %v4523_v40, 2 }
 0x505   : > { %v6070_v53 = vsel %vm6053_vm14, %v5115_v35, %v10196_v2  ;;  %v6198_v20 = vsel %vm6053_vm14, %v5563_v1, %v10211_v18  ;;  %v5127_v12 = vmax.f32 %v5125_v47, %v5126_v55  ;;  %v5574_v46 = vrot.slane %v5573_v31, 2 }
 0x506   : > { %v4693_v11 = vmul.f32 %v10281_v3, %v10281_v3  ;;  %v6262_v27 = vsel %vm5973_vm6, %v6070_v53, %v6198_v20  ;;  %v4661_v5 = vmul.f32 0.03125, %v4509_v63  ;;  %v4078_v43 = vrot.slane %v4077_v44, 1  ;;  %v11286_v20 = vld [vmem:[#allocation24_spill] sm:$0xff] }
 0x507   : > { %v6294_v19 = vsub.f32 %v6262_v27, %v10281_v3  ;;  %v10292_v8 = vmax.f32 %v10240_v39, %v4911_v56  ;;  %v4525_v2 = vadd.f32 %v4524_v33, %v4523_v40  ;;  %v5128_v15 = vrot.slane %v5127_v12, 1 }
 0x508   : > { %v10297_v18 = vsel %vm5678_vm5, 1, %v11215_v6  ;;  %v4725_v1 = vsub.f32 %v4661_v5, %v4693_v11  ;;  %v4079_v42 = vadd.f32 %v4078_v43, %v4077_v44  ;;  %v5575_v17 = vmin.f32 %v5573_v31, %v5574_v46 }
 0x509   : > { %v6385_v47 = vrot.slane %v10122_v22, %v8858_v50  ;;  %v11285_v63 = vrot.slane %v10112_v38, %v8858_v50  ;;  %v4526_v39 = vrot.slane %v4525_v2, 1  ;;  %v5129_v56 = vmax.f32 %v5127_v12, %v5128_v15  ;;  %v10316_v15 = vpop.f32.mrb[52].mxu0 }
 0x50a   : > { %v5776_v16 = vrot.slane %v10297_v18, %v8858_v50  ;;  %v4757_v62 = vmax.f32 %v4725_v1, 0.0  ;;  %v6793_v35 = vrot.slane %v10112_v38, %v11182_v61  ;;  %v4215_v3 = vmul.f32 0.03125, %v4079_v42  ;;  %v10324_v42 = vpop.f32.mrb[53].mxu0 }
 0x50b   : > { %v6537_v21 = vrot.slane %v11285_v63, %v8858_v50  ;;  %v5576_v40 = vrot.slane %v5575_v17, 1  ;;  %v4527_v55 = vadd.f32 %v4526_v39, %v4525_v2  ;;  %v6072_v53 = vsel %vm6053_vm14, %v5129_v56, %v10213_v29  ;;  %v10318_v2 = vpop.f32.mrb[52].mxu1  ;;  %11287 = vst [vmem:[#allocation5_spill] sm:$0xff] %v10324_v42 }
 0x50c   : > { %v5904_v31 = vrot.slane %v5776_v16, %v8858_v50  ;;  %v3536_v44 = vadd.f32 %v11286_v20, %v10158_v51  ;;  %v6646_v11 = vadd.f32 1e-05, %v4757_v62  ;;  %v4695_v27 = vmul.f32 %v4215_v3, %v4215_v3  ;;  %v10327_v39 = vpop.f32.mrb[53].mxu1  ;;  %v10334_v20 = vpop.f32.mrb[54].mxu0 }
 0x50d   : > { %v5577_v33 = vmin.f32 %v5575_v17, %v5576_v40  ;;  %v6545_v12 = vrot.slane %v6385_v47, %v8858_v50  ;;  %v4663_v5 = vmul.f32 0.03125, %v4527_v55  ;;  %11288 = vst [vmem:[#allocation8_spill] sm:$0xff] %v10327_v39  ;;  %v5772_v40 = vrot.slane %v10247_v26, %v8941_v37  ;;  %11289 = vst [vmem:[#allocation26_spill] sm:$0xff] %v10334_v20 }
 0x50e   : > { %vm5975_vm7 = vcmp.eq.s32.totalorder %v5904_v31, 1  ;;  %v4064_v43 = vadd.f32 %v10218_v25, %v3536_v44  ;;  %v4342_v46 = vmul.f32 %v3536_v44, %v3536_v44  ;;  %7718 = vrsqrt.f32 %v6646_v11 }
 0x50f   : > { %v6200_v29 = vsel %vm6053_vm14, %v5577_v33, %v10230_v36  ;;  %v5116_v51 = vmax.f32 %v10205_v58, %v3536_v44  ;;  %v5564_v1 = vmin.f32 %v10205_v58, %v3536_v44  ;;  %v4727_v17 = vsub.f32 %v4663_v5, %v4695_v27  ;;  %v10337_v27 = vpop.f32.mrb[54].mxu1 }
 0x510   : > { %v6264_v47 = vsel %vm5975_vm7, %v6072_v53, %v6200_v29  ;;  %v4065_v63 = vrot.slane %v4064_v43, 4  ;;  %v4512_v25 = vadd.f32 %v10232_v23, %v4342_v46  ;;  %v10332_v36 = vrot.slane %v6793_v35, %v11182_v61  ;;  %11290 = vst [vmem:[#allocation9_spill] sm:$0xff] %v10337_v27  ;;  %v10353_v27 = vpop.f32.mrb[55].mxu0 }
 0x511   : > { %v6296_v56 = vsub.f32 %v6264_v47, %v4215_v3  ;;  %v5117_v16 = vrot.slane %v5116_v51, 4  ;;  %v5565_v62 = vrot.slane %v5564_v1, 4  ;;  %v4759_v55 = vmax.f32 %v4727_v17, 0.0  ;;  %11292 = vst [vmem:[#allocation4_spill] sm:$0xff] %v10353_v27 }
 0x512   : > { %v4066_v58 = vadd.f32 %v4065_v63, %v4064_v43  ;;  %v4513_v31 = vrot.slane %v4512_v25, 4  ;;  %v6614_v53 = vmul.f32 %v6537_v21, %v6294_v19  ;;  %v5900_v23 = vrot.slane %v5772_v40, %v8858_v50 }
 0x513   : > { %v5118_v44 = vmax.f32 %v5116_v51, %v5117_v16  ;;  %v5566_v11 = vmin.f32 %v5564_v1, %v5565_v62  ;;  %v6648_v3 = vadd.f32 1e-05, %v4759_v55  ;;  %v6801_v33 = vrot.slane %v10122_v22, %v11182_v61  ;;  %v11291_v51 = vld [vmem:[#allocation29_spill] sm:$0xff] }
 0x514   : > { %v4067_v26 = vrot.slane %v4066_v58, 2  ;;  %v4514_v5 = vadd.f32 %v4513_v31, %v4512_v25  ;;  %v6616_v35 = vmul.f32 %v6545_v12, %v6296_v56  ;;  %v6381_v43 = vrot.slane %v10112_v38, %v8941_v37 }
 0x515   : > { %v5119_v46 = vrot.slane %v5118_v44, 2  ;;  %v5567_v29 = vrot.slane %v5566_v11, 2  ;;  %7720 = vrsqrt.f32 %v6648_v3  ;;  %v3589_v1 = vadd.f32 %v11291_v51, %v10164_v49 }
 0x516   : > { %v4068_v19 = vadd.f32 %v4067_v26, %v4066_v58  ;;  %v4515_v21 = vrot.slane %v4514_v5, 2  ;;  %vm5974_vm8 = vcmp.eq.s32.totalorder %v5900_v23, 1  ;;  %v6797_v63 = vrot.slane %v10112_v38, %v11207_v30 }
 0x517   : > { %v5120_v17 = vmax.f32 %v5118_v44, %v5119_v46  ;;  %v5568_v47 = vmin.f32 %v5566_v11, %v5567_v29  ;;  %v4082_v12 = vadd.f32 %v10236_v4, %v3589_v1  ;;  %v4344_v56 = vmul.f32 %v3589_v1, %v3589_v1 }
 0x518   : > { %v4069_v16 = vrot.slane %v4068_v19, 1  ;;  %v4516_v25 = vadd.f32 %v4515_v21, %v4514_v5  ;;  %v7719_v62 = vpop.eup %7718  ;;  %v5130_v58 = vmax.f32 %v10225_v54, %v3589_v1  ;;  %v5578_v31 = vmin.f32 %v10225_v54, %v3589_v1 }
 0x519   : > { %v5121_v40 = vrot.slane %v5120_v17, 1  ;;  %v5569_v55 = vrot.slane %v5568_v47, 1  ;;  %v6710_v3 = vmul.f32 %v7719_v62, %v6614_v53  ;;  %v4083_v11 = vrot.slane %v4082_v12, 4 }
 0x51a   : > { %v4070_v49 = vadd.f32 %v4069_v16, %v4068_v19  ;;  %v4517_v44 = vrot.slane %v4516_v25, 1  ;;  %v4530_v38 = vadd.f32 %v10244_v34, %v4344_v56  ;;  %v5131_v29 = vrot.slane %v5130_v58, 4 }
 0x51b   : > { %v5122_v26 = vmax.f32 %v5120_v17, %v5121_v40  ;;  %v5570_v46 = vmin.f32 %v5568_v47, %v5569_v55  ;;  %v4084_v4 = vadd.f32 %v4083_v11, %v4082_v12  ;;  %v5780_v51 = vrot.slane %v10297_v18, %v8941_v37 }
 0x51c   : > { %v4214_v5 = vmul.f32 0.03125, %v4070_v49  ;;  %v4518_v21 = vadd.f32 %v4517_v44, %v4516_v25  ;;  %v4531_v19 = vrot.slane %v4530_v38, 4  ;;  %v5132_v1 = vmax.f32 %v5130_v58, %v5131_v29 }
 0x51d   : > { %v6071_v54 = vsel %vm6053_vm14, %v5122_v26, %v10249_v9  ;;  %v6199_v53 = vsel %vm6053_vm14, %v5570_v46, %v10251_v32  ;;  %v4085_v16 = vrot.slane %v4084_v4, 2  ;;  %v5579_v18 = vrot.slane %v5578_v31, 4 }
 0x51e   : > { %v4662_v17 = vmul.f32 0.03125, %v4518_v21  ;;  %v4694_v47 = vmul.f32 %v4214_v5, %v4214_v5  ;;  %v6263_v34 = vsel %vm5974_vm8, %v6071_v54, %v6199_v53  ;;  %v4532_v12 = vadd.f32 %v4531_v19, %v4530_v38 }
 0x51f   : > { %v6295_v25 = vsub.f32 %v6263_v34, %v4214_v5  ;;  %v5133_v56 = vrot.slane %v5132_v1, 2  ;;  %v7721_v62 = vpop.eup %7720  ;;  %v11293_v40 = vrot.slane %v10242_v52, 1  ;;  %v10364_v32 = vrot.slane %v6801_v33, %v11182_v61  ;;  %v10373_v5 = vld [vmem:[%s8376_s23 + $0x50] sm:$0x77] }
 0x520   : > { %v4726_v55 = vsub.f32 %v4662_v17, %v4694_v47  ;;  %v4086_v58 = vadd.f32 %v4085_v16, %v4084_v4  ;;  %v10366_v49 = vmul.f32 %v7721_v62, %v6616_v35  ;;  %v6541_v23 = vrot.slane %v6381_v43, %v8858_v50 }
 0x521   : > { %v5360_v9 = vmin.f32 %v10242_v52, %v11293_v40  ;;  %v4533_v44 = vrot.slane %v4532_v12, 2  ;;  %v5134_v11 = vmax.f32 %v5132_v1, %v5133_v56  ;;  %v10370_v46 = vrot.slane %v6797_v63, %v11182_v61  ;;  %v10376_v52 = vld [vmem:[%s8376_s23 + $0x58] sm:$0x77] }
 0x522   : > { %v4758_v26 = vmax.f32 %v4726_v55, 0.0  ;;  %v4087_v38 = vrot.slane %v4086_v58, 1  ;;  %v5580_v29 = vmin.f32 %v5578_v31, %v5579_v18  ;;  %v10379_v33 = vadd.f32 %v10332_v36, %v6710_v3 }
 0x523   : > { %v4534_v21 = vadd.f32 %v4533_v44, %v4532_v12  ;;  %v5135_v35 = vrot.slane %v5134_v11, 1  ;;  %v5908_v4 = vrot.slane %v5780_v51, %v8858_v50  ;;  %v6389_v63 = vrot.slane %v10122_v22, %v8941_v37 }
 0x524   : > { %v6647_v43 = vadd.f32 1e-05, %v4758_v26  ;;  %v4088_v54 = vadd.f32 %v4087_v38, %v4086_v58  ;;  %v5581_v53 = vrot.slane %v5580_v29, 2  ;;  %v1576_v31 = vrot.slane %v10373_v5, %v11209_v59 }
 0x525   : > { %v4535_v19 = vrot.slane %v4534_v21, 1  ;;  %v5136_v1 = vmax.f32 %v5134_v11, %v5135_v35  ;;  %v1584_v17 = vrot.slane %v10376_v52, %v11209_v59  ;;  %v6615_v36 = vmul.f32 %v6541_v23, %v6295_v25 }
 0x526   : > { %7722 = vrsqrt.f32 %v6647_v43  ;;  %v10388_v3 = vmul.f32 0.03125, %v4088_v54  ;;  %v5582_v47 = vmin.f32 %v5580_v29, %v5581_v53  ;;  %v10393_v16 = vrot.slane %v1576_v31, %v11209_v59  ;;  %v10425_v54 = vpop.f32.mrb[55].mxu1 }
 0x527   : > { %v4536_v51 = vadd.f32 %v4535_v19, %v4534_v21  ;;  %v6073_v34 = vsel %vm6053_vm14, %v5136_v1, %v10292_v8  ;;  %v10396_v12 = vrot.slane %v1584_v17, %v11209_v59  ;;  %vm5976_vm9 = vcmp.eq.s32.totalorder %v5908_v4, 1  ;;  %11295 = vst [vmem:[#allocation27_spill] sm:$0xff] %v10425_v54 }
 0x528   : > { %v4696_v56 = vmul.f32 %v10388_v3, %v10388_v3  ;;  %v5583_v18 = vrot.slane %v5582_v47, 1  ;;  %v1580_v25 = vrot.slane %v10373_v5, %v11210_v0  ;;  %v10403_v40 = vrot.slane %v6389_v63, %v8858_v50 }
 0x529   : > { %v4664_v62 = vmul.f32 0.03125, %v4536_v51  ;;  %v3626_v8 = vadd.f32 %v10002_v10, %v10393_v16  ;;  %v3630_v55 = vadd.f32 %v10010_v24, %v10393_v16  ;;  %v3679_v23 = vadd.f32 %v10004_v28, %v10396_v12  ;;  %v11294_v28 = vld [vmem:[#allocation30_spill] sm:$0xff] }
 0x52a   : > { %v5584_v58 = vmin.f32 %v5582_v47, %v5583_v18  ;;  %v10412_v44 = vrot.slane %v1580_v25, %v11209_v59  ;;  %v1588_v11 = vrot.slane %v10376_v52, %v11210_v0  ;;  %v3683_v10 = vadd.f32 %v10012_v7, %v10396_v12 }
 0x52b   : > { %v4728_v26 = vsub.f32 %v4664_v62, %v4696_v56  ;;  %v4249_v38 = vmul.f32 %v3626_v8, %v3626_v8  ;;  %v10416_v29 = vadd.f32 %v3630_v55, %v3626_v8  ;;  %v6805_v24 = vrot.slane %v10122_v22, %v11207_v30 }
 0x52c   : > { %v6201_v21 = vsel %vm6053_vm14, %v5584_v58, %v5360_v9  ;;  %v3628_v35 = vadd.f32 %v11294_v28, %v10412_v44  ;;  %v4281_v43 = vmul.f32 %v3630_v55, %v3630_v55  ;;  %v4913_v19 = vmax.f32 %v3626_v8, %v3630_v55 }
 0x52d   : > { %v4760_v53 = vmax.f32 %v4728_v26, 0.0  ;;  %v6265_v63 = vsel %vm5976_vm9, %v6073_v34, %v6201_v21  ;;  %v5361_v1 = vmin.f32 %v3626_v8, %v3630_v55  ;;  %v4251_v17 = vmul.f32 %v3679_v23, %v3679_v23 }
 0x52e   : > { %v6297_v31 = vsub.f32 %v6265_v63, %v10388_v3  ;;  %v10430_v7 = vrot.slane %v1588_v11, %v11209_v59  ;;  %v10432_v9 = vadd.f32 %v4281_v43, %v4249_v38  ;;  %v4914_v47 = vrot.slane %v4913_v19, 4 }
 0x52f   : > { %v6649_v22 = vadd.f32 1e-05, %v4760_v53  ;;  %v5362_v51 = vrot.slane %v5361_v1, 4  ;;  %v10434_v56 = vadd.f32 %v3683_v10, %v3679_v23  ;;  %v4250_v25 = vmul.f32 %v3628_v35, %v3628_v35  ;;  %v11296_v53 = vld [vmem:[#allocation25_spill] sm:$0xff] }
 0x530   : > { %v7723_v18 = vpop.eup %7722  ;;  %v4283_v62 = vmul.f32 %v3683_v10, %v3683_v10  ;;  %v4927_v4 = vmax.f32 %v3679_v23, %v3683_v10  ;;  %v5375_v34 = vmin.f32 %v3679_v23, %v3683_v10  ;;  %v4915_v8 = vmax.f32 %v4913_v19, %v4914_v47 }
 0x531   : > { %v6711_v58 = vmul.f32 %v7723_v18, %v6615_v36  ;;  %7724 = vrsqrt.f32 %v6649_v22  ;;  %v5363_v3 = vmin.f32 %v5361_v1, %v5362_v51  ;;  %v3632_v38 = vadd.f32 %v10014_v60, %v10412_v44  ;;  %v11297_v1 = vld [vmem:[#allocation31_spill] sm:$0xff] }
 0x532   : > { %v10436_v55 = vadd.f32 %v4283_v62, %v4251_v17  ;;  %v4928_v11 = vrot.slane %v4927_v4, 4  ;;  %v5376_v26 = vrot.slane %v5375_v34, 4  ;;  %v4916_v28 = vrot.slane %v4915_v8, 2 }
 0x533   : > { %v7031_v21 = vadd.f32 %v10370_v46, %v6711_v58  ;;  %v5364_v43 = vrot.slane %v5363_v3, 2  ;;  %v3685_v63 = vadd.f32 %v11296_v53, %v10430_v7  ;;  %v4098_v36 = vadd.f32 %v3632_v38, %v3628_v35 }
 0x534   : > { %v4929_v54 = vmax.f32 %v4927_v4, %v4928_v11  ;;  %v5377_v23 = vmin.f32 %v5375_v34, %v5376_v26  ;;  %v4282_v10 = vmul.f32 %v3632_v38, %v3632_v38  ;;  %v3681_v17 = vadd.f32 %v11297_v1, %v10430_v7 }
 0x535   : > { %v7146_v19 = vcombine.low %v10379_v33, %v7031_v21  ;;  %v4917_v22 = vmax.f32 %v4915_v8, %v4916_v28  ;;  %v4920_v47 = vmax.f32 %v3628_v35, %v3632_v38  ;;  %v5368_v46 = vmin.f32 %v3628_v35, %v3632_v38 }
 0x536   : > { %v4930_v51 = vrot.slane %v4929_v54, 2  ;;  %v5378_v60 = vrot.slane %v5377_v23, 2  ;;  %v4546_v18 = vadd.f32 %v4282_v10, %v4250_v25  ;;  %v7032_v62 = vadd.f32 %v10364_v32, %v10366_v49 }
 0x537   : > { %v6965_v58 = vrot.slane %v6805_v24, %v11182_v61  ;;  %v5365_v4 = vmin.f32 %v5363_v3, %v5364_v43  ;;  %v4921_v34 = vrot.slane %v4920_v47, 4  ;;  %v4918_v11 = vrot.slane %v4917_v22, 1  ;;  %v11298_v3 = vld [vmem:[#allocation11_spill] sm:$0xff] }
 0x538   : > { %v4931_v26 = vmax.f32 %v4929_v54, %v4930_v51  ;;  %v5369_v53 = vrot.slane %v5368_v46, 4  ;;  %v4116_v33 = vadd.f32 %v3685_v63, %v3681_v17  ;;  %v6617_v21 = vmul.f32 %v10403_v40, %v6297_v31 }
 0x539   : > { %v4252_v1 = vmul.f32 %v3681_v17, %v3681_v17  ;;  %v4922_v8 = vmax.f32 %v4920_v47, %v4921_v34  ;;  %v4284_v28 = vmul.f32 %v3685_v63, %v3685_v63  ;;  %v7154_v27 = vrot.slane %v7146_v19, %v11216_v45 }
 0x53a   : > { %v5379_v25 = vmin.f32 %v5377_v23, %v5378_v60  ;;  %v5370_v35 = vmin.f32 %v5368_v46, %v5369_v53  ;;  %v4934_v38 = vmax.f32 %v3681_v17, %v3685_v63  ;;  %v5382_v24 = vmin.f32 %v3681_v17, %v3685_v63  ;;  %v11299_v53 = vld [vmem:[#allocation6_spill] sm:$0xff] }
 0x53b   : > { %v7725_v10 = vpop.eup %7724  ;;  %v4923_v32 = vrot.slane %v4922_v8, 2  ;;  %v4564_v49 = vadd.f32 %v4284_v28, %v4252_v1  ;;  %v3636_v43 = vadd.f32 %v11298_v3, %v10393_v16  ;;  %v10453_v51 = vmax.f32 %v4917_v22, %v4918_v11  ;;  %v11300_v22 = vld [vmem:[#allocation7_spill] sm:$0xff] }
 0x53c   : > { %v6713_v54 = vmul.f32 %v7725_v10, %v6617_v21  ;;  %v5366_v20 = vrot.slane %v5365_v4, 1  ;;  %v4932_v40 = vrot.slane %v4931_v26, 1  ;;  %v5371_v31 = vrot.slane %v5370_v35, 2 }
 0x53d   : > { %v4935_v47 = vrot.slane %v4934_v38, 4  ;;  %v5383_v34 = vrot.slane %v5382_v24, 4  ;;  %v4090_v19 = vadd.f32 %v10416_v29, %v3636_v43  ;;  %v5380_v60 = vrot.slane %v5379_v25, 1 }
 0x53e   : > { %v7033_v23 = vadd.f32 %v6965_v58, %v6713_v54  ;;  %v4313_v46 = vmul.f32 %v3636_v43, %v3636_v43  ;;  %v10458_v1 = vadd.f32 %v11299_v53, %v10396_v12  ;;  %v4924_v63 = vmax.f32 %v4922_v8, %v4923_v32 }
 0x53f   : > { %v4936_v17 = vmax.f32 %v4934_v38, %v4935_v47  ;;  %v5384_v28 = vmin.f32 %v5382_v24, %v5383_v34  ;;  %v10462_v11 = vadd.f32 %v11300_v22, %v10412_v44  ;;  %v10464_v10 = vmin.f32 %v5365_v4, %v5366_v20 }
 0x540   : > { %v7147_v21 = vcombine.low %v7032_v62, %v7033_v23  ;;  %v4538_v3 = vadd.f32 %v10432_v9, %v4313_v46  ;;  %v4108_v29 = vadd.f32 %v10434_v56, %v10458_v1  ;;  %v10469_v58 = vmax.f32 %v4931_v26, %v4932_v40  ;;  %v11301_v26 = vld [vmem:[#allocation10_spill] sm:$0xff] }
 0x541   : > { %v5372_v54 = vmin.f32 %v5370_v35, %v5371_v31  ;;  %v4937_v53 = vrot.slane %v4936_v17, 2  ;;  %v4315_v8 = vmul.f32 %v10458_v1, %v10458_v1  ;;  %v10474_v32 = vmin.f32 %v5379_v25, %v5380_v60  ;;  %v11302_v25 = vld [vmem:[#allocation13_spill] sm:$0xff] }
 0x542   : > { %v7161_v38 = vrot.slane %v7147_v21, %v11216_v45  ;;  %v10477_v20 = vadd.f32 %v4098_v36, %v10462_v11  ;;  %v4314_v9 = vmul.f32 %v10462_v11, %v10462_v11  ;;  %v4925_v62 = vrot.slane %v4924_v63, 1 }
 0x543   : > { %v5385_v56 = vrot.slane %v5384_v28, 2  ;;  %v4556_v4 = vadd.f32 %v10436_v55, %v4315_v8  ;;  %v10484_v35 = vadd.f32 %v11301_v26, %v10430_v7  ;;  %v3640_v31 = vadd.f32 %v11302_v25, %v10393_v16 }
 0x544   : > { %v7162_v24 = vcombine.low %v7154_v27, %v7161_v38  ;;  %v10486_v40 = vadd.f32 %v4546_v18, %v4314_v9  ;;  %vm5679_vm10 = vcmp.ge.f32.partialorder %v10373_v5, 0.0  ;;  %v5373_v36 = vrot.slane %v5372_v54, 1 }
 0x545   : > { %v10491_v47 = vmax.f32 %v4936_v17, %v4937_v53  ;;  %v10494_v34 = vadd.f32 %v4116_v33, %v10484_v35  ;;  %v4316_v55 = vmul.f32 %v10484_v35, %v10484_v35  ;;  %v4091_v23 = vadd.f32 %v4090_v19, %v3640_v31 }
 0x546   : > { %7226 = vst [vmem:[%s8381_s9 + $0x20] sm:$0xff] %v7162_v24  ;;  %v4345_v60 = vmul.f32 %v3640_v31, %v3640_v31  ;;  %v5137_v27 = vmax.f32 %v3636_v43, %v3640_v31  ;;  %v5585_v18 = vmin.f32 %v3636_v43, %v3640_v31  ;;  %v10499_v46 = vmax.f32 %v4924_v63, %v4925_v62  ;;  %v11303_v63 = vld [vmem:[#allocation12_spill] sm:$0xff] }
 0x547   : > { %v10501_v22 = vmin.f32 %v5384_v28, %v5385_v56  ;;  %v10503_v16 = vadd.f32 %v4564_v49, %v4316_v55  ;;  %v10506_v17 = vsel %vm5679_vm10, 1, %v11215_v6  ;;  %v4092_v21 = vrot.slane %v4091_v23, 4 }
 0x548   : > { %v4539_v33 = vadd.f32 %v4538_v3, %v4345_v60  ;;  %v5138_v53 = vrot.slane %v5137_v27, 4  ;;  %v5586_v8 = vrot.slane %v5585_v18, 4  ;;  %v10508_v38 = vmin.f32 %v5372_v54, %v5373_v36 }
 0x549   : > { %v5784_v43 = vrot.slane %v10506_v17, %v8858_v50  ;;  %v3693_v28 = vadd.f32 %v11303_v63, %v10396_v12  ;;  %v4093_v9 = vadd.f32 %v4092_v21, %v4091_v23  ;;  %vm5680_vm12 = vcmp.ge.f32.partialorder %v10376_v52, 0.0 }
 0x54a   : > { %v4540_v49 = vrot.slane %v4539_v33, 4  ;;  %v5139_v62 = vmax.f32 %v5137_v27, %v5138_v53  ;;  %v5587_v56 = vmin.f32 %v5585_v18, %v5586_v8  ;;  %v10520_v53 = vpop.f32.mrb[56].mxu0  ;;  %v10522_v8 = vpop.f32.mrb[56].mxu1 }
 0x54b   : > { %v5912_v3 = vrot.slane %v5784_v43, %v8858_v50  ;;  %v4109_v24 = vadd.f32 %v4108_v29, %v3693_v28  ;;  %v4094_v25 = vrot.slane %v4093_v9, 2  ;;  %v4347_v19 = vmul.f32 %v3693_v28, %v3693_v28  ;;  %11304 = vst [vmem:[#allocation28_spill] sm:$0xff] %v10520_v53  ;;  %11305 = vst [vmem:[#allocation14_spill] sm:$0xff] %v10522_v8  ;;  %v10527_v26 = vpop.f32.mrb[57].mxu1 }
 0x54c   : > { %v4541_v31 = vadd.f32 %v4540_v49, %v4539_v33  ;;  %v5140_v36 = vrot.slane %v5139_v62, 2  ;;  %v5588_v55 = vrot.slane %v5587_v56, 2  ;;  %v5151_v12 = vmax.f32 %v10458_v1, %v3693_v28  ;;  %v10525_v49 = vpop.f32.mrb[57].mxu0  ;;  %11307 = vst [vmem:[#allocation22_spill] sm:$0xff] %v10527_v26 }
 0x54d   : > { %vm5977_vm11 = vcmp.eq.s32.totalorder %v5912_v3, 1  ;;  %v4110_v60 = vrot.slane %v4109_v24, 4  ;;  %v4095_v23 = vadd.f32 %v4094_v25, %v4093_v9  ;;  %v4557_v63 = vadd.f32 %v4556_v4, %v4347_v19  ;;  %11306 = vst [vmem:[#allocation15_spill] sm:$0xff] %v10525_v49  ;;  %v10529_v25 = vpop.f32.mrb[58].mxu0 }
 0x54e   : > { %v4542_v27 = vrot.slane %v4541_v31, 2  ;;  %v5141_v18 = vmax.f32 %v5139_v62, %v5140_v36  ;;  %v5589_v21 = vmin.f32 %v5587_v56, %v5588_v55  ;;  %v5152_v29 = vrot.slane %v5151_v12, 4  ;;  %11308 = vst [vmem:[#allocation16_spill] sm:$0xff] %v10529_v25  ;;  %v10531_v62 = vpop.f32.mrb[58].mxu1  ;;  %v10533_v4 = vpop.f32.mrb[59].mxu0 }
 0x54f   : > { %v4111_v43 = vadd.f32 %v4110_v60, %v4109_v24  ;;  %v5599_v33 = vmin.f32 %v10458_v1, %v3693_v28  ;;  %v4096_v54 = vrot.slane %v4095_v23, 1  ;;  %11309 = vst [vmem:[#allocation23_spill] sm:$0xff] %v10531_v62  ;;  %v4558_v36 = vrot.slane %v4557_v63, 4  ;;  %11310 = vst [vmem:[#allocation24_spill] sm:$0xff] %v10533_v4  ;;  %v10535_v19 = vpop.f32.mrb[59].mxu1 }
 0x550   : > { %v4543_v39 = vadd.f32 %v4542_v27, %v4541_v31  ;;  %v5142_v42 = vrot.slane %v5141_v18, 1  ;;  %v5590_v9 = vrot.slane %v5589_v21, 1  ;;  %v5153_v55 = vmax.f32 %v5151_v12, %v5152_v29  ;;  %11311 = vst [vmem:[#allocation29_spill] sm:$0xff] %v10535_v19 }
 0x551   : > { %v4112_v56 = vrot.slane %v4111_v43, 2  ;;  %v5600_v24 = vrot.slane %v5599_v33, 4  ;;  %v4097_v1 = vadd.f32 %v4096_v54, %v4095_v23  ;;  %v4559_v31 = vadd.f32 %v4558_v36, %v4557_v63 }
 0x552   : > { %v4544_v28 = vrot.slane %v4543_v39, 1  ;;  %v5143_v60 = vmax.f32 %v5141_v18, %v5142_v42  ;;  %v5591_v26 = vmin.f32 %v5589_v21, %v5590_v9  ;;  %v5154_v27 = vrot.slane %v5153_v55, 2 }
 0x553   : > { %v4113_v49 = vadd.f32 %v4112_v56, %v4111_v43  ;;  %v5601_v8 = vmin.f32 %v5599_v33, %v5600_v24  ;;  %v4217_v53 = vmul.f32 0.03125, %v4097_v1  ;;  %v4560_v19 = vrot.slane %v4559_v31, 2 }
 0x554   : > { %v4545_v25 = vadd.f32 %v4544_v28, %v4543_v39  ;;  %v6074_v62 = vsel %vm6053_vm14, %v5143_v60, %v10453_v51  ;;  %v6202_v12 = vsel %vm6053_vm14, %v5591_v26, %v10464_v10  ;;  %v5155_v54 = vmax.f32 %v5153_v55, %v5154_v27 }
 0x555   : > { %v6266_v29 = vsel %vm5977_vm11, %v6074_v62, %v6202_v12  ;;  %v4114_v4 = vrot.slane %v4113_v49, 1  ;;  %v4697_v42 = vmul.f32 %v4217_v53, %v4217_v53  ;;  %v5602_v21 = vrot.slane %v5601_v8, 2 }
 0x556   : > { %v4665_v23 = vmul.f32 0.03125, %v4545_v25  ;;  %v6298_v18 = vsub.f32 %v6266_v29, %v4217_v53  ;;  %v4561_v63 = vadd.f32 %v4560_v19, %v4559_v31  ;;  %v5156_v33 = vrot.slane %v5155_v54, 1  ;;  %v11315_v29 = vld [vmem:[#allocation17_spill] sm:$0xff] }
 0x557   : > { %v4115_v43 = vadd.f32 %v4114_v4, %v4113_v49  ;;  %v11312_v39 = vrot.slane %v10491_v47, 1  ;;  %v5603_v26 = vmin.f32 %v5601_v8, %v5602_v21  ;;  %v10549_v3 = vsel %vm5680_vm12, 1, %v11215_v6 }
 0x558   : > { %v4729_v10 = vsub.f32 %v4665_v23, %v4697_v42  ;;  %v4562_v25 = vrot.slane %v4561_v63, 1  ;;  %v5157_v62 = vmax.f32 %v5155_v54, %v5156_v33  ;;  %v5792_v53 = vrot.slane %v10549_v3, %v8858_v50  ;;  %v10573_v42 = vpop.f32.mrb[60].mxu0 }
 0x559   : > { %v10546_v51 = vmax.f32 %v10491_v47, %v11312_v39  ;;  %v4219_v9 = vmul.f32 0.03125, %v4115_v43  ;;  %v11313_v56 = vrot.slane %v10373_v5, %v8858_v50  ;;  %v6809_v47 = vrot.slane %v10373_v5, %v11182_v61 }
 0x55a   : > { %v4761_v49 = vmax.f32 %v4729_v10, 0.0  ;;  %v5604_v55 = vrot.slane %v5603_v26, 1  ;;  %v4563_v8 = vadd.f32 %v4562_v25, %v4561_v63  ;;  %v5920_v4 = vrot.slane %v5792_v53, %v8858_v50  ;;  %v10582_v63 = vpop.f32.mrb[61].mxu0 }
 0x55b   : > { %v6553_v36 = vrot.slane %v11313_v56, %v8858_v50  ;;  %v4699_v24 = vmul.f32 %v4219_v9, %v4219_v9  ;;  %v6076_v19 = vsel %vm6053_vm14, %v5157_v62, %v10469_v58  ;;  %v11314_v1 = vrot.slane %v10501_v22, 1  ;;  %v10575_v58 = vpop.f32.mrb[60].mxu1 }
 0x55c   : > { %v6650_v60 = vadd.f32 1e-05, %v4761_v49  ;;  %v5605_v31 = vmin.f32 %v5603_v26, %v5604_v55  ;;  %v6401_v27 = vrot.slane %v10376_v52, %v8858_v50  ;;  %v4667_v12 = vmul.f32 0.03125, %v4563_v8  ;;  %v10584_v33 = vpop.f32.mrb[61].mxu1 }
 0x55d   : > { %v10565_v28 = vmin.f32 %v10501_v22, %v11314_v1  ;;  %vm5979_vm13 = vcmp.eq.s32.totalorder %v5920_v4, 1  ;;  %v3642_v54 = vadd.f32 %v11315_v29, %v10412_v44  ;;  %v5788_v23 = vrot.slane %v10506_v17, %v8941_v37  ;;  %11316 = vst [vmem:[#allocation30_spill] sm:$0xff] %v10584_v33  ;;  %v10598_v8 = vpop.f32.mrb[62].mxu1 }
 0x55e   : > { %v6618_v21 = vmul.f32 %v6553_v36, %v6298_v18  ;;  %7726 = vrsqrt.f32 %v6650_v60  ;;  %v10578_v22 = vrot.slane %v6809_v47, %v11182_v61  ;;  %v6204_v43 = vsel %vm6053_vm14, %v5605_v31, %v10474_v32  ;;  %11318 = vst [vmem:[#allocation31_spill] sm:$0xff] %v10598_v8  ;;  %v11319_v31 = vld [vmem:[#allocation18_spill] sm:$0xff] }
 0x55f   : > { %v4731_v44 = vsub.f32 %v4667_v12, %v4699_v24  ;;  %v6268_v39 = vsel %vm5979_vm13, %v6076_v19, %v6204_v43  ;;  %v4100_v17 = vadd.f32 %v10477_v20, %v3642_v54  ;;  %v4346_v10 = vmul.f32 %v3642_v54, %v3642_v54 }
 0x560   : > { %v6300_v26 = vsub.f32 %v6268_v39, %v4219_v9  ;;  %v6561_v25 = vrot.slane %v6401_v27, %v8858_v50  ;;  %v5144_v18 = vmax.f32 %v10462_v11, %v3642_v54  ;;  %v5592_v62 = vmin.f32 %v10462_v11, %v3642_v54  ;;  %v10596_v9 = vpop.f32.mrb[62].mxu0 }
 0x561   : > { %v4763_v53 = vmax.f32 %v4731_v44, 0.0  ;;  %v4101_v49 = vrot.slane %v4100_v17, 4  ;;  %v4548_v32 = vadd.f32 %v10486_v40, %v4346_v10  ;;  %v5916_v56 = vrot.slane %v5788_v23, %v8858_v50  ;;  %11317 = vst [vmem:[#allocation25_spill] sm:$0xff] %v10596_v9 }
 0x562   : > { %v6817_v36 = vrot.slane %v10376_v52, %v11182_v61  ;;  %v5145_v47 = vrot.slane %v5144_v18, 4  ;;  %v5593_v55 = vrot.slane %v5592_v62, 4  ;;  %v6813_v40 = vrot.slane %v10373_v5, %v11207_v30 }
 0x563   : > { %v6652_v24 = vadd.f32 1e-05, %v4763_v53  ;;  %v4102_v11 = vadd.f32 %v4101_v49, %v4100_v17  ;;  %v4549_v4 = vrot.slane %v4548_v32, 4  ;;  %v6620_v19 = vmul.f32 %v6561_v25, %v6300_v26 }
 0x564   : > { %v5146_v1 = vmax.f32 %v5144_v18, %v5145_v47  ;;  %v5594_v60 = vmin.f32 %v5592_v62, %v5593_v55  ;;  %v3695_v27 = vadd.f32 %v11319_v31, %v10430_v7  ;;  %vm5978_vm15 = vcmp.eq.s32.totalorder %v5916_v56, 1 }
 0x565   : > { %7728 = vrsqrt.f32 %v6652_v24  ;;  %v4103_v12 = vrot.slane %v4102_v11, 2  ;;  %v4550_v29 = vadd.f32 %v4549_v4, %v4548_v32  ;;  %v11321_v56 = vrot.slane %v10373_v5, %v8941_v37 }
 0x566   : > { %v5147_v54 = vrot.slane %v5146_v1, 2  ;;  %v5595_v23 = vrot.slane %v5594_v60, 2  ;;  %v4118_v43 = vadd.f32 %v10494_v34, %v3695_v27  ;;  %v4348_v44 = vmul.f32 %v3695_v27, %v3695_v27 }
 0x567   : > { %v4104_v39 = vadd.f32 %v4103_v12, %v4102_v11  ;;  %v4551_v17 = vrot.slane %v4550_v29, 2  ;;  %v5158_v10 = vmax.f32 %v10484_v35, %v3695_v27  ;;  %v5606_v26 = vmin.f32 %v10484_v35, %v3695_v27 }
 0x568   : > { %v7727_v25 = vpop.eup %7726  ;;  %v5148_v18 = vmax.f32 %v5146_v1, %v5147_v54  ;;  %v5596_v62 = vmin.f32 %v5594_v60, %v5595_v23  ;;  %v4119_v53 = vrot.slane %v4118_v43, 4  ;;  %v4566_v7 = vadd.f32 %v10503_v16, %v4348_v44  ;;  %v10610_v23 = vpop.f32.mrb[63].mxu0 }
 0x569   : > { %v6714_v49 = vmul.f32 %v7727_v25, %v6618_v21  ;;  %v4105_v32 = vrot.slane %v4104_v39, 1  ;;  %v4552_v47 = vadd.f32 %v4551_v17, %v4550_v29  ;;  %v5159_v55 = vrot.slane %v5158_v10, 4  ;;  %11320 = vst [vmem:[#allocation11_spill] sm:$0xff] %v10610_v23 }
 0x56a   : > { %v5149_v24 = vrot.slane %v5148_v18, 1  ;;  %v5597_v4 = vrot.slane %v5596_v62, 1  ;;  %v4120_v34 = vadd.f32 %v4119_v53, %v4118_v43  ;;  %v4567_v31 = vrot.slane %v4566_v7, 4 }
 0x56b   : > { %v4106_v11 = vadd.f32 %v4105_v32, %v4104_v39  ;;  %v4553_v12 = vrot.slane %v4552_v47, 1  ;;  %v5160_v20 = vmax.f32 %v5158_v10, %v5159_v55  ;;  %v5796_v35 = vrot.slane %v10549_v3, %v8941_v37 }
 0x56c   : > { %v5150_v27 = vmax.f32 %v5148_v18, %v5149_v24  ;;  %v5598_v1 = vmin.f32 %v5596_v62, %v5597_v4  ;;  %v4121_v60 = vrot.slane %v4120_v34, 2  ;;  %v4568_v54 = vadd.f32 %v4567_v31, %v4566_v7 }
 0x56d   : > { %v4218_v16 = vmul.f32 0.03125, %v4106_v11  ;;  %v4554_v21 = vadd.f32 %v4553_v12, %v4552_v47  ;;  %v5161_v29 = vrot.slane %v5160_v20, 2  ;;  %v5607_v44 = vrot.slane %v5606_v26, 4  ;;  %v10633_v11 = vld [vmem:[%s8376_s23 + $0x60] sm:$0x77] }
 0x56e   : > { %v6075_v43 = vsel %vm6053_vm14, %v5150_v27, %v10499_v46  ;;  %v6203_v39 = vsel %vm6053_vm14, %v5598_v1, %v10508_v38  ;;  %v4122_v17 = vadd.f32 %v4121_v60, %v4120_v34  ;;  %v4569_v10 = vrot.slane %v4568_v54, 2  ;;  %v10638_v60 = vld [vmem:[%s8376_s23 + $0x68] sm:$0x77] }
 0x56f   : > { %v7729_v25 = vpop.eup %7728  ;;  %v4666_v3 = vmul.f32 0.03125, %v4554_v21  ;;  %v4698_v18 = vmul.f32 %v4218_v16, %v4218_v16  ;;  %v6267_v62 = vsel %vm5978_vm15, %v6075_v43, %v6203_v39  ;;  %v5162_v53 = vmax.f32 %v5160_v20, %v5161_v29 }
 0x570   : > { %v10617_v7 = vmul.f32 %v7729_v25, %v6620_v19  ;;  %v6299_v32 = vsub.f32 %v6267_v62, %v4218_v16  ;;  %v4123_v47 = vrot.slane %v4122_v17, 1  ;;  %v4570_v55 = vadd.f32 %v4569_v10, %v4568_v54 }
 0x571   : > { %v10623_v46 = vrot.slane %v6817_v36, %v11182_v61  ;;  %v4730_v38 = vsub.f32 %v4666_v3, %v4698_v18  ;;  %v5163_v24 = vrot.slane %v5162_v53, 1  ;;  %v5608_v4 = vmin.f32 %v5606_v26, %v5607_v44 }
 0x572   : > { %v6557_v20 = vrot.slane %v11321_v56, %v8858_v50  ;;  %v10630_v19 = vrot.slane %v6813_v40, %v11182_v61  ;;  %v4124_v34 = vadd.f32 %v4123_v47, %v4122_v17  ;;  %v4571_v31 = vrot.slane %v4570_v55, 1  ;;  %v10677_v56 = vpop.f32.mrb[63].mxu1 }
 0x573   : > { %v4762_v12 = vmax.f32 %v4730_v38, 0.0  ;;  %v5164_v27 = vmax.f32 %v5162_v53, %v5163_v24  ;;  %v5609_v1 = vrot.slane %v5608_v4, 2  ;;  %v6405_v36 = vrot.slane %v10376_v52, %v8941_v37  ;;  %v11322_v38 = vld [vmem:[#allocation19_spill] sm:$0xff]  ;;  %11323 = vst [vmem:[#allocation6_spill] sm:$0xff] %v10677_v56 }
 0x574   : > { %v10641_v26 = vadd.f32 %v10578_v22, %v6714_v49  ;;  %v10643_v5 = vmul.f32 0.03125, %v4124_v34  ;;  %v4572_v54 = vadd.f32 %v4571_v31, %v4570_v55  ;;  %v5924_v40 = vrot.slane %v5796_v35, %v8858_v50 }
 0x575   : > { %v6651_v16 = vadd.f32 1e-05, %v4762_v12  ;;  %v5610_v21 = vmin.f32 %v5608_v4, %v5609_v1  ;;  %v6077_v29 = vsel %vm6053_vm14, %v5164_v27, %v10546_v51  ;;  %v1592_v44 = vrot.slane %v10633_v11, %v11209_v59  ;;  %v11324_v27 = vld [vmem:[#allocation20_spill] sm:$0xff] }
 0x576   : > { %v6619_v43 = vmul.f32 %v6557_v20, %v6299_v32  ;;  %v4668_v39 = vmul.f32 0.03125, %v4572_v54  ;;  %v4700_v17 = vmul.f32 %v10643_v5, %v10643_v5  ;;  %v1600_v22 = vrot.slane %v10638_v60, %v11209_v59 }
 0x577   : > { %7730 = vrsqrt.f32 %v6651_v16  ;;  %v5611_v49 = vrot.slane %v5610_v21, 1  ;;  %v10655_v35 = vrot.slane %v1592_v44, %v11209_v59  ;;  %v1596_v10 = vrot.slane %v10633_v11, %v11210_v0 }
 0x578   : > { %v4732_v51 = vsub.f32 %v4668_v39, %v4700_v17  ;;  %vm5980_vm0 = vcmp.eq.s32.totalorder %v5924_v40, 1  ;;  %v10660_v25 = vrot.slane %v1600_v22, %v11209_v59  ;;  %v1604_v3 = vrot.slane %v10638_v60, %v11210_v0  ;;  %v11325_v40 = vld [vmem:[#allocation21_spill] sm:$0xff] }
 0x579   : > { %v5612_v18 = vmin.f32 %v5610_v21, %v5611_v49  ;;  %v3732_v62 = vadd.f32 %v10264_v13, %v10655_v35  ;;  %v10667_v53 = vrot.slane %v1596_v10, %v11209_v59  ;;  %v3736_v32 = vadd.f32 %v10273_v14, %v10655_v35 }
 0x57a   : > { %v4764_v47 = vmax.f32 %v4732_v51, 0.0  ;;  %v6821_v55 = vrot.slane %v10376_v52, %v11207_v30  ;;  %v3785_v24 = vadd.f32 %v11322_v38, %v10660_v25  ;;  %v3789_v4 = vadd.f32 %v10275_v57, %v10660_v25 }
 0x57b   : > { %v6205_v13 = vsel %vm6053_vm14, %v5612_v18, %v10565_v28  ;;  %v4253_v20 = vmul.f32 %v3732_v62, %v3732_v62  ;;  %v10682_v34 = vrot.slane %v1604_v3, %v11209_v59  ;;  %v10684_v14 = vadd.f32 %v3736_v32, %v3732_v62 }
 0x57c   : > { %v6269_v31 = vsel %vm5980_vm0, %v6077_v29, %v6205_v13  ;;  %v6565_v52 = vrot.slane %v6405_v36, %v8858_v50  ;;  %v6653_v12 = vadd.f32 1e-05, %v4764_v47  ;;  %v3734_v1 = vadd.f32 %v11324_v27, %v10667_v53 }
 0x57d   : > { %v6301_v57 = vsub.f32 %v6269_v31, %v10643_v5  ;;  %v4255_v54 = vmul.f32 %v3785_v24, %v3785_v24  ;;  %v4285_v16 = vmul.f32 %v3736_v32, %v3736_v32  ;;  %v4941_v21 = vmax.f32 %v3732_v62, %v3736_v32 }
 0x57e   : > { %7732 = vrsqrt.f32 %v6653_v12  ;;  %v6981_v28 = vrot.slane %v6821_v55, %v11182_v61  ;;  %v5389_v44 = vmin.f32 %v3732_v62, %v3736_v32  ;;  %v10692_v39 = vadd.f32 %v3789_v4, %v3785_v24 }
 0x57f   : > { %v3787_v29 = vadd.f32 %v11325_v40, %v10682_v34  ;;  %v10696_v17 = vadd.f32 %v4285_v16, %v4253_v20  ;;  %v4942_v36 = vrot.slane %v4941_v21, 4  ;;  %v4287_v22 = vmul.f32 %v3789_v4, %v3789_v4 }
 0x580   : > { %v5390_v49 = vrot.slane %v5389_v44, 4  ;;  %v4955_v10 = vmax.f32 %v3785_v24, %v3789_v4  ;;  %v5403_v51 = vmin.f32 %v3785_v24, %v3789_v4  ;;  %v3738_v5 = vadd.f32 %v10277_v41, %v10667_v53 }
 0x581   : > { %v7731_v3 = vpop.eup %7730  ;;  %v4254_v18 = vmul.f32 %v3734_v1, %v3734_v1  ;;  %v4943_v47 = vmax.f32 %v4941_v21, %v4942_v36  ;;  %v10700_v55 = vadd.f32 %v4287_v22, %v4255_v54  ;;  %v3791_v62 = vadd.f32 %v10279_v48, %v10682_v34 }
 0x582   : > { %v6715_v32 = vmul.f32 %v7731_v3, %v6619_v43  ;;  %v5391_v38 = vmin.f32 %v5389_v44, %v5390_v49  ;;  %v4956_v13 = vrot.slane %v4955_v10, 4  ;;  %v5404_v20 = vrot.slane %v5403_v51, 4 }
 0x583   : > { %v4944_v31 = vrot.slane %v4943_v47, 2  ;;  %v10704_v12 = vadd.f32 %v3738_v5, %v3734_v1  ;;  %v4286_v27 = vmul.f32 %v3738_v5, %v3738_v5  ;;  %v4948_v24 = vmax.f32 %v3734_v1, %v3738_v5 }
 0x584   : > { %v7035_v4 = vadd.f32 %v10630_v19, %v6715_v32  ;;  %v5392_v41 = vrot.slane %v5391_v38, 2  ;;  %v4957_v16 = vmax.f32 %v4955_v10, %v4956_v13  ;;  %v5405_v40 = vmin.f32 %v5403_v51, %v5404_v20 }
 0x585   : > { %v4945_v21 = vmax.f32 %v4943_v47, %v4944_v31  ;;  %v10707_v54 = vadd.f32 %v4286_v27, %v4254_v18  ;;  %v4949_v36 = vrot.slane %v4948_v24, 4  ;;  %v5396_v22 = vmin.f32 %v3734_v1, %v3738_v5 }
 0x586   : > { %v7163_v48 = vcombine.low %v10641_v26, %v7035_v4  ;;  %v6621_v43 = vmul.f32 %v6565_v52, %v6301_v57  ;;  %v5393_v44 = vmin.f32 %v5391_v38, %v5392_v41  ;;  %v4958_v49 = vrot.slane %v4957_v16, 2 }
 0x587   : > { %v5406_v3 = vrot.slane %v5405_v40, 2  ;;  %v4950_v56 = vmax.f32 %v4948_v24, %v4949_v36  ;;  %v5397_v23 = vrot.slane %v5396_v22, 4  ;;  %v4152_v8 = vadd.f32 %v3791_v62, %v3787_v29 }
 0x588   : > { %v7733_v9 = vpop.eup %7732  ;;  %v7036_v19 = vadd.f32 %v10623_v46, %v10617_v7  ;;  %v4946_v10 = vrot.slane %v4945_v21, 1  ;;  %v5394_v51 = vrot.slane %v5393_v44, 1  ;;  %v4959_v18 = vmax.f32 %v4957_v16, %v4958_v49 }
 0x589   : > { %v6717_v47 = vmul.f32 %v7733_v9, %v6621_v43  ;;  %v5398_v32 = vmin.f32 %v5396_v22, %v5397_v23  ;;  %vm5681_vm1 = vcmp.ge.f32.partialorder %v10633_v11, 0.0  ;;  %v7171_v26 = vrot.slane %v7163_v48, %v11216_v45 }
 0x58a   : > { %v4256_v52 = vmul.f32 %v3787_v29, %v3787_v29  ;;  %v4288_v1 = vmul.f32 %v3791_v62, %v3791_v62  ;;  %v3742_v57 = vadd.f32 %v10316_v15, %v10655_v35  ;;  %v5407_v38 = vmin.f32 %v5405_v40, %v5406_v3  ;;  %v11326_v3 = vld [vmem:[#allocation5_spill] sm:$0xff] }
 0x58b   : > { %v7037_v5 = vadd.f32 %v6981_v28, %v6717_v47  ;;  %v4951_v13 = vrot.slane %v4950_v56, 2  ;;  %v4962_v20 = vmax.f32 %v3787_v29, %v3791_v62  ;;  %v10716_v31 = vmax.f32 %v4945_v21, %v4946_v10 }
 0x58c   : > { %v10718_v7 = vmin.f32 %v5393_v44, %v5394_v51  ;;  %v4600_v9 = vadd.f32 %v4288_v1, %v4256_v52  ;;  %v5410_v46 = vmin.f32 %v3787_v29, %v3791_v62  ;;  %v4960_v27 = vrot.slane %v4959_v18, 1 }
 0x58d   : > { %v7164_v23 = vcombine.low %v7036_v19, %v7037_v5  ;;  %v5399_v24 = vrot.slane %v5398_v32, 2  ;;  %v4963_v4 = vrot.slane %v4962_v20, 4  ;;  %v4126_v16 = vadd.f32 %v10684_v14, %v3742_v57 }
 0x58e   : > { %v5411_v41 = vrot.slane %v5410_v46, 4  ;;  %v4317_v36 = vmul.f32 %v3742_v57, %v3742_v57  ;;  %v3795_v15 = vadd.f32 %v10318_v2, %v10660_v25  ;;  %v5408_v40 = vrot.slane %v5407_v38, 1 }
 0x58f   : > { %v7178_v28 = vrot.slane %v7164_v23, %v11216_v45  ;;  %v4952_v21 = vmax.f32 %v4950_v56, %v4951_v13  ;;  %v4964_v22 = vmax.f32 %v4962_v20, %v4963_v4  ;;  %v10726_v49 = vmax.f32 %v4959_v18, %v4960_v27  ;;  %v11327_v56 = vld [vmem:[#allocation8_spill] sm:$0xff] }
 0x590   : > { %v5412_v48 = vmin.f32 %v5410_v46, %v5411_v41  ;;  %v4574_v29 = vadd.f32 %v10696_v17, %v4317_v36  ;;  %v4144_v62 = vadd.f32 %v10692_v39, %v3795_v15  ;;  %v4319_v43 = vmul.f32 %v3795_v15, %v3795_v15  ;;  %v11328_v17 = vld [vmem:[#allocation26_spill] sm:$0xff] }
 0x591   : > { %v7179_v44 = vcombine.low %v7171_v26, %v7178_v28  ;;  %v5400_v14 = vmin.f32 %v5398_v32, %v5399_v24  ;;  %v10730_v19 = vadd.f32 %v11326_v3, %v10667_v53  ;;  %v4965_v2 = vrot.slane %v4964_v22, 2 }
 0x592   : > { %v4592_v10 = vadd.f32 %v10700_v55, %v4319_v43  ;;  %v10735_v51 = vadd.f32 %v11327_v56, %v10682_v34  ;;  %v3746_v47 = vadd.f32 %v11328_v17, %v10655_v35  ;;  %v4953_v39 = vrot.slane %v4952_v21, 1 }
 0x593   : > { %7227 = vst [vmem:[%s8381_s9 + $0x28] sm:$0xff] %v7179_v44  ;;  %v5413_v26 = vrot.slane %v5412_v48, 2  ;;  %v10742_v18 = vadd.f32 %v10704_v12, %v10730_v19  ;;  %v4318_v32 = vmul.f32 %v10730_v19, %v10730_v19  ;;  %v10754_v35 = vsel %vm5681_vm1, 1, %v11215_v6 }
 0x594   : > { %v10747_v52 = vadd.f32 %v4152_v8, %v10735_v51  ;;  %v4320_v55 = vmul.f32 %v10735_v51, %v10735_v51  ;;  %v4127_v1 = vadd.f32 %v4126_v16, %v3746_v47  ;;  %v5401_v5 = vrot.slane %v5400_v14, 1 }
 0x595   : > { %v10757_v13 = vadd.f32 %v10707_v54, %v4318_v32  ;;  %v4349_v12 = vmul.f32 %v3746_v47, %v3746_v47  ;;  %v5165_v20 = vmax.f32 %v3742_v57, %v3746_v47  ;;  %v10759_v46 = vmax.f32 %v4964_v22, %v4965_v2  ;;  %v11329_v2 = vld [vmem:[#allocation9_spill] sm:$0xff] }
 0x596   : > { %v10761_v23 = vadd.f32 %v4600_v9, %v4320_v55  ;;  %v4128_v8 = vrot.slane %v4127_v1, 4  ;;  %v5613_v27 = vmin.f32 %v3742_v57, %v3746_v47  ;;  %v10763_v24 = vmin.f32 %v5412_v48, %v5413_v26 }
 0x597   : > { %v4575_v4 = vadd.f32 %v4574_v29, %v4349_v12  ;;  %v5166_v41 = vrot.slane %v5165_v20, 4  ;;  %v5800_v16 = vrot.slane %v10754_v35, %v8858_v50  ;;  %v10767_v36 = vmin.f32 %v5407_v38, %v5408_v40 }
 0x598   : > { %v10769_v28 = vmax.f32 %v4952_v21, %v4953_v39  ;;  %v4129_v54 = vadd.f32 %v4128_v8, %v4127_v1  ;;  %v5614_v43 = vrot.slane %v5613_v27, 4  ;;  %v10771_v44 = vmin.f32 %v5400_v14, %v5401_v5 }
 0x599   : > { %v4576_v22 = vrot.slane %v4575_v4, 4  ;;  %v5167_v9 = vmax.f32 %v5165_v20, %v5166_v41  ;;  %v5928_v3 = vrot.slane %v5800_v16, %v8858_v50  ;;  %v4967_v57 = vrot.slane %v10759_v46, 1 }
 0x59a   : > { %v4130_v48 = vrot.slane %v4129_v54, 2  ;;  %v5615_v29 = vmin.f32 %v5613_v27, %v5614_v43  ;;  %v3799_v56 = vadd.f32 %v11329_v2, %v10660_v25  ;;  %vm5682_vm3 = vcmp.ge.f32.partialorder %v10638_v60, 0.0 }
 0x59b   : > { %v4577_v40 = vadd.f32 %v4576_v22, %v4575_v4  ;;  %v5168_v21 = vrot.slane %v5167_v9, 2  ;;  %vm5981_vm2 = vcmp.eq.s32.totalorder %v5928_v3, 1 }
 0x59c   : > { %v4131_v17 = vadd.f32 %v4130_v48, %v4129_v54  ;;  %v5616_v47 = vrot.slane %v5615_v29, 2  ;;  %v4145_v14 = vadd.f32 %v4144_v62, %v3799_v56  ;;  %v4351_v39 = vmul.f32 %v3799_v56, %v3799_v56 }
 0x59d   : > { %v4578_v26 = vrot.slane %v4577_v40, 2  ;;  %v5169_v32 = vmax.f32 %v5167_v9, %v5168_v21  ;;  %v5179_v55 = vmax.f32 %v3795_v15, %v3799_v56  ;;  %v5627_v1 = vmin.f32 %v3795_v15, %v3799_v56 }
 0x59e   : > { %v4132_v5 = vrot.slane %v4131_v17, 1  ;;  %v5617_v12 = vmin.f32 %v5615_v29, %v5616_v47  ;;  %v4146_v20 = vrot.slane %v4145_v14, 4  ;;  %v4593_v8 = vadd.f32 %v4592_v10, %v4351_v39 }
 0x59f   : > { %v4579_v27 = vadd.f32 %v4578_v26, %v4577_v40  ;;  %v5170_v41 = vrot.slane %v5169_v32, 1  ;;  %v5180_v25 = vrot.slane %v5179_v55, 4  ;;  %v5628_v16 = vrot.slane %v5627_v1, 4 }
 0x5a0   : > { %v4133_v43 = vadd.f32 %v4132_v5, %v4131_v17  ;;  %v5618_v4 = vrot.slane %v5617_v12, 1  ;;  %v4147_v22 = vadd.f32 %v4146_v20, %v4145_v14  ;;  %v4594_v2 = vrot.slane %v4593_v8, 4 }
 0x5a1   : > { %v4580_v54 = vrot.slane %v4579_v27, 1  ;;  %v5171_v48 = vmax.f32 %v5169_v32, %v5170_v41  ;;  %v5181_v62 = vmax.f32 %v5179_v55, %v5180_v25  ;;  %v5629_v38 = vmin.f32 %v5627_v1, %v5628_v16 }
 0x5a2   : > { %v4221_v33 = vmul.f32 0.03125, %v4133_v43  ;;  %v5619_v9 = vmin.f32 %v5617_v12, %v5618_v4  ;;  %v4148_v21 = vrot.slane %v4147_v22, 2  ;;  %v4595_v15 = vadd.f32 %v4594_v2, %v4593_v8 }
 0x5a3   : > { %v4581_v56 = vadd.f32 %v4580_v54, %v4579_v27  ;;  %v6078_v10 = vsel %vm6053_vm14, %v5171_v48, %v10716_v31  ;;  %v5182_v29 = vrot.slane %v5181_v62, 2  ;;  %v5630_v40 = vrot.slane %v5629_v38, 2 }
 0x5a4   : > { %v4701_v47 = vmul.f32 %v4221_v33, %v4221_v33  ;;  %v6206_v17 = vsel %vm6053_vm14, %v5619_v9, %v10718_v7  ;;  %v4149_v14 = vadd.f32 %v4148_v21, %v4147_v22  ;;  %v4596_v39 = vrot.slane %v4595_v15, 2 }
 0x5a5   : > { %v4669_v26 = vmul.f32 0.03125, %v4581_v56  ;;  %v6270_v32 = vsel %vm5981_vm2, %v6078_v10, %v6206_v17  ;;  %v5183_v55 = vmax.f32 %v5181_v62, %v5182_v29  ;;  %v5631_v1 = vmin.f32 %v5629_v38, %v5630_v40 }
 0x5a6   : > { %v6302_v5 = vsub.f32 %v6270_v32, %v4221_v33  ;;  %v4150_v12 = vrot.slane %v4149_v14, 1  ;;  %v4597_v20 = vadd.f32 %v4596_v39, %v4595_v15  ;;  %v10785_v41 = vsel %vm5682_vm3, 1, %v11215_v6 }
 0x5a7   : > { %v4733_v8 = vsub.f32 %v4669_v26, %v4701_v47  ;;  %v5184_v31 = vrot.slane %v5183_v55, 1  ;;  %v5632_v27 = vrot.slane %v5631_v1, 1  ;;  %v6409_v7 = vrot.slane %v10633_v11, %v8858_v50 }
 0x5a8   : > { %v4151_v25 = vadd.f32 %v4150_v12, %v4149_v14  ;;  %v4598_v16 = vrot.slane %v4597_v20, 1  ;;  %v5808_v3 = vrot.slane %v10785_v41, %v8858_v50  ;;  %v10792_v33 = vmax.f32 %v10759_v46, %v4967_v57 }
 0x5a9   : > { %v4765_v38 = vmax.f32 %v4733_v8, 0.0  ;;  %v5185_v43 = vmax.f32 %v5183_v55, %v5184_v31  ;;  %v5633_v4 = vmin.f32 %v5631_v1, %v5632_v27  ;;  %v6417_v48 = vrot.slane %v10638_v60, %v8858_v50 }
 0x5aa   : > { %v4223_v22 = vmul.f32 0.03125, %v4151_v25  ;;  %v4599_v2 = vadd.f32 %v4598_v16, %v4597_v20  ;;  %v5936_v54 = vrot.slane %v5808_v3, %v8858_v50  ;;  %v11330_v62 = vrot.slane %v10763_v24, 1  ;;  %v11332_v16 = vld [vmem:[#allocation27_spill] sm:$0xff] }
 0x5ab   : > { %v6654_v21 = vadd.f32 1e-05, %v4765_v38  ;;  %v6080_v46 = vsel %vm6053_vm14, %v5185_v43, %v10726_v49  ;;  %v6208_v57 = vsel %vm6053_vm14, %v5633_v4, %v10767_v36  ;;  %v6569_v15 = vrot.slane %v6409_v7, %v8858_v50 }
 0x5ac   : > { %v10800_v9 = vmin.f32 %v10763_v24, %v11330_v62  ;;  %v4671_v56 = vmul.f32 0.03125, %v4599_v2  ;;  %v4703_v10 = vmul.f32 %v4223_v22, %v4223_v22  ;;  %vm5983_vm4 = vcmp.eq.s32.totalorder %v5936_v54, 1  ;;  %v11331_v24 = vld [vmem:[#allocation4_spill] sm:$0xff] }
 0x5ad   : > { %7734 = vrsqrt.f32 %v6654_v21  ;;  %v6825_v29 = vrot.slane %v10633_v11, %v11182_v61  ;;  %v6272_v40 = vsel %vm5983_vm4, %v6080_v46, %v6208_v57  ;;  %v3748_v47 = vadd.f32 %v11331_v24, %v10667_v53 }
 0x5ae   : > { %v4735_v17 = vsub.f32 %v4671_v56, %v4703_v10  ;;  %v6304_v14 = vsub.f32 %v6272_v40, %v4223_v22  ;;  %v6577_v49 = vrot.slane %v6417_v48, %v8858_v50  ;;  %v5804_v36 = vrot.slane %v10754_v35, %v8941_v37 }
 0x5af   : > { %v4136_v39 = vadd.f32 %v10742_v18, %v3748_v47  ;;  %v4350_v26 = vmul.f32 %v3748_v47, %v3748_v47  ;;  %v5172_v32 = vmax.f32 %v10730_v19, %v3748_v47  ;;  %v5620_v55 = vmin.f32 %v10730_v19, %v3748_v47 }
 0x5b0   : > { %v6622_v1 = vmul.f32 %v6569_v15, %v6302_v5  ;;  %v4767_v12 = vmax.f32 %v4735_v17, 0.0  ;;  %v6833_v20 = vrot.slane %v10638_v60, %v11182_v61  ;;  %v6413_v53 = vrot.slane %v10633_v11, %v8941_v37 }
 0x5b1   : > { %v4137_v8 = vrot.slane %v4136_v39, 4  ;;  %v4584_v31 = vadd.f32 %v10757_v13, %v4350_v26  ;;  %v5173_v27 = vrot.slane %v5172_v32, 4  ;;  %v5621_v35 = vrot.slane %v5620_v55, 4 }
 0x5b2   : > { %v6624_v7 = vmul.f32 %v6577_v49, %v6304_v14  ;;  %v6656_v18 = vadd.f32 1e-05, %v4767_v12  ;;  %v5932_v25 = vrot.slane %v5804_v36, %v8858_v50  ;;  %v3801_v19 = vadd.f32 %v11332_v16, %v10682_v34 }
 0x5b3   : > { %v4138_v5 = vadd.f32 %v4137_v8, %v4136_v39  ;;  %v4585_v3 = vrot.slane %v4584_v31, 4  ;;  %v5174_v38 = vmax.f32 %v5172_v32, %v5173_v27  ;;  %v5622_v43 = vmin.f32 %v5620_v55, %v5621_v35 }
 0x5b4   : > { %7736 = vrsqrt.f32 %v6656_v18  ;;  %v4154_v4 = vadd.f32 %v10747_v52, %v3801_v19  ;;  %v4352_v22 = vmul.f32 %v3801_v19, %v3801_v19  ;;  %v5186_v2 = vmax.f32 %v10735_v51, %v3801_v19 }
 0x5b5   : > { %v4139_v13 = vrot.slane %v4138_v5, 2  ;;  %v4586_v54 = vadd.f32 %v4585_v3, %v4584_v31  ;;  %v5175_v48 = vrot.slane %v5174_v38, 2  ;;  %v5623_v62 = vrot.slane %v5622_v43, 2 }
 0x5b6   : > { %v4155_v21 = vrot.slane %v4154_v4, 4  ;;  %v4602_v46 = vadd.f32 %v10761_v23, %v4352_v22  ;;  %v5187_v57 = vrot.slane %v5186_v2, 4  ;;  %v5634_v34 = vmin.f32 %v10735_v51, %v3801_v19 }
 0x5b7   : > { %v7735_v15 = vpop.eup %7734  ;;  %v4140_v56 = vadd.f32 %v4139_v13, %v4138_v5  ;;  %v4587_v10 = vrot.slane %v4586_v54, 2  ;;  %v5176_v40 = vmax.f32 %v5174_v38, %v5175_v48  ;;  %v5624_v24 = vmin.f32 %v5622_v43, %v5623_v62 }
 0x5b8   : > { %v6718_v47 = vmul.f32 %v7735_v15, %v6622_v1  ;;  %v4156_v52 = vadd.f32 %v4155_v21, %v4154_v4  ;;  %v4603_v17 = vrot.slane %v4602_v46, 4  ;;  %v5188_v14 = vmax.f32 %v5186_v2, %v5187_v57 }
 0x5b9   : > { %v4141_v49 = vrot.slane %v4140_v56, 1  ;;  %v4588_v36 = vadd.f32 %v4587_v10, %v4586_v54  ;;  %v5177_v39 = vrot.slane %v5176_v40, 1  ;;  %v5625_v26 = vrot.slane %v5624_v24, 1 }
 0x5ba   : > { %vm5982_vm5 = vcmp.eq.s32.totalorder %v5932_v25, 1  ;;  %v4157_v32 = vrot.slane %v4156_v52, 2  ;;  %v4604_v55 = vadd.f32 %v4603_v17, %v4602_v46  ;;  %v5189_v23 = vrot.slane %v5188_v14, 2 }
 0x5bb   : > { %v4142_v12 = vadd.f32 %v4141_v49, %v4140_v56  ;;  %v4589_v8 = vrot.slane %v4588_v36, 1  ;;  %v5178_v51 = vmax.f32 %v5176_v40, %v5177_v39  ;;  %v5626_v31 = vmin.f32 %v5624_v24, %v5625_v26  ;;  %v10845_v56 = vld [vmem:[%s8376_s23 + $0x70] sm:$0x77] }
 0x5bc   : > { %v4158_v27 = vadd.f32 %v4157_v32, %v4156_v52  ;;  %v4605_v35 = vrot.slane %v4604_v55, 2  ;;  %v5190_v18 = vmax.f32 %v5188_v14, %v5189_v23  ;;  %v5635_v16 = vrot.slane %v5634_v34, 4  ;;  %v10863_v14 = vld [vmem:[%s8376_s23 + $0x78] sm:$0x77] }
 0x5bd   : > { %v4222_v1 = vmul.f32 0.03125, %v4142_v12  ;;  %v4590_v19 = vadd.f32 %v4589_v8, %v4588_v36  ;;  %v6079_v5 = vsel %vm6053_vm14, %v5178_v51, %v10769_v28  ;;  %v6207_v3 = vsel %vm6053_vm14, %v5626_v31, %v10771_v44 }
 0x5be   : > { %v7737_v38 = vpop.eup %7736  ;;  %v6271_v43 = vsel %vm5982_vm5, %v6079_v5, %v6207_v3  ;;  %v4159_v4 = vrot.slane %v4158_v27, 1  ;;  %v4606_v22 = vadd.f32 %v4605_v35, %v4604_v55  ;;  %v5191_v2 = vrot.slane %v5190_v18, 1  ;;  %v11334_v5 = vld [vmem:[#allocation16_spill] sm:$0xff] }
 0x5bf   : > { %v10834_v13 = vmul.f32 %v7737_v38, %v6624_v7  ;;  %v4670_v54 = vmul.f32 0.03125, %v4590_v19  ;;  %v4702_v48 = vmul.f32 %v4222_v1, %v4222_v1  ;;  %v6303_v62 = vsub.f32 %v6271_v43, %v4222_v1 }
 0x5c0   : > { %v4160_v21 = vadd.f32 %v4159_v4, %v4158_v27  ;;  %v4607_v46 = vrot.slane %v4606_v22, 1  ;;  %v5192_v57 = vmax.f32 %v5190_v18, %v5191_v2  ;;  %v5636_v28 = vmin.f32 %v5634_v34, %v5635_v16  ;;  %v11333_v27 = vld [vmem:[#allocation28_spill] sm:$0xff] }
 0x5c1   : > { %v6985_v44 = vrot.slane %v6825_v29, %v11182_v61  ;;  %v4734_v25 = vsub.f32 %v4670_v54, %v4702_v48  ;;  %v6829_v15 = vrot.slane %v10633_v11, %v11207_v30  ;;  %v5812_v7 = vrot.slane %v10785_v41, %v8941_v37 }
 0x5c2   : > { %v10847_v10 = vmul.f32 0.03125, %v4160_v21  ;;  %v4608_v40 = vadd.f32 %v4607_v46, %v4606_v22  ;;  %v5637_v24 = vrot.slane %v5636_v28, 2  ;;  %v6081_v34 = vsel %vm6053_vm14, %v5192_v57, %v10792_v33  ;;  %v11335_v22 = vld [vmem:[#allocation14_spill] sm:$0xff] }
 0x5c3   : > { %v10855_v29 = vrot.slane %v6833_v20, %v11182_v61  ;;  %v4766_v52 = vmax.f32 %v4734_v25, 0.0  ;;  %v6573_v41 = vrot.slane %v6413_v53, %v8858_v50  ;;  %v5940_v17 = vrot.slane %v5812_v7, %v8858_v50 }
 0x5c4   : > { %v4672_v49 = vmul.f32 0.03125, %v4608_v40  ;;  %v4704_v33 = vmul.f32 %v10847_v10, %v10847_v10  ;;  %v5638_v36 = vmin.f32 %v5636_v28, %v5637_v24  ;;  %v1608_v39 = vrot.slane %v10845_v56, %v11209_v59  ;;  %v11337_v40 = vld [vmem:[#allocation23_spill] sm:$0xff] }
 0x5c5   : > { %v10869_v20 = vadd.f32 %v6985_v44, %v6718_v47  ;;  %v6655_v26 = vadd.f32 1e-05, %v4766_v52  ;;  %v6989_v32 = vrot.slane %v6829_v15, %v11182_v61  ;;  %v6421_v11 = vrot.slane %v10638_v60, %v8941_v37 }
 0x5c6   : > { %v4736_v53 = vsub.f32 %v4672_v49, %v4704_v33  ;;  %v5639_v55 = vrot.slane %v5638_v36, 1  ;;  %v10875_v23 = vrot.slane %v1608_v39, %v11209_v59  ;;  %v1616_v12 = vrot.slane %v10863_v14, %v11209_v59 }
 0x5c7   : > { %v6623_v8 = vmul.f32 %v6573_v41, %v6303_v62  ;;  %7738 = vrsqrt.f32 %v6655_v26  ;;  %vm5984_vm6 = vcmp.eq.s32.totalorder %v5940_v17, 1  ;;  %v1612_v47 = vrot.slane %v10845_v56, %v11210_v0  ;;  %v11339_v41 = vld [vmem:[#allocation29_spill] sm:$0xff] }
 0x5c8   : > { %v4768_v51 = vmax.f32 %v4736_v53, 0.0  ;;  %v5640_v31 = vmin.f32 %v5638_v36, %v5639_v55  ;;  %v3838_v35 = vadd.f32 %v11333_v27, %v10875_v23  ;;  %v10884_v18 = vrot.slane %v1616_v12, %v11209_v59 }
 0x5c9   : > { %v6837_v16 = vrot.slane %v10638_v60, %v11207_v30  ;;  %v10889_v1 = vrot.slane %v1612_v47, %v11209_v59  ;;  %v1620_v19 = vrot.slane %v10863_v14, %v11210_v0  ;;  %v3842_v3 = vadd.f32 %v11334_v5, %v10875_v23  ;;  %v11336_v60 = vld [vmem:[#allocation15_spill] sm:$0xff] }
 0x5ca   : > { %v6209_v38 = vsel %vm6053_vm14, %v5640_v31, %v10800_v9  ;;  %v6581_v43 = vrot.slane %v6421_v11, %v8858_v50  ;;  %v6657_v4 = vadd.f32 1e-05, %v4768_v51  ;;  %v3891_v2 = vadd.f32 %v11335_v22, %v10884_v18 }
 0x5cb   : > { %v6273_v54 = vsel %vm5984_vm6, %v6081_v34, %v6209_v38  ;;  %v3840_v48 = vadd.f32 %v11336_v60, %v10889_v1  ;;  %v4161_v62 = vadd.f32 %v3842_v3, %v3838_v35  ;;  %v10904_v0 = vadd.f32 %v10573_v42, %v10875_v23  ;;  %v11338_v42 = vld [vmem:[#allocation24_spill] sm:$0xff] }
 0x5cc   : > { %v6305_v21 = vsub.f32 %v6273_v54, %v10847_v10  ;;  %7740 = vrsqrt.f32 %v6657_v4  ;;  %v4257_v46 = vmul.f32 %v3838_v35, %v3838_v35  ;;  %v4289_v9 = vmul.f32 %v3842_v3, %v3842_v3 }
 0x5cd   : > { %v4259_v57 = vmul.f32 %v3891_v2, %v3891_v2  ;;  %v10908_v28 = vrot.slane %v1620_v19, %v11209_v59  ;;  %v4969_v44 = vmax.f32 %v3838_v35, %v3842_v3  ;;  %v5417_v25 = vmin.f32 %v3838_v35, %v3842_v3  ;;  %v11340_v35 = vld [vmem:[#allocation22_spill] sm:$0xff] }
 0x5ce   : > { %v4258_v15 = vmul.f32 %v3840_v48, %v3840_v48  ;;  %v10910_v7 = vadd.f32 %v4289_v9, %v4257_v46  ;;  %v3895_v24 = vadd.f32 %v11337_v40, %v10884_v18  ;;  %v3844_v34 = vadd.f32 %v11338_v42, %v10889_v1 }
 0x5cf   : > { %v4970_v52 = vrot.slane %v4969_v44, 4  ;;  %v5418_v10 = vrot.slane %v5417_v25, 4  ;;  %v3897_v17 = vadd.f32 %v11339_v41, %v10908_v28  ;;  %v10919_v49 = vadd.f32 %v4161_v62, %v10904_v0 }
 0x5d0   : > { %v4179_v59 = vadd.f32 %v3895_v24, %v3891_v2  ;;  %v4291_v33 = vmul.f32 %v3895_v24, %v3895_v24  ;;  %v4983_v36 = vmax.f32 %v3891_v2, %v3895_v24  ;;  %v5431_v39 = vmin.f32 %v3891_v2, %v3895_v24 }
 0x5d1   : > { %v7739_v26 = vpop.eup %7738  ;;  %v4971_v11 = vmax.f32 %v4969_v44, %v4970_v52  ;;  %v5419_v53 = vmin.f32 %v5417_v25, %v5418_v10  ;;  %v4170_v55 = vadd.f32 %v3844_v34, %v3840_v48  ;;  %v4290_v12 = vmul.f32 %v3844_v34, %v3844_v34 }
 0x5d2   : > { %v6719_v47 = vmul.f32 %v7739_v26, %v6623_v8  ;;  %v4627_v51 = vadd.f32 %v4291_v33, %v4259_v57  ;;  %v4984_v31 = vrot.slane %v4983_v36, 4  ;;  %v5432_v27 = vrot.slane %v5431_v39, 4 }
 0x5d3   : > { %v3893_v19 = vadd.f32 %v11340_v35, %v10908_v28  ;;  %v4972_v5 = vrot.slane %v4971_v11, 2  ;;  %v4618_v3 = vadd.f32 %v4290_v12, %v4258_v15  ;;  %v4976_v38 = vmax.f32 %v3840_v48, %v3844_v34 }
 0x5d4   : > { %v7039_v4 = vadd.f32 %v6989_v32, %v6719_v47  ;;  %v6997_v22 = vrot.slane %v6837_v16, %v11182_v61  ;;  %v5420_v54 = vrot.slane %v5419_v53, 2  ;;  %v5424_v2 = vmin.f32 %v3840_v48, %v3844_v34 }
 0x5d5   : > { %v6625_v60 = vmul.f32 %v6581_v43, %v6305_v21  ;;  %v4985_v62 = vmax.f32 %v4983_v36, %v4984_v31  ;;  %v5433_v46 = vmin.f32 %v5431_v39, %v5432_v27  ;;  %v4188_v9 = vadd.f32 %v3897_v17, %v3893_v19 }
 0x5d6   : > { %v7741_v44 = vpop.eup %7740  ;;  %v7180_v8 = vcombine.low %v10869_v20, %v7039_v4  ;;  %v4973_v57 = vmax.f32 %v4971_v11, %v4972_v5  ;;  %v4977_v25 = vrot.slane %v4976_v38, 4  ;;  %v7040_v40 = vadd.f32 %v10855_v29, %v10834_v13 }
 0x5d7   : > { %v6721_v24 = vmul.f32 %v7741_v44, %v6625_v60  ;;  %v5425_v15 = vrot.slane %v5424_v2, 4  ;;  %v5421_v42 = vmin.f32 %v5419_v53, %v5420_v54  ;;  %v4260_v52 = vmul.f32 %v3893_v19, %v3893_v19  ;;  %v11341_v60 = vld [vmem:[#allocation30_spill] sm:$0xff] }
 0x5d8   : > { %v4986_v16 = vrot.slane %v4985_v62, 2  ;;  %v5434_v10 = vrot.slane %v5433_v46, 2  ;;  %v7188_v43 = vrot.slane %v7180_v8, %v11216_v45  ;;  %v4974_v48 = vrot.slane %v4973_v57, 1 }
 0x5d9   : > { %v7041_v32 = vadd.f32 %v6997_v22, %v6721_v24  ;;  %v4978_v21 = vmax.f32 %v4976_v38, %v4977_v25  ;;  %v4292_v34 = vmul.f32 %v3897_v17, %v3897_v17  ;;  %v5426_v33 = vmin.f32 %v5424_v2, %v5425_v15 }
 0x5da   : > { %v4990_v20 = vmax.f32 %v3893_v19, %v3897_v17  ;;  %v5438_v36 = vmin.f32 %v3893_v19, %v3897_v17  ;;  %v5422_v39 = vrot.slane %v5421_v42, 1  ;;  %v4987_v29 = vmax.f32 %v4985_v62, %v4986_v16 }
 0x5db   : > { %v7181_v41 = vcombine.low %v7040_v40, %v7041_v32  ;;  %v4636_v26 = vadd.f32 %v4292_v34, %v4260_v52  ;;  %v5435_v11 = vmin.f32 %v5433_v46, %v5434_v10  ;;  %v4321_v53 = vmul.f32 %v10904_v0, %v10904_v0 }
 0x5dc   : > { %v10933_v12 = vadd.f32 %v10575_v58, %v10884_v18  ;;  %v10937_v47 = vadd.f32 %v10582_v63, %v10889_v1  ;;  %vm5683_vm7 = vcmp.ge.f32.partialorder %v10845_v56, 0.0  ;;  %v10940_v31 = vmax.f32 %v4973_v57, %v4974_v48 }
 0x5dd   : > { %v7195_v13 = vrot.slane %v7181_v41, %v11216_v45  ;;  %v4979_v27 = vrot.slane %v4978_v21, 2  ;;  %v5427_v35 = vrot.slane %v5426_v33, 2  ;;  %v10942_v19 = vmin.f32 %v5421_v42, %v5422_v39 }
 0x5de   : > { %v4610_v5 = vadd.f32 %v10910_v7, %v4321_v53  ;;  %v4180_v38 = vadd.f32 %v4179_v59, %v10933_v12  ;;  %v4323_v58 = vmul.f32 %v10933_v12, %v10933_v12  ;;  %v4988_v4 = vrot.slane %v4987_v29, 1  ;;  %v11342_v7 = vld [vmem:[#allocation25_spill] sm:$0xff] }
 0x5df   : > { %v7196_v17 = vcombine.low %v7188_v43, %v7195_v13  ;;  %v5436_v63 = vrot.slane %v5435_v11, 1  ;;  %v10950_v22 = vadd.f32 %v4170_v55, %v10937_v47  ;;  %v4322_v54 = vmul.f32 %v10937_v47, %v10937_v47  ;;  %v11343_v13 = vld [vmem:[#allocation31_spill] sm:$0xff] }
 0x5e0   : > { %v4628_v2 = vadd.f32 %v4627_v51, %v4323_v58  ;;  %v10956_v62 = vadd.f32 %v11341_v60, %v10908_v28  ;;  %v3852_v59 = vadd.f32 %v11342_v7, %v10875_v23  ;;  %v10963_v46 = vsel %vm5683_vm7, 1, %v11215_v6 }
 0x5e1   : > { %7228 = vst [vmem:[%s8381_s9 + $0x30] sm:$0xff] %v7196_v17  ;;  %v10965_v44 = vmax.f32 %v4978_v21, %v4979_v27  ;;  %v10967_v55 = vmin.f32 %v5426_v33, %v5427_v35  ;;  %v10969_v8 = vadd.f32 %v4618_v3, %v4322_v54  ;;  %v5816_v51 = vrot.slane %v10963_v46, %v8858_v50 }
 0x5e2   : > { %v10974_v57 = vadd.f32 %v4188_v9, %v10956_v62  ;;  %v4324_v23 = vmul.f32 %v10956_v62, %v10956_v62  ;;  %v4163_v25 = vadd.f32 %v10919_v49, %v3852_v59  ;;  %v4353_v40 = vmul.f32 %v3852_v59, %v3852_v59 }
 0x5e3   : > { %v4991_v24 = vrot.slane %v4990_v20, 4  ;;  %v5439_v15 = vrot.slane %v5438_v36, 4  ;;  %v5193_v42 = vmax.f32 %v10904_v0, %v3852_v59  ;;  %v5641_v32 = vmin.f32 %v10904_v0, %v3852_v59 }
 0x5e4   : > { %v10981_v3 = vadd.f32 %v4636_v26, %v4324_v23  ;;  %v4164_v52 = vrot.slane %v4163_v25, 4  ;;  %v4611_v16 = vadd.f32 %v4610_v5, %v4353_v40  ;;  %v5944_v10 = vrot.slane %v5816_v51, %v8858_v50 }
 0x5e5   : > { %v10984_v9 = vmax.f32 %v4987_v29, %v4988_v4  ;;  %v10986_v43 = vmin.f32 %v5435_v11, %v5436_v63  ;;  %v5194_v48 = vrot.slane %v5193_v42, 4  ;;  %v5642_v21 = vrot.slane %v5641_v32, 4 }
 0x5e6   : > { %v4981_v49 = vrot.slane %v10965_v44, 1  ;;  %v5429_v34 = vrot.slane %v10967_v55, 1  ;;  %v4165_v41 = vadd.f32 %v4164_v52, %v4163_v25  ;;  %v4612_v33 = vrot.slane %v4611_v16, 4 }
 0x5e7   : > { %v10990_v39 = vmax.f32 %v4990_v20, %v4991_v24  ;;  %v5195_v0 = vmax.f32 %v5193_v42, %v5194_v48  ;;  %v5643_v26 = vmin.f32 %v5641_v32, %v5642_v21  ;;  %v3905_v53 = vadd.f32 %v11343_v13, %v10884_v18 }
 0x5e8   : > { %v10994_v17 = vmin.f32 %v5438_v36, %v5439_v15  ;;  %v4166_v29 = vrot.slane %v4165_v41, 2  ;;  %v4613_v11 = vadd.f32 %v4612_v33, %v4611_v16  ;;  %vm5985_vm8 = vcmp.eq.s32.totalorder %v5944_v10, 1 }
 0x5e9   : > { %v5196_v27 = vrot.slane %v5195_v0, 2  ;;  %v5644_v35 = vrot.slane %v5643_v26, 2  ;;  %v4181_v5 = vadd.f32 %v4180_v38, %v3905_v53  ;;  %vm5684_vm9 = vcmp.ge.f32.partialorder %v10863_v14, 0.0 }
 0x5ea   : > { %v4167_v58 = vadd.f32 %v4166_v29, %v4165_v41  ;;  %v4614_v4 = vrot.slane %v4613_v11, 2  ;;  %v4355_v63 = vmul.f32 %v3905_v53, %v3905_v53  ;;  %v5207_v20 = vmax.f32 %v10933_v12, %v3905_v53 }
 0x5eb   : > { %v5197_v54 = vmax.f32 %v5195_v0, %v5196_v27  ;;  %v5645_v60 = vmin.f32 %v5643_v26, %v5644_v35  ;;  %v4182_v7 = vrot.slane %v4181_v5, 4  ;;  %v5655_v18 = vmin.f32 %v10933_v12, %v3905_v53 }
 0x5ec   : > { %v4168_v36 = vrot.slane %v4167_v58, 1  ;;  %v4615_v59 = vadd.f32 %v4614_v4, %v4613_v11  ;;  %v4629_v51 = vadd.f32 %v4628_v2, %v4355_v63  ;;  %v5208_v23 = vrot.slane %v5207_v20, 4 }
 0x5ed   : > { %v5198_v25 = vrot.slane %v5197_v54, 1  ;;  %v5646_v40 = vrot.slane %v5645_v60, 1  ;;  %v4183_v24 = vadd.f32 %v4182_v7, %v4181_v5  ;;  %v5656_v38 = vrot.slane %v5655_v18, 4 }
 0x5ee   : > { %v4169_v15 = vadd.f32 %v4168_v36, %v4167_v58  ;;  %v4616_v42 = vrot.slane %v4615_v59, 1  ;;  %v4630_v32 = vrot.slane %v4629_v51, 4  ;;  %v5209_v52 = vmax.f32 %v5207_v20, %v5208_v23 }
 0x5ef   : > { %v5199_v16 = vmax.f32 %v5197_v54, %v5198_v25  ;;  %v5647_v48 = vmin.f32 %v5645_v60, %v5646_v40  ;;  %v4184_v21 = vrot.slane %v4183_v24, 2  ;;  %v5657_v41 = vmin.f32 %v5655_v18, %v5656_v38 }
 0x5f0   : > { %v10999_v33 = vmul.f32 0.03125, %v4169_v15  ;;  %v4617_v0 = vadd.f32 %v4616_v42, %v4615_v59  ;;  %v4631_v12 = vadd.f32 %v4630_v32, %v4629_v51  ;;  %v5210_v26 = vrot.slane %v5209_v52, 2  ;;  %v11344_v42 = vld [vmem:[#allocation11_spill] sm:$0xff] }
 0x5f1   : > { %v6082_v2 = vsel %vm6053_vm14, %v5199_v16, %v10940_v31  ;;  %v6210_v13 = vsel %vm6053_vm14, %v5647_v48, %v10942_v19  ;;  %v4185_v53 = vadd.f32 %v4184_v21, %v4183_v24  ;;  %v5658_v29 = vrot.slane %v5657_v41, 2 }
 0x5f2   : > { %v4673_v11 = vmul.f32 0.03125, %v4617_v0  ;;  %v4705_v27 = vmul.f32 %v10999_v33, %v10999_v33  ;;  %v6274_v35 = vsel %vm5985_vm8, %v6082_v2, %v6210_v13  ;;  %v4632_v5 = vrot.slane %v4631_v12, 2 }
 0x5f3   : > { %v6306_v58 = vsub.f32 %v6274_v35, %v10999_v33  ;;  %v4186_v4 = vrot.slane %v4185_v53, 1  ;;  %v5211_v63 = vmax.f32 %v5209_v52, %v5210_v26  ;;  %v5659_v20 = vmin.f32 %v5657_v41, %v5658_v29 }
 0x5f4   : > { %v11010_v54 = vmax.f32 %v10965_v44, %v4981_v49  ;;  %v4737_v31 = vsub.f32 %v4673_v11, %v4705_v27  ;;  %v4633_v60 = vadd.f32 %v4632_v5, %v4631_v12  ;;  %v11015_v19 = vsel %vm5684_vm9, 1, %v11215_v6 }
 0x5f5   : > { %v4993_v7 = vrot.slane %v10990_v39, 2  ;;  %v4187_v10 = vadd.f32 %v4186_v4, %v4185_v53  ;;  %v5212_v18 = vrot.slane %v5211_v63, 1  ;;  %v5660_v36 = vrot.slane %v5659_v20, 1 }
 0x5f6   : > { %v5441_v59 = vrot.slane %v10994_v17, 2  ;;  %v4769_v51 = vmax.f32 %v4737_v31, 0.0  ;;  %v4634_v23 = vrot.slane %v4633_v60, 1  ;;  %v5824_v44 = vrot.slane %v11015_v19, %v8858_v50 }
 0x5f7   : > { %v6425_v49 = vrot.slane %v10845_v56, %v8858_v50  ;;  %v4227_v25 = vmul.f32 0.03125, %v4187_v10  ;;  %v5213_v40 = vmax.f32 %v5211_v63, %v5212_v18  ;;  %v5661_v24 = vmin.f32 %v5659_v20, %v5660_v36 }
 0x5f8   : > { %v6658_v6 = vadd.f32 1e-05, %v4769_v51  ;;  %v4635_v38 = vadd.f32 %v4634_v23, %v4633_v60  ;;  %v5952_v15 = vrot.slane %v5824_v44, %v8858_v50  ;;  %v3854_v32 = vadd.f32 %v11344_v42, %v10889_v1  ;;  %v11345_v51 = vld [vmem:[#allocation6_spill] sm:$0xff] }
 0x5f9   : > { %v4707_v52 = vmul.f32 %v4227_v25, %v4227_v25  ;;  %v6084_v16 = vsel %vm6053_vm14, %v5213_v40, %v10984_v9  ;;  %v6212_v48 = vsel %vm6053_vm14, %v5661_v24, %v10986_v43  ;;  %v6433_v21 = vrot.slane %v10863_v14, %v8858_v50 }
 0x5fa   : > { %7742 = vrsqrt.f32 %v6658_v6  ;;  %v4675_v41 = vmul.f32 0.03125, %v4635_v38  ;;  %vm5987_vm10 = vcmp.eq.s32.totalorder %v5952_v15, 1  ;;  %v4172_v33 = vadd.f32 %v10950_v22, %v3854_v32 }
 0x5fb   : > { %v6276_v0 = vsel %vm5987_vm10, %v6084_v16, %v6212_v48  ;;  %v4354_v12 = vmul.f32 %v3854_v32, %v3854_v32  ;;  %v5200_v26 = vmax.f32 %v10937_v47, %v3854_v32  ;;  %v5648_v1 = vmin.f32 %v10937_v47, %v3854_v32 }
 0x5fc   : > { %v6585_v2 = vrot.slane %v6425_v49, %v8858_v50  ;;  %v4739_v9 = vsub.f32 %v4675_v41, %v4707_v52  ;;  %v6308_v13 = vsub.f32 %v6276_v0, %v4227_v25  ;;  %v4173_v53 = vrot.slane %v4172_v33, 4 }
 0x5fd   : > { %v5430_v43 = vmin.f32 %v10967_v55, %v5429_v34  ;;  %v4620_v29 = vadd.f32 %v10969_v8, %v4354_v12  ;;  %v5201_v11 = vrot.slane %v5200_v26, 4  ;;  %v5649_v27 = vrot.slane %v5648_v1, 4 }
 0x5fe   : > { %v4771_v22 = vmax.f32 %v4739_v9, 0.0  ;;  %v6593_v35 = vrot.slane %v6433_v21, %v8858_v50  ;;  %v4174_v5 = vadd.f32 %v4173_v53, %v4172_v33  ;;  %v5820_v47 = vrot.slane %v10963_v46, %v8941_v37 }
 0x5ff   : > { %v11044_v4 = vmax.f32 %v10990_v39, %v4993_v7  ;;  %v4621_v63 = vrot.slane %v4620_v29, 4  ;;  %v5202_v20 = vmax.f32 %v5200_v26, %v5201_v11  ;;  %v5650_v31 = vmin.f32 %v5648_v1, %v5649_v27 }
 0x600   : > { %v11047_v60 = vmin.f32 %v10994_v17, %v5441_v59  ;;  %v6626_v55 = vmul.f32 %v6585_v2, %v6306_v58  ;;  %v6660_v8 = vadd.f32 1e-05, %v4771_v22  ;;  %v4175_v34 = vrot.slane %v4174_v5, 2 }
 0x601   : > { %v4622_v10 = vadd.f32 %v4621_v63, %v4620_v29  ;;  %v5203_v18 = vrot.slane %v5202_v20, 2  ;;  %v5651_v36 = vrot.slane %v5650_v31, 2  ;;  %v3907_v23 = vadd.f32 %v11345_v51, %v10908_v28 }
 0x602   : > { %v6628_v44 = vmul.f32 %v6593_v35, %v6308_v13  ;;  %7744 = vrsqrt.f32 %v6660_v8  ;;  %v4176_v46 = vadd.f32 %v4175_v34, %v4174_v5  ;;  %v5948_v39 = vrot.slane %v5820_v47, %v8858_v50 }
 0x603   : > { %v4623_v7 = vrot.slane %v4622_v10, 2  ;;  %v5204_v49 = vmax.f32 %v5202_v20, %v5203_v18  ;;  %v5652_v25 = vmin.f32 %v5650_v31, %v5651_v36  ;;  %v4190_v17 = vadd.f32 %v10974_v57, %v3907_v23 }
 0x604   : > { %v7743_v59 = vpop.eup %7742  ;;  %v4177_v58 = vrot.slane %v4176_v46, 1  ;;  %v4356_v40 = vmul.f32 %v3907_v23, %v3907_v23  ;;  %v5214_v24 = vmax.f32 %v10956_v62, %v3907_v23  ;;  %v5662_v6 = vmin.f32 %v10956_v62, %v3907_v23 }
 0x605   : > { %v11055_v38 = vmul.f32 %v7743_v59, %v6626_v55  ;;  %v4624_v28 = vadd.f32 %v4623_v7, %v4622_v10  ;;  %v5205_v15 = vrot.slane %v5204_v49, 1  ;;  %v5653_v42 = vrot.slane %v5652_v25, 1 }
 0x606   : > { %v4178_v32 = vadd.f32 %v4177_v58, %v4176_v46  ;;  %v4191_v52 = vrot.slane %v4190_v17, 4  ;;  %v4638_v16 = vadd.f32 %v10981_v3, %v4356_v40  ;;  %v5215_v48 = vrot.slane %v5214_v24, 4 }
 0x607   : > { %v4625_v21 = vrot.slane %v4624_v28, 1  ;;  %v5206_v41 = vmax.f32 %v5204_v49, %v5205_v15  ;;  %v5654_v57 = vmin.f32 %v5652_v25, %v5653_v42  ;;  %vm5986_vm11 = vcmp.eq.s32.totalorder %v5948_v39, 1 }
 0x608   : > { %v4226_v33 = vmul.f32 0.03125, %v4178_v32  ;;  %v4192_v0 = vadd.f32 %v4191_v52, %v4190_v17  ;;  %v4639_v12 = vrot.slane %v4638_v16, 4  ;;  %v5216_v26 = vmax.f32 %v5214_v24, %v5215_v48 }
 0x609   : > { %v4626_v1 = vadd.f32 %v4625_v21, %v4624_v28  ;;  %v6083_v62 = vsel %vm6053_vm14, %v5206_v41, %v11010_v54  ;;  %v6211_v2 = vsel %vm6053_vm14, %v5654_v57, %v5430_v43  ;;  %v5663_v9 = vrot.slane %v5662_v6, 4 }
 0x60a   : > { %v4706_v13 = vmul.f32 %v4226_v33, %v4226_v33  ;;  %v6275_v53 = vsel %vm5986_vm11, %v6083_v62, %v6211_v2  ;;  %v4193_v29 = vrot.slane %v4192_v0, 2  ;;  %v4640_v3 = vadd.f32 %v4639_v12, %v4638_v16 }
 0x60b   : > { %v4674_v11 = vmul.f32 0.03125, %v4626_v1  ;;  %v6307_v27 = vsub.f32 %v6275_v53, %v4226_v33  ;;  %v5217_v22 = vrot.slane %v5216_v26, 2  ;;  %v5664_v35 = vmin.f32 %v5662_v6, %v5663_v9 }
 0x60c   : > { %v7745_v5 = vpop.eup %7744  ;;  %v4194_v47 = vadd.f32 %v4193_v29, %v4192_v0  ;;  %v4641_v63 = vrot.slane %v4640_v3, 2  ;;  %v5828_v20 = vrot.slane %v11015_v19, %v8941_v37  ;;  %v4995_v31 = vrot.slane %v11044_v4, 1 }
 0x60d   : > { %v6724_v54 = vmul.f32 %v7745_v5, %v6628_v44  ;;  %v4738_v55 = vsub.f32 %v4674_v11, %v4706_v13  ;;  %v5218_v43 = vmax.f32 %v5216_v26, %v5217_v22  ;;  %v5665_v10 = vrot.slane %v5664_v35, 2 }
 0x60e   : > { %v4195_v8 = vrot.slane %v4194_v47, 1  ;;  %v4642_v34 = vadd.f32 %v4641_v63, %v4640_v3  ;;  %v5443_v18 = vrot.slane %v11047_v60, 1  ;;  %v5956_v7 = vrot.slane %v5828_v20, %v8858_v50 }
 0x60f   : > { %v4770_v36 = vmax.f32 %v4738_v55, 0.0  ;;  %v5219_v51 = vrot.slane %v5218_v43, 1  ;;  %v5666_v39 = vmin.f32 %v5664_v35, %v5665_v10  ;;  %v4996_v49 = vmax.f32 %v11044_v4, %v4995_v31 }
 0x610   : > { %v4196_v23 = vadd.f32 %v4195_v8, %v4194_v47  ;;  %v4643_v46 = vrot.slane %v4642_v34, 1  ;;  %v5444_v58 = vmin.f32 %v11047_v60, %v5443_v18  ;;  %v6429_v40 = vrot.slane %v10845_v56, %v8941_v37 }
 0x611   : > { %v6659_v19 = vadd.f32 1e-05, %v4770_v36  ;;  %v5220_v25 = vmax.f32 %v5218_v43, %v5219_v51  ;;  %v5667_v59 = vrot.slane %v5666_v39, 1  ;;  %vm5988_vm12 = vcmp.eq.s32.totalorder %v5956_v7, 1 }
 0x612   : > { %v4228_v17 = vmul.f32 0.03125, %v4196_v23  ;;  %v4644_v44 = vadd.f32 %v4643_v46, %v4642_v34  ;;  %v6841_v4 = vrot.slane %v10845_v56, %v11182_v61  ;;  %v6589_v16 = vrot.slane %v6429_v40, %v8858_v50 }
 0x613   : > { %7746 = vrsqrt.f32 %v6659_v19  ;;  %v6085_v24 = vsel %vm6053_vm14, %v5220_v25, %v4996_v49  ;;  %v5668_v15 = vmin.f32 %v5666_v39, %v5667_v59  ;;  %v6845_v60 = vrot.slane %v10845_v56, %v11207_v30 }
 0x614   : > { %v4676_v6 = vmul.f32 0.03125, %v4644_v44  ;;  %v4708_v28 = vmul.f32 %v4228_v17, %v4228_v17  ;;  %v7001_v41 = vrot.slane %v6841_v4, %v11182_v61  ;;  %v6627_v33 = vmul.f32 %v6589_v16, %v6307_v27 }
 0x615   : > { %v6213_v32 = vsel %vm6053_vm14, %v5668_v15, %v5444_v58  ;;  %v7005_v0 = vrot.slane %v6845_v60, %v11182_v61  ;;  %v6437_v26 = vrot.slane %v10863_v14, %v8941_v37  ;;  %v6849_v2 = vrot.slane %v10863_v14, %v11182_v61 }
 0x616   : > { %v4740_v42 = vsub.f32 %v4676_v6, %v4708_v28  ;;  %v6277_v52 = vsel %vm5988_vm12, %v6085_v24, %v6213_v32  ;;  %v7042_v1 = vadd.f32 %v7001_v41, %v11055_v38  ;;  %v6853_v13 = vrot.slane %v10863_v14, %v11207_v30 }
 0x617   : > { %v6309_v21 = vsub.f32 %v6277_v52, %v4228_v17  ;;  %v6597_v9 = vrot.slane %v6437_v26, %v8858_v50  ;;  %v7009_v29 = vrot.slane %v6849_v2, %v11182_v61 }
 0x618   : > { %v4772_v48 = vmax.f32 %v4740_v42, 0.0  ;;  %v7013_v11 = vrot.slane %v6853_v13, %v11182_v61 }
 0x619   : > { %v6629_v3 = vmul.f32 %v6597_v9, %v6309_v21  ;;  %v7044_v27 = vadd.f32 %v7009_v29, %v6724_v54 }
 0x61a   : > { %v6661_v57 = vadd.f32 1e-05, %v4772_v48 }
 0x61c   : > { %7748 = vrsqrt.f32 %v6661_v57 }
 0x61d   : > { %v7747_v12 = vpop.eup %7746 }
 0x61e   : > { %v6723_v62 = vmul.f32 %v7747_v12, %v6627_v33 }
 0x620   : > { %v7043_v56 = vadd.f32 %v7005_v0, %v6723_v62 }
 0x622   : > { %v7197_v53 = vcombine.low %v7042_v1, %v7043_v56 }
 0x624   : > { %v7205_v35 = vrot.slane %v7197_v53, %v11216_v45 }
 0x626   : > { %v7749_v37 = vpop.eup %7748 }
 0x627   : > { %v6725_v38 = vmul.f32 %v7749_v37, %v6629_v3 }
 0x629   : > { %v7045_v22 = vadd.f32 %v7013_v11, %v6725_v38 }
 0x62b   : > { %v7198_v5 = vcombine.low %v7044_v27, %v7045_v22 }
 0x62d   : > { %v7212_v47 = vrot.slane %v7198_v5, %v11216_v45 }
 0x62f   : > { %v7213_v63 = vcombine.low %v7205_v35, %v7212_v47 }
 0x631   : > { %7229 = vst [vmem:[%s8381_s9 + $0x38] sm:$0xff] %v7213_v63 }
 0x632 PF: > { %p14_p10 = scmp.ge.s32.totalorder %s7835_s28, 6   ;;  %s11346_s24 = smov %s7770_s25 }
 0x633   : > { %s11347_s25 = smov %s7844_s8  ;;  %s11348_s26 = smov %s7835_s28 }
 0x634   :  { %16 = sbr.rel (!%p14_p10) target bundleno = 2 (0x2), region = 113 }

</bundles_post_ra>
